<compile_context>
chip_gen: v7x
topology: tpu7x:2x2x1
jax: 0.10.0
libtpu: 0.0.40
codegen_flags: <defaults>
</compile_context>

<pallas_src>
import jax
import jax.numpy as jnp
from jax.experimental import pallas as pl
from jax.experimental.pallas import tpu as pltpu

# --- module constants (from the PyTorch source) ---
noise_dim = 100
label_dim = 2
G1_dim = 512
G2_dim = 1024
data_dim = 2000
G3_dim = data_dim

K_IN = noise_dim + label_dim   # 102
K_IN_PAD = 128                 # lane-aligned input features


def _cdiv(a, b):
    return -(-a // b)


def _round_up(x, m):
    return _cdiv(x, m) * m


def _leaky_relu(x, negative_slope=0.2):
    # max(x, 0.2*x) == LeakyReLU(0.2) and uses 2 VPU ops instead of cmp+sel+mul.
    return jnp.maximum(x, negative_slope * x)


def _choose_tiling(B):
    """Pick (tile_rows, padded_batch) for the 1-D batch grid.

    * rows rounded to 16 (native bf16 (16,128) sublane packing)
    * <= 512 rows per tile (step-overhead amortization, VMEM-safe on v7x)
    * >= 2 tiles whenever B > 16 so megacore sharding engages on v7x
    * tile count balanced against B so ragged batches don't balloon padding
    """
    if B <= 16:
        n_tiles = 1
    else:
        n_tiles = max(2, _cdiv(B, 512))
    tb = _round_up(_cdiv(B, n_tiles), 16)
    b_pad = _round_up(B, tb)
    return tb, b_pad


def generator_kernel(x_ref, w1_ref, b1_ref, w2_ref, b2_ref, w3_ref, b3_ref, o_ref):
    """One batch tile of the full forward pass.

    x_ref: (TB, 128) bf16; weights bf16 (VMEM-resident); biases f32 (1, out);
    o_ref: (TB, 2000) bf16.  All accumulation is f32 on the MXU; the
    elementwise epilogue (bias add, LeakyReLU, tanh) is f32 (v5e-friendly)
    and only the final store is cast to bf16.
    """
    h1 = jnp.dot(x_ref[...], w1_ref[...],
                 preferred_element_type=jnp.float32) + b1_ref[...]
    h1 = _leaky_relu(h1)                                              # (TB, 512)  f32

    h2 = jnp.dot(h1.astype(jnp.bfloat16), w2_ref[...],
                 preferred_element_type=jnp.float32) + b2_ref[...]
    h2 = _leaky_relu(h2)                                              # (TB, 1024) f32

    h3 = jnp.dot(h2.astype(jnp.bfloat16), w3_ref[...],
                 preferred_element_type=jnp.float32) + b3_ref[...]
    o_ref[...] = jnp.tanh(h3).astype(o_ref.dtype)                     # (TB, 2000) bf16


def init_generator_params(key):
    """Matches initialize_weights: weights ~ N(0, 0.02), biases = 0.
    Weights stored already transposed to (in_features, out_features), fp32."""
    k1, k2, k3 = jax.random.split(key, 3)
    w1 = 0.02 * jax.random.normal(k1, (K_IN, G1_dim), jnp.float32)
    b1 = jnp.zeros((1, G1_dim), jnp.float32)
    w2 = 0.02 * jax.random.normal(k2, (G1_dim, G2_dim), jnp.float32)
    b2 = jnp.zeros((1, G2_dim), jnp.float32)
    w3 = 0.02 * jax.random.normal(k3, (G2_dim, G3_dim), jnp.float32)
    b3 = jnp.zeros((1, G3_dim), jnp.float32)
    return (w1, b1, w2, b2, w3, b3)


def prepare_generator_params(params):
    """One-time (outside the hot path): pad w1's K dim to 128 (zero rows, so
    semantics are unchanged) and cast weights to bf16.  NOTE: bf16 weights +
    bf16 output mean results drift ~0.4% from the pure-f32 PyTorch module."""
    w1, b1, w2, b2, w3, b3 = params
    w1p = jnp.pad(w1, ((0, K_IN_PAD - K_IN), (0, 0))).astype(jnp.bfloat16)  # (128, 512)
    w2p = w2.astype(jnp.bfloat16)                                           # (512, 1024)
    w3p = w3.astype(jnp.bfloat16)                                           # (1024, 2000)
    return (w1p, b1, w2p, b2, w3p, b3)


@jax.jit
def generator_forward(z, label, kparams):
    w1, b1, w2, b2, w3, b3 = kparams
    B = z.shape[0]
    TB, B_pad = _choose_tiling(B)

    # concat(z, label) fused with feature pad (102 -> 128) and batch pad,
    # cast to bf16 for the layer-1 MXU path.
    x = jnp.concatenate([z.astype(jnp.float32), label.astype(jnp.float32)], axis=-1)
    x = jnp.pad(x, ((0, B_pad - B), (0, K_IN_PAD - K_IN))).astype(jnp.bfloat16)

    out = pl.pallas_call(
        generator_kernel,
        out_shape=jax.ShapeDtypeStruct((B_pad, G3_dim), jnp.bfloat16),
        grid=(B_pad // TB,),
        in_specs=[
            pl.BlockSpec((TB, K_IN_PAD), lambda i: (i, 0)),       # x: batch-tiled
            pl.BlockSpec((K_IN_PAD, G1_dim), lambda i: (0, 0)),   # w1: resident
            pl.BlockSpec((1, G1_dim), lambda i: (0, 0)),          # b1
            pl.BlockSpec((G1_dim, G2_dim), lambda i: (0, 0)),     # w2
            pl.BlockSpec((1, G2_dim), lambda i: (0, 0)),          # b2
            pl.BlockSpec((G2_dim, G3_dim), lambda i: (0, 0)),     # w3
            pl.BlockSpec((1, G3_dim), lambda i: (0, 0)),          # b3
        ],
        out_specs=pl.BlockSpec((TB, G3_dim), lambda i: (i, 0)),
        compiler_params=pltpu.CompilerParams(
            dimension_semantics=("parallel",),   # megacore sharding on v7x
            vmem_limit_bytes=48 << 20,           # ~24 MiB footprint at TB=512
        ),
    )(x, w1, b1, w2, b2, w3, b3)

    if B_pad != B:
        out = out[:B]        # row-only slice; identity (free) when B == B_pad
    return out               # (B, 2000) bf16


def generator_reference(z, label, kparams):
    """Pure-JAX reference mirroring the kernel's bf16-weight / f32-accum math
    (output kept f32; kernel output differs only by the final bf16 cast)."""
    w1, b1, w2, b2, w3, b3 = kparams
    x = jnp.concatenate([z.astype(jnp.float32), label.astype(jnp.float32)], axis=-1)
    x = jnp.pad(x, ((0, 0), (0, K_IN_PAD - K_IN))).astype(jnp.bfloat16)
    h1 = _leaky_relu(jnp.dot(x, w1, preferred_element_type=jnp.float32) + b1)
    h2 = _leaky_relu(jnp.dot(h1.astype(jnp.bfloat16), w2,
                             preferred_element_type=jnp.float32) + b2)
    h3 = jnp.dot(h2.astype(jnp.bfloat16), w3,
                 preferred_element_type=jnp.float32) + b3
    return jnp.tanh(h3)


if __name__ == "__main__":
    key = jax.random.PRNGKey(0)
    k_params, k_z, k_label = jax.random.split(key, 3)

    B = 8  # small batch
    raw_params = init_generator_params(k_params)
    kparams = prepare_generator_params(raw_params)

    z = jax.random.normal(k_z, (B, noise_dim), jnp.float32)
    label_idx = jax.random.randint(k_label, (B,), 0, label_dim)
    label = jax.nn.one_hot(label_idx, label_dim, dtype=jnp.float32)

    out = jax.block_until_ready(generator_forward(z, label, kparams))
    ref = generator_reference(z, label, kparams)

    assert out.shape == (B, data_dim), out.shape
    out_f32 = out.astype(jnp.float32)
    max_err = float(jnp.max(jnp.abs(out_f32 - ref)))
    assert jnp.allclose(out_f32, ref, atol=2e-2, rtol=2e-2), \
        f"mismatch vs reference: {max_err}"

    print("KERNEL_OK")
</pallas_src>

<mosaic_0001>
module attributes {stable_mosaic.version = 11 : i64} {
  func.func @generator_kernel(%arg0: i32, %arg1: memref<16x128xbf16, #tpu.memory_space<vmem>>, %arg2: memref<128x512xbf16, #tpu.memory_space<vmem>>, %arg3: memref<1x512xf32, #tpu.memory_space<vmem>>, %arg4: memref<512x1024xbf16, #tpu.memory_space<vmem>>, %arg5: memref<1x1024xf32, #tpu.memory_space<vmem>>, %arg6: memref<1024x2000xbf16, #tpu.memory_space<vmem>>, %arg7: memref<1x2000xf32, #tpu.memory_space<vmem>>, %arg8: memref<16x2000xbf16, #tpu.memory_space<vmem>>) attributes {dimension_semantics = [#tpu.dimension_semantics<parallel>], iteration_bounds = array<i64: 1>, scalar_prefetch = 0 : i64, scratch_operands = 0 : i64, tpu.core_type = #tpu.core_type<tc>, window_params = [{transform_indices = @transform_0, window_bounds = array<i64: 16, 128>}, {pipeline_mode = #tpu.pipeline_mode<synchronous>, transform_indices = @transform_1, window_bounds = array<i64: 128, 512>}, {pipeline_mode = #tpu.pipeline_mode<synchronous>, transform_indices = @transform_2, window_bounds = array<i64: 1, 512>}, {pipeline_mode = #tpu.pipeline_mode<synchronous>, transform_indices = @transform_3, window_bounds = array<i64: 512, 1024>}, {pipeline_mode = #tpu.pipeline_mode<synchronous>, transform_indices = @transform_4, window_bounds = array<i64: 1, 1024>}, {pipeline_mode = #tpu.pipeline_mode<synchronous>, transform_indices = @transform_5, window_bounds = array<i64: 1024, 2000>}, {pipeline_mode = #tpu.pipeline_mode<synchronous>, transform_indices = @transform_6, window_bounds = array<i64: 1, 2000>}, {transform_indices = @transform_7, window_bounds = array<i64: 16, 2000>}]} {
    %c0 = arith.constant 0 : index
    %c0_0 = arith.constant 0 : index
    %0 = vector.load %arg1[%c0, %c0_0] : memref<16x128xbf16, #tpu.memory_space<vmem>>, vector<16x128xbf16>
    %c0_1 = arith.constant 0 : index
    %c0_2 = arith.constant 0 : index
    %1 = vector.load %arg2[%c0_1, %c0_2] : memref<128x512xbf16, #tpu.memory_space<vmem>>, vector<128x512xbf16>
    %cst = arith.constant dense<0.000000e+00> : vector<16x512xf32>
    %2 = tpu.matmul %0, %1, %cst {dimension_numbers = #tpu.dot_dimension_numbers<[1], [0], [0], [1], [0, 0, 1, 1], [], []>} : vector<16x128xbf16>, vector<128x512xbf16>, vector<16x512xf32> -> vector<16x512xf32>
    %c0_3 = arith.constant 0 : index
    %c0_4 = arith.constant 0 : index
    %3 = vector.load %arg3[%c0_3, %c0_4] : memref<1x512xf32, #tpu.memory_space<vmem>>, vector<1x512xf32>
    %4 = vector.broadcast %3 : vector<1x512xf32> to vector<16x512xf32>
    %5 = arith.addf %2, %4 : vector<16x512xf32>
    %cst_5 = arith.constant 2.000000e-01 : f32
    %6 = vector.broadcast %cst_5 : f32 to vector<16x512xf32>
    %7 = arith.mulf %6, %5 : vector<16x512xf32>
    %8 = arith.maximumf %5, %7 : vector<16x512xf32>
    %9 = arith.truncf %8 : vector<16x512xf32> to vector<16x512xbf16>
    %c0_6 = arith.constant 0 : index
    %c0_7 = arith.constant 0 : index
    %10 = vector.load %arg4[%c0_6, %c0_7] : memref<512x1024xbf16, #tpu.memory_space<vmem>>, vector<512x1024xbf16>
    %cst_8 = arith.constant dense<0.000000e+00> : vector<16x1024xf32>
    %11 = tpu.matmul %9, %10, %cst_8 {dimension_numbers = #tpu.dot_dimension_numbers<[1], [0], [0], [1], [0, 0, 1, 1], [], []>} : vector<16x512xbf16>, vector<512x1024xbf16>, vector<16x1024xf32> -> vector<16x1024xf32>
    %c0_9 = arith.constant 0 : index
    %c0_10 = arith.constant 0 : index
    %12 = vector.load %arg5[%c0_9, %c0_10] : memref<1x1024xf32, #tpu.memory_space<vmem>>, vector<1x1024xf32>
    %13 = vector.broadcast %12 : vector<1x1024xf32> to vector<16x1024xf32>
    %14 = arith.addf %11, %13 : vector<16x1024xf32>
    %cst_11 = arith.constant 2.000000e-01 : f32
    %15 = vector.broadcast %cst_11 : f32 to vector<16x1024xf32>
    %16 = arith.mulf %15, %14 : vector<16x1024xf32>
    %17 = arith.maximumf %14, %16 : vector<16x1024xf32>
    %18 = arith.truncf %17 : vector<16x1024xf32> to vector<16x1024xbf16>
    %c0_12 = arith.constant 0 : index
    %c0_13 = arith.constant 0 : index
    %19 = vector.load %arg6[%c0_12, %c0_13] : memref<1024x2000xbf16, #tpu.memory_space<vmem>>, vector<1024x2000xbf16>
    %cst_14 = arith.constant dense<0.000000e+00> : vector<16x2000xf32>
    %20 = tpu.matmul %18, %19, %cst_14 {dimension_numbers = #tpu.dot_dimension_numbers<[1], [0], [0], [1], [0, 0, 1, 1], [], []>} : vector<16x1024xbf16>, vector<1024x2000xbf16>, vector<16x2000xf32> -> vector<16x2000xf32>
    %c0_15 = arith.constant 0 : index
    %c0_16 = arith.constant 0 : index
    %21 = vector.load %arg7[%c0_15, %c0_16] : memref<1x2000xf32, #tpu.memory_space<vmem>>, vector<1x2000xf32>
    %22 = vector.broadcast %21 : vector<1x2000xf32> to vector<16x2000xf32>
    %23 = arith.addf %20, %22 : vector<16x2000xf32>
    %24 = math.tanh %23 : vector<16x2000xf32>
    %25 = arith.truncf %24 : vector<16x2000xf32> to vector<16x2000xbf16>
    %c0_17 = arith.constant 0 : index
    %c0_18 = arith.constant 0 : index
    %26 = vector.load %arg8[%c0_17, %c0_18] : memref<16x2000xbf16, #tpu.memory_space<vmem>>, vector<16x2000xbf16>
    tpu.vector_store %arg8[%c0_17, %c0_18], %25 {strides = array<i32>} : memref<16x2000xbf16, #tpu.memory_space<vmem>>, vector<16x2000xbf16>,
    return
  }
  func.func @transform_0(%arg0: i32) -> (i32, i32) {
    %c0_i32 = arith.constant 0 : i32
    %c0_i32_0 = arith.constant 0 : i32
    return %arg0, %c0_i32 : i32, i32
  }
  func.func @transform_1(%arg0: i32) -> (i32, i32) {
    %c0_i32 = arith.constant 0 : i32
    %c0_i32_0 = arith.constant 0 : i32
    %c0_i32_1 = arith.constant 0 : i32
    return %c0_i32, %c0_i32_0 : i32, i32
  }
  func.func @transform_2(%arg0: i32) -> (i32, i32) {
    %c0_i32 = arith.constant 0 : i32
    %c0_i32_0 = arith.constant 0 : i32
    %c0_i32_1 = arith.constant 0 : i32
    return %c0_i32, %c0_i32_0 : i32, i32
  }
  func.func @transform_3(%arg0: i32) -> (i32, i32) {
    %c0_i32 = arith.constant 0 : i32
    %c0_i32_0 = arith.constant 0 : i32
    %c0_i32_1 = arith.constant 0 : i32
    return %c0_i32, %c0_i32_0 : i32, i32
  }
  func.func @transform_4(%arg0: i32) -> (i32, i32) {
    %c0_i32 = arith.constant 0 : i32
    %c0_i32_0 = arith.constant 0 : i32
    %c0_i32_1 = arith.constant 0 : i32
    return %c0_i32, %c0_i32_0 : i32, i32
  }
  func.func @transform_5(%arg0: i32) -> (i32, i32) {
    %c0_i32 = arith.constant 0 : i32
    %c0_i32_0 = arith.constant 0 : i32
    %c0_i32_1 = arith.constant 0 : i32
    return %c0_i32, %c0_i32_0 : i32, i32
  }
  func.func @transform_6(%arg0: i32) -> (i32, i32) {
    %c0_i32 = arith.constant 0 : i32
    %c0_i32_0 = arith.constant 0 : i32
    %c0_i32_1 = arith.constant 0 : i32
    return %c0_i32, %c0_i32_0 : i32, i32
  }
  func.func @transform_7(%arg0: i32) -> (i32, i32) {
    %c0_i32 = arith.constant 0 : i32
    %c0_i32_0 = arith.constant 0 : i32
    return %arg0, %c0_i32 : i32, i32
  }
}

</mosaic_0001>

<bundles_post_ra>
// kernel: generator_forward.1
= control target key start
LH: loop header
LB: loop body
LE: loop exit
PB: predicated region body
PF: predicated region fallthrough
CT: control target
= control target key end

     0   :  { %v11692_v1 = vmov 0   ;;  %vm10056_vm0 = vcmask 1043456   ;;  %vm10057_vm1 = vcmask 654340   ;;  %s15941_s1 = inlined_call_operand.vmem [shape: bf16[128,512], index: 1, kind: input, shape index: {}]   ;;  %s15942_s0 = inlined_call_operand.vmem [shape: bf16[16,128], index: 0, kind: input, shape index: {}]   ;;  %s15943_s3 = inlined_call_operand.vmem [shape: bf16[512,1024], index: 3, kind: input, shape index: {}]   ;;  %s15944_s2 = inlined_call_operand.vmem [shape: f32[1,512], index: 2, kind: input, shape index: {}]   ;;  %s15945_s5 = inlined_call_operand.vmem [shape: bf16[1024,2000], index: 5, kind: input, shape index: {}]   ;;  %s15946_s4 = inlined_call_operand.vmem [shape: f32[1,1024], index: 4, kind: input, shape index: {}]   ;;  %s15947_s6 = inlined_call_operand.vmem [shape: f32[1,2000], index: 6, kind: input, shape index: {}]   ;;  %s15948_s7 = inlined_call_operand.vmem [shape: bf16[16,2000], index: 7, kind: output, shape index: {}]  }
   0x1   :  { %v11578_v0 = vld [vmem:[%s15941_s1 + $0x4] ss:$16 sps:$4 sm:$0xff]   ;;  %281 = vmatprep.mubr.bf16.mxu0 %v11692_v1  ;;  %324 = vmatprep.mubr.bf16.mxu1 %v11692_v1  ;;  %v11580_v2 = vld [vmem:[%s15941_s1] ss:$16 sps:$4 sm:$0xff]   ;;  %v11603_v10 = vld [vmem:[%s15941_s1 + $0xc] ss:$16 sps:$4 sm:$0xff]  }
   0x2   :  { %249 = vmatprep.subr.bf16.mxu0 %v11578_v0  ;;  %v11581_v3 = vld [vmem:[%s15941_s1 + $0x24] ss:$16 sps:$4 sm:$0xff]   ;;  %v11583_v4 = vld [vmem:[%s15941_s1 + $0x20] ss:$16 sps:$4 sm:$0xff]   ;;  %v11605_v11 = vld [vmem:[%s15941_s1 + $0x8] ss:$16 sps:$4 sm:$0xff]   ;;  %292 = vmatprep.subr.bf16.mxu1 %v11603_v10 }
   0x3   :  { %250 = vmatpush1.bf16.msra.mxu0 %v11580_v2  ;;  %v11584_v5 = vld [vmem:[%s15941_s1 + $0x44] ss:$16 sps:$4 sm:$0xff]   ;;  %v11586_v6 = vld [vmem:[%s15941_s1 + $0x40] ss:$16 sps:$4 sm:$0xff]   ;;  %v11606_v12 = vld [vmem:[%s15941_s1 + $0x2c] ss:$16 sps:$4 sm:$0xff]   ;;  %293 = vmatpush1.bf16.msra.mxu1 %v11605_v11 }
   0x4   :  { %251 = vmatprep.subr.bf16.mxu0 %v11581_v3  ;;  %v11587_v7 = vld [vmem:[%s15941_s1 + $0x64] ss:$16 sps:$4 sm:$0xff]   ;;  %v11589_v8 = vld [vmem:[%s15941_s1 + $0x60] ss:$16 sps:$4 sm:$0xff]   ;;  %v11608_v14 = vld [vmem:[%s15941_s1 + $0x28] ss:$16 sps:$4 sm:$0xff]   ;;  %294 = vmatprep.subr.bf16.mxu1 %v11606_v12 }
   0x5   :  { %v11590_v9 = vld [vmem:[%s15941_s1 + $0x84] ss:$16 sps:$4 sm:$0xff]   ;;  %v11592_v13 = vld [vmem:[%s15941_s1 + $0x80] ss:$16 sps:$4 sm:$0xff]   ;;  %v11609_v16 = vld [vmem:[%s15941_s1 + $0x4c] ss:$16 sps:$4 sm:$0xff]  }
   0x6   :  { %v11593_v15 = vld [vmem:[%s15941_s1 + $0xa4] ss:$16 sps:$4 sm:$0xff]   ;;  %v11595_v17 = vld [vmem:[%s15941_s1 + $0xa0] ss:$16 sps:$4 sm:$0xff]   ;;  %v11611_v18 = vld [vmem:[%s15941_s1 + $0x48] ss:$16 sps:$4 sm:$0xff]  }
   0x7   :  { %252 = vmatpush1.bf16.msra.mxu0 %v11583_v4  ;;  %295 = vmatpush1.bf16.msra.mxu1 %v11608_v14  ;;  %v11596_v19 = vld [vmem:[%s15941_s1 + $0xc4] ss:$16 sps:$4 sm:$0xff]   ;;  %v11612_v20 = vld [vmem:[%s15941_s1 + $0x6c] ss:$16 sps:$4 sm:$0xff]   ;;  %v11598_v21 = vld [vmem:[%s15941_s1 + $0xc0] ss:$16 sps:$4 sm:$0xff]  }
   0x8   :  { %253 = vmatprep.subr.bf16.mxu0 %v11584_v5  ;;  %296 = vmatprep.subr.bf16.mxu1 %v11609_v16  ;;  %v11614_v22 = vld [vmem:[%s15941_s1 + $0x68] ss:$16 sps:$4 sm:$0xff]   ;;  %v11599_v23 = vld [vmem:[%s15941_s1 + $0xe4] ss:$16 sps:$4 sm:$0xff]   ;;  %v11615_v24 = vld [vmem:[%s15941_s1 + $0x8c] ss:$16 sps:$4 sm:$0xff]  }
   0x9   :  { %v355_v25 = vld [vmem:[%s15943_s3] sm:$0xff]  ;;  %v11617_v28 = vld [vmem:[%s15941_s1 + $0x88] ss:$16 sps:$4 sm:$0xff]   ;;  %v11618_v29 = vld [vmem:[%s15941_s1 + $0xac] ss:$16 sps:$4 sm:$0xff]  }
   0xa   :  { %v359_v26 = vld [vmem:[%s15943_s3 + $0x20] sm:$0xff]  ;;  %v11620_v34 = vld [vmem:[%s15941_s1 + $0xa8] ss:$16 sps:$4 sm:$0xff]   ;;  %v11621_v36 = vld [vmem:[%s15941_s1 + $0xcc] ss:$16 sps:$4 sm:$0xff]  }
   0xb   :  { %254 = vmatpush1.bf16.msra.mxu0 %v11586_v6  ;;  %297 = vmatpush1.bf16.msra.mxu1 %v11611_v18  ;;  %v11601_v27 = vld [vmem:[%s15941_s1 + $0xe0] ss:$16 sps:$4 sm:$0xff]   ;;  %v10106_v30 = vcombine.high %v355_v25, %v359_v26  ;;  %v10105_v35 = vcombine.low %v355_v25, %v359_v26  ;;  %v11623_v40 = vld [vmem:[%s15941_s1 + $0xc8] ss:$16 sps:$4 sm:$0xff]   ;;  %v11624_v42 = vld [vmem:[%s15941_s1 + $0xec] ss:$16 sps:$4 sm:$0xff]  }
   0xc   :  { %255 = vmatprep.subr.bf16.mxu0 %v11587_v7  ;;  %298 = vmatprep.subr.bf16.mxu1 %v11612_v20  ;;  %v363_v31 = vld [vmem:[%s15943_s3 + $0x40] sm:$0xff]  ;;  %v356_v43 = vld [vmem:[%s15943_s3 + $0x8] sm:$0xff]  ;;  %vm10058_vm2 = vmor %vm10057_vm1, %vm10056_vm0 }
   0xd   :  { %v367_v32 = vld [vmem:[%s15943_s3 + $0x60] sm:$0xff]  ;;  %v360_v45 = vld [vmem:[%s15943_s3 + $0x28] sm:$0xff] }
   0xe   :  { %v11602_v33 = vld [vmem:[%s15942_s0] sm:$0xff]   ;;  %v10114_v37 = vcombine.high %v363_v31, %v367_v32  ;;  %v10113_v41 = vcombine.low %v363_v31, %v367_v32  ;;  %v11626_v48 = vld [vmem:[%s15941_s1 + $0xe8] ss:$16 sps:$4 sm:$0xff]   ;;  %v10108_v50 = vcombine.high %v356_v43, %v360_v45  ;;  %v10107_v56 = vcombine.low %v356_v43, %v360_v45 }
   0xf   :  { %256 = vmatpush1.bf16.msra.mxu0 %v11589_v8  ;;  %299 = vmatpush1.bf16.msra.mxu1 %v11614_v22  ;;  %v371_v38 = vld [vmem:[%s15943_s3 + $0x80] sm:$0xff]  ;;  %v364_v51 = vld [vmem:[%s15943_s3 + $0x48] sm:$0xff] }
  0x10   :  { %257 = vmatprep.subr.bf16.mxu0 %v11590_v9  ;;  %300 = vmatprep.subr.bf16.mxu1 %v11615_v24  ;;  %v375_v39 = vld [vmem:[%s15943_s3 + $0xa0] sm:$0xff]  ;;  %v368_v53 = vld [vmem:[%s15943_s3 + $0x68] sm:$0xff] }
  0x11   :  { %v10122_v44 = vcombine.high %v371_v38, %v375_v39  ;;  %v379_v46 = vld [vmem:[%s15943_s3 + $0xc0] sm:$0xff]  ;;  %v10121_v49 = vcombine.low %v371_v38, %v375_v39  ;;  %v10116_v58 = vcombine.high %v364_v51, %v368_v53  ;;  %v372_v59 = vld [vmem:[%s15943_s3 + $0x88] sm:$0xff]  ;;  %v10115_v0 = vcombine.low %v364_v51, %v368_v53 }
  0x12   :  { %v383_v47 = vld [vmem:[%s15943_s3 + $0xe0] sm:$0xff]  ;;  %v376_v61 = vld [vmem:[%s15943_s3 + $0xa8] sm:$0xff] }
  0x13   :  { %258 = vmatpush1.bf16.msra.mxu0 %v11592_v13  ;;  %301 = vmatpush1.bf16.msra.mxu1 %v11617_v28  ;;  %v10130_v52 = vcombine.high %v379_v46, %v383_v47  ;;  %v387_v54 = vld [vmem:[%s15943_s3 + $0x100] sm:$0xff]  ;;  %v10129_v57 = vcombine.low %v379_v46, %v383_v47  ;;  %v10124_v2 = vcombine.high %v372_v59, %v376_v61  ;;  %v380_v3 = vld [vmem:[%s15943_s3 + $0xc8] sm:$0xff] }
  0x14   :  { %259 = vmatprep.subr.bf16.mxu0 %v11593_v15  ;;  %302 = vmatprep.subr.bf16.mxu1 %v11618_v29  ;;  %v391_v55 = vld [vmem:[%s15943_s3 + $0x120] sm:$0xff]  ;;  %v384_v5 = vld [vmem:[%s15943_s3 + $0xe8] sm:$0xff]  ;;  %v10123_v8 = vcombine.low %v372_v59, %v376_v61 }
  0x15   :  { %v10138_v60 = vcombine.high %v387_v54, %v391_v55  ;;  %v395_v62 = vld [vmem:[%s15943_s3 + $0x140] sm:$0xff]  ;;  %v10137_v1 = vcombine.low %v387_v54, %v391_v55  ;;  %v10132_v10 = vcombine.high %v380_v3, %v384_v5  ;;  %v388_v11 = vld [vmem:[%s15943_s3 + $0x108] sm:$0xff]  ;;  %v10131_v16 = vcombine.low %v380_v3, %v384_v5 }
  0x16   :  { %v399_v63 = vld [vmem:[%s15943_s3 + $0x160] sm:$0xff]  ;;  %v392_v13 = vld [vmem:[%s15943_s3 + $0x128] sm:$0xff] }
  0x17   :  { %260 = vmatpush1.bf16.msra.mxu0 %v11595_v17  ;;  %303 = vmatpush1.bf16.msra.mxu1 %v11620_v34  ;;  %v10146_v4 = vcombine.high %v395_v62, %v399_v63  ;;  %v403_v6 = vld [vmem:[%s15943_s3 + $0x180] sm:$0xff]  ;;  %v10145_v9 = vcombine.low %v395_v62, %v399_v63  ;;  %v10140_v18 = vcombine.high %v388_v11, %v392_v13  ;;  %v408_v29 = vld [vmem:[%s15943_s3 + $0x1a8] sm:$0xff] }
  0x18   :  { %261 = vmatprep.subr.bf16.mxu0 %v11596_v19  ;;  %304 = vmatprep.subr.bf16.mxu1 %v11621_v36  ;;  %v407_v7 = vld [vmem:[%s15943_s3 + $0x1a0] sm:$0xff]  ;;  %v396_v19 = vld [vmem:[%s15943_s3 + $0x148] sm:$0xff]  ;;  %v10139_v24 = vcombine.low %v388_v11, %v392_v13 }
  0x19   :  { %v10154_v12 = vcombine.high %v403_v6, %v407_v7  ;;  %v411_v14 = vld [vmem:[%s15943_s3 + $0x1c0] sm:$0xff]  ;;  %v10153_v17 = vcombine.low %v403_v6, %v407_v7  ;;  %v420_v43 = vld [vmem:[%s15943_s3 + $0x208] sm:$0xff] }
  0x1a   :  { %v415_v15 = vld [vmem:[%s15943_s3 + $0x1e0] sm:$0xff]  ;;  %v424_v45 = vld [vmem:[%s15943_s3 + $0x228] sm:$0xff] }
  0x1b   :  { %262 = vmatpush1.bf16.msra.mxu0 %v11598_v21  ;;  %305 = vmatpush1.bf16.msra.mxu1 %v11623_v40  ;;  %v10162_v20 = vcombine.high %v411_v14, %v415_v15  ;;  %v400_v21 = vld [vmem:[%s15943_s3 + $0x168] sm:$0xff]  ;;  %v419_v22 = vld [vmem:[%s15943_s3 + $0x200] sm:$0xff]  ;;  %v10161_v25 = vcombine.low %v411_v14, %v415_v15 }
  0x1c   :  { %263 = vmatprep.subr.bf16.mxu0 %v11599_v23  ;;  %306 = vmatprep.subr.bf16.mxu1 %v11624_v42  ;;  %v423_v23 = vld [vmem:[%s15943_s3 + $0x220] sm:$0xff]  ;;  %v10148_v26 = vcombine.high %v396_v19, %v400_v21  ;;  %v10147_v32 = vcombine.low %v396_v19, %v400_v21  ;;  %v428_v51 = vld [vmem:[%s15943_s3 + $0x248] sm:$0xff] }
  0x1d   :  { %v10170_v28 = vcombine.high %v419_v22, %v423_v23  ;;  %v431_v31 = vld [vmem:[%s15943_s3 + $0x260] sm:$0xff]  ;;  %v432_v53 = vld [vmem:[%s15943_s3 + $0x268] sm:$0xff] }
  0x1e   :  { %v435_v38 = vld [vmem:[%s15943_s3 + $0x280] sm:$0xff]  ;;  %v440_v61 = vld [vmem:[%s15943_s3 + $0x2a8] sm:$0xff]  ;;  %v10179_v62 = vcombine.low %v428_v51, %v432_v53 }
  0x1f   :  { %264 = vmatpush1.bf16.msra.mxu0 %v11601_v27  ;;  %307 = vmatpush1.bf16.msra.mxu1 %v11626_v48  ;;  %v404_v27 = vld [vmem:[%s15943_s3 + $0x188] sm:$0xff]  ;;  %v439_v39 = vld [vmem:[%s15943_s3 + $0x2a0] sm:$0xff] }
  0x20   :  { %1933 = vmatprep.subr.bf16.mxu0 %v10106_v30  ;;  %2019 = vmatprep.subr.bf16.mxu1 %v10108_v50  ;;  %v427_v30 = vld [vmem:[%s15943_s3 + $0x240] sm:$0xff]  ;;  %v10156_v34 = vcombine.high %v404_v27, %v408_v29  ;;  %v10155_v40 = vcombine.low %v404_v27, %v408_v29  ;;  %v10172_v50 = vcombine.high %v420_v43, %v424_v45  ;;  %v452_v5 = vld [vmem:[%s15943_s3 + $0x308] sm:$0xff] }
  0x21   :  { %v10178_v36 = vcombine.high %v427_v30, %v431_v31  ;;  %v443_v46 = vld [vmem:[%s15943_s3 + $0x2c0] sm:$0xff]  ;;  %v456_v6 = vld [vmem:[%s15943_s3 + $0x328] sm:$0xff] }
  0x22   :  { %282 = vmatmul.mubr.bf16.vlgmr.msra.gmra.mrb[0].mxu0 %v11602_v33  ;;  %325 = vmatmul.mubr.bf16.vlgmr.msra.gmra.mrb[0].mxu1 %v11602_v33  ;;  %v10169_v33 = vcombine.low %v419_v22, %v423_v23  ;;  %v447_v47 = vld [vmem:[%s15943_s3 + $0x2e0] sm:$0xff]  ;;  %v464_v14 = vld [vmem:[%s15943_s3 + $0x368] sm:$0xff] }
  0x23   :  { %1934 = vmatpush1.bf16.msra.mxu0 %v10105_v35  ;;  %2020 = vmatpush1.bf16.msra.mxu1 %v10107_v56  ;;  %v412_v35 = vld [vmem:[%s15943_s3 + $0x1c8] sm:$0xff]  ;;  %v451_v54 = vld [vmem:[%s15943_s3 + $0x300] sm:$0xff]  ;;  %v10171_v56 = vcombine.low %v420_v43, %v424_v45 }
  0x24   :  { %1935 = vmatprep.subr.bf16.mxu0 %v10114_v37  ;;  %2021 = vmatprep.subr.bf16.mxu1 %v10116_v58  ;;  %v416_v37 = vld [vmem:[%s15943_s3 + $0x1e8] sm:$0xff]  ;;  %v455_v55 = vld [vmem:[%s15943_s3 + $0x320] sm:$0xff]  ;;  %v10180_v58 = vcombine.high %v428_v51, %v432_v53 }
  0x25   :  { %v10164_v42 = vcombine.high %v412_v35, %v416_v37  ;;  %v10163_v48 = vcombine.low %v412_v35, %v416_v37  ;;  %v10202_v59 = vcombine.high %v451_v54, %v455_v55  ;;  %v10201_v63 = vcombine.low %v451_v54, %v455_v55  ;;  %v463_v11 = vld [vmem:[%s15943_s3 + $0x360] sm:$0xff]  ;;  %v472_v22 = vld [vmem:[%s15943_s3 + $0x3a8] sm:$0xff] }
  0x26   :  { %v471_v19 = vld [vmem:[%s15943_s3 + $0x3a0] sm:$0xff] }
  0x27   :  { %1936 = vmatpush1.bf16.msra.mxu0 %v10113_v41  ;;  %2022 = vmatpush1.bf16.msra.mxu1 %v10115_v0  ;;  %v10177_v41 = vcombine.low %v427_v30, %v431_v31  ;;  %v479_v27 = vld [vmem:[%s15943_s3 + $0x3e0] sm:$0xff]  ;;  %v480_v30 = vld [vmem:[%s15943_s3 + $0x3e8] sm:$0xff] }
  0x28   :  { %1937 = vmatprep.subr.bf16.mxu0 %v10122_v44  ;;  %2023 = vmatprep.subr.bf16.mxu1 %v10124_v2  ;;  %v10186_v44 = vcombine.high %v435_v38, %v439_v39  ;;  %v448_v2 = vld [vmem:[%s15943_s3 + $0x2e8] sm:$0xff]  ;;  %v487_v35 = vld [vmem:[%s15943_s3 + $0x420] sm:$0xff] }
  0x29   :  { %v61_v45 = vld [vmem:[%s15944_s2] sm:$0xf] }
  0x2b   :  { %1938 = vmatpush1.bf16.msra.mxu0 %v10121_v49  ;;  %2024 = vmatpush1.bf16.msra.mxu1 %v10123_v8  ;;  %v10185_v49 = vcombine.low %v435_v38, %v439_v39  ;;  %v10204_v8 = vcombine.high %v452_v5, %v456_v6  ;;  %v488_v38 = vld [vmem:[%s15943_s3 + $0x428] sm:$0xff] }
  0x2c   :  { %1939 = vmatprep.subr.bf16.mxu0 %v10130_v52  ;;  %2025 = vmatprep.subr.bf16.mxu1 %v10132_v10  ;;  %v10194_v52 = vcombine.high %v443_v46, %v447_v47  ;;  %v459_v10 = vld [vmem:[%s15943_s3 + $0x340] sm:$0xff] }
  0x2d   :  { %v10210_v13 = vcombine.high %v459_v10, %v463_v11  ;;  %v10209_v15 = vcombine.low %v459_v10, %v463_v11 }
  0x2f   :  { %1940 = vmatpush1.bf16.msra.mxu0 %v10129_v57  ;;  %2026 = vmatpush1.bf16.msra.mxu1 %v10131_v16  ;;  %v10193_v57 = vcombine.low %v443_v46, %v447_v47 }
  0x30   :  { %1941 = vmatprep.subr.bf16.mxu0 %v10138_v60  ;;  %2027 = vmatprep.subr.bf16.mxu1 %v10140_v18  ;;  %v436_v60 = vld [vmem:[%s15943_s3 + $0x288] sm:$0xff]  ;;  %v467_v18 = vld [vmem:[%s15943_s3 + $0x380] sm:$0xff] }
  0x31   :  { %v10188_v0 = vcombine.high %v436_v60, %v440_v61  ;;  %v10187_v3 = vcombine.low %v436_v60, %v440_v61  ;;  %v10218_v21 = vcombine.high %v467_v18, %v471_v19  ;;  %v10217_v23 = vcombine.low %v467_v18, %v471_v19 }
  0x33   :  { %1942 = vmatpush1.bf16.msra.mxu0 %v10137_v1  ;;  %2028 = vmatpush1.bf16.msra.mxu1 %v10139_v24  ;;  %v444_v1 = vld [vmem:[%s15943_s3 + $0x2c8] sm:$0xff] }
  0x34   :  { %1943 = vmatprep.subr.bf16.mxu0 %v10146_v4  ;;  %2029 = vmatprep.subr.bf16.mxu1 %v10148_v26  ;;  %v10196_v4 = vcombine.high %v444_v1, %v448_v2  ;;  %v10195_v7 = vcombine.low %v444_v1, %v448_v2  ;;  %v475_v26 = vld [vmem:[%s15943_s3 + $0x3c0] sm:$0xff] }
  0x35   :  { %v10226_v29 = vcombine.high %v475_v26, %v479_v27  ;;  %v10225_v31 = vcombine.low %v475_v26, %v479_v27  ;;  %v491_v1 = vld [vmem:[%s15943_s3 + $0x440] sm:$0xff] }
  0x36   :  { %v507_v26 = vld [vmem:[%s15943_s3 + $0x4c0] sm:$0xff] }
  0x37   :  { %1944 = vmatpush1.bf16.msra.mxu0 %v10145_v9  ;;  %2030 = vmatpush1.bf16.msra.mxu1 %v10147_v32  ;;  %v10203_v9 = vcombine.low %v452_v5, %v456_v6  ;;  %v492_v5 = vld [vmem:[%s15943_s3 + $0x448] sm:$0xff] }
  0x38   :  { %1945 = vmatprep.subr.bf16.mxu0 %v10154_v12  ;;  %2031 = vmatprep.subr.bf16.mxu1 %v10156_v34  ;;  %v460_v12 = vld [vmem:[%s15943_s3 + $0x348] sm:$0xff]  ;;  %v483_v34 = vld [vmem:[%s15943_s3 + $0x400] sm:$0xff] }
  0x39   :  { %v10211_v16 = vcombine.low %v460_v12, %v464_v14  ;;  %v10234_v37 = vcombine.high %v483_v34, %v487_v35  ;;  %v10233_v39 = vcombine.low %v483_v34, %v487_v35  ;;  %v496_v6 = vld [vmem:[%s15943_s3 + $0x468] sm:$0xff] }
  0x3b   :  { %1946 = vmatpush1.bf16.msra.mxu0 %v10153_v17  ;;  %2032 = vmatpush1.bf16.msra.mxu1 %v10155_v40  ;;  %v10212_v17 = vcombine.high %v460_v12, %v464_v14  ;;  %v10244_v12 = vcombine.high %v492_v5, %v496_v6  ;;  %v503_v14 = vld [vmem:[%s15943_s3 + $0x4a0] sm:$0xff] }
  0x3c   :  { %1947 = vmatprep.subr.bf16.mxu0 %v10162_v20  ;;  %2033 = vmatprep.subr.bf16.mxu1 %v10164_v42  ;;  %v468_v20 = vld [vmem:[%s15943_s3 + $0x388] sm:$0xff]  ;;  %v63_v42 = vlaneseq }
  0x3d   :  { %v10219_v24 = vcombine.low %v468_v20, %v472_v22 }
  0x3e   :  { %v12036_v43 = vshrl.u32 %v63_v42, 7 }
  0x3f   :  { %1948 = vmatpush1.bf16.msra.mxu0 %v10161_v25  ;;  %2034 = vmatpush1.bf16.msra.mxu1 %v10163_v48  ;;  %v10220_v25 = vcombine.high %v468_v20, %v472_v22 }
  0x40   :  { %1949 = vmatprep.subr.bf16.mxu0 %v10170_v28  ;;  %2035 = vmatprep.subr.bf16.mxu1 %v10172_v50  ;;  %v476_v28 = vld [vmem:[%s15943_s3 + $0x3c8] sm:$0xff]  ;;  %v12045_v46 = vsub.s32 1, %v12036_v43  ;;  %v12050_v60 = vsub.s32 2, %v12036_v43 }
  0x41   :  { %v10227_v32 = vcombine.low %v476_v28, %v480_v30 }
  0x42   :  { %v70_v48 = vrot.slane %v61_v45, %v12045_v46 }
  0x43   :  { %1950 = vmatpush1.bf16.msra.mxu0 %v10169_v33  ;;  %2036 = vmatpush1.bf16.msra.mxu1 %v10171_v56  ;;  %v10228_v33 = vcombine.high %v476_v28, %v480_v30  ;;  %v511_v30 = vld [vmem:[%s15943_s3 + $0x4e0] sm:$0xff] }
  0x44   :  { %1951 = vmatprep.subr.bf16.mxu0 %v10178_v36  ;;  %2037 = vmatprep.subr.bf16.mxu1 %v10180_v58  ;;  %v484_v36 = vld [vmem:[%s15943_s3 + $0x408] sm:$0xff] }
  0x45   :  { %v10235_v40 = vcombine.low %v484_v36, %v488_v38 }
  0x47   :  { %1952 = vmatpush1.bf16.msra.mxu0 %v10177_v41  ;;  %2038 = vmatpush1.bf16.msra.mxu1 %v10179_v62  ;;  %v10236_v41 = vcombine.high %v484_v36, %v488_v38  ;;  %v12053_v62 = vsub.s32 3, %v12036_v43 }
  0x48   :  { %1953 = vmatprep.subr.bf16.mxu0 %v10186_v44  ;;  %2039 = vmatprep.subr.bf16.mxu1 %v10188_v0  ;;  %v12039_v44 = vsub.s32 0, %v12036_v43 }
  0x49   :  { %v78_v10 = vrot.slane %v61_v45, %v12053_v62 }
  0x4a   :  { %v66_v47 = vrot.slane %v61_v45, %v12039_v44 }
  0x4b   :  { %1954 = vmatpush1.bf16.msra.mxu0 %v10185_v49  ;;  %2040 = vmatpush1.bf16.msra.mxu1 %v10187_v3 }
  0x4c   :  { %1955 = vmatprep.subr.bf16.mxu0 %v10194_v52  ;;  %2041 = vmatprep.subr.bf16.mxu1 %v10196_v4  ;;  %v495_v4 = vld [vmem:[%s15943_s3 + $0x460] sm:$0xff] }
  0x4d   :  { %v10242_v11 = vcombine.high %v491_v1, %v495_v4  ;;  %v10241_v20 = vcombine.low %v491_v1, %v495_v4  ;;  %v531_v4 = vld [vmem:[%s15943_s3 + $0x580] sm:$0xff] }
  0x4f   :  { %1956 = vmatpush1.bf16.msra.mxu0 %v10193_v57  ;;  %2042 = vmatpush1.bf16.msra.mxu1 %v10195_v7 }
  0x50   :  { %1957 = vmatprep.subr.bf16.mxu0 %v10202_v59  ;;  %2043 = vmatprep.subr.bf16.mxu1 %v10204_v8  ;;  %v74_v8 = vrot.slane %v61_v45, %v12050_v60  ;;  %v515_v45 = vld [vmem:[%s15943_s3 + $0x500] sm:$0xff] }
  0x53   :  { %1958 = vmatpush1.bf16.msra.mxu0 %v10201_v63  ;;  %2044 = vmatpush1.bf16.msra.mxu1 %v10203_v9 }
  0x54   :  { %1959 = vmatprep.subr.bf16.mxu0 %v10210_v13  ;;  %2045 = vmatprep.subr.bf16.mxu1 %v10212_v17  ;;  %v499_v13 = vld [vmem:[%s15943_s3 + $0x480] sm:$0xff] }
  0x57   :  { %1960 = vmatpush1.bf16.msra.mxu0 %v10209_v15  ;;  %2046 = vmatpush1.bf16.msra.mxu1 %v10211_v16  ;;  %v500_v15 = vld [vmem:[%s15943_s3 + $0x488] sm:$0xff] }
  0x58   :  { %1961 = vmatprep.subr.bf16.mxu0 %v10218_v21  ;;  %2047 = vmatprep.subr.bf16.mxu1 %v10220_v25  ;;  %v504_v16 = vld [vmem:[%s15943_s3 + $0x4a8] sm:$0xff]  ;;  %v10243_v21 = vcombine.low %v492_v5, %v496_v6  ;;  %v535_v5 = vld [vmem:[%s15943_s3 + $0x5a0] sm:$0xff] }
  0x59   :  { %v10252_v25 = vcombine.high %v500_v15, %v504_v16  ;;  %v10251_v38 = vcombine.low %v500_v15, %v504_v16  ;;  %v532_v6 = vld [vmem:[%s15943_s3 + $0x588] sm:$0xff]  ;;  %v543_v15 = vld [vmem:[%s15943_s3 + $0x5e0] sm:$0xff] }
  0x5a   :  { %v540_v16 = vld [vmem:[%s15943_s3 + $0x5c8] sm:$0xff] }
  0x5b   :  { %1962 = vmatpush1.bf16.msra.mxu0 %v10217_v23  ;;  %2048 = vmatpush1.bf16.msra.mxu1 %v10219_v24  ;;  %v10250_v24 = vcombine.high %v499_v13, %v503_v14 }
  0x5c   :  { %1963 = vmatprep.subr.bf16.mxu0 %v10226_v29  ;;  %2049 = vmatprep.subr.bf16.mxu1 %v10228_v33 }
  0x5f   :  { %1964 = vmatpush1.bf16.msra.mxu0 %v10225_v31  ;;  %2050 = vmatpush1.bf16.msra.mxu1 %v10227_v32  ;;  %v508_v31 = vld [vmem:[%s15943_s3 + $0x4c8] sm:$0xff] }
  0x60   :  { %1976 = vmatprep.subr.bf16.mxu0 %v10234_v37  ;;  %2062 = vmatprep.subr.bf16.mxu1 %v10236_v41  ;;  %v512_v32 = vld [vmem:[%s15943_s3 + $0x4e8] sm:$0xff]  ;;  %v10249_v37 = vcombine.low %v499_v13, %v503_v14  ;;  %v10258_v41 = vcombine.high %v507_v26, %v511_v30  ;;  %v539_v14 = vld [vmem:[%s15943_s3 + $0x5c0] sm:$0xff] }
  0x61   :  { %v10260_v42 = vcombine.high %v508_v31, %v512_v32 }
  0xf5   :  { %v283_v49 = vpop.f32.mrb[0].mxu0  ;;  %v326_v17 = vpop.f32.mrb[0].mxu1 }
  0xf6   :  { %v284_v50 = vadd.f32 %v283_v49, %v66_v47  ;;  %v285_v51 = vpop.f32.mrb[1].mxu0  ;;  %v327_v18 = vadd.f32 %v326_v17, %v74_v8  ;;  %v328_v19 = vpop.f32.mrb[1].mxu1  ;;  %v516_v49 = vld [vmem:[%s15943_s3 + $0x508] sm:$0xff] }
  0xf7   :  { %v286_v52 = vadd.f32 %v285_v51, %v70_v48  ;;  %v287_v53 = vpop.f32.mrb[2].mxu0  ;;  %v329_v22 = vadd.f32 %v328_v19, %v78_v10  ;;  %v330_v23 = vpop.f32.mrb[2].mxu1  ;;  %v544_v17 = vld [vmem:[%s15943_s3 + $0x5e8] sm:$0xff] }
  0xf8   :  { %v335_v54 = vmul.f32 0.2, %v284_v50  ;;  %v288_v55 = vadd.f32 %v287_v53, %v66_v47  ;;  %v289_v56 = vpop.f32.mrb[3].mxu0  ;;  %v337_v27 = vmul.f32 0.2, %v327_v18  ;;  %v331_v28 = vadd.f32 %v330_v23, %v74_v8  ;;  %v332_v29 = vpop.f32.mrb[3].mxu1 }
  0xf9   :  { %v336_v57 = vmul.f32 0.2, %v286_v52  ;;  %v290_v58 = vadd.f32 %v289_v56, %v70_v48  ;;  %v338_v33 = vmul.f32 0.2, %v329_v22  ;;  %v333_v34 = vadd.f32 %v332_v29, %v78_v10  ;;  %v519_v48 = vld [vmem:[%s15943_s3 + $0x520] sm:$0xff]  ;;  %v536_v8 = vld [vmem:[%s15943_s3 + $0x5a8] sm:$0xff] }
  0xfa   :  { %v339_v59 = vmul.f32 0.2, %v288_v55  ;;  %v343_v63 = vmax.f32 %v284_v50, %v335_v54  ;;  %v345_v35 = vmax.f32 %v327_v18, %v337_v27  ;;  %v341_v36 = vmul.f32 0.2, %v331_v28  ;;  %v520_v50 = vld [vmem:[%s15943_s3 + $0x528] sm:$0xff]  ;;  %v551_v23 = vld [vmem:[%s15943_s3 + $0x620] sm:$0xff] }
  0xfb   :  { %v340_v61 = vmul.f32 0.2, %v290_v58  ;;  %v344_v2 = vmax.f32 %v286_v52, %v336_v57  ;;  %v10257_v53 = vcombine.low %v507_v26, %v511_v30  ;;  %v10259_v54 = vcombine.low %v508_v31, %v512_v32  ;;  %v555_v30 = vld [vmem:[%s15943_s3 + $0x640] sm:$0xff]  ;;  %v556_v32 = vld [vmem:[%s15943_s3 + $0x648] sm:$0xff] }
  0xfc   :  { %v347_v0 = vmax.f32 %v288_v55, %v339_v59  ;;  %v349_v47 = vmax.f32 %v331_v28, %v341_v36  ;;  %v10266_v56 = vcombine.high %v515_v45, %v519_v48  ;;  %v10268_v57 = vcombine.high %v516_v49, %v520_v50  ;;  %v527_v59 = vld [vmem:[%s15943_s3 + $0x560] sm:$0xff] }
  0xfd   :  { %v348_v3 = vmax.f32 %v290_v58, %v340_v61  ;;  %v523_v58 = vld [vmem:[%s15943_s3 + $0x540] sm:$0xff]  ;;  %v524_v61 = vld [vmem:[%s15943_s3 + $0x548] sm:$0xff]  ;;  %v10267_v1 = vcombine.low %v516_v49, %v520_v50  ;;  %v10284_v13 = vcombine.high %v532_v6, %v536_v8  ;;  %v10281_v18 = vcombine.low %v531_v4, %v535_v5 }
  0xfe   :  { %v12067_v7 = vpack.c.bf16 %v347_v0, %v343_v63  ;;  %v12113_v52 = vpack.c.bf16 %v349_v47, %v345_v35  ;;  %v528_v63 = vld [vmem:[%s15943_s3 + $0x568] sm:$0xff]  ;;  %v10265_v0 = vcombine.low %v515_v45, %v519_v48  ;;  %v10273_v10 = vcombine.low %v523_v58, %v527_v59  ;;  %v559_v31 = vld [vmem:[%s15943_s3 + $0x660] sm:$0xff] }
  0xff   :  { %v12070_v9 = vpack.c.bf16 %v348_v3, %v344_v2  ;;  %v10274_v2 = vcombine.high %v523_v58, %v527_v59  ;;  %v10276_v3 = vcombine.high %v524_v61, %v528_v63  ;;  %v10283_v19 = vcombine.low %v532_v6, %v536_v8  ;;  %v571_v49 = vld [vmem:[%s15943_s3 + $0x6c0] sm:$0xff]  ;;  %v588_v8 = vld [vmem:[%s15943_s3 + $0x748] sm:$0xff] }
 0x100   :  { %v10289_v26 = vcombine.low %v539_v14, %v543_v15  ;;  %v10291_v27 = vcombine.low %v540_v16, %v544_v17  ;;  %v10306_v36 = vcombine.high %v555_v30, %v559_v31  ;;  %v575_v50 = vld [vmem:[%s15943_s3 + $0x6e0] sm:$0xff] }
 0x101   :  { %1965 = vmatprep.mubr.bf16.mxu0 %v12070_v9  ;;  %2051 = vmatprep.mubr.bf16.mxu1 %v12070_v9  ;;  %v579_v59 = vld [vmem:[%s15943_s3 + $0x700] sm:$0xff] }
 0x102   :  { %1966 = vmatmul.mubr.bf16.vlgmr.msra.gmra.mrb[4].mxu0 %v12067_v7  ;;  %2052 = vmatmul.mubr.bf16.vlgmr.msra.gmra.mrb[4].mxu1 %v12067_v7  ;;  %v591_v6 = vld [vmem:[%s15943_s3 + $0x760] sm:$0xff] }
 0x103   :  { %1977 = vmatpush1.bf16.msra.mxu0 %v10233_v39  ;;  %2063 = vmatpush1.bf16.msra.mxu1 %v10235_v40  ;;  %v346_v39 = vmax.f32 %v329_v22, %v338_v33  ;;  %v342_v40 = vmul.f32 0.2, %v333_v34  ;;  %v547_v22 = vld [vmem:[%s15943_s3 + $0x600] sm:$0xff]  ;;  %v560_v33 = vld [vmem:[%s15943_s3 + $0x668] sm:$0xff] }
 0x104   :  { %1978 = vmatprep.subr.bf16.mxu0 %v10242_v11  ;;  %2064 = vmatprep.subr.bf16.mxu1 %v10244_v12  ;;  %v10275_v11 = vcombine.low %v524_v61, %v528_v63  ;;  %v10282_v12 = vcombine.high %v531_v4, %v535_v5  ;;  %v10298_v28 = vcombine.high %v547_v22, %v551_v23  ;;  %v583_v61 = vld [vmem:[%s15943_s3 + $0x720] sm:$0xff]  ;;  %v580_v63 = vld [vmem:[%s15943_s3 + $0x708] sm:$0xff] }
 0x105   :  { %v350_v51 = vmax.f32 %v333_v34, %v342_v40  ;;  %v10297_v34 = vcombine.low %v547_v22, %v551_v23  ;;  %v564_v40 = vld [vmem:[%s15943_s3 + $0x688] sm:$0xff]  ;;  %v10307_v45 = vcombine.low %v556_v32, %v560_v33  ;;  %v587_v5 = vld [vmem:[%s15943_s3 + $0x740] sm:$0xff] }
 0x106   :  { %v603_v23 = vld [vmem:[%s15943_s3 + $0x7c0] sm:$0xff] }
 0x107   :  { %1979 = vmatpush1.bf16.msra.mxu0 %v10241_v20  ;;  %2065 = vmatpush1.bf16.msra.mxu1 %v10243_v21  ;;  %v12115_v55 = vpack.c.bf16 %v350_v51, %v346_v39  ;;  %v10290_v20 = vcombine.high %v539_v14, %v543_v15  ;;  %v10292_v21 = vcombine.high %v540_v16, %v544_v17  ;;  %v567_v39 = vld [vmem:[%s15943_s3 + $0x6a0] sm:$0xff]  ;;  %v572_v51 = vld [vmem:[%s15943_s3 + $0x6c8] sm:$0xff] }
 0x108   :  { %1980 = vmatprep.subr.bf16.mxu0 %v10250_v24  ;;  %2066 = vmatprep.subr.bf16.mxu1 %v10252_v25  ;;  %v548_v24 = vld [vmem:[%s15943_s3 + $0x608] sm:$0xff]  ;;  %v595_v15 = vld [vmem:[%s15943_s3 + $0x780] sm:$0xff] }
 0x109   :  { %2008 = vmatprep.mubr.bf16.mxu0 %v12115_v55  ;;  %2094 = vmatprep.mubr.bf16.mxu1 %v12115_v55  ;;  %v552_v25 = vld [vmem:[%s15943_s3 + $0x628] sm:$0xff]  ;;  %v599_v16 = vld [vmem:[%s15943_s3 + $0x7a0] sm:$0xff] }
 0x10a   :  { %v10300_v29 = vcombine.high %v548_v24, %v552_v25  ;;  %v10299_v35 = vcombine.low %v548_v24, %v552_v25  ;;  %v596_v17 = vld [vmem:[%s15943_s3 + $0x788] sm:$0xff]  ;;  %v607_v24 = vld [vmem:[%s15943_s3 + $0x7e0] sm:$0xff] }
 0x10b   :  { %1981 = vmatpush1.bf16.msra.mxu0 %v10249_v37  ;;  %2067 = vmatpush1.bf16.msra.mxu1 %v10251_v38  ;;  %v10308_v37 = vcombine.high %v556_v32, %v560_v33  ;;  %v563_v38 = vld [vmem:[%s15943_s3 + $0x680] sm:$0xff]  ;;  %v604_v25 = vld [vmem:[%s15943_s3 + $0x7c8] sm:$0xff]  ;;  %v361_v32 = vld [vmem:[%s15943_s3 + $0x30] sm:$0xff] }
 0x10c   :  { %1982 = vmatprep.subr.bf16.mxu0 %v10258_v41  ;;  %2068 = vmatprep.subr.bf16.mxu1 %v10260_v42  ;;  %v568_v41 = vld [vmem:[%s15943_s3 + $0x6a8] sm:$0xff]  ;;  %v10305_v42 = vcombine.low %v555_v30, %v559_v31  ;;  %v10314_v47 = vcombine.high %v563_v38, %v567_v39  ;;  %v357_v31 = vld [vmem:[%s15943_s3 + $0x10] sm:$0xff]  ;;  %v358_v33 = vld [vmem:[%s15943_s3 + $0x18] sm:$0xff] }
 0x10d   :  { %v10316_v48 = vcombine.high %v564_v40, %v568_v41 }
 0x10f   :  { %1983 = vmatpush1.bf16.msra.mxu0 %v10257_v53  ;;  %2069 = vmatpush1.bf16.msra.mxu1 %v10259_v54  ;;  %v576_v53 = vld [vmem:[%s15943_s3 + $0x6e8] sm:$0xff]  ;;  %v10313_v54 = vcombine.low %v563_v38, %v567_v39  ;;  %v365_v39 = vld [vmem:[%s15943_s3 + $0x50] sm:$0xff] }
 0x110   :  { %1984 = vmatprep.subr.bf16.mxu0 %v10266_v56  ;;  %2070 = vmatprep.subr.bf16.mxu1 %v10268_v57  ;;  %v10315_v56 = vcombine.low %v564_v40, %v568_v41  ;;  %v10322_v57 = vcombine.high %v571_v49, %v575_v50  ;;  %v10324_v58 = vcombine.high %v572_v51, %v576_v53  ;;  %v369_v40 = vld [vmem:[%s15943_s3 + $0x70] sm:$0xff]  ;;  %v366_v41 = vld [vmem:[%s15943_s3 + $0x58] sm:$0xff] }
 0x113   :  { %1985 = vmatpush1.bf16.msra.mxu0 %v10265_v0  ;;  %2071 = vmatpush1.bf16.msra.mxu1 %v10267_v1  ;;  %v584_v0 = vld [vmem:[%s15943_s3 + $0x728] sm:$0xff]  ;;  %v10321_v1 = vcombine.low %v571_v49, %v575_v50  ;;  %v373_v50 = vld [vmem:[%s15943_s3 + $0x90] sm:$0xff] }
 0x114   :  { %1986 = vmatprep.subr.bf16.mxu0 %v10274_v2  ;;  %2072 = vmatprep.subr.bf16.mxu1 %v10276_v3  ;;  %v10323_v2 = vcombine.low %v572_v51, %v576_v53  ;;  %v10330_v3 = vcombine.high %v579_v59, %v583_v61  ;;  %v10332_v4 = vcombine.high %v580_v63, %v584_v0  ;;  %v377_v51 = vld [vmem:[%s15943_s3 + $0xb0] sm:$0xff]  ;;  %v374_v53 = vld [vmem:[%s15943_s3 + $0x98] sm:$0xff] }
 0x117   :  { %1987 = vmatpush1.bf16.msra.mxu0 %v10273_v10  ;;  %2073 = vmatpush1.bf16.msra.mxu1 %v10275_v11  ;;  %v592_v10 = vld [vmem:[%s15943_s3 + $0x768] sm:$0xff]  ;;  %v10329_v11 = vcombine.low %v579_v59, %v583_v61  ;;  %v381_v61 = vld [vmem:[%s15943_s3 + $0xd0] sm:$0xff] }
 0x118   :  { %1988 = vmatprep.subr.bf16.mxu0 %v10282_v12  ;;  %2074 = vmatprep.subr.bf16.mxu1 %v10284_v13  ;;  %v10331_v12 = vcombine.low %v580_v63, %v584_v0  ;;  %v10338_v13 = vcombine.high %v587_v5, %v591_v6  ;;  %v10340_v14 = vcombine.high %v588_v8, %v592_v10  ;;  %v385_v63 = vld [vmem:[%s15943_s3 + $0xf0] sm:$0xff]  ;;  %v382_v0 = vld [vmem:[%s15943_s3 + $0xd8] sm:$0xff] }
 0x11b   :  { %1989 = vmatpush1.bf16.msra.mxu0 %v10281_v18  ;;  %2075 = vmatpush1.bf16.msra.mxu1 %v10283_v19  ;;  %v600_v18 = vld [vmem:[%s15943_s3 + $0x7a8] sm:$0xff]  ;;  %v10337_v19 = vcombine.low %v587_v5, %v591_v6  ;;  %v389_v5 = vld [vmem:[%s15943_s3 + $0x110] sm:$0xff] }
 0x11c   :  { %1990 = vmatprep.subr.bf16.mxu0 %v10290_v20  ;;  %2076 = vmatprep.subr.bf16.mxu1 %v10292_v21  ;;  %v10339_v20 = vcombine.low %v588_v8, %v592_v10  ;;  %v10346_v21 = vcombine.high %v595_v15, %v599_v16  ;;  %v10348_v22 = vcombine.high %v596_v17, %v600_v18  ;;  %v393_v6 = vld [vmem:[%s15943_s3 + $0x130] sm:$0xff]  ;;  %v390_v8 = vld [vmem:[%s15943_s3 + $0x118] sm:$0xff] }
 0x11d   :  { %v394_v10 = vld [vmem:[%s15943_s3 + $0x138] sm:$0xff] }
 0x11f   :  { %1991 = vmatpush1.bf16.msra.mxu0 %v10289_v26  ;;  %2077 = vmatpush1.bf16.msra.mxu1 %v10291_v27  ;;  %v608_v26 = vld [vmem:[%s15943_s3 + $0x7e8] sm:$0xff]  ;;  %v10345_v27 = vcombine.low %v595_v15, %v599_v16  ;;  %v397_v15 = vld [vmem:[%s15943_s3 + $0x150] sm:$0xff] }
 0x120   :  { %1992 = vmatprep.subr.bf16.mxu0 %v10298_v28  ;;  %2078 = vmatprep.subr.bf16.mxu1 %v10300_v29  ;;  %v10347_v28 = vcombine.low %v596_v17, %v600_v18  ;;  %v10354_v29 = vcombine.high %v603_v23, %v607_v24  ;;  %v10356_v30 = vcombine.high %v604_v25, %v608_v26  ;;  %v401_v16 = vld [vmem:[%s15943_s3 + $0x170] sm:$0xff]  ;;  %v398_v17 = vld [vmem:[%s15943_s3 + $0x158] sm:$0xff] }
 0x121   :  { %v402_v18 = vld [vmem:[%s15943_s3 + $0x178] sm:$0xff] }
 0x123   :  { %1993 = vmatpush1.bf16.msra.mxu0 %v10297_v34  ;;  %2079 = vmatpush1.bf16.msra.mxu1 %v10299_v35  ;;  %v362_v34 = vld [vmem:[%s15943_s3 + $0x38] sm:$0xff]  ;;  %v10353_v35 = vcombine.low %v603_v23, %v607_v24  ;;  %v405_v23 = vld [vmem:[%s15943_s3 + $0x190] sm:$0xff] }
 0x124   :  { %1994 = vmatprep.subr.bf16.mxu0 %v10306_v36  ;;  %2080 = vmatprep.subr.bf16.mxu1 %v10308_v37  ;;  %v10355_v36 = vcombine.low %v604_v25, %v608_v26  ;;  %v10110_v37 = vcombine.high %v357_v31, %v361_v32  ;;  %v10112_v38 = vcombine.high %v358_v33, %v362_v34  ;;  %v409_v24 = vld [vmem:[%s15943_s3 + $0x1b0] sm:$0xff]  ;;  %v406_v25 = vld [vmem:[%s15943_s3 + $0x198] sm:$0xff] }
 0x125   :  { %v410_v26 = vld [vmem:[%s15943_s3 + $0x1b8] sm:$0xff] }
 0x127   :  { %1995 = vmatpush1.bf16.msra.mxu0 %v10305_v42  ;;  %2081 = vmatpush1.bf16.msra.mxu1 %v10307_v45  ;;  %v370_v42 = vld [vmem:[%s15943_s3 + $0x78] sm:$0xff]  ;;  %v10109_v45 = vcombine.low %v357_v31, %v361_v32  ;;  %v413_v31 = vld [vmem:[%s15943_s3 + $0x1d0] sm:$0xff] }
 0x128   :  { %1996 = vmatprep.subr.bf16.mxu0 %v10314_v47  ;;  %2082 = vmatprep.subr.bf16.mxu1 %v10316_v48  ;;  %v10111_v47 = vcombine.low %v358_v33, %v362_v34  ;;  %v10118_v48 = vcombine.high %v365_v39, %v369_v40  ;;  %v10120_v49 = vcombine.high %v366_v41, %v370_v42  ;;  %v417_v32 = vld [vmem:[%s15943_s3 + $0x1f0] sm:$0xff]  ;;  %v414_v33 = vld [vmem:[%s15943_s3 + $0x1d8] sm:$0xff] }
 0x129   :  { %v418_v34 = vld [vmem:[%s15943_s3 + $0x1f8] sm:$0xff] }
 0x12b   :  { %1997 = vmatpush1.bf16.msra.mxu0 %v10313_v54  ;;  %2083 = vmatpush1.bf16.msra.mxu1 %v10315_v56  ;;  %v378_v54 = vld [vmem:[%s15943_s3 + $0xb8] sm:$0xff]  ;;  %v10117_v56 = vcombine.low %v365_v39, %v369_v40  ;;  %v421_v39 = vld [vmem:[%s15943_s3 + $0x210] sm:$0xff] }
 0x12c   :  { %1998 = vmatprep.subr.bf16.mxu0 %v10322_v57  ;;  %2084 = vmatprep.subr.bf16.mxu1 %v10324_v58  ;;  %v10119_v57 = vcombine.low %v366_v41, %v370_v42  ;;  %v10126_v58 = vcombine.high %v373_v50, %v377_v51  ;;  %v10128_v59 = vcombine.high %v374_v53, %v378_v54  ;;  %v425_v40 = vld [vmem:[%s15943_s3 + $0x230] sm:$0xff]  ;;  %v422_v41 = vld [vmem:[%s15943_s3 + $0x218] sm:$0xff] }
 0x12d   :  { %v426_v42 = vld [vmem:[%s15943_s3 + $0x238] sm:$0xff] }
 0x12f   :  { %1999 = vmatpush1.bf16.msra.mxu0 %v10321_v1  ;;  %2085 = vmatpush1.bf16.msra.mxu1 %v10323_v2  ;;  %v10125_v1 = vcombine.low %v373_v50, %v377_v51  ;;  %v10127_v2 = vcombine.low %v374_v53, %v378_v54  ;;  %v429_v50 = vld [vmem:[%s15943_s3 + $0x250] sm:$0xff]  ;;  %v430_v53 = vld [vmem:[%s15943_s3 + $0x258] sm:$0xff] }
 0x130   :  { %2000 = vmatprep.subr.bf16.mxu0 %v10330_v3  ;;  %2086 = vmatprep.subr.bf16.mxu1 %v10332_v4  ;;  %v10134_v3 = vcombine.high %v381_v61, %v385_v63  ;;  %v433_v51 = vld [vmem:[%s15943_s3 + $0x270] sm:$0xff]  ;;  %v434_v54 = vld [vmem:[%s15943_s3 + $0x278] sm:$0xff] }
 0x133   :  { %2001 = vmatpush1.bf16.msra.mxu0 %v10329_v11  ;;  %2087 = vmatpush1.bf16.msra.mxu1 %v10331_v12  ;;  %v10133_v11 = vcombine.low %v381_v61, %v385_v63  ;;  %v437_v61 = vld [vmem:[%s15943_s3 + $0x290] sm:$0xff] }
 0x134   :  { %2002 = vmatprep.subr.bf16.mxu0 %v10338_v13  ;;  %2088 = vmatprep.subr.bf16.mxu1 %v10340_v14  ;;  %v10142_v13 = vcombine.high %v389_v5, %v393_v6  ;;  %v10144_v14 = vcombine.high %v390_v8, %v394_v10  ;;  %v441_v63 = vld [vmem:[%s15943_s3 + $0x2b0] sm:$0xff] }
 0x137   :  { %2003 = vmatpush1.bf16.msra.mxu0 %v10337_v19  ;;  %2089 = vmatpush1.bf16.msra.mxu1 %v10339_v20  ;;  %v10141_v19 = vcombine.low %v389_v5, %v393_v6  ;;  %v10143_v20 = vcombine.low %v390_v8, %v394_v10  ;;  %v445_v5 = vld [vmem:[%s15943_s3 + $0x2d0] sm:$0xff]  ;;  %v446_v8 = vld [vmem:[%s15943_s3 + $0x2d8] sm:$0xff] }
 0x138   :  { %2004 = vmatprep.subr.bf16.mxu0 %v10346_v21  ;;  %2090 = vmatprep.subr.bf16.mxu1 %v10348_v22  ;;  %v10150_v21 = vcombine.high %v397_v15, %v401_v16  ;;  %v10152_v22 = vcombine.high %v398_v17, %v402_v18  ;;  %v449_v6 = vld [vmem:[%s15943_s3 + $0x2f0] sm:$0xff]  ;;  %v450_v10 = vld [vmem:[%s15943_s3 + $0x2f8] sm:$0xff] }
 0x13b   :  { %2005 = vmatpush1.bf16.msra.mxu0 %v10345_v27  ;;  %2091 = vmatpush1.bf16.msra.mxu1 %v10347_v28  ;;  %v10149_v27 = vcombine.low %v397_v15, %v401_v16  ;;  %v10151_v28 = vcombine.low %v398_v17, %v402_v18  ;;  %v453_v15 = vld [vmem:[%s15943_s3 + $0x310] sm:$0xff]  ;;  %v454_v17 = vld [vmem:[%s15943_s3 + $0x318] sm:$0xff] }
 0x13c   :  { %2006 = vmatprep.subr.bf16.mxu0 %v10354_v29  ;;  %2092 = vmatprep.subr.bf16.mxu1 %v10356_v30  ;;  %v10158_v29 = vcombine.high %v405_v23, %v409_v24  ;;  %v10160_v30 = vcombine.high %v406_v25, %v410_v26  ;;  %v457_v16 = vld [vmem:[%s15943_s3 + $0x330] sm:$0xff]  ;;  %v458_v18 = vld [vmem:[%s15943_s3 + $0x338] sm:$0xff] }
 0x13f   :  { %2007 = vmatpush1.bf16.msra.mxu0 %v10353_v35  ;;  %2093 = vmatpush1.bf16.msra.mxu1 %v10355_v36  ;;  %v10157_v35 = vcombine.low %v405_v23, %v409_v24  ;;  %v10159_v36 = vcombine.low %v406_v25, %v410_v26  ;;  %v461_v23 = vld [vmem:[%s15943_s3 + $0x350] sm:$0xff]  ;;  %v462_v25 = vld [vmem:[%s15943_s3 + $0x358] sm:$0xff] }
 0x140   :  { %2105 = vmatprep.subr.bf16.mxu0 %v10110_v37  ;;  %2191 = vmatprep.subr.bf16.mxu1 %v10112_v38  ;;  %v10166_v37 = vcombine.high %v413_v31, %v417_v32  ;;  %v10168_v38 = vcombine.high %v414_v33, %v418_v34  ;;  %v465_v24 = vld [vmem:[%s15943_s3 + $0x370] sm:$0xff]  ;;  %v466_v26 = vld [vmem:[%s15943_s3 + $0x378] sm:$0xff] }
 0x142   :  { %2009 = vmatmul.mubr.bf16.vlgmr.msra.gmra.mrb[4].mxu0 %v12113_v52  ;;  %2095 = vmatmul.mubr.bf16.vlgmr.msra.gmra.mrb[4].mxu1 %v12113_v52 }
 0x143   :  { %2106 = vmatpush1.bf16.msra.mxu0 %v10109_v45  ;;  %2137 = vmatprep.mubr.bf16.mxu0 %v12070_v9  ;;  %v10165_v45 = vcombine.low %v413_v31, %v417_v32  ;;  %v469_v31 = vld [vmem:[%s15943_s3 + $0x390] sm:$0xff] }
 0x144   :  { %2192 = vmatpush1.bf16.msra.mxu1 %v10111_v47  ;;  %2223 = vmatprep.mubr.bf16.mxu1 %v12070_v9  ;;  %v386_v9 = vld [vmem:[%s15943_s3 + $0xf8] sm:$0xff]  ;;  %v10167_v47 = vcombine.low %v414_v33, %v418_v34  ;;  %v473_v32 = vld [vmem:[%s15943_s3 + $0x3b0] sm:$0xff] }
 0x145   :  { %2107 = vmatprep.subr.bf16.mxu0 %v10118_v48  ;;  %2193 = vmatprep.subr.bf16.mxu1 %v10120_v49  ;;  %v10136_v4 = vcombine.high %v382_v0, %v386_v9  ;;  %v10135_v12 = vcombine.low %v382_v0, %v386_v9  ;;  %v10174_v48 = vcombine.high %v421_v39, %v425_v40  ;;  %v438_v0 = vld [vmem:[%s15943_s3 + $0x298] sm:$0xff] }
 0x146   :  { %v10176_v49 = vcombine.high %v422_v41, %v426_v42  ;;  %v442_v9 = vld [vmem:[%s15943_s3 + $0x2b8] sm:$0xff] }
 0x147   :  { %2108 = vmatpush1.bf16.msra.mxu0 %v10117_v56  ;;  %v10173_v56 = vcombine.low %v421_v39, %v425_v40  ;;  %v470_v33 = vld [vmem:[%s15943_s3 + $0x398] sm:$0xff]  ;;  %v477_v39 = vld [vmem:[%s15943_s3 + $0x3d0] sm:$0xff] }
 0x148   :  { %2194 = vmatpush1.bf16.msra.mxu1 %v10119_v57  ;;  %2109 = vmatprep.subr.bf16.mxu0 %v10126_v58  ;;  %v10175_v57 = vcombine.low %v422_v41, %v426_v42  ;;  %v10182_v58 = vcombine.high %v429_v50, %v433_v51  ;;  %v474_v34 = vld [vmem:[%s15943_s3 + $0x3b8] sm:$0xff]  ;;  %v481_v40 = vld [vmem:[%s15943_s3 + $0x3f0] sm:$0xff] }
 0x149   :  { %2195 = vmatprep.subr.bf16.mxu1 %v10128_v59  ;;  %v10184_v59 = vcombine.high %v430_v53, %v434_v54  ;;  %v478_v41 = vld [vmem:[%s15943_s3 + $0x3d8] sm:$0xff] }
 0x14a   :  { %v482_v42 = vld [vmem:[%s15943_s3 + $0x3f8] sm:$0xff] }
 0x14b   :  { %2110 = vmatpush1.bf16.msra.mxu0 %v10125_v1  ;;  %v10181_v1 = vcombine.low %v429_v50, %v433_v51  ;;  %v485_v50 = vld [vmem:[%s15943_s3 + $0x410] sm:$0xff] }
 0x14c   :  { %2196 = vmatpush1.bf16.msra.mxu1 %v10127_v2  ;;  %2111 = vmatprep.subr.bf16.mxu0 %v10134_v3  ;;  %v10183_v2 = vcombine.low %v430_v53, %v434_v54  ;;  %v10190_v3 = vcombine.high %v437_v61, %v441_v63  ;;  %v489_v51 = vld [vmem:[%s15943_s3 + $0x430] sm:$0xff]  ;;  %v486_v53 = vld [vmem:[%s15943_s3 + $0x418] sm:$0xff] }
 0x14d   :  { %2197 = vmatprep.subr.bf16.mxu1 %v10136_v4  ;;  %v10192_v4 = vcombine.high %v438_v0, %v442_v9  ;;  %v490_v54 = vld [vmem:[%s15943_s3 + $0x438] sm:$0xff] }
 0x14f   :  { %2112 = vmatpush1.bf16.msra.mxu0 %v10133_v11  ;;  %v10189_v11 = vcombine.low %v437_v61, %v441_v63  ;;  %v493_v61 = vld [vmem:[%s15943_s3 + $0x450] sm:$0xff] }
 0x150   :  { %2198 = vmatpush1.bf16.msra.mxu1 %v10135_v12  ;;  %2113 = vmatprep.subr.bf16.mxu0 %v10142_v13  ;;  %v10191_v12 = vcombine.low %v438_v0, %v442_v9  ;;  %v10198_v13 = vcombine.high %v445_v5, %v449_v6  ;;  %v497_v63 = vld [vmem:[%s15943_s3 + $0x470] sm:$0xff]  ;;  %v10237_v0 = vcombine.low %v485_v50, %v489_v51  ;;  %v494_v9 = vld [vmem:[%s15943_s3 + $0x458] sm:$0xff] }
 0x151   :  { %2199 = vmatprep.subr.bf16.mxu1 %v10144_v14  ;;  %v10200_v14 = vcombine.high %v446_v8, %v450_v10 }
 0x153   :  { %2114 = vmatpush1.bf16.msra.mxu0 %v10141_v19  ;;  %v10197_v19 = vcombine.low %v445_v5, %v449_v6  ;;  %v505_v5 = vld [vmem:[%s15943_s3 + $0x4b0] sm:$0xff] }
 0x154   :  { %2200 = vmatpush1.bf16.msra.mxu1 %v10143_v20  ;;  %2115 = vmatprep.subr.bf16.mxu0 %v10150_v21  ;;  %v10199_v20 = vcombine.low %v446_v8, %v450_v10  ;;  %v10206_v21 = vcombine.high %v453_v15, %v457_v16  ;;  %v502_v8 = vld [vmem:[%s15943_s3 + $0x498] sm:$0xff] }
 0x155   :  { %2201 = vmatprep.subr.bf16.mxu1 %v10152_v22  ;;  %v10208_v22 = vcombine.high %v454_v17, %v458_v18  ;;  %v506_v10 = vld [vmem:[%s15943_s3 + $0x4b8] sm:$0xff] }
 0x157   :  { %2116 = vmatpush1.bf16.msra.mxu0 %v10149_v27  ;;  %v10205_v27 = vcombine.low %v453_v15, %v457_v16  ;;  %v509_v15 = vld [vmem:[%s15943_s3 + $0x4d0] sm:$0xff] }
 0x158   :  { %2202 = vmatpush1.bf16.msra.mxu1 %v10151_v28  ;;  %2117 = vmatprep.subr.bf16.mxu0 %v10158_v29  ;;  %v10207_v28 = vcombine.low %v454_v17, %v458_v18  ;;  %v10214_v29 = vcombine.high %v461_v23, %v465_v24  ;;  %v513_v16 = vld [vmem:[%s15943_s3 + $0x4f0] sm:$0xff]  ;;  %v514_v17 = vld [vmem:[%s15943_s3 + $0x4f8] sm:$0xff]  ;;  %v10255_v18 = vcombine.low %v502_v8, %v506_v10 }
 0x159   :  { %2203 = vmatprep.subr.bf16.mxu1 %v10160_v30  ;;  %v10216_v30 = vcombine.high %v462_v25, %v466_v26 }
 0x15b   :  { %2118 = vmatpush1.bf16.msra.mxu0 %v10157_v35  ;;  %v10213_v35 = vcombine.low %v461_v23, %v465_v24  ;;  %v518_v23 = vld [vmem:[%s15943_s3 + $0x518] sm:$0xff] }
 0x15c   :  { %2204 = vmatpush1.bf16.msra.mxu1 %v10159_v36  ;;  %2119 = vmatprep.subr.bf16.mxu0 %v10166_v37  ;;  %v10215_v36 = vcombine.low %v462_v25, %v466_v26  ;;  %v10222_v37 = vcombine.high %v469_v31, %v473_v32  ;;  %v522_v24 = vld [vmem:[%s15943_s3 + $0x538] sm:$0xff]  ;;  %v10261_v25 = vcombine.low %v509_v15, %v513_v16 }
 0x15d   :  { %2205 = vmatprep.subr.bf16.mxu1 %v10168_v38  ;;  %v10224_v38 = vcombine.high %v470_v33, %v474_v34 }
 0x15f   :  { %2120 = vmatpush1.bf16.msra.mxu0 %v10165_v45  ;;  %v10221_v45 = vcombine.low %v469_v31, %v473_v32  ;;  %v526_v31 = vld [vmem:[%s15943_s3 + $0x558] sm:$0xff] }
 0x160   :  { %2206 = vmatpush1.bf16.msra.mxu1 %v10167_v47  ;;  %2121 = vmatprep.subr.bf16.mxu0 %v10174_v48  ;;  %v10223_v47 = vcombine.low %v470_v33, %v474_v34  ;;  %v10230_v48 = vcombine.high %v477_v39, %v481_v40  ;;  %v530_v32 = vld [vmem:[%s15943_s3 + $0x578] sm:$0xff]  ;;  %v10271_v34 = vcombine.low %v518_v23, %v522_v24 }
 0x161   :  { %2207 = vmatprep.subr.bf16.mxu1 %v10176_v49  ;;  %v10232_v49 = vcombine.high %v478_v41, %v482_v42 }
 0x163   :  { %2122 = vmatpush1.bf16.msra.mxu0 %v10173_v56  ;;  %v10229_v56 = vcombine.low %v477_v39, %v481_v40  ;;  %v534_v39 = vld [vmem:[%s15943_s3 + $0x598] sm:$0xff] }
 0x164   :  { %2208 = vmatpush1.bf16.msra.mxu1 %v10175_v57  ;;  %2123 = vmatprep.subr.bf16.mxu0 %v10182_v58  ;;  %v10231_v57 = vcombine.low %v478_v41, %v482_v42  ;;  %v10238_v58 = vcombine.high %v485_v50, %v489_v51  ;;  %v538_v40 = vld [vmem:[%s15943_s3 + $0x5b8] sm:$0xff]  ;;  %v10279_v42 = vcombine.low %v526_v31, %v530_v32 }
 0x165   :  { %2209 = vmatprep.subr.bf16.mxu1 %v10184_v59  ;;  %v10240_v59 = vcombine.high %v486_v53, %v490_v54  ;;  %v542_v50 = vld [vmem:[%s15943_s3 + $0x5d8] sm:$0xff] }
 0x166   :  { %v546_v51 = vld [vmem:[%s15943_s3 + $0x5f8] sm:$0xff] }
 0x167   :  { %2124 = vmatpush1.bf16.msra.mxu0 %v10181_v1  ;;  %v498_v1 = vld [vmem:[%s15943_s3 + $0x478] sm:$0xff] }
 0x168   :  { %2210 = vmatpush1.bf16.msra.mxu1 %v10183_v2  ;;  %2125 = vmatprep.subr.bf16.mxu0 %v10190_v3  ;;  %v10239_v2 = vcombine.low %v486_v53, %v490_v54  ;;  %v10246_v3 = vcombine.high %v493_v61, %v497_v63  ;;  %v10248_v6 = vcombine.high %v494_v9, %v498_v1 }
 0x169   :  { %2211 = vmatprep.subr.bf16.mxu1 %v10192_v4  ;;  %v501_v4 = vld [vmem:[%s15943_s3 + $0x490] sm:$0xff]  ;;  %v10287_v54 = vcombine.low %v534_v39, %v538_v40 }
 0x16b   :  { %2126 = vmatpush1.bf16.msra.mxu0 %v10189_v11  ;;  %v10245_v11 = vcombine.low %v493_v61, %v497_v63  ;;  %v550_v61 = vld [vmem:[%s15943_s3 + $0x618] sm:$0xff] }
 0x16c   :  { %2212 = vmatpush1.bf16.msra.mxu1 %v10191_v12  ;;  %2127 = vmatprep.subr.bf16.mxu0 %v10198_v13  ;;  %v10247_v12 = vcombine.low %v494_v9, %v498_v1  ;;  %v10254_v13 = vcombine.high %v501_v4, %v505_v5  ;;  %v554_v63 = vld [vmem:[%s15943_s3 + $0x638] sm:$0xff]  ;;  %v10295_v9 = vcombine.low %v542_v50, %v546_v51 }
 0x16d   :  { %2213 = vmatprep.subr.bf16.mxu1 %v10200_v14  ;;  %v10256_v14 = vcombine.high %v502_v8, %v506_v10  ;;  %v10303_v10 = vcombine.low %v550_v61, %v554_v63 }
 0x16f   :  { %2128 = vmatpush1.bf16.msra.mxu0 %v10197_v19  ;;  %v10262_v19 = vcombine.high %v509_v15, %v513_v16  ;;  %v566_v15 = vld [vmem:[%s15943_s3 + $0x698] sm:$0xff] }
 0x170   :  { %2214 = vmatpush1.bf16.msra.mxu1 %v10199_v20  ;;  %2129 = vmatprep.subr.bf16.mxu0 %v10206_v21  ;;  %v517_v21 = vld [vmem:[%s15943_s3 + $0x510] sm:$0xff]  ;;  %v570_v16 = vld [vmem:[%s15943_s3 + $0x6b8] sm:$0xff] }
 0x171   :  { %2215 = vmatprep.subr.bf16.mxu1 %v10208_v22  ;;  %v521_v22 = vld [vmem:[%s15943_s3 + $0x530] sm:$0xff] }
 0x172   :  { %v10269_v33 = vcombine.low %v517_v21, %v521_v22 }
 0x173   :  { %2130 = vmatpush1.bf16.msra.mxu0 %v10205_v27  ;;  %v10270_v27 = vcombine.high %v517_v21, %v521_v22  ;;  %v574_v21 = vld [vmem:[%s15943_s3 + $0x6d8] sm:$0xff] }
 0x174   :  { %2216 = vmatpush1.bf16.msra.mxu1 %v10207_v28  ;;  %2131 = vmatprep.subr.bf16.mxu0 %v10214_v29  ;;  %v10272_v28 = vcombine.high %v518_v23, %v522_v24  ;;  %v525_v29 = vld [vmem:[%s15943_s3 + $0x550] sm:$0xff]  ;;  %v578_v22 = vld [vmem:[%s15943_s3 + $0x6f8] sm:$0xff]  ;;  %v10319_v24 = vcombine.low %v566_v15, %v570_v16 }
 0x175   :  { %2217 = vmatprep.subr.bf16.mxu1 %v10216_v30  ;;  %v529_v30 = vld [vmem:[%s15943_s3 + $0x570] sm:$0xff] }
 0x176   :  { %v10277_v41 = vcombine.low %v525_v29, %v529_v30 }
 0x177   :  { %2132 = vmatpush1.bf16.msra.mxu0 %v10213_v35  ;;  %v10278_v35 = vcombine.high %v525_v29, %v529_v30  ;;  %v582_v29 = vld [vmem:[%s15943_s3 + $0x718] sm:$0xff] }
 0x178   :  { %2218 = vmatpush1.bf16.msra.mxu1 %v10215_v36  ;;  %2133 = vmatprep.subr.bf16.mxu0 %v10222_v37  ;;  %v10280_v36 = vcombine.high %v526_v31, %v530_v32  ;;  %v533_v37 = vld [vmem:[%s15943_s3 + $0x590] sm:$0xff]  ;;  %v586_v30 = vld [vmem:[%s15943_s3 + $0x738] sm:$0xff]  ;;  %v10327_v32 = vcombine.low %v574_v21, %v578_v22 }
 0x179   :  { %2219 = vmatprep.subr.bf16.mxu1 %v10224_v38  ;;  %v537_v38 = vld [vmem:[%s15943_s3 + $0x5b0] sm:$0xff] }
 0x17a   :  { %v10285_v53 = vcombine.low %v533_v37, %v537_v38 }
 0x17b   :  { %2134 = vmatpush1.bf16.msra.mxu0 %v10221_v45  ;;  %v10286_v45 = vcombine.high %v533_v37, %v537_v38  ;;  %v590_v37 = vld [vmem:[%s15943_s3 + $0x758] sm:$0xff] }
 0x17c   :  { %2220 = vmatpush1.bf16.msra.mxu1 %v10223_v47  ;;  %2135 = vmatprep.subr.bf16.mxu0 %v10230_v48  ;;  %v10288_v47 = vcombine.high %v534_v39, %v538_v40  ;;  %v541_v48 = vld [vmem:[%s15943_s3 + $0x5d0] sm:$0xff]  ;;  %v594_v38 = vld [vmem:[%s15943_s3 + $0x778] sm:$0xff]  ;;  %v10335_v40 = vcombine.low %v582_v29, %v586_v30 }
 0x17d   :  { %2221 = vmatprep.subr.bf16.mxu1 %v10232_v49  ;;  %v545_v49 = vld [vmem:[%s15943_s3 + $0x5f0] sm:$0xff] }
 0x17f   :  { %2136 = vmatpush1.bf16.msra.mxu0 %v10229_v56  ;;  %v10294_v56 = vcombine.high %v541_v48, %v545_v49 }
 0x180   :  { %2222 = vmatpush1.bf16.msra.mxu1 %v10231_v57  ;;  %2148 = vmatprep.subr.bf16.mxu0 %v10238_v58  ;;  %v10296_v57 = vcombine.high %v542_v50, %v546_v51  ;;  %v549_v58 = vld [vmem:[%s15943_s3 + $0x610] sm:$0xff]  ;;  %v10343_v51 = vcombine.low %v590_v37, %v594_v38 }
 0x181   :  { %2234 = vmatprep.subr.bf16.mxu1 %v10240_v59  ;;  %v553_v59 = vld [vmem:[%s15943_s3 + $0x630] sm:$0xff] }
 0x182   :  { %2138 = vmatmul.mubr.bf16.vlgmr.msra.gmra.mrb[8].mxu0 %v12067_v7  ;;  %v10302_v1 = vcombine.high %v549_v58, %v553_v59  ;;  %v10301_v8 = vcombine.low %v549_v58, %v553_v59  ;;  %v606_v58 = vld [vmem:[%s15943_s3 + $0x7d8] sm:$0xff] }
 0x183   :  { %2224 = vmatmul.mubr.bf16.vlgmr.msra.gmra.mrb[8].mxu1 %v12067_v7  ;;  %2149 = vmatpush1.bf16.msra.mxu0 %v10237_v0  ;;  %v510_v7 = vld [vmem:[%s15943_s3 + $0x4d8] sm:$0xff]  ;;  %v10293_v0 = vcombine.low %v541_v48, %v545_v49 }
 0x184   :  { %2180 = vmatprep.mubr.bf16.mxu0 %v12115_v55  ;;  %2235 = vmatpush1.bf16.msra.mxu1 %v10239_v2  ;;  %v10264_v20 = vcombine.high %v510_v7, %v514_v17  ;;  %v10263_v26 = vcombine.low %v510_v7, %v514_v17  ;;  %v10304_v2 = vcombine.high %v550_v61, %v554_v63  ;;  %v598_v48 = vld [vmem:[%s15943_s3 + $0x798] sm:$0xff] }
 0x185   :  { %2266 = vmatprep.mubr.bf16.mxu1 %v12115_v55  ;;  %2150 = vmatprep.subr.bf16.mxu0 %v10246_v3  ;;  %v10253_v55 = vcombine.low %v501_v4, %v505_v5  ;;  %v557_v3 = vld [vmem:[%s15943_s3 + $0x650] sm:$0xff]  ;;  %v558_v5 = vld [vmem:[%s15943_s3 + $0x658] sm:$0xff] }
 0x186   :  { %2236 = vmatprep.subr.bf16.mxu1 %v10248_v6  ;;  %v561_v4 = vld [vmem:[%s15943_s3 + $0x670] sm:$0xff]  ;;  %v562_v6 = vld [vmem:[%s15943_s3 + $0x678] sm:$0xff] }
 0x187   :  { %2151 = vmatpush1.bf16.msra.mxu0 %v10245_v11  ;;  %v10310_v11 = vcombine.high %v557_v3, %v561_v4  ;;  %v10309_v7 = vcombine.low %v557_v3, %v561_v4  ;;  %v10311_v17 = vcombine.low %v558_v5, %v562_v6  ;;  %v602_v49 = vld [vmem:[%s15943_s3 + $0x7b8] sm:$0xff]  ;;  %v2318_v3 = vld [vmem:[%s15945_s5 + $0x8] sm:$0xff] }
 0x188   :  { %2237 = vmatpush1.bf16.msra.mxu1 %v10247_v12  ;;  %2152 = vmatprep.subr.bf16.mxu0 %v10254_v13  ;;  %v10312_v12 = vcombine.high %v558_v5, %v562_v6  ;;  %v565_v13 = vld [vmem:[%s15943_s3 + $0x690] sm:$0xff]  ;;  %v610_v59 = vld [vmem:[%s15943_s3 + $0x7f8] sm:$0xff]  ;;  %v10351_v63 = vcombine.low %v598_v48, %v602_v49  ;;  %v2326_v4 = vld [vmem:[%s15945_s5 + $0x48] sm:$0xff] }
 0x189   :  { %2238 = vmatprep.subr.bf16.mxu1 %v10256_v14  ;;  %v569_v14 = vld [vmem:[%s15943_s3 + $0x6b0] sm:$0xff]  ;;  %v10359_v6 = vcombine.low %v606_v58, %v610_v59 }
 0x18a   :  { %v10317_v23 = vcombine.low %v565_v13, %v569_v14 }
 0x18b   :  { %2153 = vmatpush1.bf16.msra.mxu0 %v10253_v55  ;;  %v10318_v55 = vcombine.high %v565_v13, %v569_v14  ;;  %v2334_v13 = vld [vmem:[%s15945_s5 + $0x88] sm:$0xff] }
 0x18c   :  { %2239 = vmatpush1.bf16.msra.mxu1 %v10255_v18  ;;  %2154 = vmatprep.subr.bf16.mxu0 %v10262_v19  ;;  %v10320_v18 = vcombine.high %v566_v15, %v570_v16  ;;  %v573_v19 = vld [vmem:[%s15943_s3 + $0x6d0] sm:$0xff]  ;;  %v2342_v14 = vld [vmem:[%s15945_s5 + $0xc8] sm:$0xff]  ;;  %v10363_v16 = vcombine.low %v2318_v3, %v2326_v4 }
 0x18d   :  { %2240 = vmatprep.subr.bf16.mxu1 %v10264_v20  ;;  %v577_v20 = vld [vmem:[%s15943_s3 + $0x6f0] sm:$0xff] }
 0x18e   :  { %v10325_v31 = vcombine.low %v573_v19, %v577_v20 }
 0x18f   :  { %2155 = vmatpush1.bf16.msra.mxu0 %v10261_v25  ;;  %v10326_v25 = vcombine.high %v573_v19, %v577_v20  ;;  %v2350_v19 = vld [vmem:[%s15945_s5 + $0x108] sm:$0xff] }
 0x190   :  { %2241 = vmatpush1.bf16.msra.mxu1 %v10263_v26  ;;  %2156 = vmatprep.subr.bf16.mxu0 %v10270_v27  ;;  %v10328_v26 = vcombine.high %v574_v21, %v578_v22  ;;  %v581_v27 = vld [vmem:[%s15943_s3 + $0x710] sm:$0xff]  ;;  %v2358_v20 = vld [vmem:[%s15945_s5 + $0x148] sm:$0xff]  ;;  %v10379_v22 = vcombine.low %v2334_v13, %v2342_v14 }
 0x191   :  { %2242 = vmatprep.subr.bf16.mxu1 %v10272_v28  ;;  %v585_v28 = vld [vmem:[%s15943_s3 + $0x730] sm:$0xff] }
 0x192   :  { %v10333_v39 = vcombine.low %v581_v27, %v585_v28 }
 0x193   :  { %2157 = vmatpush1.bf16.msra.mxu0 %v10269_v33  ;;  %v10334_v33 = vcombine.high %v581_v27, %v585_v28  ;;  %v2374_v27 = vld [vmem:[%s15945_s5 + $0x1c8] sm:$0xff] }
 0x194   :  { %2243 = vmatpush1.bf16.msra.mxu1 %v10271_v34  ;;  %2158 = vmatprep.subr.bf16.mxu0 %v10278_v35  ;;  %v10336_v34 = vcombine.high %v582_v29, %v586_v30  ;;  %v589_v35 = vld [vmem:[%s15943_s3 + $0x750] sm:$0xff]  ;;  %v10395_v29 = vcombine.low %v2350_v19, %v2358_v20 }
 0x195   :  { %2244 = vmatprep.subr.bf16.mxu1 %v10280_v36  ;;  %v593_v36 = vld [vmem:[%s15943_s3 + $0x770] sm:$0xff] }
 0x196   :  { %v10341_v50 = vcombine.low %v589_v35, %v593_v36 }
 0x197   :  { %2159 = vmatpush1.bf16.msra.mxu0 %v10277_v41  ;;  %v10342_v41 = vcombine.high %v589_v35, %v593_v36  ;;  %v2390_v35 = vld [vmem:[%s15945_s5 + $0x248] sm:$0xff] }
 0x198   :  { %2245 = vmatpush1.bf16.msra.mxu1 %v10279_v42  ;;  %2160 = vmatprep.subr.bf16.mxu0 %v10286_v45  ;;  %v10344_v42 = vcombine.high %v590_v37, %v594_v38  ;;  %v597_v45 = vld [vmem:[%s15943_s3 + $0x790] sm:$0xff] }
 0x199   :  { %2246 = vmatprep.subr.bf16.mxu1 %v10288_v47  ;;  %v601_v47 = vld [vmem:[%s15943_s3 + $0x7b0] sm:$0xff] }
 0x19a   :  { %v10349_v61 = vcombine.low %v597_v45, %v601_v47 }
 0x19b   :  { %2161 = vmatpush1.bf16.msra.mxu0 %v10285_v53  ;;  %v10350_v53 = vcombine.high %v597_v45, %v601_v47  ;;  %v2406_v45 = vld [vmem:[%s15945_s5 + $0x2c8] sm:$0xff] }
 0x19c   :  { %2247 = vmatpush1.bf16.msra.mxu1 %v10287_v54  ;;  %2162 = vmatprep.subr.bf16.mxu0 %v10294_v56  ;;  %v10352_v54 = vcombine.high %v598_v48, %v602_v49  ;;  %v605_v56 = vld [vmem:[%s15943_s3 + $0x7d0] sm:$0xff] }
 0x19d   :  { %2248 = vmatprep.subr.bf16.mxu1 %v10296_v57  ;;  %v609_v57 = vld [vmem:[%s15943_s3 + $0x7f0] sm:$0xff] }
 0x19e   :  { %v10357_v5 = vcombine.low %v605_v56, %v609_v57 }
 0x19f   :  { %2163 = vmatpush1.bf16.msra.mxu0 %v10293_v0  ;;  %v10358_v0 = vcombine.high %v605_v56, %v609_v57  ;;  %v2422_v56 = vld [vmem:[%s15945_s5 + $0x348] sm:$0xff] }
 0x1a0   :  { %2249 = vmatpush1.bf16.msra.mxu1 %v10295_v9  ;;  %2164 = vmatprep.subr.bf16.mxu0 %v10302_v1  ;;  %v10360_v9 = vcombine.high %v606_v58, %v610_v59  ;;  %v2317_v1 = vld [vmem:[%s15945_s5] sm:$0xff] }
 0x1a1   :  { %2250 = vmatprep.subr.bf16.mxu1 %v10304_v2  ;;  %v2325_v2 = vld [vmem:[%s15945_s5 + $0x40] sm:$0xff] }
 0x1a2   :  { %v10361_v15 = vcombine.low %v2317_v1, %v2325_v2 }
 0x1a3   :  { %2165 = vmatpush1.bf16.msra.mxu0 %v10301_v8  ;;  %v10362_v8 = vcombine.high %v2317_v1, %v2325_v2  ;;  %v2438_v1 = vld [vmem:[%s15945_s5 + $0x3c8] sm:$0xff] }
 0x1a4   :  { %2251 = vmatpush1.bf16.msra.mxu1 %v10303_v10  ;;  %2166 = vmatprep.subr.bf16.mxu0 %v10310_v11  ;;  %v10364_v10 = vcombine.high %v2318_v3, %v2326_v4  ;;  %v2333_v11 = vld [vmem:[%s15945_s5 + $0x80] sm:$0xff] }
 0x1a5   :  { %2252 = vmatprep.subr.bf16.mxu1 %v10312_v12  ;;  %v2341_v12 = vld [vmem:[%s15945_s5 + $0xc0] sm:$0xff] }
 0x1a6   :  { %v10377_v21 = vcombine.low %v2333_v11, %v2341_v12 }
 0x1a7   :  { %2167 = vmatpush1.bf16.msra.mxu0 %v10309_v7  ;;  %v10378_v7 = vcombine.high %v2333_v11, %v2341_v12  ;;  %v2454_v11 = vld [vmem:[%s15945_s5 + $0x448] sm:$0xff] }
 0x1a8   :  { %2253 = vmatpush1.bf16.msra.mxu1 %v10311_v17  ;;  %2168 = vmatprep.subr.bf16.mxu0 %v10318_v55  ;;  %v10380_v17 = vcombine.high %v2334_v13, %v2342_v14  ;;  %v2349_v55 = vld [vmem:[%s15945_s5 + $0x100] sm:$0xff] }
 0x1a9   :  { %2254 = vmatprep.subr.bf16.mxu1 %v10320_v18  ;;  %v2357_v18 = vld [vmem:[%s15945_s5 + $0x140] sm:$0xff] }
 0x1aa   :  { %v10393_v28 = vcombine.low %v2349_v55, %v2357_v18 }
 0x1ab   :  { %2169 = vmatpush1.bf16.msra.mxu0 %v10317_v23  ;;  %v10394_v23 = vcombine.high %v2349_v55, %v2357_v18  ;;  %v2470_v55 = vld [vmem:[%s15945_s5 + $0x4c8] sm:$0xff] }
 0x1ac   :  { %2255 = vmatpush1.bf16.msra.mxu1 %v10319_v24  ;;  %2170 = vmatprep.subr.bf16.mxu0 %v10326_v25  ;;  %v10396_v24 = vcombine.high %v2350_v19, %v2358_v20  ;;  %v2365_v25 = vld [vmem:[%s15945_s5 + $0x180] sm:$0xff] }
 0x1ad   :  { %2256 = vmatprep.subr.bf16.mxu1 %v10328_v26  ;;  %v2373_v26 = vld [vmem:[%s15945_s5 + $0x1c0] sm:$0xff] }
 0x1ae   :  { %v10410_v30 = vcombine.high %v2365_v25, %v2373_v26  ;;  %v10409_v36 = vcombine.low %v2365_v25, %v2373_v26  ;;  %v2486_v25 = vld [vmem:[%s15945_s5 + $0x548] sm:$0xff] }
 0x1af   :  { %2171 = vmatpush1.bf16.msra.mxu0 %v10325_v31 }
 0x1b0   :  { %2257 = vmatpush1.bf16.msra.mxu1 %v10327_v32  ;;  %2172 = vmatprep.subr.bf16.mxu0 %v10334_v33  ;;  %v2381_v32 = vld [vmem:[%s15945_s5 + $0x200] sm:$0xff] }
 0x1b1   :  { %2258 = vmatprep.subr.bf16.mxu1 %v10336_v34  ;;  %v2389_v33 = vld [vmem:[%s15945_s5 + $0x240] sm:$0xff]  ;;  %v2382_v34 = vld [vmem:[%s15945_s5 + $0x208] sm:$0xff] }
 0x1b2   :  { %v10426_v38 = vcombine.high %v2381_v32, %v2389_v33  ;;  %v10425_v47 = vcombine.low %v2381_v32, %v2389_v33  ;;  %v10427_v48 = vcombine.low %v2382_v34, %v2390_v35  ;;  %v2502_v32 = vld [vmem:[%s15945_s5 + $0x5c8] sm:$0xff] }
 0x1b3   :  { %2173 = vmatpush1.bf16.msra.mxu0 %v10333_v39  ;;  %v10428_v39 = vcombine.high %v2382_v34, %v2390_v35 }
 0x1b4   :  { %2259 = vmatpush1.bf16.msra.mxu1 %v10335_v40  ;;  %2174 = vmatprep.subr.bf16.mxu0 %v10342_v41  ;;  %v2397_v40 = vld [vmem:[%s15945_s5 + $0x280] sm:$0xff] }
 0x1b5   :  { %2260 = vmatprep.subr.bf16.mxu1 %v10344_v42  ;;  %v2405_v41 = vld [vmem:[%s15945_s5 + $0x2c0] sm:$0xff]  ;;  %v2398_v42 = vld [vmem:[%s15945_s5 + $0x288] sm:$0xff] }
 0x1b6   :  { %v10442_v49 = vcombine.high %v2397_v40, %v2405_v41  ;;  %v10441_v57 = vcombine.low %v2397_v40, %v2405_v41  ;;  %v10443_v58 = vcombine.low %v2398_v42, %v2406_v45  ;;  %v2518_v40 = vld [vmem:[%s15945_s5 + $0x648] sm:$0xff] }
 0x1b7   :  { %2175 = vmatpush1.bf16.msra.mxu0 %v10341_v50  ;;  %v10444_v50 = vcombine.high %v2398_v42, %v2406_v45 }
 0x1b8   :  { %2261 = vmatpush1.bf16.msra.mxu1 %v10343_v51  ;;  %2176 = vmatprep.subr.bf16.mxu0 %v10350_v53  ;;  %v2413_v51 = vld [vmem:[%s15945_s5 + $0x300] sm:$0xff] }
 0x1b9   :  { %2262 = vmatprep.subr.bf16.mxu1 %v10352_v54  ;;  %v2421_v53 = vld [vmem:[%s15945_s5 + $0x340] sm:$0xff]  ;;  %v2414_v54 = vld [vmem:[%s15945_s5 + $0x308] sm:$0xff] }
 0x1ba   :  { %v10458_v59 = vcombine.high %v2413_v51, %v2421_v53  ;;  %v10457_v2 = vcombine.low %v2413_v51, %v2421_v53  ;;  %v10459_v3 = vcombine.low %v2414_v54, %v2422_v56  ;;  %v2534_v51 = vld [vmem:[%s15945_s5 + $0x6c8] sm:$0xff] }
 0x1bb   :  { %2177 = vmatpush1.bf16.msra.mxu0 %v10349_v61  ;;  %v10460_v61 = vcombine.high %v2414_v54, %v2422_v56 }
 0x1bc   :  { %2263 = vmatpush1.bf16.msra.mxu1 %v10351_v63  ;;  %2178 = vmatprep.subr.bf16.mxu0 %v10358_v0  ;;  %v2429_v63 = vld [vmem:[%s15945_s5 + $0x380] sm:$0xff] }
 0x1bd   :  { %2264 = vmatprep.subr.bf16.mxu1 %v10360_v9  ;;  %v2437_v0 = vld [vmem:[%s15945_s5 + $0x3c0] sm:$0xff]  ;;  %v2430_v9 = vld [vmem:[%s15945_s5 + $0x388] sm:$0xff] }
 0x1be   :  { %v10474_v4 = vcombine.high %v2429_v63, %v2437_v0  ;;  %v10473_v12 = vcombine.low %v2429_v63, %v2437_v0  ;;  %v10475_v13 = vcombine.low %v2430_v9, %v2438_v1  ;;  %v2550_v63 = vld [vmem:[%s15945_s5 + $0x748] sm:$0xff] }
 0x1bf   :  { %2179 = vmatpush1.bf16.msra.mxu0 %v10357_v5  ;;  %v10476_v5 = vcombine.high %v2430_v9, %v2438_v1 }
 0x1c0   :  { %2265 = vmatpush1.bf16.msra.mxu1 %v10359_v6  ;;  %8545 = vmatprep.subr.bf16.mxu0 %v10362_v8  ;;  %v2445_v6 = vld [vmem:[%s15945_s5 + $0x400] sm:$0xff] }
 0x1c1   :  { %8717 = vmatprep.subr.bf16.mxu1 %v10364_v10  ;;  %v2453_v8 = vld [vmem:[%s15945_s5 + $0x440] sm:$0xff]  ;;  %v2446_v10 = vld [vmem:[%s15945_s5 + $0x408] sm:$0xff] }
 0x1c2   :  { %2181 = vmatmul.mubr.bf16.vlgmr.msra.gmra.mrb[8].mxu0 %v12113_v52  ;;  %v10490_v14 = vcombine.high %v2445_v6, %v2453_v8  ;;  %v10489_v18 = vcombine.low %v2445_v6, %v2453_v8  ;;  %v10491_v19 = vcombine.low %v2446_v10, %v2454_v11  ;;  %v2566_v6 = vld [vmem:[%s15945_s5 + $0x7c8] sm:$0xff] }
 0x1c3   :  { %2267 = vmatmul.mubr.bf16.vlgmr.msra.gmra.mrb[8].mxu1 %v12113_v52  ;;  %8546 = vmatpush1.bf16.msra.mxu0 %v10361_v15  ;;  %v2366_v52 = vld [vmem:[%s15945_s5 + $0x188] sm:$0xff]  ;;  %v10492_v15 = vcombine.high %v2446_v10, %v2454_v11 }
 0x1c4   :  { %8718 = vmatpush1.bf16.msra.mxu1 %v10363_v16  ;;  %8547 = vmatprep.subr.bf16.mxu0 %v10378_v7  ;;  %v10412_v31 = vcombine.high %v2366_v52, %v2374_v27  ;;  %v10411_v37 = vcombine.low %v2366_v52, %v2374_v27  ;;  %v2461_v16 = vld [vmem:[%s15945_s5 + $0x480] sm:$0xff] }
 0x1c5   :  { %8719 = vmatprep.subr.bf16.mxu1 %v10380_v17  ;;  %v2469_v7 = vld [vmem:[%s15945_s5 + $0x4c0] sm:$0xff]  ;;  %v2462_v17 = vld [vmem:[%s15945_s5 + $0x488] sm:$0xff] }
 0x1c6   :  { %v10506_v20 = vcombine.high %v2461_v16, %v2469_v7  ;;  %v10505_v26 = vcombine.low %v2461_v16, %v2469_v7  ;;  %v10507_v52 = vcombine.low %v2462_v17, %v2470_v55  ;;  %v12855_v16 = vld [vmem:[%s15945_s5 + $0x848] sm:$0xff] }
 0x1c7   :  { %8548 = vmatpush1.bf16.msra.mxu0 %v10377_v21  ;;  %v10508_v21 = vcombine.high %v2462_v17, %v2470_v55 }
 0x1c8   :  { %8720 = vmatpush1.bf16.msra.mxu1 %v10379_v22  ;;  %8549 = vmatprep.subr.bf16.mxu0 %v10394_v23  ;;  %v2477_v22 = vld [vmem:[%s15945_s5 + $0x500] sm:$0xff] }
 0x1c9   :  { %8721 = vmatprep.subr.bf16.mxu1 %v10396_v24  ;;  %v2485_v23 = vld [vmem:[%s15945_s5 + $0x540] sm:$0xff]  ;;  %v2478_v24 = vld [vmem:[%s15945_s5 + $0x508] sm:$0xff] }
 0x1ca   :  { %v10522_v27 = vcombine.high %v2477_v22, %v2485_v23  ;;  %v10521_v33 = vcombine.low %v2477_v22, %v2485_v23  ;;  %v10523_v34 = vcombine.low %v2478_v24, %v2486_v25 }
 0x1cb   :  { %8550 = vmatpush1.bf16.msra.mxu0 %v10393_v28  ;;  %v10524_v28 = vcombine.high %v2478_v24, %v2486_v25 }
 0x1cc   :  { %8722 = vmatpush1.bf16.msra.mxu1 %v10395_v29  ;;  %8551 = vmatprep.subr.bf16.mxu0 %v10410_v30  ;;  %v2493_v29 = vld [vmem:[%s15945_s5 + $0x580] sm:$0xff] }
 0x1cd   :  { %8723 = vmatprep.subr.bf16.mxu1 %v10412_v31  ;;  %v2501_v30 = vld [vmem:[%s15945_s5 + $0x5c0] sm:$0xff]  ;;  %v2494_v31 = vld [vmem:[%s15945_s5 + $0x588] sm:$0xff] }
 0x1ce   :  { %v10538_v35 = vcombine.high %v2493_v29, %v2501_v30  ;;  %v10537_v41 = vcombine.low %v2493_v29, %v2501_v30  ;;  %v10539_v42 = vcombine.low %v2494_v31, %v2502_v32 }
 0x1cf   :  { %8552 = vmatpush1.bf16.msra.mxu0 %v10409_v36  ;;  %v10540_v36 = vcombine.high %v2494_v31, %v2502_v32 }
 0x1d0   :  { %8724 = vmatpush1.bf16.msra.mxu1 %v10411_v37  ;;  %8553 = vmatprep.subr.bf16.mxu0 %v10426_v38  ;;  %v2509_v37 = vld [vmem:[%s15945_s5 + $0x600] sm:$0xff] }
 0x1d1   :  { %8725 = vmatprep.subr.bf16.mxu1 %v10428_v39  ;;  %v2517_v38 = vld [vmem:[%s15945_s5 + $0x640] sm:$0xff]  ;;  %v2510_v39 = vld [vmem:[%s15945_s5 + $0x608] sm:$0xff] }
 0x1d2   :  { %v10554_v45 = vcombine.high %v2509_v37, %v2517_v38  ;;  %v10553_v53 = vcombine.low %v2509_v37, %v2517_v38  ;;  %v10555_v54 = vcombine.low %v2510_v39, %v2518_v40 }
 0x1d3   :  { %8554 = vmatpush1.bf16.msra.mxu0 %v10425_v47  ;;  %v10556_v47 = vcombine.high %v2510_v39, %v2518_v40 }
 0x1d4   :  { %8726 = vmatpush1.bf16.msra.mxu1 %v10427_v48  ;;  %8555 = vmatprep.subr.bf16.mxu0 %v10442_v49  ;;  %v2525_v48 = vld [vmem:[%s15945_s5 + $0x680] sm:$0xff] }
 0x1d5   :  { %8727 = vmatprep.subr.bf16.mxu1 %v10444_v50  ;;  %v2533_v49 = vld [vmem:[%s15945_s5 + $0x6c0] sm:$0xff]  ;;  %v2526_v50 = vld [vmem:[%s15945_s5 + $0x688] sm:$0xff] }
 0x1d6   :  { %v10570_v56 = vcombine.high %v2525_v48, %v2533_v49  ;;  %v10569_v0 = vcombine.low %v2525_v48, %v2533_v49  ;;  %v10571_v9 = vcombine.low %v2526_v50, %v2534_v51 }
 0x1d7   :  { %8556 = vmatpush1.bf16.msra.mxu0 %v10441_v57  ;;  %v10572_v57 = vcombine.high %v2526_v50, %v2534_v51 }
 0x1d8   :  { %8728 = vmatpush1.bf16.msra.mxu1 %v10443_v58  ;;  %8557 = vmatprep.subr.bf16.mxu0 %v10458_v59  ;;  %v2541_v58 = vld [vmem:[%s15945_s5 + $0x700] sm:$0xff] }
 0x1d9   :  { %8729 = vmatprep.subr.bf16.mxu1 %v10460_v61  ;;  %v2549_v59 = vld [vmem:[%s15945_s5 + $0x740] sm:$0xff]  ;;  %v2542_v61 = vld [vmem:[%s15945_s5 + $0x708] sm:$0xff] }
 0x1da   :  { %v10586_v1 = vcombine.high %v2541_v58, %v2549_v59  ;;  %v10585_v8 = vcombine.low %v2541_v58, %v2549_v59  ;;  %v10587_v10 = vcombine.low %v2542_v61, %v2550_v63 }
 0x1db   :  { %8558 = vmatpush1.bf16.msra.mxu0 %v10457_v2  ;;  %v10588_v2 = vcombine.high %v2542_v61, %v2550_v63  ;;  %v2589_v61 = vld [vmem:[%s15945_s5 + $0x880] sm:$0xff] }
 0x1dc   :  { %8730 = vmatpush1.bf16.msra.mxu1 %v10459_v3  ;;  %8559 = vmatprep.subr.bf16.mxu0 %v10474_v4  ;;  %v2557_v3 = vld [vmem:[%s15945_s5 + $0x780] sm:$0xff] }
 0x1dd   :  { %8731 = vmatprep.subr.bf16.mxu1 %v10476_v5  ;;  %v2565_v4 = vld [vmem:[%s15945_s5 + $0x7c0] sm:$0xff]  ;;  %v2558_v5 = vld [vmem:[%s15945_s5 + $0x788] sm:$0xff] }
 0x1de   :  { %v10602_v11 = vcombine.high %v2557_v3, %v2565_v4  ;;  %v10601_v7 = vcombine.low %v2557_v3, %v2565_v4  ;;  %v10603_v17 = vcombine.low %v2558_v5, %v2566_v6 }
 0x1df   :  { %8560 = vmatpush1.bf16.msra.mxu0 %v10473_v12  ;;  %v10604_v12 = vcombine.high %v2558_v5, %v2566_v6 }
 0x1e0   :  { %8732 = vmatpush1.bf16.msra.mxu1 %v10475_v13  ;;  %8561 = vmatprep.subr.bf16.mxu0 %v10490_v14  ;;  %v12840_v13 = vld [vmem:[%s15945_s5 + $0x800] sm:$0xff] }
 0x1e1   :  { %8733 = vmatprep.subr.bf16.mxu1 %v10492_v15  ;;  %v12845_v14 = vld [vmem:[%s15945_s5 + $0x840] sm:$0xff]  ;;  %v12850_v15 = vld [vmem:[%s15945_s5 + $0x808] sm:$0xff] }
 0x1e2   :  { %v10618_v55 = vcombine.high %v12840_v13, %v12845_v14  ;;  %v10617_v5 = vcombine.low %v12840_v13, %v12845_v14  ;;  %v10619_v6 = vcombine.low %v12850_v15, %v12855_v16  ;;  %v2606_v13 = vld [vmem:[%s15945_s5 + $0x908] sm:$0xff] }
 0x1e3   :  { %8562 = vmatpush1.bf16.msra.mxu0 %v10489_v18  ;;  %v10620_v18 = vcombine.high %v12850_v15, %v12855_v16  ;;  %v2614_v14 = vld [vmem:[%s15945_s5 + $0x948] sm:$0xff] }
 0x1e4   :  { %8734 = vmatpush1.bf16.msra.mxu1 %v10491_v19  ;;  %8563 = vmatprep.subr.bf16.mxu0 %v10506_v20  ;;  %v12864_v19 = vld [vmem:[%s15946_s4] sm:$0xff] }
 0x1e5   :  { %8735 = vmatprep.subr.bf16.mxu1 %v10508_v21  ;;  %v616_v20 = vrot.slane %v12864_v19, %v12039_v44  ;;  %v624_v21 = vrot.slane %v12864_v19, %v12050_v60  ;;  %v620_v22 = vrot.slane %v12864_v19, %v12045_v46  ;;  %v628_v23 = vrot.slane %v12864_v19, %v12053_v62 }
 0x1e7   :  { %8564 = vmatpush1.bf16.msra.mxu0 %v10505_v26 }
 0x1e8   :  { %8736 = vmatpush1.bf16.msra.mxu1 %v10507_v52  ;;  %8565 = vmatprep.subr.bf16.mxu0 %v10522_v27 }
 0x1e9   :  { %8737 = vmatprep.subr.bf16.mxu1 %v10524_v28 }
 0x1eb   :  { %8566 = vmatpush1.bf16.msra.mxu0 %v10521_v33 }
 0x1ec   :  { %8738 = vmatpush1.bf16.msra.mxu1 %v10523_v34  ;;  %8567 = vmatprep.subr.bf16.mxu0 %v10538_v35 }
 0x1ed   :  { %8739 = vmatprep.subr.bf16.mxu1 %v10540_v36 }
 0x1ef   :  { %8568 = vmatpush1.bf16.msra.mxu0 %v10537_v41 }
 0x1f0   :  { %8740 = vmatpush1.bf16.msra.mxu1 %v10539_v42  ;;  %8569 = vmatprep.subr.bf16.mxu0 %v10554_v45 }
 0x1f1   :  { %8741 = vmatprep.subr.bf16.mxu1 %v10556_v47 }
 0x1f3   :  { %8570 = vmatpush1.bf16.msra.mxu0 %v10553_v53 }
 0x1f4   :  { %8742 = vmatpush1.bf16.msra.mxu1 %v10555_v54  ;;  %8571 = vmatprep.subr.bf16.mxu0 %v10570_v56 }
 0x1f5   :  { %8743 = vmatprep.subr.bf16.mxu1 %v10572_v57 }
 0x1f7   :  { %8572 = vmatpush1.bf16.msra.mxu0 %v10569_v0 }
 0x1f8   :  { %8744 = vmatpush1.bf16.msra.mxu1 %v10571_v9  ;;  %8573 = vmatprep.subr.bf16.mxu0 %v10586_v1  ;;  %v2597_v9 = vld [vmem:[%s15945_s5 + $0x8c0] sm:$0xff]  ;;  %v2590_v1 = vld [vmem:[%s15945_s5 + $0x888] sm:$0xff] }
 0x1f9   :  { %8745 = vmatprep.subr.bf16.mxu1 %v10588_v2  ;;  %v2598_v2 = vld [vmem:[%s15945_s5 + $0x8c8] sm:$0xff]  ;;  %v10633_v15 = vcombine.low %v2589_v61, %v2597_v9 }
 0x1fa   :  { %v10635_v16 = vcombine.low %v2590_v1, %v2598_v2 }
 0x1fb   :  { %8574 = vmatpush1.bf16.msra.mxu0 %v10585_v8  ;;  %v2605_v8 = vld [vmem:[%s15945_s5 + $0x900] sm:$0xff] }
 0x1fc   :  { %8746 = vmatpush1.bf16.msra.mxu1 %v10587_v10  ;;  %8575 = vmatprep.subr.bf16.mxu0 %v10602_v11  ;;  %v10634_v10 = vcombine.high %v2589_v61, %v2597_v9  ;;  %v10636_v11 = vcombine.high %v2590_v1, %v2598_v2  ;;  %v2701_v1 = vld [vmem:[%s15945_s5 + $0xc00] sm:$0xff] }
 0x1fd   :  { %8747 = vmatprep.subr.bf16.mxu1 %v10604_v12  ;;  %v2613_v12 = vld [vmem:[%s15945_s5 + $0x940] sm:$0xff] }
 0x1fe   :  { %v2709_v2 = vld [vmem:[%s15945_s5 + $0xc40] sm:$0xff] }
 0x1ff   :  { %8576 = vmatpush1.bf16.msra.mxu0 %v10601_v7  ;;  %v10650_v7 = vcombine.high %v2605_v8, %v2613_v12 }
 0x200   :  { %8748 = vmatpush1.bf16.msra.mxu1 %v10603_v17  ;;  %8588 = vmatprep.subr.bf16.mxu0 %v10618_v55  ;;  %v10652_v17 = vcombine.high %v2606_v13, %v2614_v14  ;;  %v2621_v55 = vld [vmem:[%s15945_s5 + $0x980] sm:$0xff] }
 0x201   :  { %8760 = vmatprep.subr.bf16.mxu1 %v10620_v18  ;;  %v2629_v18 = vld [vmem:[%s15945_s5 + $0x9c0] sm:$0xff] }
 0x215   :  { %v2010_v24 = vpop.f32.mrb[4].mxu0  ;;  %v2096_v25 = vpop.f32.mrb[4].mxu1 }
 0x216   :  { %v11417_v26 = vadd.f32 %v2010_v24, %v616_v20  ;;  %v11421_v52 = vadd.f32 %v2096_v25, %v624_v21  ;;  %v2012_v27 = vpop.f32.mrb[5].mxu0  ;;  %v2098_v28 = vpop.f32.mrb[5].mxu1  ;;  %v10666_v24 = vcombine.high %v2621_v55, %v2629_v18 }
 0x217   :  { %v11418_v29 = vadd.f32 %v2012_v27, %v620_v22  ;;  %v11422_v30 = vadd.f32 %v2098_v28, %v628_v23  ;;  %v2014_v31 = vpop.f32.mrb[6].mxu0  ;;  %v2100_v32 = vpop.f32.mrb[6].mxu1  ;;  %v2638_v27 = vld [vmem:[%s15945_s5 + $0xa08] sm:$0xff] }
 0x218   :  { %v2277_v33 = vmul.f32 0.2, %v11417_v26  ;;  %v2279_v34 = vmul.f32 0.2, %v11421_v52  ;;  %v11419_v35 = vadd.f32 %v2014_v31, %v616_v20  ;;  %v11423_v36 = vadd.f32 %v2100_v32, %v624_v21  ;;  %v2016_v37 = vpop.f32.mrb[7].mxu0  ;;  %v2102_v38 = vpop.f32.mrb[7].mxu1 }
 0x219   :  { %v2278_v39 = vmul.f32 0.2, %v11418_v29  ;;  %v2280_v40 = vmul.f32 0.2, %v11422_v30  ;;  %v11420_v41 = vadd.f32 %v2016_v37, %v620_v22  ;;  %v11424_v42 = vadd.f32 %v2102_v38, %v628_v23  ;;  %v2622_v20 = vld [vmem:[%s15945_s5 + $0x988] sm:$0xff] }
 0x21a   :  { %v2285_v45 = vmul.f32 0.2, %v11419_v35  ;;  %v2287_v47 = vmul.f32 0.2, %v11423_v36  ;;  %v2293_v50 = vmax.f32 %v11417_v26, %v2277_v33  ;;  %v2295_v51 = vmax.f32 %v11421_v52, %v2279_v34  ;;  %v2630_v21 = vld [vmem:[%s15945_s5 + $0x9c8] sm:$0xff]  ;;  %v2637_v26 = vld [vmem:[%s15945_s5 + $0xa00] sm:$0xff] }
 0x21b   :  { %v2286_v48 = vmul.f32 0.2, %v11420_v41  ;;  %v2288_v49 = vmul.f32 0.2, %v11424_v42  ;;  %v2294_v56 = vmax.f32 %v11418_v29, %v2278_v39  ;;  %v2296_v57 = vmax.f32 %v11422_v30, %v2280_v40  ;;  %v2645_v52 = vld [vmem:[%s15945_s5 + $0xa40] sm:$0xff]  ;;  %v2646_v28 = vld [vmem:[%s15945_s5 + $0xa48] sm:$0xff] }
 0x21c   :  { %v2301_v53 = vmax.f32 %v11419_v35, %v2285_v45  ;;  %v2303_v54 = vmax.f32 %v11423_v36, %v2287_v47  ;;  %v10649_v22 = vcombine.low %v2605_v8, %v2613_v12  ;;  %v10651_v23 = vcombine.low %v2606_v13, %v2614_v14  ;;  %v2653_v33 = vld [vmem:[%s15945_s5 + $0xa80] sm:$0xff]  ;;  %v2654_v35 = vld [vmem:[%s15945_s5 + $0xa88] sm:$0xff] }
 0x21d   :  { %v2302_v58 = vmax.f32 %v11420_v41, %v2286_v48  ;;  %v2304_v59 = vmax.f32 %v11424_v42, %v2288_v49  ;;  %v10668_v25 = vcombine.high %v2622_v20, %v2630_v21  ;;  %v10665_v29 = vcombine.low %v2621_v55, %v2629_v18  ;;  %v2661_v34 = vld [vmem:[%s15945_s5 + $0xac0] sm:$0xff]  ;;  %v2662_v36 = vld [vmem:[%s15945_s5 + $0xac8] sm:$0xff] }
 0x21e   :  { %v12877_v63 = vpack.c.bf16 %v2301_v53, %v2293_v50  ;;  %v12879_v0 = vpack.c.bf16 %v2303_v54, %v2295_v51  ;;  %v10667_v30 = vcombine.low %v2622_v20, %v2630_v21  ;;  %v10682_v31 = vcombine.high %v2637_v26, %v2645_v52  ;;  %v2669_v41 = vld [vmem:[%s15945_s5 + $0xb00] sm:$0xff]  ;;  %v2670_v45 = vld [vmem:[%s15945_s5 + $0xb08] sm:$0xff] }
 0x21f   :  { %v12890_v3 = vpack.c.bf16 %v2302_v58, %v2294_v56  ;;  %v12892_v4 = vpack.c.bf16 %v2304_v59, %v2296_v57  ;;  %v10684_v32 = vcombine.high %v2638_v27, %v2646_v28  ;;  %v10681_v37 = vcombine.low %v2637_v26, %v2645_v52  ;;  %v2677_v42 = vld [vmem:[%s15945_s5 + $0xb40] sm:$0xff]  ;;  %v2678_v47 = vld [vmem:[%s15945_s5 + $0xb48] sm:$0xff] }
 0x220   :  { %v10683_v38 = vcombine.low %v2638_v27, %v2646_v28  ;;  %v10698_v39 = vcombine.high %v2653_v33, %v2661_v34  ;;  %v10700_v40 = vcombine.high %v2654_v35, %v2662_v36  ;;  %v10697_v48 = vcombine.low %v2653_v33, %v2661_v34  ;;  %v2685_v53 = vld [vmem:[%s15945_s5 + $0xb80] sm:$0xff]  ;;  %v2686_v56 = vld [vmem:[%s15945_s5 + $0xb88] sm:$0xff] }
 0x221   :  { %8577 = vmatprep.mubr.bf16.mxu0 %v12890_v3  ;;  %8749 = vmatprep.mubr.bf16.mxu1 %v12890_v3  ;;  %v10699_v49 = vcombine.low %v2654_v35, %v2662_v36  ;;  %v10714_v50 = vcombine.high %v2669_v41, %v2677_v42  ;;  %v10716_v51 = vcombine.high %v2670_v45, %v2678_v47  ;;  %v2693_v54 = vld [vmem:[%s15945_s5 + $0xbc0] sm:$0xff]  ;;  %v2694_v57 = vld [vmem:[%s15945_s5 + $0xbc8] sm:$0xff] }
 0x222   :  { %8578 = vmatmul.mubr.bf16.vlgmr.msra.gmra.mrb[12].mxu0 %v12877_v63  ;;  %8750 = vmatmul.mubr.bf16.vlgmr.msra.gmra.mrb[12].mxu1 %v12877_v63  ;;  %v10713_v58 = vcombine.low %v2669_v41, %v2677_v42  ;;  %v10715_v59 = vcombine.low %v2670_v45, %v2678_v47  ;;  %v10730_v61 = vcombine.high %v2685_v53, %v2693_v54  ;;  %v2717_v13 = vld [vmem:[%s15945_s5 + $0xc80] sm:$0xff] }
 0x223   :  { %8589 = vmatpush1.bf16.msra.mxu0 %v10617_v5  ;;  %8761 = vmatpush1.bf16.msra.mxu1 %v10619_v6  ;;  %v10732_v9 = vcombine.high %v2686_v56, %v2694_v57  ;;  %v2702_v5 = vld [vmem:[%s15945_s5 + $0xc08] sm:$0xff]  ;;  %v10729_v8 = vcombine.low %v2685_v53, %v2693_v54  ;;  %v2725_v14 = vld [vmem:[%s15945_s5 + $0xcc0] sm:$0xff] }
 0x224   :  { %8620 = vmatprep.mubr.bf16.mxu0 %v12892_v4  ;;  %8792 = vmatprep.mubr.bf16.mxu1 %v12892_v4  ;;  %v2710_v6 = vld [vmem:[%s15945_s5 + $0xc48] sm:$0xff]  ;;  %v10762_v55 = vcombine.high %v2717_v13, %v2725_v14  ;;  %v2733_v20 = vld [vmem:[%s15945_s5 + $0xd00] sm:$0xff] }
 0x225   :  { %8590 = vmatprep.subr.bf16.mxu0 %v10634_v10  ;;  %8762 = vmatprep.subr.bf16.mxu1 %v10636_v11  ;;  %v10731_v10 = vcombine.low %v2686_v56, %v2694_v57  ;;  %v10746_v11 = vcombine.high %v2701_v1, %v2709_v2  ;;  %v10748_v12 = vcombine.high %v2702_v5, %v2710_v6  ;;  %v2741_v21 = vld [vmem:[%s15945_s5 + $0xd40] sm:$0xff] }
 0x226   :  { %v10778_v26 = vcombine.high %v2733_v20, %v2741_v21  ;;  %v2749_v27 = vld [vmem:[%s15945_s5 + $0xd80] sm:$0xff] }
 0x227   :  { %8591 = vmatpush1.bf16.msra.mxu0 %v10633_v15  ;;  %8763 = vmatpush1.bf16.msra.mxu1 %v10635_v16  ;;  %v2718_v15 = vld [vmem:[%s15945_s5 + $0xc88] sm:$0xff]  ;;  %v2757_v28 = vld [vmem:[%s15945_s5 + $0xdc0] sm:$0xff] }
 0x228   :  { %8592 = vmatprep.subr.bf16.mxu0 %v10650_v7  ;;  %8764 = vmatprep.subr.bf16.mxu1 %v10652_v17  ;;  %v2726_v16 = vld [vmem:[%s15945_s5 + $0xcc8] sm:$0xff]  ;;  %v10745_v7 = vcombine.low %v2701_v1, %v2709_v2  ;;  %v10747_v17 = vcombine.low %v2702_v5, %v2710_v6  ;;  %v10794_v33 = vcombine.high %v2749_v27, %v2757_v28  ;;  %v2765_v35 = vld [vmem:[%s15945_s5 + $0xe00] sm:$0xff] }
 0x229   :  { %v10764_v18 = vcombine.high %v2718_v15, %v2726_v16  ;;  %v2773_v36 = vld [vmem:[%s15945_s5 + $0xe40] sm:$0xff] }
 0x22a   :  { %v10810_v41 = vcombine.high %v2765_v35, %v2773_v36  ;;  %v2781_v45 = vld [vmem:[%s15945_s5 + $0xe80] sm:$0xff] }
 0x22b   :  { %8593 = vmatpush1.bf16.msra.mxu0 %v10649_v22  ;;  %8765 = vmatpush1.bf16.msra.mxu1 %v10651_v23  ;;  %v2734_v22 = vld [vmem:[%s15945_s5 + $0xd08] sm:$0xff]  ;;  %v2789_v47 = vld [vmem:[%s15945_s5 + $0xec0] sm:$0xff] }
 0x22c   :  { %8594 = vmatprep.subr.bf16.mxu0 %v10666_v24  ;;  %8766 = vmatprep.subr.bf16.mxu1 %v10668_v25  ;;  %v2742_v23 = vld [vmem:[%s15945_s5 + $0xd48] sm:$0xff]  ;;  %v10761_v24 = vcombine.low %v2717_v13, %v2725_v14  ;;  %v10763_v25 = vcombine.low %v2718_v15, %v2726_v16  ;;  %v10826_v53 = vcombine.high %v2781_v45, %v2789_v47  ;;  %v2797_v56 = vld [vmem:[%s15945_s5 + $0xf00] sm:$0xff] }
 0x22d   :  { %v10780_v52 = vcombine.high %v2734_v22, %v2742_v23  ;;  %v2805_v57 = vld [vmem:[%s15945_s5 + $0xf40] sm:$0xff] }
 0x22e   :  { %v10842_v1 = vcombine.high %v2797_v56, %v2805_v57  ;;  %v2813_v5 = vld [vmem:[%s15945_s5 + $0xf80] sm:$0xff] }
 0x22f   :  { %8595 = vmatpush1.bf16.msra.mxu0 %v10665_v29  ;;  %8767 = vmatpush1.bf16.msra.mxu1 %v10667_v30  ;;  %v2750_v29 = vld [vmem:[%s15945_s5 + $0xd88] sm:$0xff]  ;;  %v2821_v6 = vld [vmem:[%s15945_s5 + $0xfc0] sm:$0xff] }
 0x230   :  { %8596 = vmatprep.subr.bf16.mxu0 %v10682_v31  ;;  %8768 = vmatprep.subr.bf16.mxu1 %v10684_v32  ;;  %v2758_v30 = vld [vmem:[%s15945_s5 + $0xdc8] sm:$0xff]  ;;  %v10777_v31 = vcombine.low %v2733_v20, %v2741_v21  ;;  %v10779_v32 = vcombine.low %v2734_v22, %v2742_v23  ;;  %v10858_v13 = vcombine.high %v2813_v5, %v2821_v6  ;;  %v2829_v15 = vld [vmem:[%s15945_s5 + $0x1000] sm:$0xff] }
 0x231   :  { %v10796_v34 = vcombine.high %v2750_v29, %v2758_v30  ;;  %v2837_v16 = vld [vmem:[%s15945_s5 + $0x1040] sm:$0xff] }
 0x232   :  { %v10874_v20 = vcombine.high %v2829_v15, %v2837_v16  ;;  %v2845_v22 = vld [vmem:[%s15945_s5 + $0x1080] sm:$0xff] }
 0x233   :  { %8597 = vmatpush1.bf16.msra.mxu0 %v10681_v37  ;;  %8769 = vmatpush1.bf16.msra.mxu1 %v10683_v38  ;;  %v2766_v37 = vld [vmem:[%s15945_s5 + $0xe08] sm:$0xff]  ;;  %v2853_v23 = vld [vmem:[%s15945_s5 + $0x10c0] sm:$0xff] }
 0x234   :  { %8598 = vmatprep.subr.bf16.mxu0 %v10698_v39  ;;  %8770 = vmatprep.subr.bf16.mxu1 %v10700_v40  ;;  %v2774_v38 = vld [vmem:[%s15945_s5 + $0xe48] sm:$0xff]  ;;  %v10793_v39 = vcombine.low %v2749_v27, %v2757_v28  ;;  %v10795_v40 = vcombine.low %v2750_v29, %v2758_v30  ;;  %v10890_v27 = vcombine.high %v2845_v22, %v2853_v23  ;;  %v2861_v29 = vld [vmem:[%s15945_s5 + $0x1100] sm:$0xff] }
 0x235   :  { %v10812_v42 = vcombine.high %v2766_v37, %v2774_v38  ;;  %v2869_v30 = vld [vmem:[%s15945_s5 + $0x1140] sm:$0xff] }
 0x237   :  { %8599 = vmatpush1.bf16.msra.mxu0 %v10697_v48  ;;  %8771 = vmatpush1.bf16.msra.mxu1 %v10699_v49  ;;  %v2782_v48 = vld [vmem:[%s15945_s5 + $0xe88] sm:$0xff] }
 0x238   :  { %8600 = vmatprep.subr.bf16.mxu0 %v10714_v50  ;;  %8772 = vmatprep.subr.bf16.mxu1 %v10716_v51  ;;  %v2790_v49 = vld [vmem:[%s15945_s5 + $0xec8] sm:$0xff]  ;;  %v10809_v50 = vcombine.low %v2765_v35, %v2773_v36  ;;  %v10811_v51 = vcombine.low %v2766_v37, %v2774_v38  ;;  %v10906_v35 = vcombine.high %v2861_v29, %v2869_v30  ;;  %v2877_v37 = vld [vmem:[%s15945_s5 + $0x1180] sm:$0xff] }
 0x239   :  { %v10828_v54 = vcombine.high %v2782_v48, %v2790_v49  ;;  %v2885_v38 = vld [vmem:[%s15945_s5 + $0x11c0] sm:$0xff] }
 0x23b   :  { %8601 = vmatpush1.bf16.msra.mxu0 %v10713_v58  ;;  %8773 = vmatpush1.bf16.msra.mxu1 %v10715_v59  ;;  %v2798_v58 = vld [vmem:[%s15945_s5 + $0xf08] sm:$0xff] }
 0x23c   :  { %8602 = vmatprep.subr.bf16.mxu0 %v10730_v61  ;;  %8774 = vmatprep.subr.bf16.mxu1 %v10732_v9  ;;  %v2806_v59 = vld [vmem:[%s15945_s5 + $0xf48] sm:$0xff]  ;;  %v10825_v61 = vcombine.low %v2781_v45, %v2789_v47  ;;  %v10827_v9 = vcombine.low %v2782_v48, %v2790_v49  ;;  %v10922_v45 = vcombine.high %v2877_v37, %v2885_v38  ;;  %v2893_v48 = vld [vmem:[%s15945_s5 + $0x1200] sm:$0xff] }
 0x23d   :  { %v10844_v2 = vcombine.high %v2798_v58, %v2806_v59  ;;  %v2901_v49 = vld [vmem:[%s15945_s5 + $0x1240] sm:$0xff] }
 0x23f   :  { %8603 = vmatpush1.bf16.msra.mxu0 %v10729_v8  ;;  %8775 = vmatpush1.bf16.msra.mxu1 %v10731_v10  ;;  %v2814_v8 = vld [vmem:[%s15945_s5 + $0xf88] sm:$0xff] }
 0x240   :  { %8604 = vmatprep.subr.bf16.mxu0 %v10746_v11  ;;  %8776 = vmatprep.subr.bf16.mxu1 %v10748_v12  ;;  %v2822_v10 = vld [vmem:[%s15945_s5 + $0xfc8] sm:$0xff]  ;;  %v10841_v11 = vcombine.low %v2797_v56, %v2805_v57  ;;  %v10843_v12 = vcombine.low %v2798_v58, %v2806_v59  ;;  %v10938_v56 = vcombine.high %v2893_v48, %v2901_v49  ;;  %v2909_v58 = vld [vmem:[%s15945_s5 + $0x1280] sm:$0xff] }
 0x241   :  { %v10860_v14 = vcombine.high %v2814_v8, %v2822_v10  ;;  %v2917_v59 = vld [vmem:[%s15945_s5 + $0x12c0] sm:$0xff] }
 0x243   :  { %8605 = vmatpush1.bf16.msra.mxu0 %v10745_v7  ;;  %8777 = vmatpush1.bf16.msra.mxu1 %v10747_v17  ;;  %v2830_v7 = vld [vmem:[%s15945_s5 + $0x1008] sm:$0xff] }
 0x244   :  { %8606 = vmatprep.subr.bf16.mxu0 %v10762_v55  ;;  %8778 = vmatprep.subr.bf16.mxu1 %v10764_v18  ;;  %v2838_v17 = vld [vmem:[%s15945_s5 + $0x1048] sm:$0xff]  ;;  %v10857_v55 = vcombine.low %v2813_v5, %v2821_v6  ;;  %v10859_v18 = vcombine.low %v2814_v8, %v2822_v10  ;;  %v10954_v5 = vcombine.high %v2909_v58, %v2917_v59  ;;  %v2925_v8 = vld [vmem:[%s15945_s5 + $0x1300] sm:$0xff] }
 0x245   :  { %v10876_v21 = vcombine.high %v2830_v7, %v2838_v17  ;;  %v2933_v10 = vld [vmem:[%s15945_s5 + $0x1340] sm:$0xff] }
 0x247   :  { %8607 = vmatpush1.bf16.msra.mxu0 %v10761_v24  ;;  %8779 = vmatpush1.bf16.msra.mxu1 %v10763_v25  ;;  %v2846_v24 = vld [vmem:[%s15945_s5 + $0x1088] sm:$0xff] }
 0x248   :  { %8608 = vmatprep.subr.bf16.mxu0 %v10778_v26  ;;  %8780 = vmatprep.subr.bf16.mxu1 %v10780_v52  ;;  %v2854_v25 = vld [vmem:[%s15945_s5 + $0x10c8] sm:$0xff]  ;;  %v10873_v26 = vcombine.low %v2829_v15, %v2837_v16  ;;  %v10875_v52 = vcombine.low %v2830_v7, %v2838_v17  ;;  %v10970_v15 = vcombine.high %v2925_v8, %v2933_v10  ;;  %v2941_v7 = vld [vmem:[%s15945_s5 + $0x1380] sm:$0xff] }
 0x249   :  { %v10892_v28 = vcombine.high %v2846_v24, %v2854_v25  ;;  %v2949_v17 = vld [vmem:[%s15945_s5 + $0x13c0] sm:$0xff] }
 0x24b   :  { %8609 = vmatpush1.bf16.msra.mxu0 %v10777_v31  ;;  %8781 = vmatpush1.bf16.msra.mxu1 %v10779_v32  ;;  %v2862_v31 = vld [vmem:[%s15945_s5 + $0x1108] sm:$0xff] }
 0x24c   :  { %8610 = vmatprep.subr.bf16.mxu0 %v10794_v33  ;;  %8782 = vmatprep.subr.bf16.mxu1 %v10796_v34  ;;  %v2870_v32 = vld [vmem:[%s15945_s5 + $0x1148] sm:$0xff]  ;;  %v10889_v33 = vcombine.low %v2845_v22, %v2853_v23  ;;  %v10891_v34 = vcombine.low %v2846_v24, %v2854_v25  ;;  %v10986_v22 = vcombine.high %v2941_v7, %v2949_v17  ;;  %v2957_v24 = vld [vmem:[%s15945_s5 + $0x1400] sm:$0xff] }
 0x24d   :  { %v10908_v36 = vcombine.high %v2862_v31, %v2870_v32  ;;  %v2965_v25 = vld [vmem:[%s15945_s5 + $0x1440] sm:$0xff] }
 0x24f   :  { %8611 = vmatpush1.bf16.msra.mxu0 %v10793_v39  ;;  %8783 = vmatpush1.bf16.msra.mxu1 %v10795_v40  ;;  %v2878_v39 = vld [vmem:[%s15945_s5 + $0x1188] sm:$0xff] }
 0x250   :  { %8612 = vmatprep.subr.bf16.mxu0 %v10810_v41  ;;  %8784 = vmatprep.subr.bf16.mxu1 %v10812_v42  ;;  %v2886_v40 = vld [vmem:[%s15945_s5 + $0x11c8] sm:$0xff]  ;;  %v10905_v41 = vcombine.low %v2861_v29, %v2869_v30  ;;  %v10907_v42 = vcombine.low %v2862_v31, %v2870_v32  ;;  %v11002_v29 = vcombine.high %v2957_v24, %v2965_v25  ;;  %v2973_v31 = vld [vmem:[%s15945_s5 + $0x1480] sm:$0xff] }
 0x251   :  { %v10924_v47 = vcombine.high %v2878_v39, %v2886_v40  ;;  %v2981_v32 = vld [vmem:[%s15945_s5 + $0x14c0] sm:$0xff] }
 0x253   :  { %8613 = vmatpush1.bf16.msra.mxu0 %v10809_v50  ;;  %8785 = vmatpush1.bf16.msra.mxu1 %v10811_v51  ;;  %v2894_v50 = vld [vmem:[%s15945_s5 + $0x1208] sm:$0xff] }
 0x254   :  { %8614 = vmatprep.subr.bf16.mxu0 %v10826_v53  ;;  %8786 = vmatprep.subr.bf16.mxu1 %v10828_v54  ;;  %v2902_v51 = vld [vmem:[%s15945_s5 + $0x1248] sm:$0xff]  ;;  %v10921_v53 = vcombine.low %v2877_v37, %v2885_v38  ;;  %v10923_v54 = vcombine.low %v2878_v39, %v2886_v40  ;;  %v11018_v37 = vcombine.high %v2973_v31, %v2981_v32  ;;  %v2989_v39 = vld [vmem:[%s15945_s5 + $0x1500] sm:$0xff] }
 0x255   :  { %v10940_v57 = vcombine.high %v2894_v50, %v2902_v51  ;;  %v2997_v40 = vld [vmem:[%s15945_s5 + $0x1540] sm:$0xff] }
 0x257   :  { %8615 = vmatpush1.bf16.msra.mxu0 %v10825_v61  ;;  %8787 = vmatpush1.bf16.msra.mxu1 %v10827_v9  ;;  %v2910_v61 = vld [vmem:[%s15945_s5 + $0x1288] sm:$0xff] }
 0x258   :  { %8616 = vmatprep.subr.bf16.mxu0 %v10842_v1  ;;  %8788 = vmatprep.subr.bf16.mxu1 %v10844_v2  ;;  %v2918_v9 = vld [vmem:[%s15945_s5 + $0x12c8] sm:$0xff]  ;;  %v10937_v1 = vcombine.low %v2893_v48, %v2901_v49  ;;  %v10939_v2 = vcombine.low %v2894_v50, %v2902_v51  ;;  %v11034_v48 = vcombine.high %v2989_v39, %v2997_v40  ;;  %v3005_v50 = vld [vmem:[%s15945_s5 + $0x1580] sm:$0xff] }
 0x259   :  { %v10956_v6 = vcombine.high %v2910_v61, %v2918_v9  ;;  %v3013_v51 = vld [vmem:[%s15945_s5 + $0x15c0] sm:$0xff] }
 0x25b   :  { %8617 = vmatpush1.bf16.msra.mxu0 %v10841_v11  ;;  %8789 = vmatpush1.bf16.msra.mxu1 %v10843_v12  ;;  %v2926_v11 = vld [vmem:[%s15945_s5 + $0x1308] sm:$0xff] }
 0x25c   :  { %8618 = vmatprep.subr.bf16.mxu0 %v10858_v13  ;;  %8790 = vmatprep.subr.bf16.mxu1 %v10860_v14  ;;  %v2934_v12 = vld [vmem:[%s15945_s5 + $0x1348] sm:$0xff]  ;;  %v10953_v13 = vcombine.low %v2909_v58, %v2917_v59  ;;  %v10955_v14 = vcombine.low %v2910_v61, %v2918_v9  ;;  %v11050_v58 = vcombine.high %v3005_v50, %v3013_v51  ;;  %v3021_v61 = vld [vmem:[%s15945_s5 + $0x1600] sm:$0xff] }
 0x25d   :  { %v10972_v16 = vcombine.high %v2926_v11, %v2934_v12  ;;  %v3029_v9 = vld [vmem:[%s15945_s5 + $0x1640] sm:$0xff] }
 0x25f   :  { %8619 = vmatpush1.bf16.msra.mxu0 %v10857_v55  ;;  %8791 = vmatpush1.bf16.msra.mxu1 %v10859_v18  ;;  %v2942_v55 = vld [vmem:[%s15945_s5 + $0x1388] sm:$0xff] }
 0x260   :  { %8631 = vmatprep.subr.bf16.mxu0 %v10874_v20  ;;  %8803 = vmatprep.subr.bf16.mxu1 %v10876_v21  ;;  %v2950_v18 = vld [vmem:[%s15945_s5 + $0x13c8] sm:$0xff]  ;;  %v10969_v20 = vcombine.low %v2925_v8, %v2933_v10  ;;  %v10971_v21 = vcombine.low %v2926_v11, %v2934_v12  ;;  %v11066_v8 = vcombine.high %v3021_v61, %v3029_v9  ;;  %v3037_v11 = vld [vmem:[%s15945_s5 + $0x1680] sm:$0xff] }
 0x261   :  { %v10988_v23 = vcombine.high %v2942_v55, %v2950_v18  ;;  %v3045_v12 = vld [vmem:[%s15945_s5 + $0x16c0] sm:$0xff] }
 0x262   :  { %8621 = vmatmul.mubr.bf16.vlgmr.msra.gmra.mrb[12].mxu0 %v12879_v0  ;;  %8793 = vmatmul.mubr.bf16.vlgmr.msra.gmra.mrb[12].mxu1 %v12879_v0 }
 0x263   :  { %8632 = vmatpush1.bf16.msra.mxu0 %v10873_v26  ;;  %8804 = vmatpush1.bf16.msra.mxu1 %v10875_v52  ;;  %v2958_v26 = vld [vmem:[%s15945_s5 + $0x1408] sm:$0xff] }
 0x264   :  { %8633 = vmatprep.subr.bf16.mxu0 %v10890_v27  ;;  %8805 = vmatprep.subr.bf16.mxu1 %v10892_v28  ;;  %v2966_v52 = vld [vmem:[%s15945_s5 + $0x1448] sm:$0xff]  ;;  %v10985_v27 = vcombine.low %v2941_v7, %v2949_v17  ;;  %v10987_v28 = vcombine.low %v2942_v55, %v2950_v18  ;;  %v11065_v7 = vcombine.low %v3021_v61, %v3029_v9  ;;  %v13249_v55 = vsub.s32 5, %v12036_v43 }
 0x265   :  { %v11004_v30 = vcombine.high %v2958_v26, %v2966_v52  ;;  %v11082_v18 = vcombine.high %v3037_v11, %v3045_v12 }
 0x267   :  { %8634 = vmatpush1.bf16.msra.mxu0 %v10889_v33  ;;  %8806 = vmatpush1.bf16.msra.mxu1 %v10891_v34  ;;  %v2974_v33 = vld [vmem:[%s15945_s5 + $0x1488] sm:$0xff] }
 0x268   :  { %8635 = vmatprep.subr.bf16.mxu0 %v10906_v35  ;;  %8807 = vmatprep.subr.bf16.mxu1 %v10908_v36  ;;  %v2982_v34 = vld [vmem:[%s15945_s5 + $0x14c8] sm:$0xff]  ;;  %v11001_v35 = vcombine.low %v2957_v24, %v2965_v25  ;;  %v11003_v36 = vcombine.low %v2958_v26, %v2966_v52  ;;  %v11081_v52 = vcombine.low %v3037_v11, %v3045_v12 }
 0x269   :  { %v11020_v38 = vcombine.high %v2974_v33, %v2982_v34  ;;  %v3054_v24 = vld [vmem:[%s15945_s5 + $0x1708] sm:$0xff] }
 0x26a   :  { %v3062_v25 = vld [vmem:[%s15945_s5 + $0x1748] sm:$0xff] }
 0x26b   :  { %8636 = vmatpush1.bf16.msra.mxu0 %v10905_v41  ;;  %8808 = vmatpush1.bf16.msra.mxu1 %v10907_v42  ;;  %v2990_v41 = vld [vmem:[%s15945_s5 + $0x1508] sm:$0xff] }
 0x26c   :  { %8637 = vmatprep.subr.bf16.mxu0 %v10922_v45  ;;  %8809 = vmatprep.subr.bf16.mxu1 %v10924_v47  ;;  %v2998_v42 = vld [vmem:[%s15945_s5 + $0x1548] sm:$0xff]  ;;  %v11017_v45 = vcombine.low %v2973_v31, %v2981_v32  ;;  %v11019_v47 = vcombine.low %v2974_v33, %v2982_v34  ;;  %v11100_v31 = vcombine.high %v3054_v24, %v3062_v25  ;;  %v13277_v32 = vld [vmem:[%s15945_s5 + $0x1780] sm:$0xff] }
 0x26d   :  { %v11036_v49 = vcombine.high %v2990_v41, %v2998_v42  ;;  %v13282_v33 = vld [vmem:[%s15945_s5 + $0x17c0] sm:$0xff] }
 0x26e   :  { %v11113_v12 = vcombine.low %v13277_v32, %v13282_v33 }
 0x26f   :  { %8638 = vmatpush1.bf16.msra.mxu0 %v10921_v53  ;;  %8810 = vmatpush1.bf16.msra.mxu1 %v10923_v54  ;;  %v3006_v53 = vld [vmem:[%s15945_s5 + $0x1588] sm:$0xff] }
 0x270   :  { %8639 = vmatprep.subr.bf16.mxu0 %v10938_v56  ;;  %8811 = vmatprep.subr.bf16.mxu1 %v10940_v57  ;;  %v3014_v54 = vld [vmem:[%s15945_s5 + $0x15c8] sm:$0xff]  ;;  %v11033_v56 = vcombine.low %v2989_v39, %v2997_v40  ;;  %v11035_v57 = vcombine.low %v2990_v41, %v2998_v42  ;;  %v11099_v40 = vcombine.low %v3054_v24, %v3062_v25 }
 0x271   :  { %v11052_v59 = vcombine.high %v3006_v53, %v3014_v54 }
 0x273   :  { %8640 = vmatpush1.bf16.msra.mxu0 %v10937_v1  ;;  %8812 = vmatpush1.bf16.msra.mxu1 %v10939_v2  ;;  %v3022_v1 = vld [vmem:[%s15945_s5 + $0x1608] sm:$0xff] }
 0x274   :  { %8641 = vmatprep.subr.bf16.mxu0 %v10954_v5  ;;  %8813 = vmatprep.subr.bf16.mxu1 %v10956_v6  ;;  %v3030_v2 = vld [vmem:[%s15945_s5 + $0x1648] sm:$0xff]  ;;  %v11049_v5 = vcombine.low %v3005_v50, %v3013_v51  ;;  %v11051_v6 = vcombine.low %v3006_v53, %v3014_v54 }
 0x275   :  { %v11068_v10 = vcombine.high %v3022_v1, %v3030_v2  ;;  %v11067_v17 = vcombine.low %v3022_v1, %v3030_v2 }
 0x277   :  { %8642 = vmatpush1.bf16.msra.mxu0 %v10953_v13  ;;  %8814 = vmatpush1.bf16.msra.mxu1 %v10955_v14  ;;  %v3038_v13 = vld [vmem:[%s15945_s5 + $0x1688] sm:$0xff] }
 0x278   :  { %8643 = vmatprep.subr.bf16.mxu0 %v10970_v15  ;;  %8815 = vmatprep.subr.bf16.mxu1 %v10972_v16  ;;  %v3046_v14 = vld [vmem:[%s15945_s5 + $0x16c8] sm:$0xff]  ;;  %v13243_v15 = vsub.s32 4, %v12036_v43  ;;  %v13246_v16 = vsub.s32 6, %v12036_v43 }
 0x27a   :  { %v640_v26 = vrot.slane %v12864_v19, %v13246_v16 }
 0x27b   :  { %8644 = vmatpush1.bf16.msra.mxu0 %v10969_v20  ;;  %8816 = vmatpush1.bf16.msra.mxu1 %v10971_v21  ;;  %v11084_v20 = vcombine.high %v3038_v13, %v3046_v14  ;;  %v13252_v21 = vsub.s32 7, %v12036_v43  ;;  %v632_v43 = vrot.slane %v12864_v19, %v13243_v15 }
 0x27c   :  { %8645 = vmatprep.subr.bf16.mxu0 %v10986_v22  ;;  %8817 = vmatprep.subr.bf16.mxu1 %v10988_v23  ;;  %v3053_v22 = vld [vmem:[%s15945_s5 + $0x1700] sm:$0xff] }
 0x27d   :  { %v3061_v23 = vld [vmem:[%s15945_s5 + $0x1740] sm:$0xff] }
 0x27e   :  { %v11097_v39 = vcombine.low %v3053_v22, %v3061_v23 }
 0x27f   :  { %8646 = vmatpush1.bf16.msra.mxu0 %v10985_v27  ;;  %8818 = vmatpush1.bf16.msra.mxu1 %v10987_v28  ;;  %v11083_v27 = vcombine.low %v3038_v13, %v3046_v14  ;;  %v636_v28 = vrot.slane %v12864_v19, %v13249_v55 }
 0x280   :  { %8647 = vmatprep.subr.bf16.mxu0 %v11002_v29  ;;  %8819 = vmatprep.subr.bf16.mxu1 %v11004_v30  ;;  %v644_v29 = vrot.slane %v12864_v19, %v13252_v21  ;;  %v11098_v30 = vcombine.high %v3053_v22, %v3061_v23  ;;  %v3078_v19 = vld [vmem:[%s15945_s5 + $0x17c8] sm:$0xff] }
 0x283   :  { %8648 = vmatpush1.bf16.msra.mxu0 %v11001_v35  ;;  %8820 = vmatpush1.bf16.msra.mxu1 %v11003_v36  ;;  %v3070_v35 = vld [vmem:[%s15945_s5 + $0x1788] sm:$0xff] }
 0x284   :  { %8649 = vmatprep.subr.bf16.mxu0 %v11018_v37  ;;  %8821 = vmatprep.subr.bf16.mxu1 %v11020_v38 }
 0x287   :  { %8650 = vmatpush1.bf16.msra.mxu0 %v11017_v45  ;;  %8822 = vmatpush1.bf16.msra.mxu1 %v11019_v47 }
 0x288   :  { %8651 = vmatprep.subr.bf16.mxu0 %v11034_v48  ;;  %8823 = vmatprep.subr.bf16.mxu1 %v11036_v49  ;;  %v11114_v48 = vcombine.high %v13277_v32, %v13282_v33  ;;  %v13295_v49 = vld [vmem:[%s15945_s5 + $0x1800] sm:$0xff]  ;;  %v3102_v32 = vld [vmem:[%s15945_s5 + $0x1888] sm:$0xff] }
 0x289   :  { %v3110_v33 = vld [vmem:[%s15945_s5 + $0x18c8] sm:$0xff] }
 0x28b   :  { %8652 = vmatpush1.bf16.msra.mxu0 %v11033_v56  ;;  %8824 = vmatpush1.bf16.msra.mxu1 %v11035_v57  ;;  %v11116_v57 = vcombine.high %v3070_v35, %v3078_v19 }
 0x28c   :  { %8653 = vmatprep.subr.bf16.mxu0 %v11050_v58  ;;  %8825 = vmatprep.subr.bf16.mxu1 %v11052_v59  ;;  %v3093_v58 = vld [vmem:[%s15945_s5 + $0x1840] sm:$0xff]  ;;  %v3086_v59 = vld [vmem:[%s15945_s5 + $0x1808] sm:$0xff] }
 0x28f   :  { %8654 = vmatpush1.bf16.msra.mxu0 %v11049_v5  ;;  %8826 = vmatpush1.bf16.msra.mxu1 %v11051_v6  ;;  %v3094_v6 = vld [vmem:[%s15945_s5 + $0x1848] sm:$0xff] }
 0x290   :  { %8655 = vmatprep.subr.bf16.mxu0 %v11066_v8  ;;  %8827 = vmatprep.subr.bf16.mxu1 %v11068_v10  ;;  %v11132_v23 = vcombine.high %v3086_v59, %v3094_v6 }
 0x293   :  { %8656 = vmatpush1.bf16.msra.mxu0 %v11065_v7  ;;  %8828 = vmatpush1.bf16.msra.mxu1 %v11067_v17  ;;  %v11115_v7 = vcombine.low %v3070_v35, %v3078_v19  ;;  %v11130_v17 = vcombine.high %v13295_v49, %v3093_v58  ;;  %v11131_v19 = vcombine.low %v3086_v59, %v3094_v6 }
 0x294   :  { %8657 = vmatprep.subr.bf16.mxu0 %v11082_v18  ;;  %8829 = vmatprep.subr.bf16.mxu1 %v11084_v20 }
 0x295   :  { %v2182_v34 = vpop.f32.mrb[8].mxu0 }
 0x296   :  { %v11425_v36 = vadd.f32 %v2182_v34, %v632_v43  ;;  %v2268_v37 = vpop.f32.mrb[8].mxu1  ;;  %v2184_v38 = vpop.f32.mrb[9].mxu0 }
 0x297   :  { %v11429_v41 = vadd.f32 %v2268_v37, %v640_v26  ;;  %v11426_v42 = vadd.f32 %v2184_v38, %v636_v28  ;;  %v2270_v45 = vpop.f32.mrb[9].mxu1  ;;  %8658 = vmatpush1.bf16.msra.mxu0 %v11081_v52  ;;  %8830 = vmatpush1.bf16.msra.mxu1 %v11083_v27  ;;  %v2186_v47 = vpop.f32.mrb[10].mxu0  ;;  %v3101_v52 = vld [vmem:[%s15945_s5 + $0x1880] sm:$0xff] }
 0x298   :  { %v2281_v50 = vmul.f32 0.2, %v11425_v36  ;;  %v11430_v51 = vadd.f32 %v2270_v45, %v644_v29  ;;  %v11427_v53 = vadd.f32 %v2186_v47, %v632_v43  ;;  %v2272_v54 = vpop.f32.mrb[10].mxu1  ;;  %v2188_v56 = vpop.f32.mrb[11].mxu0  ;;  %8659 = vmatprep.subr.bf16.mxu0 %v11098_v30  ;;  %8831 = vmatprep.subr.bf16.mxu1 %v11100_v31  ;;  %v11129_v30 = vcombine.low %v13295_v49, %v3093_v58  ;;  %v3109_v31 = vld [vmem:[%s15945_s5 + $0x18c0] sm:$0xff] }
 0x299   :  { %v2283_v61 = vmul.f32 0.2, %v11429_v41  ;;  %v2282_v9 = vmul.f32 0.2, %v11426_v42  ;;  %v11431_v1 = vadd.f32 %v2272_v54, %v640_v26  ;;  %v11428_v2 = vadd.f32 %v2188_v56, %v636_v28  ;;  %v2274_v5 = vpop.f32.mrb[11].mxu1  ;;  %v3117_v37 = vld [vmem:[%s15945_s5 + $0x1900] sm:$0xff] }
 0x29a   :  { %v2284_v8 = vmul.f32 0.2, %v11430_v51  ;;  %v2289_v10 = vmul.f32 0.2, %v11427_v53  ;;  %v11432_v11 = vadd.f32 %v2274_v5, %v644_v29  ;;  %v2297_v18 = vmax.f32 %v11425_v36, %v2281_v50  ;;  %v3133_v50 = vld [vmem:[%s15945_s5 + $0x1980] sm:$0xff]  ;;  %v3142_v54 = vld [vmem:[%s15945_s5 + $0x19c8] sm:$0xff] }
 0x29b   :  { %v2291_v13 = vmul.f32 0.2, %v11431_v1  ;;  %v2290_v14 = vmul.f32 0.2, %v11428_v2  ;;  %8660 = vmatpush1.bf16.msra.mxu0 %v11097_v39  ;;  %8832 = vmatpush1.bf16.msra.mxu1 %v11099_v40  ;;  %v2299_v24 = vmax.f32 %v11429_v41, %v2283_v61  ;;  %v2298_v25 = vmax.f32 %v11426_v42, %v2282_v9  ;;  %v3125_v40 = vld [vmem:[%s15945_s5 + $0x1940] sm:$0xff]  ;;  %v3118_v41 = vld [vmem:[%s15945_s5 + $0x1908] sm:$0xff] }
 0x29c   :  { %v2305_v20 = vmax.f32 %v11427_v53, %v2289_v10  ;;  %v2292_v22 = vmul.f32 0.2, %v11432_v11  ;;  %8661 = vmatprep.subr.bf16.mxu0 %v11114_v48  ;;  %8833 = vmatprep.subr.bf16.mxu1 %v11116_v57  ;;  %v2300_v27 = vmax.f32 %v11430_v51, %v2284_v8  ;;  %v11146_v38 = vcombine.high %v3101_v52, %v3109_v31  ;;  %v3126_v42 = vld [vmem:[%s15945_s5 + $0x1948] sm:$0xff]  ;;  %v3141_v51 = vld [vmem:[%s15945_s5 + $0x19c0] sm:$0xff] }
 0x29d   :  { %v2307_v43 = vmax.f32 %v11431_v1, %v2291_v13  ;;  %v2306_v26 = vmax.f32 %v11428_v2, %v2290_v14  ;;  %v11148_v39 = vcombine.high %v3102_v32, %v3110_v33  ;;  %v11145_v45 = vcombine.low %v3101_v52, %v3109_v31  ;;  %v3134_v53 = vld [vmem:[%s15945_s5 + $0x1988] sm:$0xff]  ;;  %v3149_v61 = vld [vmem:[%s15945_s5 + $0x1a00] sm:$0xff] }
 0x29e   :  { %v13312_v28 = vpack.c.bf16 %v2305_v20, %v2297_v18  ;;  %v2308_v29 = vmax.f32 %v11432_v11, %v2292_v22  ;;  %v11147_v47 = vcombine.low %v3102_v32, %v3110_v33  ;;  %v11162_v48 = vcombine.high %v3117_v37, %v3125_v40  ;;  %v3157_v9 = vld [vmem:[%s15945_s5 + $0x1a40] sm:$0xff]  ;;  %v3150_v1 = vld [vmem:[%s15945_s5 + $0x1a08] sm:$0xff] }
 0x29f   :  { %v13324_v34 = vpack.c.bf16 %v2307_v43, %v2299_v24  ;;  %v13326_v35 = vpack.c.bf16 %v2306_v26, %v2298_v25  ;;  %8662 = vmatpush1.bf16.msra.mxu0 %v11113_v12  ;;  %8834 = vmatpush1.bf16.msra.mxu1 %v11115_v7  ;;  %v11164_v49 = vcombine.high %v3118_v41, %v3126_v42  ;;  %v3158_v2 = vld [vmem:[%s15945_s5 + $0x1a48] sm:$0xff]  ;;  %v3165_v11 = vld [vmem:[%s15945_s5 + $0x1a80] sm:$0xff] }
 0x2a0   :  { %v13328_v36 = vpack.c.bf16 %v2308_v29, %v2300_v27  ;;  %8674 = vmatprep.subr.bf16.mxu0 %v11130_v17  ;;  %8846 = vmatprep.subr.bf16.mxu1 %v11132_v23  ;;  %v11161_v56 = vcombine.low %v3117_v37, %v3125_v40  ;;  %v11163_v57 = vcombine.low %v3118_v41, %v3126_v42  ;;  %v3173_v12 = vld [vmem:[%s15945_s5 + $0x1ac0] sm:$0xff]  ;;  %v3166_v13 = vld [vmem:[%s15945_s5 + $0x1a88] sm:$0xff] }
 0x2a1   :  { %8663 = vmatprep.mubr.bf16.mxu0 %v13326_v35  ;;  %8835 = vmatprep.mubr.bf16.mxu1 %v13326_v35  ;;  %v11178_v58 = vcombine.high %v3133_v50, %v3141_v51  ;;  %v11180_v59 = vcombine.high %v3134_v53, %v3142_v54  ;;  %v11177_v5 = vcombine.low %v3133_v50, %v3141_v51  ;;  %v3174_v14 = vld [vmem:[%s15945_s5 + $0x1ac8] sm:$0xff]  ;;  %v3181_v22 = vld [vmem:[%s15945_s5 + $0x1b00] sm:$0xff] }
 0x2a2   :  { %8664 = vmatmul.mubr.bf16.vlgmr.msra.gmra.mrb[12].mxu0 %v13312_v28  ;;  %8836 = vmatmul.mubr.bf16.vlgmr.msra.gmra.mrb[12].mxu1 %v13312_v28  ;;  %v11179_v6 = vcombine.low %v3134_v53, %v3142_v54  ;;  %v11194_v8 = vcombine.high %v3149_v61, %v3157_v9  ;;  %v11196_v10 = vcombine.high %v3150_v1, %v3158_v2  ;;  %v3189_v23 = vld [vmem:[%s15945_s5 + $0x1b40] sm:$0xff]  ;;  %v3182_v24 = vld [vmem:[%s15945_s5 + $0x1b08] sm:$0xff] }
 0x2a3   :  { %8675 = vmatpush1.bf16.msra.mxu0 %v11129_v30  ;;  %8847 = vmatpush1.bf16.msra.mxu1 %v11131_v19  ;;  %v11193_v7 = vcombine.low %v3149_v61, %v3157_v9  ;;  %v11195_v17 = vcombine.low %v3150_v1, %v3158_v2  ;;  %v11210_v18 = vcombine.high %v3165_v11, %v3173_v12  ;;  %v3190_v25 = vld [vmem:[%s15945_s5 + $0x1b48] sm:$0xff]  ;;  %v3197_v29 = vld [vmem:[%s15945_s5 + $0x1b80] sm:$0xff] }
 0x2a4   :  { %8706 = vmatprep.mubr.bf16.mxu0 %v13328_v36  ;;  %8878 = vmatprep.mubr.bf16.mxu1 %v13328_v36  ;;  %v11212_v20 = vcombine.high %v3166_v13, %v3174_v14  ;;  %v11209_v43 = vcombine.low %v3165_v11, %v3173_v12  ;;  %v11211_v26 = vcombine.low %v3166_v13, %v3174_v14  ;;  %v3205_v30 = vld [vmem:[%s15945_s5 + $0x1bc0] sm:$0xff]  ;;  %v3198_v31 = vld [vmem:[%s15945_s5 + $0x1b88] sm:$0xff] }
 0x2a5   :  { %8676 = vmatprep.subr.bf16.mxu0 %v11146_v38  ;;  %8848 = vmatprep.subr.bf16.mxu1 %v11148_v39  ;;  %v11226_v52 = vcombine.high %v3181_v22, %v3189_v23  ;;  %v11228_v27 = vcombine.high %v3182_v24, %v3190_v25  ;;  %v3206_v32 = vld [vmem:[%s15945_s5 + $0x1bc8] sm:$0xff]  ;;  %v11225_v33 = vcombine.low %v3181_v22, %v3189_v23  ;;  %v3213_v39 = vld [vmem:[%s15945_s5 + $0x1c00] sm:$0xff] }
 0x2a6   :  { %v11227_v19 = vcombine.low %v3182_v24, %v3190_v25  ;;  %v11242_v37 = vcombine.high %v3197_v29, %v3205_v30  ;;  %v11244_v38 = vcombine.high %v3198_v31, %v3206_v32  ;;  %v3221_v40 = vld [vmem:[%s15945_s5 + $0x1c40] sm:$0xff]  ;;  %v3214_v41 = vld [vmem:[%s15945_s5 + $0x1c08] sm:$0xff] }
 0x2a7   :  { %8677 = vmatpush1.bf16.msra.mxu0 %v11145_v45  ;;  %8849 = vmatpush1.bf16.msra.mxu1 %v11147_v47  ;;  %v3222_v42 = vld [vmem:[%s15945_s5 + $0x1c48] sm:$0xff]  ;;  %v11241_v45 = vcombine.low %v3197_v29, %v3205_v30  ;;  %v11243_v47 = vcombine.low %v3198_v31, %v3206_v32  ;;  %v3229_v50 = vld [vmem:[%s15945_s5 + $0x1c80] sm:$0xff] }
 0x2a8   :  { %8678 = vmatprep.subr.bf16.mxu0 %v11162_v48  ;;  %8850 = vmatprep.subr.bf16.mxu1 %v11164_v49  ;;  %v11258_v48 = vcombine.high %v3213_v39, %v3221_v40  ;;  %v11260_v49 = vcombine.high %v3214_v41, %v3222_v42  ;;  %v3237_v51 = vld [vmem:[%s15945_s5 + $0x1cc0] sm:$0xff]  ;;  %v3230_v53 = vld [vmem:[%s15945_s5 + $0x1c88] sm:$0xff] }
 0x2a9   :  { %v3238_v54 = vld [vmem:[%s15945_s5 + $0x1cc8] sm:$0xff]  ;;  %v3245_v61 = vld [vmem:[%s15945_s5 + $0x1d00] sm:$0xff] }
 0x2aa   :  { %v3253_v9 = vld [vmem:[%s15945_s5 + $0x1d40] sm:$0xff]  ;;  %v3246_v1 = vld [vmem:[%s15945_s5 + $0x1d08] sm:$0xff] }
 0x2ab   :  { %8679 = vmatpush1.bf16.msra.mxu0 %v11161_v56  ;;  %8851 = vmatpush1.bf16.msra.mxu1 %v11163_v57  ;;  %v11257_v56 = vcombine.low %v3213_v39, %v3221_v40  ;;  %v11259_v57 = vcombine.low %v3214_v41, %v3222_v42  ;;  %v3254_v2 = vld [vmem:[%s15945_s5 + $0x1d48] sm:$0xff]  ;;  %v3261_v11 = vld [vmem:[%s15945_s5 + $0x1d80] sm:$0xff] }
 0x2ac   :  { %8680 = vmatprep.subr.bf16.mxu0 %v11178_v58  ;;  %8852 = vmatprep.subr.bf16.mxu1 %v11180_v59  ;;  %v11274_v58 = vcombine.high %v3229_v50, %v3237_v51  ;;  %v11276_v59 = vcombine.high %v3230_v53, %v3238_v54  ;;  %v3269_v12 = vld [vmem:[%s15945_s5 + $0x1dc0] sm:$0xff]  ;;  %v3262_v13 = vld [vmem:[%s15945_s5 + $0x1d88] sm:$0xff] }
 0x2ad   :  { %v3270_v14 = vld [vmem:[%s15945_s5 + $0x1dc8] sm:$0xff]  ;;  %v3277_v22 = vld [vmem:[%s15945_s5 + $0x1e00] sm:$0xff] }
 0x2ae   :  { %v3285_v23 = vld [vmem:[%s15945_s5 + $0x1e40] sm:$0xff]  ;;  %v3278_v24 = vld [vmem:[%s15945_s5 + $0x1e08] sm:$0xff] }
 0x2af   :  { %8681 = vmatpush1.bf16.msra.mxu0 %v11177_v5  ;;  %8853 = vmatpush1.bf16.msra.mxu1 %v11179_v6  ;;  %v11273_v5 = vcombine.low %v3229_v50, %v3237_v51  ;;  %v11275_v6 = vcombine.low %v3230_v53, %v3238_v54  ;;  %v3286_v25 = vld [vmem:[%s15945_s5 + $0x1e48] sm:$0xff]  ;;  %v3293_v29 = vld [vmem:[%s15945_s5 + $0x1e80] sm:$0xff] }
 0x2b0   :  { %8682 = vmatprep.subr.bf16.mxu0 %v11194_v8  ;;  %8854 = vmatprep.subr.bf16.mxu1 %v11196_v10  ;;  %v11290_v8 = vcombine.high %v3245_v61, %v3253_v9  ;;  %v11292_v10 = vcombine.high %v3246_v1, %v3254_v2  ;;  %v3301_v30 = vld [vmem:[%s15945_s5 + $0x1ec0] sm:$0xff]  ;;  %v3294_v31 = vld [vmem:[%s15945_s5 + $0x1e88] sm:$0xff] }
 0x2b1   :  { %v3302_v32 = vld [vmem:[%s15945_s5 + $0x1ec8] sm:$0xff]  ;;  %v3309_v39 = vld [vmem:[%s15945_s5 + $0x1f00] sm:$0xff] }
 0x2b2   :  { %v3317_v40 = vld [vmem:[%s15945_s5 + $0x1f40] sm:$0xff]  ;;  %v3310_v41 = vld [vmem:[%s15945_s5 + $0x1f08] sm:$0xff] }
 0x2b3   :  { %8683 = vmatpush1.bf16.msra.mxu0 %v11193_v7  ;;  %8855 = vmatpush1.bf16.msra.mxu1 %v11195_v17  ;;  %v11289_v7 = vcombine.low %v3245_v61, %v3253_v9  ;;  %v11291_v17 = vcombine.low %v3246_v1, %v3254_v2  ;;  %v3318_v42 = vld [vmem:[%s15945_s5 + $0x1f48] sm:$0xff]  ;;  %v3325_v50 = vld [vmem:[%s15945_s5 + $0x1f80] sm:$0xff]  ;;  %v2319_v61 = vld [vmem:[%s15945_s5 + $0x10] sm:$0xff] }
 0x2b4   :  { %8684 = vmatprep.subr.bf16.mxu0 %v11210_v18  ;;  %8856 = vmatprep.subr.bf16.mxu1 %v11212_v20  ;;  %v11306_v18 = vcombine.high %v3261_v11, %v3269_v12  ;;  %v11308_v20 = vcombine.high %v3262_v13, %v3270_v14  ;;  %v3333_v51 = vld [vmem:[%s15945_s5 + $0x1fc0] sm:$0xff]  ;;  %v3326_v53 = vld [vmem:[%s15945_s5 + $0x1f88] sm:$0xff]  ;;  %v2327_v9 = vld [vmem:[%s15945_s5 + $0x50] sm:$0xff] }
 0x2b5   :  { %v3334_v54 = vld [vmem:[%s15945_s5 + $0x1fc8] sm:$0xff]  ;;  %v2320_v1 = vld [vmem:[%s15945_s5 + $0x18] sm:$0xff] }
 0x2b6   :  { %v2328_v2 = vld [vmem:[%s15945_s5 + $0x58] sm:$0xff] }
 0x2b7   :  { %8685 = vmatpush1.bf16.msra.mxu0 %v11209_v43  ;;  %8857 = vmatpush1.bf16.msra.mxu1 %v11211_v26  ;;  %v11305_v43 = vcombine.low %v3261_v11, %v3269_v12  ;;  %v11307_v26 = vcombine.low %v3262_v13, %v3270_v14  ;;  %v2335_v11 = vld [vmem:[%s15945_s5 + $0x90] sm:$0xff]  ;;  %v2336_v13 = vld [vmem:[%s15945_s5 + $0x98] sm:$0xff] }
 0x2b8   :  { %8686 = vmatprep.subr.bf16.mxu0 %v11226_v52  ;;  %8858 = vmatprep.subr.bf16.mxu1 %v11228_v27  ;;  %v11322_v52 = vcombine.high %v3277_v22, %v3285_v23  ;;  %v11324_v27 = vcombine.high %v3278_v24, %v3286_v25  ;;  %v2343_v12 = vld [vmem:[%s15945_s5 + $0xd0] sm:$0xff]  ;;  %v2344_v14 = vld [vmem:[%s15945_s5 + $0xd8] sm:$0xff] }
 0x2bb   :  { %8687 = vmatpush1.bf16.msra.mxu0 %v11225_v33  ;;  %8859 = vmatpush1.bf16.msra.mxu1 %v11227_v19  ;;  %v11321_v33 = vcombine.low %v3277_v22, %v3285_v23  ;;  %v11323_v19 = vcombine.low %v3278_v24, %v3286_v25  ;;  %v2351_v22 = vld [vmem:[%s15945_s5 + $0x110] sm:$0xff]  ;;  %v2352_v24 = vld [vmem:[%s15945_s5 + $0x118] sm:$0xff] }
 0x2bc   :  { %8688 = vmatprep.subr.bf16.mxu0 %v11242_v37  ;;  %8860 = vmatprep.subr.bf16.mxu1 %v11244_v38  ;;  %v11338_v37 = vcombine.high %v3293_v29, %v3301_v30  ;;  %v11340_v38 = vcombine.high %v3294_v31, %v3302_v32  ;;  %v2359_v23 = vld [vmem:[%s15945_s5 + $0x150] sm:$0xff]  ;;  %v2360_v25 = vld [vmem:[%s15945_s5 + $0x158] sm:$0xff] }
 0x2bf   :  { %8689 = vmatpush1.bf16.msra.mxu0 %v11241_v45  ;;  %8861 = vmatpush1.bf16.msra.mxu1 %v11243_v47  ;;  %v11337_v45 = vcombine.low %v3293_v29, %v3301_v30  ;;  %v11339_v47 = vcombine.low %v3294_v31, %v3302_v32  ;;  %v2367_v29 = vld [vmem:[%s15945_s5 + $0x190] sm:$0xff]  ;;  %v2368_v31 = vld [vmem:[%s15945_s5 + $0x198] sm:$0xff] }
 0x2c0   :  { %8690 = vmatprep.subr.bf16.mxu0 %v11258_v48  ;;  %8862 = vmatprep.subr.bf16.mxu1 %v11260_v49  ;;  %v11354_v48 = vcombine.high %v3309_v39, %v3317_v40  ;;  %v11356_v49 = vcombine.high %v3310_v41, %v3318_v42  ;;  %v2375_v30 = vld [vmem:[%s15945_s5 + $0x1d0] sm:$0xff]  ;;  %v2376_v32 = vld [vmem:[%s15945_s5 + $0x1d8] sm:$0xff] }
 0x2c3   :  { %8691 = vmatpush1.bf16.msra.mxu0 %v11257_v56  ;;  %8863 = vmatpush1.bf16.msra.mxu1 %v11259_v57  ;;  %v11353_v56 = vcombine.low %v3309_v39, %v3317_v40  ;;  %v11355_v57 = vcombine.low %v3310_v41, %v3318_v42  ;;  %v2383_v39 = vld [vmem:[%s15945_s5 + $0x210] sm:$0xff]  ;;  %v2384_v41 = vld [vmem:[%s15945_s5 + $0x218] sm:$0xff] }
 0x2c4   :  { %8692 = vmatprep.subr.bf16.mxu0 %v11274_v58  ;;  %8864 = vmatprep.subr.bf16.mxu1 %v11276_v59  ;;  %v11370_v58 = vcombine.high %v3325_v50, %v3333_v51  ;;  %v11372_v59 = vcombine.high %v3326_v53, %v3334_v54  ;;  %v2391_v40 = vld [vmem:[%s15945_s5 + $0x250] sm:$0xff]  ;;  %v2392_v42 = vld [vmem:[%s15945_s5 + $0x258] sm:$0xff] }
 0x2c7   :  { %8693 = vmatpush1.bf16.msra.mxu0 %v11273_v5  ;;  %8865 = vmatpush1.bf16.msra.mxu1 %v11275_v6  ;;  %v11369_v5 = vcombine.low %v3325_v50, %v3333_v51  ;;  %v11371_v6 = vcombine.low %v3326_v53, %v3334_v54  ;;  %v2399_v50 = vld [vmem:[%s15945_s5 + $0x290] sm:$0xff]  ;;  %v2400_v53 = vld [vmem:[%s15945_s5 + $0x298] sm:$0xff] }
 0x2c8   :  { %8694 = vmatprep.subr.bf16.mxu0 %v11290_v8  ;;  %8866 = vmatprep.subr.bf16.mxu1 %v11292_v10  ;;  %v10366_v8 = vcombine.high %v2319_v61, %v2327_v9  ;;  %v10368_v10 = vcombine.high %v2320_v1, %v2328_v2  ;;  %v2407_v51 = vld [vmem:[%s15945_s5 + $0x2d0] sm:$0xff]  ;;  %v2408_v54 = vld [vmem:[%s15945_s5 + $0x2d8] sm:$0xff] }
 0x2cb   :  { %8695 = vmatpush1.bf16.msra.mxu0 %v11289_v7  ;;  %8867 = vmatpush1.bf16.msra.mxu1 %v11291_v17  ;;  %v10365_v7 = vcombine.low %v2319_v61, %v2327_v9  ;;  %v10367_v17 = vcombine.low %v2320_v1, %v2328_v2  ;;  %v2415_v61 = vld [vmem:[%s15945_s5 + $0x310] sm:$0xff]  ;;  %v2416_v1 = vld [vmem:[%s15945_s5 + $0x318] sm:$0xff] }
 0x2cc   :  { %8696 = vmatprep.subr.bf16.mxu0 %v11306_v18  ;;  %8868 = vmatprep.subr.bf16.mxu1 %v11308_v20  ;;  %v10382_v18 = vcombine.high %v2335_v11, %v2343_v12  ;;  %v10384_v20 = vcombine.high %v2336_v13, %v2344_v14  ;;  %v2423_v9 = vld [vmem:[%s15945_s5 + $0x350] sm:$0xff]  ;;  %v2424_v2 = vld [vmem:[%s15945_s5 + $0x358] sm:$0xff] }
 0x2cf   :  { %8697 = vmatpush1.bf16.msra.mxu0 %v11305_v43  ;;  %8869 = vmatpush1.bf16.msra.mxu1 %v11307_v26  ;;  %v10381_v43 = vcombine.low %v2335_v11, %v2343_v12  ;;  %v10383_v26 = vcombine.low %v2336_v13, %v2344_v14  ;;  %v2431_v11 = vld [vmem:[%s15945_s5 + $0x390] sm:$0xff]  ;;  %v2432_v13 = vld [vmem:[%s15945_s5 + $0x398] sm:$0xff] }
 0x2d0   :  { %8698 = vmatprep.subr.bf16.mxu0 %v11322_v52  ;;  %8870 = vmatprep.subr.bf16.mxu1 %v11324_v27  ;;  %v10398_v52 = vcombine.high %v2351_v22, %v2359_v23  ;;  %v10400_v27 = vcombine.high %v2352_v24, %v2360_v25  ;;  %v2439_v12 = vld [vmem:[%s15945_s5 + $0x3d0] sm:$0xff]  ;;  %v2440_v14 = vld [vmem:[%s15945_s5 + $0x3d8] sm:$0xff] }
 0x2d3   :  { %8699 = vmatpush1.bf16.msra.mxu0 %v11321_v33  ;;  %8871 = vmatpush1.bf16.msra.mxu1 %v11323_v19  ;;  %v10397_v33 = vcombine.low %v2351_v22, %v2359_v23  ;;  %v10399_v19 = vcombine.low %v2352_v24, %v2360_v25  ;;  %v2447_v22 = vld [vmem:[%s15945_s5 + $0x410] sm:$0xff]  ;;  %v2448_v24 = vld [vmem:[%s15945_s5 + $0x418] sm:$0xff] }
 0x2d4   :  { %8700 = vmatprep.subr.bf16.mxu0 %v11338_v37  ;;  %8872 = vmatprep.subr.bf16.mxu1 %v11340_v38  ;;  %v10414_v37 = vcombine.high %v2367_v29, %v2375_v30  ;;  %v10416_v38 = vcombine.high %v2368_v31, %v2376_v32  ;;  %v2455_v23 = vld [vmem:[%s15945_s5 + $0x450] sm:$0xff]  ;;  %v2456_v25 = vld [vmem:[%s15945_s5 + $0x458] sm:$0xff] }
 0x2d7   :  { %8701 = vmatpush1.bf16.msra.mxu0 %v11337_v45  ;;  %8873 = vmatpush1.bf16.msra.mxu1 %v11339_v47  ;;  %v10413_v45 = vcombine.low %v2367_v29, %v2375_v30  ;;  %v10415_v47 = vcombine.low %v2368_v31, %v2376_v32  ;;  %v2463_v29 = vld [vmem:[%s15945_s5 + $0x490] sm:$0xff]  ;;  %v2464_v31 = vld [vmem:[%s15945_s5 + $0x498] sm:$0xff] }
 0x2d8   :  { %8702 = vmatprep.subr.bf16.mxu0 %v11354_v48  ;;  %8874 = vmatprep.subr.bf16.mxu1 %v11356_v49  ;;  %v10430_v48 = vcombine.high %v2383_v39, %v2391_v40  ;;  %v10432_v49 = vcombine.high %v2384_v41, %v2392_v42  ;;  %v2471_v30 = vld [vmem:[%s15945_s5 + $0x4d0] sm:$0xff]  ;;  %v2472_v32 = vld [vmem:[%s15945_s5 + $0x4d8] sm:$0xff] }
 0x2db   :  { %8703 = vmatpush1.bf16.msra.mxu0 %v11353_v56  ;;  %8875 = vmatpush1.bf16.msra.mxu1 %v11355_v57  ;;  %v10429_v56 = vcombine.low %v2383_v39, %v2391_v40  ;;  %v10431_v57 = vcombine.low %v2384_v41, %v2392_v42  ;;  %v2479_v39 = vld [vmem:[%s15945_s5 + $0x510] sm:$0xff]  ;;  %v2480_v41 = vld [vmem:[%s15945_s5 + $0x518] sm:$0xff] }
 0x2dc   :  { %8704 = vmatprep.subr.bf16.mxu0 %v11370_v58  ;;  %8876 = vmatprep.subr.bf16.mxu1 %v11372_v59  ;;  %v10446_v58 = vcombine.high %v2399_v50, %v2407_v51  ;;  %v10448_v59 = vcombine.high %v2400_v53, %v2408_v54  ;;  %v2487_v40 = vld [vmem:[%s15945_s5 + $0x550] sm:$0xff]  ;;  %v2488_v42 = vld [vmem:[%s15945_s5 + $0x558] sm:$0xff] }
 0x2df   :  { %8705 = vmatpush1.bf16.msra.mxu0 %v11369_v5  ;;  %8877 = vmatpush1.bf16.msra.mxu1 %v11371_v6  ;;  %v10445_v5 = vcombine.low %v2399_v50, %v2407_v51  ;;  %v10447_v6 = vcombine.low %v2400_v53, %v2408_v54  ;;  %v2495_v50 = vld [vmem:[%s15945_s5 + $0x590] sm:$0xff]  ;;  %v2496_v53 = vld [vmem:[%s15945_s5 + $0x598] sm:$0xff] }
 0x2e0   :  { %8889 = vmatprep.subr.bf16.mxu0 %v10366_v8  ;;  %9061 = vmatprep.subr.bf16.mxu1 %v10368_v10  ;;  %v10462_v8 = vcombine.high %v2415_v61, %v2423_v9  ;;  %v10464_v10 = vcombine.high %v2416_v1, %v2424_v2  ;;  %v2503_v51 = vld [vmem:[%s15945_s5 + $0x5d0] sm:$0xff]  ;;  %v2504_v54 = vld [vmem:[%s15945_s5 + $0x5d8] sm:$0xff] }
 0x2e2   :  { %8707 = vmatmul.mubr.bf16.vlgmr.msra.gmra.mrb[12].mxu0 %v13324_v34  ;;  %8879 = vmatmul.mubr.bf16.vlgmr.msra.gmra.mrb[12].mxu1 %v13324_v34 }
 0x2e3   :  { %8890 = vmatpush1.bf16.msra.mxu0 %v10365_v7  ;;  %8921 = vmatprep.mubr.bf16.mxu0 %v12890_v3  ;;  %v10461_v7 = vcombine.low %v2415_v61, %v2423_v9  ;;  %v2511_v61 = vld [vmem:[%s15945_s5 + $0x610] sm:$0xff] }
 0x2e4   :  { %9062 = vmatpush1.bf16.msra.mxu1 %v10367_v17  ;;  %9093 = vmatprep.mubr.bf16.mxu1 %v12890_v3  ;;  %v10463_v17 = vcombine.low %v2416_v1, %v2424_v2  ;;  %v2519_v9 = vld [vmem:[%s15945_s5 + $0x650] sm:$0xff]  ;;  %v2512_v1 = vld [vmem:[%s15945_s5 + $0x618] sm:$0xff] }
 0x2e5   :  { %8891 = vmatprep.subr.bf16.mxu0 %v10382_v18  ;;  %9063 = vmatprep.subr.bf16.mxu1 %v10384_v20  ;;  %v10478_v18 = vcombine.high %v2431_v11, %v2439_v12  ;;  %v10480_v20 = vcombine.high %v2432_v13, %v2440_v14  ;;  %v2520_v2 = vld [vmem:[%s15945_s5 + $0x658] sm:$0xff] }
 0x2e7   :  { %8892 = vmatpush1.bf16.msra.mxu0 %v10381_v43  ;;  %v10477_v43 = vcombine.low %v2431_v11, %v2439_v12  ;;  %v2527_v11 = vld [vmem:[%s15945_s5 + $0x690] sm:$0xff] }
 0x2e8   :  { %9064 = vmatpush1.bf16.msra.mxu1 %v10383_v26  ;;  %8893 = vmatprep.subr.bf16.mxu0 %v10398_v52  ;;  %v10479_v26 = vcombine.low %v2432_v13, %v2440_v14  ;;  %v10494_v52 = vcombine.high %v2447_v22, %v2455_v23  ;;  %v2535_v12 = vld [vmem:[%s15945_s5 + $0x6d0] sm:$0xff]  ;;  %v2528_v13 = vld [vmem:[%s15945_s5 + $0x698] sm:$0xff] }
 0x2e9   :  { %9065 = vmatprep.subr.bf16.mxu1 %v10400_v27  ;;  %v10496_v27 = vcombine.high %v2448_v24, %v2456_v25  ;;  %v2536_v14 = vld [vmem:[%s15945_s5 + $0x6d8] sm:$0xff] }
 0x2eb   :  { %8894 = vmatpush1.bf16.msra.mxu0 %v10397_v33  ;;  %v10493_v33 = vcombine.low %v2447_v22, %v2455_v23  ;;  %v2543_v22 = vld [vmem:[%s15945_s5 + $0x710] sm:$0xff] }
 0x2ec   :  { %9066 = vmatpush1.bf16.msra.mxu1 %v10399_v19  ;;  %8895 = vmatprep.subr.bf16.mxu0 %v10414_v37  ;;  %v10495_v19 = vcombine.low %v2448_v24, %v2456_v25  ;;  %v10510_v37 = vcombine.high %v2463_v29, %v2471_v30  ;;  %v2551_v23 = vld [vmem:[%s15945_s5 + $0x750] sm:$0xff]  ;;  %v2544_v24 = vld [vmem:[%s15945_s5 + $0x718] sm:$0xff] }
 0x2ed   :  { %9067 = vmatprep.subr.bf16.mxu1 %v10416_v38  ;;  %v10512_v38 = vcombine.high %v2464_v31, %v2472_v32  ;;  %v2552_v25 = vld [vmem:[%s15945_s5 + $0x758] sm:$0xff] }
 0x2ef   :  { %8896 = vmatpush1.bf16.msra.mxu0 %v10413_v45  ;;  %v10509_v45 = vcombine.low %v2463_v29, %v2471_v30  ;;  %v2559_v29 = vld [vmem:[%s15945_s5 + $0x790] sm:$0xff] }
 0x2f0   :  { %9068 = vmatpush1.bf16.msra.mxu1 %v10415_v47  ;;  %8897 = vmatprep.subr.bf16.mxu0 %v10430_v48  ;;  %v10511_v47 = vcombine.low %v2464_v31, %v2472_v32  ;;  %v10526_v48 = vcombine.high %v2479_v39, %v2487_v40  ;;  %v2567_v30 = vld [vmem:[%s15945_s5 + $0x7d0] sm:$0xff]  ;;  %v2560_v31 = vld [vmem:[%s15945_s5 + $0x798] sm:$0xff] }
 0x2f1   :  { %9069 = vmatprep.subr.bf16.mxu1 %v10432_v49  ;;  %v10528_v49 = vcombine.high %v2480_v41, %v2488_v42  ;;  %v2568_v32 = vld [vmem:[%s15945_s5 + $0x7d8] sm:$0xff] }
 0x2f3   :  { %8898 = vmatpush1.bf16.msra.mxu0 %v10429_v56  ;;  %v10525_v56 = vcombine.low %v2479_v39, %v2487_v40  ;;  %v2575_v39 = vld [vmem:[%s15945_s5 + $0x810] sm:$0xff] }
 0x2f4   :  { %9070 = vmatpush1.bf16.msra.mxu1 %v10431_v57  ;;  %8899 = vmatprep.subr.bf16.mxu0 %v10446_v58  ;;  %v10527_v57 = vcombine.low %v2480_v41, %v2488_v42  ;;  %v10542_v58 = vcombine.high %v2495_v50, %v2503_v51  ;;  %v2583_v40 = vld [vmem:[%s15945_s5 + $0x850] sm:$0xff]  ;;  %v2576_v41 = vld [vmem:[%s15945_s5 + $0x818] sm:$0xff] }
 0x2f5   :  { %9071 = vmatprep.subr.bf16.mxu1 %v10448_v59  ;;  %v10544_v59 = vcombine.high %v2496_v53, %v2504_v54  ;;  %v2584_v42 = vld [vmem:[%s15945_s5 + $0x858] sm:$0xff] }
 0x2f7   :  { %8900 = vmatpush1.bf16.msra.mxu0 %v10445_v5  ;;  %v10541_v5 = vcombine.low %v2495_v50, %v2503_v51  ;;  %v2591_v50 = vld [vmem:[%s15945_s5 + $0x890] sm:$0xff] }
 0x2f8   :  { %9072 = vmatpush1.bf16.msra.mxu1 %v10447_v6  ;;  %8901 = vmatprep.subr.bf16.mxu0 %v10462_v8  ;;  %v10543_v6 = vcombine.low %v2496_v53, %v2504_v54  ;;  %v10558_v8 = vcombine.high %v2511_v61, %v2519_v9  ;;  %v2599_v51 = vld [vmem:[%s15945_s5 + $0x8d0] sm:$0xff]  ;;  %v10621_v53 = vcombine.low %v2575_v39, %v2583_v40  ;;  %v2592_v54 = vld [vmem:[%s15945_s5 + $0x898] sm:$0xff] }
 0x2f9   :  { %9073 = vmatprep.subr.bf16.mxu1 %v10464_v10  ;;  %v10560_v10 = vcombine.high %v2512_v1, %v2520_v2 }
 0x2fb   :  { %8902 = vmatpush1.bf16.msra.mxu0 %v10461_v7  ;;  %v10557_v7 = vcombine.low %v2511_v61, %v2519_v9  ;;  %v2615_v61 = vld [vmem:[%s15945_s5 + $0x950] sm:$0xff] }
 0x2fc   :  { %9074 = vmatpush1.bf16.msra.mxu1 %v10463_v17  ;;  %8903 = vmatprep.subr.bf16.mxu0 %v10478_v18  ;;  %v10559_v17 = vcombine.low %v2512_v1, %v2520_v2  ;;  %v10574_v18 = vcombine.high %v2527_v11, %v2535_v12  ;;  %v2608_v1 = vld [vmem:[%s15945_s5 + $0x918] sm:$0xff] }
 0x2fd   :  { %9075 = vmatprep.subr.bf16.mxu1 %v10480_v20  ;;  %v10576_v20 = vcombine.high %v2528_v13, %v2536_v14  ;;  %v2616_v2 = vld [vmem:[%s15945_s5 + $0x958] sm:$0xff] }
 0x2ff   :  { %8904 = vmatpush1.bf16.msra.mxu0 %v10477_v43  ;;  %v10573_v43 = vcombine.low %v2527_v11, %v2535_v12  ;;  %v2623_v11 = vld [vmem:[%s15945_s5 + $0x990] sm:$0xff] }
 0x300   :  { %9076 = vmatpush1.bf16.msra.mxu1 %v10479_v26  ;;  %8905 = vmatprep.subr.bf16.mxu0 %v10494_v52  ;;  %v10575_v26 = vcombine.low %v2528_v13, %v2536_v14  ;;  %v10590_v52 = vcombine.high %v2543_v22, %v2551_v23  ;;  %v2631_v12 = vld [vmem:[%s15945_s5 + $0x9d0] sm:$0xff]  ;;  %v2624_v13 = vld [vmem:[%s15945_s5 + $0x998] sm:$0xff] }
 0x301   :  { %9077 = vmatprep.subr.bf16.mxu1 %v10496_v27  ;;  %v10592_v27 = vcombine.high %v2544_v24, %v2552_v25  ;;  %v2632_v14 = vld [vmem:[%s15945_s5 + $0x9d8] sm:$0xff] }
 0x303   :  { %8906 = vmatpush1.bf16.msra.mxu0 %v10493_v33  ;;  %v10589_v33 = vcombine.low %v2543_v22, %v2551_v23  ;;  %v2639_v22 = vld [vmem:[%s15945_s5 + $0xa10] sm:$0xff] }
 0x304   :  { %9078 = vmatpush1.bf16.msra.mxu1 %v10495_v19  ;;  %8907 = vmatprep.subr.bf16.mxu0 %v10510_v37  ;;  %v10591_v19 = vcombine.low %v2544_v24, %v2552_v25  ;;  %v10606_v37 = vcombine.high %v2559_v29, %v2567_v30  ;;  %v2647_v23 = vld [vmem:[%s15945_s5 + $0xa50] sm:$0xff]  ;;  %v2640_v24 = vld [vmem:[%s15945_s5 + $0xa18] sm:$0xff] }
 0x305   :  { %9079 = vmatprep.subr.bf16.mxu1 %v10512_v38  ;;  %v10608_v38 = vcombine.high %v2560_v31, %v2568_v32  ;;  %v2648_v25 = vld [vmem:[%s15945_s5 + $0xa58] sm:$0xff] }
 0x307   :  { %8908 = vmatpush1.bf16.msra.mxu0 %v10509_v45  ;;  %v10605_v45 = vcombine.low %v2559_v29, %v2567_v30  ;;  %v2655_v29 = vld [vmem:[%s15945_s5 + $0xa90] sm:$0xff] }
 0x308   :  { %9080 = vmatpush1.bf16.msra.mxu1 %v10511_v47  ;;  %8909 = vmatprep.subr.bf16.mxu0 %v10526_v48  ;;  %v10607_v47 = vcombine.low %v2560_v31, %v2568_v32  ;;  %v10622_v48 = vcombine.high %v2575_v39, %v2583_v40  ;;  %v2663_v30 = vld [vmem:[%s15945_s5 + $0xad0] sm:$0xff]  ;;  %v2656_v31 = vld [vmem:[%s15945_s5 + $0xa98] sm:$0xff] }
 0x309   :  { %9081 = vmatprep.subr.bf16.mxu1 %v10528_v49  ;;  %v10624_v49 = vcombine.high %v2576_v41, %v2584_v42  ;;  %v2664_v32 = vld [vmem:[%s15945_s5 + $0xad8] sm:$0xff]  ;;  %v2671_v39 = vld [vmem:[%s15945_s5 + $0xb10] sm:$0xff] }
 0x30a   :  { %v2679_v40 = vld [vmem:[%s15945_s5 + $0xb50] sm:$0xff] }
 0x30b   :  { %8910 = vmatpush1.bf16.msra.mxu0 %v10525_v56  ;;  %v2600_v56 = vld [vmem:[%s15945_s5 + $0x8d8] sm:$0xff] }
 0x30c   :  { %9082 = vmatpush1.bf16.msra.mxu1 %v10527_v57  ;;  %8911 = vmatprep.subr.bf16.mxu0 %v10542_v58  ;;  %v10623_v57 = vcombine.low %v2576_v41, %v2584_v42  ;;  %v10638_v58 = vcombine.high %v2591_v50, %v2599_v51  ;;  %v10640_v9 = vcombine.high %v2592_v54, %v2600_v56  ;;  %v2672_v41 = vld [vmem:[%s15945_s5 + $0xb18] sm:$0xff] }
 0x30d   :  { %9083 = vmatprep.subr.bf16.mxu1 %v10544_v59  ;;  %v2607_v59 = vld [vmem:[%s15945_s5 + $0x910] sm:$0xff]  ;;  %v2680_v42 = vld [vmem:[%s15945_s5 + $0xb58] sm:$0xff] }
 0x30f   :  { %8912 = vmatpush1.bf16.msra.mxu0 %v10541_v5  ;;  %v10637_v5 = vcombine.low %v2591_v50, %v2599_v51  ;;  %v2687_v50 = vld [vmem:[%s15945_s5 + $0xb90] sm:$0xff] }
 0x310   :  { %9084 = vmatpush1.bf16.msra.mxu1 %v10543_v6  ;;  %8913 = vmatprep.subr.bf16.mxu0 %v10558_v8  ;;  %v10639_v6 = vcombine.low %v2592_v54, %v2600_v56  ;;  %v10654_v8 = vcombine.high %v2607_v59, %v2615_v61  ;;  %v2695_v51 = vld [vmem:[%s15945_s5 + $0xbd0] sm:$0xff]  ;;  %v2696_v54 = vld [vmem:[%s15945_s5 + $0xbd8] sm:$0xff]  ;;  %v10717_v56 = vcombine.low %v2671_v39, %v2679_v40 }
 0x311   :  { %9085 = vmatprep.subr.bf16.mxu1 %v10560_v10  ;;  %v10656_v10 = vcombine.high %v2608_v1, %v2616_v2 }
 0x313   :  { %8914 = vmatpush1.bf16.msra.mxu0 %v10557_v7  ;;  %v10653_v7 = vcombine.low %v2607_v59, %v2615_v61  ;;  %v2703_v61 = vld [vmem:[%s15945_s5 + $0xc10] sm:$0xff] }
 0x314   :  { %9086 = vmatpush1.bf16.msra.mxu1 %v10559_v17  ;;  %8915 = vmatprep.subr.bf16.mxu0 %v10574_v18  ;;  %v10655_v17 = vcombine.low %v2608_v1, %v2616_v2  ;;  %v10670_v18 = vcombine.high %v2623_v11, %v2631_v12  ;;  %v2704_v1 = vld [vmem:[%s15945_s5 + $0xc18] sm:$0xff] }
 0x315   :  { %9087 = vmatprep.subr.bf16.mxu1 %v10576_v20  ;;  %v10672_v20 = vcombine.high %v2624_v13, %v2632_v14  ;;  %v2712_v2 = vld [vmem:[%s15945_s5 + $0xc58] sm:$0xff] }
 0x317   :  { %8916 = vmatpush1.bf16.msra.mxu0 %v10573_v43  ;;  %v10669_v43 = vcombine.low %v2623_v11, %v2631_v12  ;;  %v2719_v11 = vld [vmem:[%s15945_s5 + $0xc90] sm:$0xff] }
 0x318   :  { %9088 = vmatpush1.bf16.msra.mxu1 %v10575_v26  ;;  %8917 = vmatprep.subr.bf16.mxu0 %v10590_v52  ;;  %v10671_v26 = vcombine.low %v2624_v13, %v2632_v14  ;;  %v10686_v52 = vcombine.high %v2639_v22, %v2647_v23  ;;  %v2727_v12 = vld [vmem:[%s15945_s5 + $0xcd0] sm:$0xff]  ;;  %v2720_v13 = vld [vmem:[%s15945_s5 + $0xc98] sm:$0xff] }
 0x319   :  { %9089 = vmatprep.subr.bf16.mxu1 %v10592_v27  ;;  %v10688_v27 = vcombine.high %v2640_v24, %v2648_v25  ;;  %v2728_v14 = vld [vmem:[%s15945_s5 + $0xcd8] sm:$0xff] }
 0x31b   :  { %8918 = vmatpush1.bf16.msra.mxu0 %v10589_v33  ;;  %v10685_v33 = vcombine.low %v2639_v22, %v2647_v23  ;;  %v2735_v22 = vld [vmem:[%s15945_s5 + $0xd10] sm:$0xff] }
 0x31c   :  { %9090 = vmatpush1.bf16.msra.mxu1 %v10591_v19  ;;  %8919 = vmatprep.subr.bf16.mxu0 %v10606_v37  ;;  %v10687_v19 = vcombine.low %v2640_v24, %v2648_v25  ;;  %v10702_v37 = vcombine.high %v2655_v29, %v2663_v30  ;;  %v2743_v23 = vld [vmem:[%s15945_s5 + $0xd50] sm:$0xff]  ;;  %v2736_v24 = vld [vmem:[%s15945_s5 + $0xd18] sm:$0xff] }
 0x31d   :  { %9091 = vmatprep.subr.bf16.mxu1 %v10608_v38  ;;  %v10704_v38 = vcombine.high %v2656_v31, %v2664_v32  ;;  %v2744_v25 = vld [vmem:[%s15945_s5 + $0xd58] sm:$0xff] }
 0x31f   :  { %8920 = vmatpush1.bf16.msra.mxu0 %v10605_v45  ;;  %v10701_v45 = vcombine.low %v2655_v29, %v2663_v30  ;;  %v2751_v29 = vld [vmem:[%s15945_s5 + $0xd90] sm:$0xff] }
 0x320   :  { %9092 = vmatpush1.bf16.msra.mxu1 %v10607_v47  ;;  %8932 = vmatprep.subr.bf16.mxu0 %v10622_v48  ;;  %v10703_v47 = vcombine.low %v2656_v31, %v2664_v32  ;;  %v10718_v48 = vcombine.high %v2671_v39, %v2679_v40  ;;  %v2759_v30 = vld [vmem:[%s15945_s5 + $0xdd0] sm:$0xff]  ;;  %v2752_v31 = vld [vmem:[%s15945_s5 + $0xd98] sm:$0xff] }
 0x321   :  { %9104 = vmatprep.subr.bf16.mxu1 %v10624_v49  ;;  %v10720_v49 = vcombine.high %v2672_v41, %v2680_v42  ;;  %v2760_v32 = vld [vmem:[%s15945_s5 + $0xdd8] sm:$0xff]  ;;  %v2767_v39 = vld [vmem:[%s15945_s5 + $0xe10] sm:$0xff] }
 0x322   :  { %8922 = vmatmul.mubr.bf16.vlgmr.msra.gmra.mrb[16].mxu0 %v12877_v63  ;;  %v2775_v40 = vld [vmem:[%s15945_s5 + $0xe50] sm:$0xff] }
 0x323   :  { %9094 = vmatmul.mubr.bf16.vlgmr.msra.gmra.mrb[16].mxu1 %v12877_v63  ;;  %8933 = vmatpush1.bf16.msra.mxu0 %v10621_v53  ;;  %v2688_v53 = vld [vmem:[%s15945_s5 + $0xb98] sm:$0xff] }
 0x324   :  { %8964 = vmatprep.mubr.bf16.mxu0 %v12892_v4  ;;  %9105 = vmatpush1.bf16.msra.mxu1 %v10623_v57  ;;  %v10719_v57 = vcombine.low %v2672_v41, %v2680_v42  ;;  %v10736_v59 = vcombine.high %v2688_v53, %v2696_v54  ;;  %v2768_v41 = vld [vmem:[%s15945_s5 + $0xe18] sm:$0xff] }
 0x325   :  { %9136 = vmatprep.mubr.bf16.mxu1 %v12892_v4  ;;  %8934 = vmatprep.subr.bf16.mxu0 %v10638_v58  ;;  %v10734_v58 = vcombine.high %v2687_v50, %v2695_v51  ;;  %v2776_v42 = vld [vmem:[%s15945_s5 + $0xe58] sm:$0xff] }
 0x326   :  { %9106 = vmatprep.subr.bf16.mxu1 %v10640_v9  ;;  %v2711_v9 = vld [vmem:[%s15945_s5 + $0xc50] sm:$0xff] }
 0x327   :  { %8935 = vmatpush1.bf16.msra.mxu0 %v10637_v5  ;;  %v10733_v5 = vcombine.low %v2687_v50, %v2695_v51  ;;  %v2783_v50 = vld [vmem:[%s15945_s5 + $0xe90] sm:$0xff] }
 0x328   :  { %9107 = vmatpush1.bf16.msra.mxu1 %v10639_v6  ;;  %8936 = vmatprep.subr.bf16.mxu0 %v10654_v8  ;;  %v10735_v6 = vcombine.low %v2688_v53, %v2696_v54  ;;  %v10750_v8 = vcombine.high %v2703_v61, %v2711_v9  ;;  %v2791_v51 = vld [vmem:[%s15945_s5 + $0xed0] sm:$0xff]  ;;  %v2784_v53 = vld [vmem:[%s15945_s5 + $0xe98] sm:$0xff] }
 0x329   :  { %9108 = vmatprep.subr.bf16.mxu1 %v10656_v10  ;;  %v10752_v10 = vcombine.high %v2704_v1, %v2712_v2  ;;  %v2792_v54 = vld [vmem:[%s15945_s5 + $0xed8] sm:$0xff] }
 0x32b   :  { %8937 = vmatpush1.bf16.msra.mxu0 %v10653_v7  ;;  %v10749_v7 = vcombine.low %v2703_v61, %v2711_v9  ;;  %v2799_v61 = vld [vmem:[%s15945_s5 + $0xf10] sm:$0xff] }
 0x32c   :  { %9109 = vmatpush1.bf16.msra.mxu1 %v10655_v17  ;;  %8938 = vmatprep.subr.bf16.mxu0 %v10670_v18  ;;  %v10751_v17 = vcombine.low %v2704_v1, %v2712_v2  ;;  %v10766_v18 = vcombine.high %v2719_v11, %v2727_v12  ;;  %v2807_v9 = vld [vmem:[%s15945_s5 + $0xf50] sm:$0xff]  ;;  %v2800_v1 = vld [vmem:[%s15945_s5 + $0xf18] sm:$0xff] }
 0x32d   :  { %9110 = vmatprep.subr.bf16.mxu1 %v10672_v20  ;;  %v10768_v20 = vcombine.high %v2720_v13, %v2728_v14  ;;  %v2808_v2 = vld [vmem:[%s15945_s5 + $0xf58] sm:$0xff] }
 0x32f   :  { %8939 = vmatpush1.bf16.msra.mxu0 %v10669_v43  ;;  %v10765_v43 = vcombine.low %v2719_v11, %v2727_v12  ;;  %v2815_v11 = vld [vmem:[%s15945_s5 + $0xf90] sm:$0xff] }
 0x330   :  { %9111 = vmatpush1.bf16.msra.mxu1 %v10671_v26  ;;  %8940 = vmatprep.subr.bf16.mxu0 %v10686_v52  ;;  %v10767_v26 = vcombine.low %v2720_v13, %v2728_v14  ;;  %v10782_v52 = vcombine.high %v2735_v22, %v2743_v23  ;;  %v2823_v12 = vld [vmem:[%s15945_s5 + $0xfd0] sm:$0xff]  ;;  %v2816_v13 = vld [vmem:[%s15945_s5 + $0xf98] sm:$0xff] }
 0x331   :  { %9112 = vmatprep.subr.bf16.mxu1 %v10688_v27  ;;  %v10784_v27 = vcombine.high %v2736_v24, %v2744_v25  ;;  %v2824_v14 = vld [vmem:[%s15945_s5 + $0xfd8] sm:$0xff] }
 0x333   :  { %8941 = vmatpush1.bf16.msra.mxu0 %v10685_v33  ;;  %v10781_v33 = vcombine.low %v2735_v22, %v2743_v23  ;;  %v2831_v22 = vld [vmem:[%s15945_s5 + $0x1010] sm:$0xff] }
 0x334   :  { %9113 = vmatpush1.bf16.msra.mxu1 %v10687_v19  ;;  %8942 = vmatprep.subr.bf16.mxu0 %v10702_v37  ;;  %v10783_v19 = vcombine.low %v2736_v24, %v2744_v25  ;;  %v10798_v37 = vcombine.high %v2751_v29, %v2759_v30  ;;  %v2839_v23 = vld [vmem:[%s15945_s5 + $0x1050] sm:$0xff]  ;;  %v2832_v24 = vld [vmem:[%s15945_s5 + $0x1018] sm:$0xff] }
 0x335   :  { %9114 = vmatprep.subr.bf16.mxu1 %v10704_v38  ;;  %v10800_v38 = vcombine.high %v2752_v31, %v2760_v32  ;;  %v2840_v25 = vld [vmem:[%s15945_s5 + $0x1058] sm:$0xff] }
 0x337   :  { %8943 = vmatpush1.bf16.msra.mxu0 %v10701_v45  ;;  %v10797_v45 = vcombine.low %v2751_v29, %v2759_v30  ;;  %v2847_v29 = vld [vmem:[%s15945_s5 + $0x1090] sm:$0xff] }
 0x338   :  { %9115 = vmatpush1.bf16.msra.mxu1 %v10703_v47  ;;  %8944 = vmatprep.subr.bf16.mxu0 %v10718_v48  ;;  %v10799_v47 = vcombine.low %v2752_v31, %v2760_v32  ;;  %v10814_v48 = vcombine.high %v2767_v39, %v2775_v40  ;;  %v2855_v30 = vld [vmem:[%s15945_s5 + $0x10d0] sm:$0xff]  ;;  %v10877_v31 = vcombine.low %v2831_v22, %v2839_v23  ;;  %v2848_v32 = vld [vmem:[%s15945_s5 + $0x1098] sm:$0xff] }
 0x339   :  { %9116 = vmatprep.subr.bf16.mxu1 %v10720_v49  ;;  %v10816_v49 = vcombine.high %v2768_v41, %v2776_v42 }
 0x33b   :  { %8945 = vmatpush1.bf16.msra.mxu0 %v10717_v56  ;;  %v10813_v56 = vcombine.low %v2767_v39, %v2775_v40  ;;  %v2871_v39 = vld [vmem:[%s15945_s5 + $0x1150] sm:$0xff] }
 0x33c   :  { %9117 = vmatpush1.bf16.msra.mxu1 %v10719_v57  ;;  %8946 = vmatprep.subr.bf16.mxu0 %v10734_v58  ;;  %v10815_v57 = vcombine.low %v2768_v41, %v2776_v42  ;;  %v10830_v58 = vcombine.high %v2783_v50, %v2791_v51  ;;  %v2864_v41 = vld [vmem:[%s15945_s5 + $0x1118] sm:$0xff] }
 0x33d   :  { %9118 = vmatprep.subr.bf16.mxu1 %v10736_v59  ;;  %v10832_v59 = vcombine.high %v2784_v53, %v2792_v54  ;;  %v2872_v42 = vld [vmem:[%s15945_s5 + $0x1158] sm:$0xff] }
 0x33f   :  { %8947 = vmatpush1.bf16.msra.mxu0 %v10733_v5  ;;  %v10829_v5 = vcombine.low %v2783_v50, %v2791_v51  ;;  %v2879_v50 = vld [vmem:[%s15945_s5 + $0x1190] sm:$0xff] }
 0x340   :  { %9119 = vmatpush1.bf16.msra.mxu1 %v10735_v6  ;;  %8948 = vmatprep.subr.bf16.mxu0 %v10750_v8  ;;  %v10831_v6 = vcombine.low %v2784_v53, %v2792_v54  ;;  %v10846_v8 = vcombine.high %v2799_v61, %v2807_v9  ;;  %v2887_v51 = vld [vmem:[%s15945_s5 + $0x11d0] sm:$0xff]  ;;  %v2880_v53 = vld [vmem:[%s15945_s5 + $0x1198] sm:$0xff] }
 0x341   :  { %9120 = vmatprep.subr.bf16.mxu1 %v10752_v10  ;;  %v10848_v10 = vcombine.high %v2800_v1, %v2808_v2  ;;  %v2888_v54 = vld [vmem:[%s15945_s5 + $0x11d8] sm:$0xff] }
 0x343   :  { %8949 = vmatpush1.bf16.msra.mxu0 %v10749_v7  ;;  %v10845_v7 = vcombine.low %v2799_v61, %v2807_v9  ;;  %v2895_v61 = vld [vmem:[%s15945_s5 + $0x1210] sm:$0xff] }
 0x344   :  { %9121 = vmatpush1.bf16.msra.mxu1 %v10751_v17  ;;  %8950 = vmatprep.subr.bf16.mxu0 %v10766_v18  ;;  %v10847_v17 = vcombine.low %v2800_v1, %v2808_v2  ;;  %v10862_v18 = vcombine.high %v2815_v11, %v2823_v12  ;;  %v2903_v9 = vld [vmem:[%s15945_s5 + $0x1250] sm:$0xff]  ;;  %v2896_v1 = vld [vmem:[%s15945_s5 + $0x1218] sm:$0xff] }
 0x345   :  { %9122 = vmatprep.subr.bf16.mxu1 %v10768_v20  ;;  %v10864_v20 = vcombine.high %v2816_v13, %v2824_v14  ;;  %v2904_v2 = vld [vmem:[%s15945_s5 + $0x1258] sm:$0xff] }
 0x347   :  { %8951 = vmatpush1.bf16.msra.mxu0 %v10765_v43  ;;  %v10861_v43 = vcombine.low %v2815_v11, %v2823_v12  ;;  %v2911_v11 = vld [vmem:[%s15945_s5 + $0x1290] sm:$0xff] }
 0x348   :  { %9123 = vmatpush1.bf16.msra.mxu1 %v10767_v26  ;;  %8952 = vmatprep.subr.bf16.mxu0 %v10782_v52  ;;  %v10863_v26 = vcombine.low %v2816_v13, %v2824_v14  ;;  %v10878_v52 = vcombine.high %v2831_v22, %v2839_v23  ;;  %v2919_v12 = vld [vmem:[%s15945_s5 + $0x12d0] sm:$0xff]  ;;  %v2912_v13 = vld [vmem:[%s15945_s5 + $0x1298] sm:$0xff] }
 0x349   :  { %9124 = vmatprep.subr.bf16.mxu1 %v10784_v27  ;;  %v10880_v27 = vcombine.high %v2832_v24, %v2840_v25  ;;  %v2920_v14 = vld [vmem:[%s15945_s5 + $0x12d8] sm:$0xff]  ;;  %v2927_v22 = vld [vmem:[%s15945_s5 + $0x1310] sm:$0xff] }
 0x34a   :  { %v2935_v23 = vld [vmem:[%s15945_s5 + $0x1350] sm:$0xff] }
 0x34b   :  { %8953 = vmatpush1.bf16.msra.mxu0 %v10781_v33  ;;  %v2856_v33 = vld [vmem:[%s15945_s5 + $0x10d8] sm:$0xff] }
 0x34c   :  { %9125 = vmatpush1.bf16.msra.mxu1 %v10783_v19  ;;  %8954 = vmatprep.subr.bf16.mxu0 %v10798_v37  ;;  %v10879_v19 = vcombine.low %v2832_v24, %v2840_v25  ;;  %v10894_v37 = vcombine.high %v2847_v29, %v2855_v30  ;;  %v10896_v40 = vcombine.high %v2848_v32, %v2856_v33  ;;  %v2928_v24 = vld [vmem:[%s15945_s5 + $0x1318] sm:$0xff] }
 0x34d   :  { %9126 = vmatprep.subr.bf16.mxu1 %v10800_v38  ;;  %v2863_v38 = vld [vmem:[%s15945_s5 + $0x1110] sm:$0xff]  ;;  %v2936_v25 = vld [vmem:[%s15945_s5 + $0x1358] sm:$0xff] }
 0x34f   :  { %8955 = vmatpush1.bf16.msra.mxu0 %v10797_v45  ;;  %v10893_v45 = vcombine.low %v2847_v29, %v2855_v30  ;;  %v2943_v29 = vld [vmem:[%s15945_s5 + $0x1390] sm:$0xff] }
 0x350   :  { %9127 = vmatpush1.bf16.msra.mxu1 %v10799_v47  ;;  %8956 = vmatprep.subr.bf16.mxu0 %v10814_v48  ;;  %v10895_v47 = vcombine.low %v2848_v32, %v2856_v33  ;;  %v10910_v48 = vcombine.high %v2863_v38, %v2871_v39  ;;  %v2951_v30 = vld [vmem:[%s15945_s5 + $0x13d0] sm:$0xff]  ;;  %v2952_v32 = vld [vmem:[%s15945_s5 + $0x13d8] sm:$0xff]  ;;  %v10973_v33 = vcombine.low %v2927_v22, %v2935_v23 }
 0x351   :  { %9128 = vmatprep.subr.bf16.mxu1 %v10816_v49  ;;  %v10912_v49 = vcombine.high %v2864_v41, %v2872_v42 }
 0x353   :  { %8957 = vmatpush1.bf16.msra.mxu0 %v10813_v56  ;;  %v10909_v56 = vcombine.low %v2863_v38, %v2871_v39  ;;  %v2959_v39 = vld [vmem:[%s15945_s5 + $0x1410] sm:$0xff] }
 0x354   :  { %9129 = vmatpush1.bf16.msra.mxu1 %v10815_v57  ;;  %8958 = vmatprep.subr.bf16.mxu0 %v10830_v58  ;;  %v10911_v57 = vcombine.low %v2864_v41, %v2872_v42  ;;  %v10926_v58 = vcombine.high %v2879_v50, %v2887_v51  ;;  %v2960_v41 = vld [vmem:[%s15945_s5 + $0x1418] sm:$0xff] }
 0x355   :  { %9130 = vmatprep.subr.bf16.mxu1 %v10832_v59  ;;  %v10928_v59 = vcombine.high %v2880_v53, %v2888_v54  ;;  %v2968_v42 = vld [vmem:[%s15945_s5 + $0x1458] sm:$0xff] }
 0x357   :  { %8959 = vmatpush1.bf16.msra.mxu0 %v10829_v5  ;;  %v10925_v5 = vcombine.low %v2879_v50, %v2887_v51  ;;  %v2975_v50 = vld [vmem:[%s15945_s5 + $0x1490] sm:$0xff] }
 0x358   :  { %9131 = vmatpush1.bf16.msra.mxu1 %v10831_v6  ;;  %8960 = vmatprep.subr.bf16.mxu0 %v10846_v8  ;;  %v10927_v6 = vcombine.low %v2880_v53, %v2888_v54  ;;  %v10942_v8 = vcombine.high %v2895_v61, %v2903_v9  ;;  %v2983_v51 = vld [vmem:[%s15945_s5 + $0x14d0] sm:$0xff]  ;;  %v2976_v53 = vld [vmem:[%s15945_s5 + $0x1498] sm:$0xff] }
 0x359   :  { %9132 = vmatprep.subr.bf16.mxu1 %v10848_v10  ;;  %v10944_v10 = vcombine.high %v2896_v1, %v2904_v2  ;;  %v2984_v54 = vld [vmem:[%s15945_s5 + $0x14d8] sm:$0xff] }
 0x35b   :  { %8961 = vmatpush1.bf16.msra.mxu0 %v10845_v7  ;;  %v10941_v7 = vcombine.low %v2895_v61, %v2903_v9  ;;  %v2991_v61 = vld [vmem:[%s15945_s5 + $0x1510] sm:$0xff] }
 0x35c   :  { %9133 = vmatpush1.bf16.msra.mxu1 %v10847_v17  ;;  %8962 = vmatprep.subr.bf16.mxu0 %v10862_v18  ;;  %v10943_v17 = vcombine.low %v2896_v1, %v2904_v2  ;;  %v10958_v18 = vcombine.high %v2911_v11, %v2919_v12  ;;  %v2999_v9 = vld [vmem:[%s15945_s5 + $0x1550] sm:$0xff]  ;;  %v2992_v1 = vld [vmem:[%s15945_s5 + $0x1518] sm:$0xff] }
 0x35d   :  { %9134 = vmatprep.subr.bf16.mxu1 %v10864_v20  ;;  %v10960_v20 = vcombine.high %v2912_v13, %v2920_v14  ;;  %v3000_v2 = vld [vmem:[%s15945_s5 + $0x1558] sm:$0xff] }
 0x35f   :  { %8963 = vmatpush1.bf16.msra.mxu0 %v10861_v43  ;;  %v10957_v43 = vcombine.low %v2911_v11, %v2919_v12  ;;  %v3007_v11 = vld [vmem:[%s15945_s5 + $0x1590] sm:$0xff] }
 0x360   :  { %9135 = vmatpush1.bf16.msra.mxu1 %v10863_v26  ;;  %8975 = vmatprep.subr.bf16.mxu0 %v10878_v52  ;;  %v10959_v26 = vcombine.low %v2912_v13, %v2920_v14  ;;  %v10974_v52 = vcombine.high %v2927_v22, %v2935_v23  ;;  %v3015_v12 = vld [vmem:[%s15945_s5 + $0x15d0] sm:$0xff]  ;;  %v3008_v13 = vld [vmem:[%s15945_s5 + $0x1598] sm:$0xff] }
 0x361   :  { %9147 = vmatprep.subr.bf16.mxu1 %v10880_v27  ;;  %v10976_v27 = vcombine.high %v2928_v24, %v2936_v25  ;;  %v3016_v14 = vld [vmem:[%s15945_s5 + $0x15d8] sm:$0xff]  ;;  %v3023_v22 = vld [vmem:[%s15945_s5 + $0x1610] sm:$0xff] }
 0x362   :  { %8965 = vmatmul.mubr.bf16.vlgmr.msra.gmra.mrb[16].mxu0 %v12879_v0  ;;  %v3031_v23 = vld [vmem:[%s15945_s5 + $0x1650] sm:$0xff] }
 0x363   :  { %9137 = vmatmul.mubr.bf16.vlgmr.msra.gmra.mrb[16].mxu1 %v12879_v0  ;;  %8976 = vmatpush1.bf16.msra.mxu0 %v10877_v31  ;;  %v2944_v31 = vld [vmem:[%s15945_s5 + $0x1398] sm:$0xff] }
 0x364   :  { %9007 = vmatprep.mubr.bf16.mxu0 %v13326_v35  ;;  %9148 = vmatpush1.bf16.msra.mxu1 %v10879_v19  ;;  %v10975_v19 = vcombine.low %v2928_v24, %v2936_v25  ;;  %v10992_v38 = vcombine.high %v2944_v31, %v2952_v32  ;;  %v3024_v24 = vld [vmem:[%s15945_s5 + $0x1618] sm:$0xff] }
 0x365   :  { %9179 = vmatprep.mubr.bf16.mxu1 %v13326_v35  ;;  %8977 = vmatprep.subr.bf16.mxu0 %v10894_v37  ;;  %v10990_v37 = vcombine.high %v2943_v29, %v2951_v30  ;;  %v3032_v25 = vld [vmem:[%s15945_s5 + $0x1658] sm:$0xff] }
 0x366   :  { %9149 = vmatprep.subr.bf16.mxu1 %v10896_v40  ;;  %v2967_v40 = vld [vmem:[%s15945_s5 + $0x1450] sm:$0xff] }
 0x367   :  { %8978 = vmatpush1.bf16.msra.mxu0 %v10893_v45  ;;  %v10989_v45 = vcombine.low %v2943_v29, %v2951_v30  ;;  %v3039_v29 = vld [vmem:[%s15945_s5 + $0x1690] sm:$0xff] }
 0x368   :  { %9150 = vmatpush1.bf16.msra.mxu1 %v10895_v47  ;;  %8979 = vmatprep.subr.bf16.mxu0 %v10910_v48  ;;  %v10991_v47 = vcombine.low %v2944_v31, %v2952_v32  ;;  %v11006_v48 = vcombine.high %v2959_v39, %v2967_v40  ;;  %v3047_v30 = vld [vmem:[%s15945_s5 + $0x16d0] sm:$0xff]  ;;  %v3040_v31 = vld [vmem:[%s15945_s5 + $0x1698] sm:$0xff] }
 0x369   :  { %9151 = vmatprep.subr.bf16.mxu1 %v10912_v49  ;;  %v11008_v49 = vcombine.high %v2960_v41, %v2968_v42  ;;  %v3048_v32 = vld [vmem:[%s15945_s5 + $0x16d8] sm:$0xff] }
 0x36b   :  { %8980 = vmatpush1.bf16.msra.mxu0 %v10909_v56  ;;  %v11005_v56 = vcombine.low %v2959_v39, %v2967_v40  ;;  %v3055_v39 = vld [vmem:[%s15945_s5 + $0x1710] sm:$0xff] }
 0x36c   :  { %9152 = vmatpush1.bf16.msra.mxu1 %v10911_v57  ;;  %8981 = vmatprep.subr.bf16.mxu0 %v10926_v58  ;;  %v11007_v57 = vcombine.low %v2960_v41, %v2968_v42  ;;  %v11022_v58 = vcombine.high %v2975_v50, %v2983_v51  ;;  %v3063_v40 = vld [vmem:[%s15945_s5 + $0x1750] sm:$0xff]  ;;  %v3056_v41 = vld [vmem:[%s15945_s5 + $0x1718] sm:$0xff] }
 0x36d   :  { %9153 = vmatprep.subr.bf16.mxu1 %v10928_v59  ;;  %v11024_v59 = vcombine.high %v2976_v53, %v2984_v54  ;;  %v3064_v42 = vld [vmem:[%s15945_s5 + $0x1758] sm:$0xff] }
 0x36f   :  { %8982 = vmatpush1.bf16.msra.mxu0 %v10925_v5  ;;  %v11021_v5 = vcombine.low %v2975_v50, %v2983_v51  ;;  %v3071_v50 = vld [vmem:[%s15945_s5 + $0x1790] sm:$0xff] }
 0x370   :  { %9154 = vmatpush1.bf16.msra.mxu1 %v10927_v6  ;;  %8983 = vmatprep.subr.bf16.mxu0 %v10942_v8  ;;  %v11023_v6 = vcombine.low %v2976_v53, %v2984_v54  ;;  %v11038_v8 = vcombine.high %v2991_v61, %v2999_v9  ;;  %v3079_v51 = vld [vmem:[%s15945_s5 + $0x17d0] sm:$0xff]  ;;  %v3072_v53 = vld [vmem:[%s15945_s5 + $0x1798] sm:$0xff] }
 0x371   :  { %9155 = vmatprep.subr.bf16.mxu1 %v10944_v10  ;;  %v11040_v10 = vcombine.high %v2992_v1, %v3000_v2  ;;  %v3080_v54 = vld [vmem:[%s15945_s5 + $0x17d8] sm:$0xff] }
 0x373   :  { %8984 = vmatpush1.bf16.msra.mxu0 %v10941_v7  ;;  %v11037_v7 = vcombine.low %v2991_v61, %v2999_v9  ;;  %v3087_v61 = vld [vmem:[%s15945_s5 + $0x1810] sm:$0xff] }
 0x374   :  { %9156 = vmatpush1.bf16.msra.mxu1 %v10943_v17  ;;  %8985 = vmatprep.subr.bf16.mxu0 %v10958_v18  ;;  %v11039_v17 = vcombine.low %v2992_v1, %v3000_v2  ;;  %v11054_v18 = vcombine.high %v3007_v11, %v3015_v12  ;;  %v3095_v9 = vld [vmem:[%s15945_s5 + $0x1850] sm:$0xff]  ;;  %v3088_v1 = vld [vmem:[%s15945_s5 + $0x1818] sm:$0xff] }
 0x375   :  { %9157 = vmatprep.subr.bf16.mxu1 %v10960_v20  ;;  %v11056_v20 = vcombine.high %v3008_v13, %v3016_v14  ;;  %v3096_v2 = vld [vmem:[%s15945_s5 + $0x1858] sm:$0xff] }
 0x377   :  { %8986 = vmatpush1.bf16.msra.mxu0 %v10957_v43  ;;  %v11053_v43 = vcombine.low %v3007_v11, %v3015_v12  ;;  %v3103_v11 = vld [vmem:[%s15945_s5 + $0x1890] sm:$0xff] }
 0x378   :  { %9158 = vmatpush1.bf16.msra.mxu1 %v10959_v26  ;;  %8987 = vmatprep.subr.bf16.mxu0 %v10974_v52  ;;  %v11055_v26 = vcombine.low %v3008_v13, %v3016_v14  ;;  %v11070_v52 = vcombine.high %v3023_v22, %v3031_v23  ;;  %v3111_v12 = vld [vmem:[%s15945_s5 + $0x18d0] sm:$0xff]  ;;  %v11133_v13 = vcombine.low %v3087_v61, %v3095_v9  ;;  %v3104_v14 = vld [vmem:[%s15945_s5 + $0x1898] sm:$0xff] }
 0x379   :  { %9159 = vmatprep.subr.bf16.mxu1 %v10976_v27  ;;  %v11072_v27 = vcombine.high %v3024_v24, %v3032_v25 }
 0x37b   :  { %8988 = vmatpush1.bf16.msra.mxu0 %v10973_v33  ;;  %v11069_v33 = vcombine.low %v3023_v22, %v3031_v23  ;;  %v3127_v22 = vld [vmem:[%s15945_s5 + $0x1950] sm:$0xff] }
 0x37c   :  { %9160 = vmatpush1.bf16.msra.mxu1 %v10975_v19  ;;  %8989 = vmatprep.subr.bf16.mxu0 %v10990_v37  ;;  %v11071_v19 = vcombine.low %v3024_v24, %v3032_v25  ;;  %v11086_v37 = vcombine.high %v3039_v29, %v3047_v30  ;;  %v3120_v24 = vld [vmem:[%s15945_s5 + $0x1918] sm:$0xff] }
 0x37d   :  { %9161 = vmatprep.subr.bf16.mxu1 %v10992_v38  ;;  %v11088_v38 = vcombine.high %v3040_v31, %v3048_v32  ;;  %v3128_v25 = vld [vmem:[%s15945_s5 + $0x1958] sm:$0xff] }
 0x37f   :  { %8990 = vmatpush1.bf16.msra.mxu0 %v10989_v45  ;;  %v11085_v45 = vcombine.low %v3039_v29, %v3047_v30  ;;  %v3135_v29 = vld [vmem:[%s15945_s5 + $0x1990] sm:$0xff] }
 0x380   :  { %9162 = vmatpush1.bf16.msra.mxu1 %v10991_v47  ;;  %8991 = vmatprep.subr.bf16.mxu0 %v11006_v48  ;;  %v11087_v47 = vcombine.low %v3040_v31, %v3048_v32  ;;  %v11102_v48 = vcombine.high %v3055_v39, %v3063_v40  ;;  %v3143_v30 = vld [vmem:[%s15945_s5 + $0x19d0] sm:$0xff]  ;;  %v3136_v31 = vld [vmem:[%s15945_s5 + $0x1998] sm:$0xff] }
 0x381   :  { %9163 = vmatprep.subr.bf16.mxu1 %v11008_v49  ;;  %v11104_v49 = vcombine.high %v3056_v41, %v3064_v42  ;;  %v3144_v32 = vld [vmem:[%s15945_s5 + $0x19d8] sm:$0xff] }
 0x383   :  { %8992 = vmatpush1.bf16.msra.mxu0 %v11005_v56  ;;  %v11101_v56 = vcombine.low %v3055_v39, %v3063_v40  ;;  %v3151_v39 = vld [vmem:[%s15945_s5 + $0x1a10] sm:$0xff] }
 0x384   :  { %9164 = vmatpush1.bf16.msra.mxu1 %v11007_v57  ;;  %8993 = vmatprep.subr.bf16.mxu0 %v11022_v58  ;;  %v11103_v57 = vcombine.low %v3056_v41, %v3064_v42  ;;  %v11118_v58 = vcombine.high %v3071_v50, %v3079_v51  ;;  %v3159_v40 = vld [vmem:[%s15945_s5 + $0x1a50] sm:$0xff]  ;;  %v3152_v41 = vld [vmem:[%s15945_s5 + $0x1a18] sm:$0xff] }
 0x385   :  { %9165 = vmatprep.subr.bf16.mxu1 %v11024_v59  ;;  %v11120_v59 = vcombine.high %v3072_v53, %v3080_v54  ;;  %v3160_v42 = vld [vmem:[%s15945_s5 + $0x1a58] sm:$0xff] }
 0x387   :  { %8994 = vmatpush1.bf16.msra.mxu0 %v11021_v5  ;;  %v11117_v5 = vcombine.low %v3071_v50, %v3079_v51  ;;  %v3167_v50 = vld [vmem:[%s15945_s5 + $0x1a90] sm:$0xff] }
 0x388   :  { %9166 = vmatpush1.bf16.msra.mxu1 %v11023_v6  ;;  %8995 = vmatprep.subr.bf16.mxu0 %v11038_v8  ;;  %v11119_v6 = vcombine.low %v3072_v53, %v3080_v54  ;;  %v11134_v8 = vcombine.high %v3087_v61, %v3095_v9  ;;  %v3175_v51 = vld [vmem:[%s15945_s5 + $0x1ad0] sm:$0xff]  ;;  %v3168_v53 = vld [vmem:[%s15945_s5 + $0x1a98] sm:$0xff] }
 0x389   :  { %9167 = vmatprep.subr.bf16.mxu1 %v11040_v10  ;;  %v11136_v10 = vcombine.high %v3088_v1, %v3096_v2  ;;  %v3176_v54 = vld [vmem:[%s15945_s5 + $0x1ad8] sm:$0xff]  ;;  %v3183_v9 = vld [vmem:[%s15945_s5 + $0x1b10] sm:$0xff] }
 0x38a   :  { %v11216_v61 = vcombine.high %v3168_v53, %v3176_v54 }
 0x38b   :  { %8996 = vmatpush1.bf16.msra.mxu0 %v11037_v7  ;;  %v3112_v7 = vld [vmem:[%s15945_s5 + $0x18d8] sm:$0xff] }
 0x38c   :  { %9168 = vmatpush1.bf16.msra.mxu1 %v11039_v17  ;;  %8997 = vmatprep.subr.bf16.mxu0 %v11054_v18  ;;  %v11135_v17 = vcombine.low %v3088_v1, %v3096_v2  ;;  %v11150_v18 = vcombine.high %v3103_v11, %v3111_v12  ;;  %v11152_v23 = vcombine.high %v3104_v14, %v3112_v7  ;;  %v3191_v1 = vld [vmem:[%s15945_s5 + $0x1b50] sm:$0xff] }
 0x38d   :  { %9169 = vmatprep.subr.bf16.mxu1 %v11056_v20  ;;  %v3119_v20 = vld [vmem:[%s15945_s5 + $0x1910] sm:$0xff] }
 0x38f   :  { %8998 = vmatpush1.bf16.msra.mxu0 %v11053_v43  ;;  %v11149_v43 = vcombine.low %v3103_v11, %v3111_v12  ;;  %v11213_v12 = vcombine.low %v3167_v50, %v3175_v51 }
 0x390   :  { %9170 = vmatpush1.bf16.msra.mxu1 %v11055_v26  ;;  %8999 = vmatprep.subr.bf16.mxu0 %v11070_v52  ;;  %v11151_v26 = vcombine.low %v3104_v14, %v3112_v7  ;;  %v11166_v52 = vcombine.high %v3119_v20, %v3127_v22  ;;  %v11230_v14 = vcombine.high %v3183_v9, %v3191_v1 }
 0x391   :  { %9171 = vmatprep.subr.bf16.mxu1 %v11072_v27  ;;  %v11168_v27 = vcombine.high %v3120_v24, %v3128_v25 }
 0x393   :  { %9000 = vmatpush1.bf16.msra.mxu0 %v11069_v33  ;;  %v11165_v33 = vcombine.low %v3119_v20, %v3127_v22  ;;  %v3199_v20 = vld [vmem:[%s15945_s5 + $0x1b90] sm:$0xff] }
 0x394   :  { %9172 = vmatpush1.bf16.msra.mxu1 %v11071_v19  ;;  %9001 = vmatprep.subr.bf16.mxu0 %v11086_v37  ;;  %v11167_v19 = vcombine.low %v3120_v24, %v3128_v25  ;;  %v11182_v37 = vcombine.high %v3135_v29, %v3143_v30  ;;  %v3207_v22 = vld [vmem:[%s15945_s5 + $0x1bd0] sm:$0xff] }
 0x395   :  { %9173 = vmatprep.subr.bf16.mxu1 %v11088_v38  ;;  %v11184_v38 = vcombine.high %v3136_v31, %v3144_v32 }
 0x397   :  { %9002 = vmatpush1.bf16.msra.mxu0 %v11085_v45  ;;  %v11181_v45 = vcombine.low %v3135_v29, %v3143_v30 }
 0x398   :  { %9174 = vmatpush1.bf16.msra.mxu1 %v11087_v47  ;;  %9003 = vmatprep.subr.bf16.mxu0 %v11102_v48  ;;  %v11183_v47 = vcombine.low %v3136_v31, %v3144_v32  ;;  %v11198_v48 = vcombine.high %v3151_v39, %v3159_v40  ;;  %v11229_v32 = vcombine.low %v3183_v9, %v3191_v1 }
 0x399   :  { %9175 = vmatprep.subr.bf16.mxu1 %v11104_v49  ;;  %v11200_v49 = vcombine.high %v3152_v41, %v3160_v42 }
 0x39b   :  { %9004 = vmatpush1.bf16.msra.mxu0 %v11101_v56  ;;  %v11197_v56 = vcombine.low %v3151_v39, %v3159_v40  ;;  %v11246_v39 = vcombine.high %v3199_v20, %v3207_v22 }
 0x39c   :  { %9176 = vmatpush1.bf16.msra.mxu1 %v11103_v57  ;;  %9005 = vmatprep.subr.bf16.mxu0 %v11118_v58  ;;  %v3341_v57 = vld [vmem:[%s15947_s6] sm:$0xff]  ;;  %v11199_v58 = vcombine.low %v3152_v41, %v3160_v42  ;;  %v3215_v42 = vld [vmem:[%s15945_s5 + $0x1c10] sm:$0xff] }
 0x39d   :  { %9177 = vmatprep.subr.bf16.mxu1 %v11120_v59  ;;  %v11214_v59 = vcombine.high %v3167_v50, %v3175_v51  ;;  %v3348_v2 = vrot.slane %v3341_v57, %v12039_v44  ;;  %v3360_v11 = vrot.slane %v3341_v57, %v12053_v62  ;;  %v11245_v51 = vcombine.low %v3199_v20, %v3207_v22 }
 0x39f   :  { %9006 = vmatpush1.bf16.msra.mxu0 %v11117_v5  ;;  %v3356_v5 = vrot.slane %v3341_v57, %v12050_v60 }
 0x3a0   :  { %9178 = vmatpush1.bf16.msra.mxu1 %v11119_v6  ;;  %9018 = vmatprep.subr.bf16.mxu0 %v11134_v8  ;;  %v3184_v6 = vld [vmem:[%s15945_s5 + $0x1b18] sm:$0xff] }
 0x3a1   :  { %9190 = vmatprep.subr.bf16.mxu1 %v11136_v10  ;;  %v3192_v8 = vld [vmem:[%s15945_s5 + $0x1b58] sm:$0xff]  ;;  %v3352_v10 = vrot.slane %v3341_v57, %v12045_v46  ;;  %v3231_v57 = vld [vmem:[%s15945_s5 + $0x1c90] sm:$0xff] }
 0x3a2   :  { %9008 = vmatmul.mubr.bf16.vlgmr.msra.gmra.mrb[16].mxu0 %v13312_v28 }
 0x3a3   :  { %9180 = vmatmul.mubr.bf16.vlgmr.msra.gmra.mrb[16].mxu1 %v13312_v28  ;;  %9019 = vmatpush1.bf16.msra.mxu0 %v11133_v13  ;;  %v11215_v13 = vcombine.low %v3168_v53, %v3176_v54 }
 0x3a4   :  { %9050 = vmatprep.mubr.bf16.mxu0 %v13328_v36  ;;  %9191 = vmatpush1.bf16.msra.mxu1 %v11135_v17 }
 0x3a5   :  { %9222 = vmatprep.mubr.bf16.mxu1 %v13328_v36  ;;  %9020 = vmatprep.subr.bf16.mxu0 %v11150_v18  ;;  %v11232_v18 = vcombine.high %v3184_v6, %v3192_v8 }
 0x3a6   :  { %9192 = vmatprep.subr.bf16.mxu1 %v11152_v23 }
 0x3a7   :  { %9021 = vmatpush1.bf16.msra.mxu0 %v11149_v43 }
 0x3a8   :  { %9193 = vmatpush1.bf16.msra.mxu1 %v11151_v26  ;;  %9022 = vmatprep.subr.bf16.mxu0 %v11166_v52  ;;  %v3200_v26 = vld [vmem:[%s15945_s5 + $0x1b98] sm:$0xff] }
 0x3a9   :  { %9194 = vmatprep.subr.bf16.mxu1 %v11168_v27  ;;  %v3208_v52 = vld [vmem:[%s15945_s5 + $0x1bd8] sm:$0xff] }
 0x3aa   :  { %v11248_v41 = vcombine.high %v3200_v26, %v3208_v52  ;;  %v11247_v53 = vcombine.low %v3200_v26, %v3208_v52  ;;  %v3264_v52 = vld [vmem:[%s15945_s5 + $0x1d98] sm:$0xff] }
 0x3ab   :  { %9023 = vmatpush1.bf16.msra.mxu0 %v11165_v33 }
 0x3ac   :  { %9195 = vmatpush1.bf16.msra.mxu1 %v11167_v19  ;;  %9024 = vmatprep.subr.bf16.mxu0 %v11182_v37 }
 0x3ad   :  { %9196 = vmatprep.subr.bf16.mxu1 %v11184_v38  ;;  %v11231_v38 = vcombine.low %v3184_v6, %v3192_v8  ;;  %v3247_v6 = vld [vmem:[%s15945_s5 + $0x1d10] sm:$0xff] }
 0x3ae   :  { %v3255_v8 = vld [vmem:[%s15945_s5 + $0x1d50] sm:$0xff] }
 0x3af   :  { %9025 = vmatpush1.bf16.msra.mxu0 %v11181_v45  ;;  %v3223_v45 = vld [vmem:[%s15945_s5 + $0x1c50] sm:$0xff] }
 0x3b0   :  { %9197 = vmatpush1.bf16.msra.mxu1 %v11183_v47  ;;  %9026 = vmatprep.subr.bf16.mxu0 %v11198_v48  ;;  %v3216_v48 = vld [vmem:[%s15945_s5 + $0x1c18] sm:$0xff]  ;;  %v11262_v54 = vcombine.high %v3215_v42, %v3223_v45  ;;  %v11261_v9 = vcombine.low %v3215_v42, %v3223_v45 }
 0x3b1   :  { %9198 = vmatprep.subr.bf16.mxu1 %v11200_v49  ;;  %v3224_v49 = vld [vmem:[%s15945_s5 + $0x1c58] sm:$0xff] }
 0x3b2   :  { %v11263_v1 = vcombine.low %v3216_v48, %v3224_v49  ;;  %v3280_v42 = vld [vmem:[%s15945_s5 + $0x1e18] sm:$0xff] }
 0x3b3   :  { %9027 = vmatpush1.bf16.msra.mxu0 %v11197_v56  ;;  %v11264_v56 = vcombine.high %v3216_v48, %v3224_v49  ;;  %v3288_v45 = vld [vmem:[%s15945_s5 + $0x1e58] sm:$0xff] }
 0x3b4   :  { %9199 = vmatpush1.bf16.msra.mxu1 %v11199_v58  ;;  %9028 = vmatprep.subr.bf16.mxu0 %v11214_v59  ;;  %v3239_v58 = vld [vmem:[%s15945_s5 + $0x1cd0] sm:$0xff]  ;;  %v3232_v59 = vld [vmem:[%s15945_s5 + $0x1c98] sm:$0xff] }
 0x3b5   :  { %v8708_v7 = vpop.f32.mrb[12].mxu0  ;;  %v8880_v17 = vpop.f32.mrb[12].mxu1  ;;  %9200 = vmatprep.subr.bf16.mxu1 %v11216_v61  ;;  %v3240_v61 = vld [vmem:[%s15945_s5 + $0x1cd8] sm:$0xff] }
 0x3b6   :  { %v11433_v23 = vadd.f32 %v8708_v7, %v3348_v2  ;;  %v11437_v24 = vadd.f32 %v8880_v17, %v3356_v5  ;;  %v8710_v25 = vpop.f32.mrb[13].mxu0  ;;  %v8882_v43 = vpop.f32.mrb[13].mxu1  ;;  %v11279_v17 = vcombine.low %v3232_v59, %v3240_v61 }
 0x3b7   :  { %v11434_v27 = vadd.f32 %v8710_v25, %v3352_v10  ;;  %v11438_v29 = vadd.f32 %v8882_v43, %v3360_v11  ;;  %v8712_v30 = vpop.f32.mrb[14].mxu0  ;;  %v8884_v31 = vpop.f32.mrb[14].mxu1  ;;  %9029 = vmatpush1.bf16.msra.mxu0 %v11213_v12  ;;  %v3256_v12 = vld [vmem:[%s15945_s5 + $0x1d58] sm:$0xff]  ;;  %v3271_v25 = vld [vmem:[%s15945_s5 + $0x1dd0] sm:$0xff] }
 0x3b8   :  { %11627 = vtanh.f32 %v11433_v23  ;;  %v11435_v33 = vadd.f32 %v8712_v30, %v3348_v2  ;;  %9201 = vmatpush1.bf16.msra.mxu1 %v11215_v13  ;;  %v8714_v19 = vpop.f32.mrb[15].mxu0  ;;  %v8886_v37 = vpop.f32.mrb[15].mxu1  ;;  %9030 = vmatprep.subr.bf16.mxu0 %v11230_v14  ;;  %v11439_v40 = vadd.f32 %v8884_v31, %v3356_v5  ;;  %v11278_v2 = vcombine.high %v3231_v57, %v3239_v58 }
 0x3b9   :  { %11629 = vtanh.f32 %v11437_v24  ;;  %9202 = vmatprep.subr.bf16.mxu1 %v11232_v18  ;;  %v11436_v47 = vadd.f32 %v8714_v19, %v3352_v10  ;;  %v11440_v50 = vadd.f32 %v8886_v37, %v3360_v11  ;;  %v11280_v5 = vcombine.high %v3232_v59, %v3240_v61  ;;  %v3248_v11 = vld [vmem:[%s15945_s5 + $0x1d18] sm:$0xff]  ;;  %v3263_v24 = vld [vmem:[%s15945_s5 + $0x1d90] sm:$0xff] }
 0x3ba   :  { %11631 = vtanh.f32 %v11434_v27  ;;  %v11277_v14 = vcombine.low %v3231_v57, %v3239_v58  ;;  %v11294_v18 = vcombine.high %v3247_v6, %v3255_v8  ;;  %v11296_v23 = vcombine.high %v3248_v11, %v3256_v12  ;;  %v3272_v27 = vld [vmem:[%s15945_s5 + $0x1dd8] sm:$0xff] }
 0x3bb   :  { %11633 = vtanh.f32 %v11438_v29  ;;  %9031 = vmatpush1.bf16.msra.mxu0 %v11229_v32  ;;  %v11293_v30 = vcombine.low %v3247_v6, %v3255_v8  ;;  %v11295_v32 = vcombine.low %v3248_v11, %v3256_v12  ;;  %v11311_v48 = vcombine.low %v3264_v52, %v3272_v27  ;;  %v3327_v12 = vld [vmem:[%s15945_s5 + $0x1f90] sm:$0xff] }
 0x3bc   :  { %11635 = vtanh.f32 %v11435_v33  ;;  %9203 = vmatpush1.bf16.msra.mxu1 %v11231_v38  ;;  %9032 = vmatprep.subr.bf16.mxu0 %v11246_v39  ;;  %v11310_v33 = vcombine.high %v3263_v24, %v3271_v25  ;;  %v11312_v38 = vcombine.high %v3264_v52, %v3272_v27  ;;  %v3279_v39 = vld [vmem:[%s15945_s5 + $0x1e10] sm:$0xff]  ;;  %v11327_v58 = vcombine.low %v3280_v42, %v3288_v45 }
 0x3bd   :  { %11637 = vtanh.f32 %v11439_v40  ;;  %9204 = vmatprep.subr.bf16.mxu1 %v11248_v41  ;;  %v3287_v40 = vld [vmem:[%s15945_s5 + $0x1e50] sm:$0xff] }
 0x3be   :  { %11639 = vtanh.f32 %v11436_v47  ;;  %v11309_v47 = vcombine.low %v3263_v24, %v3271_v25  ;;  %v11326_v49 = vcombine.high %v3279_v39, %v3287_v40  ;;  %v11325_v57 = vcombine.low %v3279_v39, %v3287_v40  ;;  %v2329_v24 = vld [vmem:[%s15945_s5 + $0x60] sm:$0xff]  ;;  %v2322_v25 = vld [vmem:[%s15945_s5 + $0x28] sm:$0xff] }
 0x3bf   :  { %11641 = vtanh.f32 %v11440_v50  ;;  %9033 = vmatpush1.bf16.msra.mxu0 %v11245_v51  ;;  %v11328_v50 = vcombine.high %v3280_v42, %v3288_v45  ;;  %v3295_v51 = vld [vmem:[%s15945_s5 + $0x1e90] sm:$0xff]  ;;  %v2353_v39 = vld [vmem:[%s15945_s5 + $0x120] sm:$0xff]  ;;  %v2354_v42 = vld [vmem:[%s15945_s5 + $0x128] sm:$0xff] }
 0x3c0   :  { %9205 = vmatpush1.bf16.msra.mxu1 %v11247_v53  ;;  %9034 = vmatprep.subr.bf16.mxu0 %v11262_v54  ;;  %v3303_v53 = vld [vmem:[%s15945_s5 + $0x1ed0] sm:$0xff]  ;;  %v3296_v54 = vld [vmem:[%s15945_s5 + $0x1e98] sm:$0xff]  ;;  %v2361_v40 = vld [vmem:[%s15945_s5 + $0x160] sm:$0xff] }
 0x3c1   :  { %9206 = vmatprep.subr.bf16.mxu1 %v11264_v56  ;;  %v3304_v56 = vld [vmem:[%s15945_s5 + $0x1ed8] sm:$0xff]  ;;  %v11342_v59 = vcombine.high %v3295_v51, %v3303_v53  ;;  %v11341_v6 = vcombine.low %v3295_v51, %v3303_v53  ;;  %v2362_v45 = vld [vmem:[%s15945_s5 + $0x168] sm:$0xff]  ;;  %v2369_v51 = vld [vmem:[%s15945_s5 + $0x1a0] sm:$0xff] }
 0x3c2   :  { %v11628_v10 = vpop.eup %11627  ;;  %v11344_v61 = vcombine.high %v3296_v54, %v3304_v56  ;;  %v11343_v8 = vcombine.low %v3296_v54, %v3304_v56  ;;  %v2377_v53 = vld [vmem:[%s15945_s5 + $0x1e0] sm:$0xff]  ;;  %v2370_v54 = vld [vmem:[%s15945_s5 + $0x1a8] sm:$0xff] }
 0x3c3   :  { %v11630_v13 = vpop.eup %11629  ;;  %9035 = vmatpush1.bf16.msra.mxu0 %v11261_v9  ;;  %v3311_v9 = vld [vmem:[%s15945_s5 + $0x1f10] sm:$0xff]  ;;  %v2378_v56 = vld [vmem:[%s15945_s5 + $0x1e8] sm:$0xff] }
 0x3c4   :  { %v11632_v7 = vpop.eup %11631  ;;  %9207 = vmatpush1.bf16.msra.mxu1 %v11263_v1  ;;  %9036 = vmatprep.subr.bf16.mxu0 %v11278_v2  ;;  %v3319_v1 = vld [vmem:[%s15945_s5 + $0x1f50] sm:$0xff]  ;;  %v3312_v2 = vld [vmem:[%s15945_s5 + $0x1f18] sm:$0xff] }
 0x3c5   :  { %v11634_v20 = vpop.eup %11633  ;;  %v11401_v22 = vpack.c.bf16 %v11632_v7, %v11628_v10  ;;  %9208 = vmatprep.subr.bf16.mxu1 %v11280_v5  ;;  %v3320_v5 = vld [vmem:[%s15945_s5 + $0x1f58] sm:$0xff]  ;;  %v11358_v10 = vcombine.high %v3311_v9, %v3319_v1 }
 0x3c6   :  { %v11636_v43 = vpop.eup %11635  ;;  %v11402_v26 = vpack.c.bf16 %v11634_v20, %v11630_v13  ;;  %v11360_v11 = vcombine.high %v3312_v2, %v3320_v5  ;;  %v3335_v13 = vld [vmem:[%s15945_s5 + $0x1fd0] sm:$0xff]  ;;  %v3336_v7 = vld [vmem:[%s15945_s5 + $0x1fd8] sm:$0xff] }
 0x3c7   :  { %v11638_v29 = vpop.eup %11637  ;;  %10049 = vst [vmem:[%s15948_s7] sm:$0xff] %v11401_v22  ;;  %9037 = vmatpush1.bf16.msra.mxu0 %v11277_v14  ;;  %v3328_v14 = vld [vmem:[%s15945_s5 + $0x1f98] sm:$0xff]  ;;  %v11374_v20 = vcombine.high %v3327_v12, %v3335_v13 }
 0x3c8   :  { %v11640_v31 = vpop.eup %11639  ;;  %10050 = vst [vmem:[%s15948_s7 + $0x8] sm:$0xff] %v11402_v26  ;;  %9209 = vmatpush1.bf16.msra.mxu1 %v11279_v17  ;;  %9038 = vmatprep.subr.bf16.mxu0 %v11294_v18  ;;  %v11357_v17 = vcombine.low %v3311_v9, %v3319_v1  ;;  %v11359_v18 = vcombine.low %v3312_v2, %v3320_v5  ;;  %v2385_v9 = vld [vmem:[%s15945_s5 + $0x220] sm:$0xff]  ;;  %v2386_v2 = vld [vmem:[%s15945_s5 + $0x228] sm:$0xff] }
 0x3c9   :  { %v11642_v19 = vpop.eup %11641  ;;  %v11409_v37 = vpack.c.bf16 %v11640_v31, %v11636_v43  ;;  %9210 = vmatprep.subr.bf16.mxu1 %v11296_v23  ;;  %v11376_v22 = vcombine.high %v3328_v14, %v3336_v7  ;;  %v2321_v23 = vld [vmem:[%s15945_s5 + $0x20] sm:$0xff]  ;;  %v2330_v43 = vld [vmem:[%s15945_s5 + $0x68] sm:$0xff]  ;;  %v11373_v26 = vcombine.low %v3327_v12, %v3335_v13  ;;  %v11375_v52 = vcombine.low %v3328_v14, %v3336_v7 }
 0x3ca   :  { %v11410_v41 = vpack.c.bf16 %v11642_v19, %v11638_v29  ;;  %v10370_v27 = vcombine.high %v2321_v23, %v2329_v24  ;;  %v10372_v29 = vcombine.high %v2322_v25, %v2330_v43  ;;  %v2345_v31 = vld [vmem:[%s15945_s5 + $0xe0] sm:$0xff]  ;;  %v2346_v19 = vld [vmem:[%s15945_s5 + $0xe8] sm:$0xff] }
 0x3cb   :  { %10060 = vst [vmem:[%s15948_s7 + $0x40] sm:$0xff] %v11409_v37  ;;  %9039 = vmatpush1.bf16.msra.mxu0 %v11293_v30  ;;  %v2337_v30 = vld [vmem:[%s15945_s5 + $0xa0] sm:$0xff]  ;;  %v10371_v37 = vcombine.low %v2322_v25, %v2330_v43  ;;  %v2394_v5 = vld [vmem:[%s15945_s5 + $0x268] sm:$0xff] }
 0x3cc   :  { %10061 = vst [vmem:[%s15948_s7 + $0x48] sm:$0xff] %v11410_v41  ;;  %9211 = vmatpush1.bf16.msra.mxu1 %v11295_v32  ;;  %9040 = vmatprep.subr.bf16.mxu0 %v11310_v33  ;;  %v10369_v32 = vcombine.low %v2321_v23, %v2329_v24  ;;  %v2338_v33 = vld [vmem:[%s15945_s5 + $0xa8] sm:$0xff]  ;;  %v2393_v1 = vld [vmem:[%s15945_s5 + $0x260] sm:$0xff] }
 0x3cd   :  { %9212 = vmatprep.subr.bf16.mxu1 %v11312_v38  ;;  %v10386_v38 = vcombine.high %v2337_v30, %v2345_v31  ;;  %v10388_v41 = vcombine.high %v2338_v33, %v2346_v19  ;;  %v2401_v12 = vld [vmem:[%s15945_s5 + $0x2a0] sm:$0xff]  ;;  %v2402_v14 = vld [vmem:[%s15945_s5 + $0x2a8] sm:$0xff] }
 0x3ce   :  { %v2409_v13 = vld [vmem:[%s15945_s5 + $0x2e0] sm:$0xff]  ;;  %v2410_v7 = vld [vmem:[%s15945_s5 + $0x2e8] sm:$0xff] }
 0x3cf   :  { %9041 = vmatpush1.bf16.msra.mxu0 %v11309_v47  ;;  %v10385_v47 = vcombine.low %v2337_v30, %v2345_v31  ;;  %v2417_v23 = vld [vmem:[%s15945_s5 + $0x320] sm:$0xff]  ;;  %v2418_v25 = vld [vmem:[%s15945_s5 + $0x328] sm:$0xff] }
 0x3d0   :  { %9213 = vmatpush1.bf16.msra.mxu1 %v11311_v48  ;;  %9042 = vmatprep.subr.bf16.mxu0 %v11326_v49  ;;  %v10387_v48 = vcombine.low %v2338_v33, %v2346_v19  ;;  %v10402_v49 = vcombine.high %v2353_v39, %v2361_v40  ;;  %v2425_v24 = vld [vmem:[%s15945_s5 + $0x360] sm:$0xff]  ;;  %v2426_v43 = vld [vmem:[%s15945_s5 + $0x368] sm:$0xff] }
 0x3d1   :  { %9214 = vmatprep.subr.bf16.mxu1 %v11328_v50  ;;  %v10404_v50 = vcombine.high %v2354_v42, %v2362_v45  ;;  %v2433_v30 = vld [vmem:[%s15945_s5 + $0x3a0] sm:$0xff]  ;;  %v2442_v33 = vld [vmem:[%s15945_s5 + $0x3e8] sm:$0xff]  ;;  %v10465_v19 = vcombine.low %v2417_v23, %v2425_v24 }
 0x3d2   :  { %v2441_v31 = vld [vmem:[%s15945_s5 + $0x3e0] sm:$0xff] }
 0x3d3   :  { %9043 = vmatpush1.bf16.msra.mxu0 %v11325_v57  ;;  %v10401_v57 = vcombine.low %v2353_v39, %v2361_v40  ;;  %v2449_v40 = vld [vmem:[%s15945_s5 + $0x420] sm:$0xff] }
 0x3d4   :  { %9215 = vmatpush1.bf16.msra.mxu1 %v11327_v58  ;;  %9044 = vmatprep.subr.bf16.mxu0 %v11342_v59  ;;  %v10403_v58 = vcombine.low %v2354_v42, %v2362_v45  ;;  %v10418_v59 = vcombine.high %v2369_v51, %v2377_v53  ;;  %v2450_v42 = vld [vmem:[%s15945_s5 + $0x428] sm:$0xff] }
 0x3d5   :  { %9216 = vmatprep.subr.bf16.mxu1 %v11344_v61  ;;  %v10420_v61 = vcombine.high %v2370_v54, %v2378_v56  ;;  %v2458_v45 = vld [vmem:[%s15945_s5 + $0x468] sm:$0xff] }
 0x3d7   :  { %9045 = vmatpush1.bf16.msra.mxu0 %v11341_v6  ;;  %v10417_v6 = vcombine.low %v2369_v51, %v2377_v53  ;;  %v2465_v51 = vld [vmem:[%s15945_s5 + $0x4a0] sm:$0xff] }
 0x3d8   :  { %9217 = vmatpush1.bf16.msra.mxu1 %v11343_v8  ;;  %9046 = vmatprep.subr.bf16.mxu0 %v11358_v10  ;;  %v10419_v8 = vcombine.low %v2370_v54, %v2378_v56  ;;  %v10434_v10 = vcombine.high %v2385_v9, %v2393_v1  ;;  %v2473_v53 = vld [vmem:[%s15945_s5 + $0x4e0] sm:$0xff]  ;;  %v2466_v54 = vld [vmem:[%s15945_s5 + $0x4a8] sm:$0xff] }
 0x3d9   :  { %9218 = vmatprep.subr.bf16.mxu1 %v11360_v11  ;;  %v10436_v11 = vcombine.high %v2386_v2, %v2394_v5  ;;  %v2474_v56 = vld [vmem:[%s15945_s5 + $0x4e8] sm:$0xff] }
 0x3db   :  { %9047 = vmatpush1.bf16.msra.mxu0 %v11357_v17  ;;  %v10433_v17 = vcombine.low %v2385_v9, %v2393_v1  ;;  %v2481_v9 = vld [vmem:[%s15945_s5 + $0x520] sm:$0xff] }
 0x3dc   :  { %9219 = vmatpush1.bf16.msra.mxu1 %v11359_v18  ;;  %9048 = vmatprep.subr.bf16.mxu0 %v11374_v20  ;;  %v10435_v18 = vcombine.low %v2386_v2, %v2394_v5  ;;  %v10450_v20 = vcombine.high %v2401_v12, %v2409_v13  ;;  %v2489_v1 = vld [vmem:[%s15945_s5 + $0x560] sm:$0xff]  ;;  %v2482_v2 = vld [vmem:[%s15945_s5 + $0x528] sm:$0xff] }
 0x3dd   :  { %9220 = vmatprep.subr.bf16.mxu1 %v11376_v22  ;;  %v10452_v22 = vcombine.high %v2402_v14, %v2410_v7  ;;  %v2490_v5 = vld [vmem:[%s15945_s5 + $0x568] sm:$0xff] }
 0x3df   :  { %9049 = vmatpush1.bf16.msra.mxu0 %v11373_v26  ;;  %v10449_v26 = vcombine.low %v2401_v12, %v2409_v13  ;;  %v2497_v12 = vld [vmem:[%s15945_s5 + $0x5a0] sm:$0xff] }
 0x3e0   :  { %9221 = vmatpush1.bf16.msra.mxu1 %v11375_v52  ;;  %9233 = vmatprep.subr.bf16.mxu0 %v10370_v27  ;;  %v10451_v52 = vcombine.low %v2402_v14, %v2410_v7  ;;  %v10466_v27 = vcombine.high %v2417_v23, %v2425_v24  ;;  %v2505_v13 = vld [vmem:[%s15945_s5 + $0x5e0] sm:$0xff]  ;;  %v2498_v14 = vld [vmem:[%s15945_s5 + $0x5a8] sm:$0xff] }
 0x3e1   :  { %9405 = vmatprep.subr.bf16.mxu1 %v10372_v29  ;;  %v10468_v29 = vcombine.high %v2418_v25, %v2426_v43  ;;  %v2506_v7 = vld [vmem:[%s15945_s5 + $0x5e8] sm:$0xff]  ;;  %v2513_v23 = vld [vmem:[%s15945_s5 + $0x620] sm:$0xff] }
 0x3e2   :  { %9051 = vmatmul.mubr.bf16.vlgmr.msra.gmra.mrb[16].mxu0 %v13324_v34  ;;  %v2521_v24 = vld [vmem:[%s15945_s5 + $0x660] sm:$0xff] }
 0x3e3   :  { %9223 = vmatmul.mubr.bf16.vlgmr.msra.gmra.mrb[16].mxu1 %v13324_v34  ;;  %9234 = vmatpush1.bf16.msra.mxu0 %v10369_v32  ;;  %v2434_v32 = vld [vmem:[%s15945_s5 + $0x3a8] sm:$0xff] }
 0x3e4   :  { %9265 = vmatprep.mubr.bf16.mxu0 %v12890_v3  ;;  %9406 = vmatpush1.bf16.msra.mxu1 %v10371_v37  ;;  %v10467_v37 = vcombine.low %v2418_v25, %v2426_v43  ;;  %v10484_v39 = vcombine.high %v2434_v32, %v2442_v33  ;;  %v2514_v25 = vld [vmem:[%s15945_s5 + $0x628] sm:$0xff] }
 0x3e5   :  { %9437 = vmatprep.mubr.bf16.mxu1 %v12890_v3  ;;  %9235 = vmatprep.subr.bf16.mxu0 %v10386_v38  ;;  %v10482_v38 = vcombine.high %v2433_v30, %v2441_v31  ;;  %v2522_v43 = vld [vmem:[%s15945_s5 + $0x668] sm:$0xff] }
 0x3e6   :  { %9407 = vmatprep.subr.bf16.mxu1 %v10388_v41  ;;  %v2457_v41 = vld [vmem:[%s15945_s5 + $0x460] sm:$0xff] }
 0x3e7   :  { %9236 = vmatpush1.bf16.msra.mxu0 %v10385_v47  ;;  %v10481_v47 = vcombine.low %v2433_v30, %v2441_v31  ;;  %v2529_v30 = vld [vmem:[%s15945_s5 + $0x6a0] sm:$0xff] }
 0x3e8   :  { %9408 = vmatpush1.bf16.msra.mxu1 %v10387_v48  ;;  %9237 = vmatprep.subr.bf16.mxu0 %v10402_v49  ;;  %v10483_v48 = vcombine.low %v2434_v32, %v2442_v33  ;;  %v10498_v49 = vcombine.high %v2449_v40, %v2457_v41  ;;  %v2537_v31 = vld [vmem:[%s15945_s5 + $0x6e0] sm:$0xff]  ;;  %v2530_v32 = vld [vmem:[%s15945_s5 + $0x6a8] sm:$0xff] }
 0x3e9   :  { %9409 = vmatprep.subr.bf16.mxu1 %v10404_v50  ;;  %v10500_v50 = vcombine.high %v2450_v42, %v2458_v45  ;;  %v2538_v33 = vld [vmem:[%s15945_s5 + $0x6e8] sm:$0xff] }
 0x3eb   :  { %9238 = vmatpush1.bf16.msra.mxu0 %v10401_v57  ;;  %v10497_v57 = vcombine.low %v2449_v40, %v2457_v41  ;;  %v2545_v40 = vld [vmem:[%s15945_s5 + $0x720] sm:$0xff] }
 0x3ec   :  { %9410 = vmatpush1.bf16.msra.mxu1 %v10403_v58  ;;  %9239 = vmatprep.subr.bf16.mxu0 %v10418_v59  ;;  %v10499_v58 = vcombine.low %v2450_v42, %v2458_v45  ;;  %v10514_v59 = vcombine.high %v2465_v51, %v2473_v53  ;;  %v2553_v41 = vld [vmem:[%s15945_s5 + $0x760] sm:$0xff]  ;;  %v2546_v42 = vld [vmem:[%s15945_s5 + $0x728] sm:$0xff] }
 0x3ed   :  { %9411 = vmatprep.subr.bf16.mxu1 %v10420_v61  ;;  %v10516_v61 = vcombine.high %v2466_v54, %v2474_v56  ;;  %v2554_v45 = vld [vmem:[%s15945_s5 + $0x768] sm:$0xff] }
 0x3ef   :  { %9240 = vmatpush1.bf16.msra.mxu0 %v10417_v6  ;;  %v10513_v6 = vcombine.low %v2465_v51, %v2473_v53  ;;  %v2561_v51 = vld [vmem:[%s15945_s5 + $0x7a0] sm:$0xff] }
 0x3f0   :  { %9412 = vmatpush1.bf16.msra.mxu1 %v10419_v8  ;;  %9241 = vmatprep.subr.bf16.mxu0 %v10434_v10  ;;  %v10515_v8 = vcombine.low %v2466_v54, %v2474_v56  ;;  %v10530_v10 = vcombine.high %v2481_v9, %v2489_v1  ;;  %v2569_v53 = vld [vmem:[%s15945_s5 + $0x7e0] sm:$0xff]  ;;  %v2562_v54 = vld [vmem:[%s15945_s5 + $0x7a8] sm:$0xff] }
 0x3f1   :  { %9413 = vmatprep.subr.bf16.mxu1 %v10436_v11  ;;  %v10532_v11 = vcombine.high %v2482_v2, %v2490_v5  ;;  %v2570_v56 = vld [vmem:[%s15945_s5 + $0x7e8] sm:$0xff] }
 0x3f3   :  { %9242 = vmatpush1.bf16.msra.mxu0 %v10433_v17  ;;  %v10529_v17 = vcombine.low %v2481_v9, %v2489_v1  ;;  %v2577_v9 = vld [vmem:[%s15945_s5 + $0x820] sm:$0xff] }
 0x3f4   :  { %9414 = vmatpush1.bf16.msra.mxu1 %v10435_v18  ;;  %9243 = vmatprep.subr.bf16.mxu0 %v10450_v20  ;;  %v10531_v18 = vcombine.low %v2482_v2, %v2490_v5  ;;  %v10546_v20 = vcombine.high %v2497_v12, %v2505_v13  ;;  %v2585_v1 = vld [vmem:[%s15945_s5 + $0x860] sm:$0xff]  ;;  %v2578_v2 = vld [vmem:[%s15945_s5 + $0x828] sm:$0xff] }
 0x3f5   :  { %9415 = vmatprep.subr.bf16.mxu1 %v10452_v22  ;;  %v10548_v22 = vcombine.high %v2498_v14, %v2506_v7  ;;  %v2586_v5 = vld [vmem:[%s15945_s5 + $0x868] sm:$0xff] }
 0x3f7   :  { %9244 = vmatpush1.bf16.msra.mxu0 %v10449_v26  ;;  %v10545_v26 = vcombine.low %v2497_v12, %v2505_v13  ;;  %v2593_v12 = vld [vmem:[%s15945_s5 + $0x8a0] sm:$0xff] }
 0x3f8   :  { %9416 = vmatpush1.bf16.msra.mxu1 %v10451_v52  ;;  %9245 = vmatprep.subr.bf16.mxu0 %v10466_v27  ;;  %v10547_v52 = vcombine.low %v2498_v14, %v2506_v7  ;;  %v10562_v27 = vcombine.high %v2513_v23, %v2521_v24  ;;  %v2601_v13 = vld [vmem:[%s15945_s5 + $0x8e0] sm:$0xff]  ;;  %v10625_v14 = vcombine.low %v2577_v9, %v2585_v1  ;;  %v2594_v7 = vld [vmem:[%s15945_s5 + $0x8a8] sm:$0xff] }
 0x3f9   :  { %9417 = vmatprep.subr.bf16.mxu1 %v10468_v29  ;;  %v10564_v29 = vcombine.high %v2514_v25, %v2522_v43 }
 0x3fb   :  { %9246 = vmatpush1.bf16.msra.mxu0 %v10465_v19  ;;  %v10561_v19 = vcombine.low %v2513_v23, %v2521_v24  ;;  %v2617_v23 = vld [vmem:[%s15945_s5 + $0x960] sm:$0xff] }
 0x3fc   :  { %9418 = vmatpush1.bf16.msra.mxu1 %v10467_v37  ;;  %9247 = vmatprep.subr.bf16.mxu0 %v10482_v38  ;;  %v10563_v37 = vcombine.low %v2514_v25, %v2522_v43  ;;  %v10578_v38 = vcombine.high %v2529_v30, %v2537_v31  ;;  %v2610_v25 = vld [vmem:[%s15945_s5 + $0x928] sm:$0xff] }
 0x3fd   :  { %9419 = vmatprep.subr.bf16.mxu1 %v10484_v39  ;;  %v10580_v39 = vcombine.high %v2530_v32, %v2538_v33  ;;  %v2618_v43 = vld [vmem:[%s15945_s5 + $0x968] sm:$0xff] }
 0x3ff   :  { %9248 = vmatpush1.bf16.msra.mxu0 %v10481_v47  ;;  %v10577_v47 = vcombine.low %v2529_v30, %v2537_v31  ;;  %v2625_v30 = vld [vmem:[%s15945_s5 + $0x9a0] sm:$0xff] }
 0x400   :  { %9420 = vmatpush1.bf16.msra.mxu1 %v10483_v48  ;;  %9249 = vmatprep.subr.bf16.mxu0 %v10498_v49  ;;  %v10579_v48 = vcombine.low %v2530_v32, %v2538_v33  ;;  %v10594_v49 = vcombine.high %v2545_v40, %v2553_v41  ;;  %v2633_v31 = vld [vmem:[%s15945_s5 + $0x9e0] sm:$0xff]  ;;  %v2626_v32 = vld [vmem:[%s15945_s5 + $0x9a8] sm:$0xff] }
 0x401   :  { %9421 = vmatprep.subr.bf16.mxu1 %v10500_v50  ;;  %v10596_v50 = vcombine.high %v2546_v42, %v2554_v45  ;;  %v2634_v33 = vld [vmem:[%s15945_s5 + $0x9e8] sm:$0xff] }
 0x403   :  { %9250 = vmatpush1.bf16.msra.mxu0 %v10497_v57  ;;  %v10593_v57 = vcombine.low %v2545_v40, %v2553_v41  ;;  %v2641_v40 = vld [vmem:[%s15945_s5 + $0xa20] sm:$0xff] }
 0x404   :  { %9422 = vmatpush1.bf16.msra.mxu1 %v10499_v58  ;;  %9251 = vmatprep.subr.bf16.mxu0 %v10514_v59  ;;  %v10595_v58 = vcombine.low %v2546_v42, %v2554_v45  ;;  %v10610_v59 = vcombine.high %v2561_v51, %v2569_v53  ;;  %v2649_v41 = vld [vmem:[%s15945_s5 + $0xa60] sm:$0xff]  ;;  %v2642_v42 = vld [vmem:[%s15945_s5 + $0xa28] sm:$0xff] }
 0x405   :  { %9423 = vmatprep.subr.bf16.mxu1 %v10516_v61  ;;  %v10612_v61 = vcombine.high %v2562_v54, %v2570_v56  ;;  %v2650_v45 = vld [vmem:[%s15945_s5 + $0xa68] sm:$0xff] }
 0x407   :  { %9252 = vmatpush1.bf16.msra.mxu0 %v10513_v6  ;;  %v10609_v6 = vcombine.low %v2561_v51, %v2569_v53  ;;  %v2657_v51 = vld [vmem:[%s15945_s5 + $0xaa0] sm:$0xff] }
 0x408   :  { %9424 = vmatpush1.bf16.msra.mxu1 %v10515_v8  ;;  %9253 = vmatprep.subr.bf16.mxu0 %v10530_v10  ;;  %v10611_v8 = vcombine.low %v2562_v54, %v2570_v56  ;;  %v10626_v10 = vcombine.high %v2577_v9, %v2585_v1  ;;  %v2665_v53 = vld [vmem:[%s15945_s5 + $0xae0] sm:$0xff]  ;;  %v2658_v54 = vld [vmem:[%s15945_s5 + $0xaa8] sm:$0xff] }
 0x409   :  { %9425 = vmatprep.subr.bf16.mxu1 %v10532_v11  ;;  %v10628_v11 = vcombine.high %v2578_v2, %v2586_v5  ;;  %v2666_v56 = vld [vmem:[%s15945_s5 + $0xae8] sm:$0xff]  ;;  %v2673_v9 = vld [vmem:[%s15945_s5 + $0xb20] sm:$0xff] }
 0x40a   :  { %v2681_v1 = vld [vmem:[%s15945_s5 + $0xb60] sm:$0xff] }
 0x40b   :  { %9254 = vmatpush1.bf16.msra.mxu0 %v10529_v17  ;;  %v2602_v17 = vld [vmem:[%s15945_s5 + $0x8e8] sm:$0xff] }
 0x40c   :  { %9426 = vmatpush1.bf16.msra.mxu1 %v10531_v18  ;;  %9255 = vmatprep.subr.bf16.mxu0 %v10546_v20  ;;  %v10627_v18 = vcombine.low %v2578_v2, %v2586_v5  ;;  %v10642_v20 = vcombine.high %v2593_v12, %v2601_v13  ;;  %v10644_v24 = vcombine.high %v2594_v7, %v2602_v17  ;;  %v2674_v2 = vld [vmem:[%s15945_s5 + $0xb28] sm:$0xff] }
 0x40d   :  { %9427 = vmatprep.subr.bf16.mxu1 %v10548_v22  ;;  %v2609_v22 = vld [vmem:[%s15945_s5 + $0x920] sm:$0xff]  ;;  %v2682_v5 = vld [vmem:[%s15945_s5 + $0xb68] sm:$0xff] }
 0x40f   :  { %9256 = vmatpush1.bf16.msra.mxu0 %v10545_v26  ;;  %v10641_v26 = vcombine.low %v2593_v12, %v2601_v13  ;;  %v2689_v12 = vld [vmem:[%s15945_s5 + $0xba0] sm:$0xff] }
 0x410   :  { %9428 = vmatpush1.bf16.msra.mxu1 %v10547_v52  ;;  %9257 = vmatprep.subr.bf16.mxu0 %v10562_v27  ;;  %v10643_v52 = vcombine.low %v2594_v7, %v2602_v17  ;;  %v10658_v27 = vcombine.high %v2609_v22, %v2617_v23  ;;  %v2697_v13 = vld [vmem:[%s15945_s5 + $0xbe0] sm:$0xff]  ;;  %v2698_v7 = vld [vmem:[%s15945_s5 + $0xbe8] sm:$0xff]  ;;  %v10721_v17 = vcombine.low %v2673_v9, %v2681_v1 }
 0x411   :  { %9429 = vmatprep.subr.bf16.mxu1 %v10564_v29  ;;  %v10660_v29 = vcombine.high %v2610_v25, %v2618_v43 }
 0x413   :  { %9258 = vmatpush1.bf16.msra.mxu0 %v10561_v19  ;;  %v10657_v19 = vcombine.low %v2609_v22, %v2617_v23  ;;  %v2705_v23 = vld [vmem:[%s15945_s5 + $0xc20] sm:$0xff] }
 0x414   :  { %9430 = vmatpush1.bf16.msra.mxu1 %v10563_v37  ;;  %9259 = vmatprep.subr.bf16.mxu0 %v10578_v38  ;;  %v10659_v37 = vcombine.low %v2610_v25, %v2618_v43  ;;  %v10674_v38 = vcombine.high %v2625_v30, %v2633_v31  ;;  %v2706_v25 = vld [vmem:[%s15945_s5 + $0xc28] sm:$0xff] }
 0x415   :  { %9431 = vmatprep.subr.bf16.mxu1 %v10580_v39  ;;  %v10676_v39 = vcombine.high %v2626_v32, %v2634_v33  ;;  %v2714_v43 = vld [vmem:[%s15945_s5 + $0xc68] sm:$0xff] }
 0x417   :  { %9260 = vmatpush1.bf16.msra.mxu0 %v10577_v47  ;;  %v10673_v47 = vcombine.low %v2625_v30, %v2633_v31  ;;  %v2721_v30 = vld [vmem:[%s15945_s5 + $0xca0] sm:$0xff] }
 0x418   :  { %9432 = vmatpush1.bf16.msra.mxu1 %v10579_v48  ;;  %9261 = vmatprep.subr.bf16.mxu0 %v10594_v49  ;;  %v10675_v48 = vcombine.low %v2626_v32, %v2634_v33  ;;  %v10690_v49 = vcombine.high %v2641_v40, %v2649_v41  ;;  %v2729_v31 = vld [vmem:[%s15945_s5 + $0xce0] sm:$0xff]  ;;  %v2722_v32 = vld [vmem:[%s15945_s5 + $0xca8] sm:$0xff] }
 0x419   :  { %9433 = vmatprep.subr.bf16.mxu1 %v10596_v50  ;;  %v10692_v50 = vcombine.high %v2642_v42, %v2650_v45  ;;  %v2730_v33 = vld [vmem:[%s15945_s5 + $0xce8] sm:$0xff] }
 0x41b   :  { %9262 = vmatpush1.bf16.msra.mxu0 %v10593_v57  ;;  %v10689_v57 = vcombine.low %v2641_v40, %v2649_v41  ;;  %v2737_v40 = vld [vmem:[%s15945_s5 + $0xd20] sm:$0xff] }
 0x41c   :  { %9434 = vmatpush1.bf16.msra.mxu1 %v10595_v58  ;;  %9263 = vmatprep.subr.bf16.mxu0 %v10610_v59  ;;  %v10691_v58 = vcombine.low %v2642_v42, %v2650_v45  ;;  %v10706_v59 = vcombine.high %v2657_v51, %v2665_v53  ;;  %v2745_v41 = vld [vmem:[%s15945_s5 + $0xd60] sm:$0xff]  ;;  %v2738_v42 = vld [vmem:[%s15945_s5 + $0xd28] sm:$0xff] }
 0x41d   :  { %9435 = vmatprep.subr.bf16.mxu1 %v10612_v61  ;;  %v10708_v61 = vcombine.high %v2658_v54, %v2666_v56  ;;  %v2746_v45 = vld [vmem:[%s15945_s5 + $0xd68] sm:$0xff] }
 0x41f   :  { %9264 = vmatpush1.bf16.msra.mxu0 %v10609_v6  ;;  %v10705_v6 = vcombine.low %v2657_v51, %v2665_v53  ;;  %v2753_v51 = vld [vmem:[%s15945_s5 + $0xda0] sm:$0xff] }
 0x420   :  { %9436 = vmatpush1.bf16.msra.mxu1 %v10611_v8  ;;  %9276 = vmatprep.subr.bf16.mxu0 %v10626_v10  ;;  %v10707_v8 = vcombine.low %v2658_v54, %v2666_v56  ;;  %v10722_v10 = vcombine.high %v2673_v9, %v2681_v1  ;;  %v2761_v53 = vld [vmem:[%s15945_s5 + $0xde0] sm:$0xff]  ;;  %v2754_v54 = vld [vmem:[%s15945_s5 + $0xda8] sm:$0xff] }
 0x421   :  { %9448 = vmatprep.subr.bf16.mxu1 %v10628_v11  ;;  %v10724_v11 = vcombine.high %v2674_v2, %v2682_v5  ;;  %v2762_v56 = vld [vmem:[%s15945_s5 + $0xde8] sm:$0xff]  ;;  %v2769_v9 = vld [vmem:[%s15945_s5 + $0xe20] sm:$0xff] }
 0x422   :  { %9266 = vmatmul.mubr.bf16.vlgmr.msra.gmra.mrb[20].mxu0 %v12877_v63  ;;  %v2777_v1 = vld [vmem:[%s15945_s5 + $0xe60] sm:$0xff] }
 0x423   :  { %9438 = vmatmul.mubr.bf16.vlgmr.msra.gmra.mrb[20].mxu1 %v12877_v63  ;;  %9277 = vmatpush1.bf16.msra.mxu0 %v10625_v14  ;;  %v2690_v14 = vld [vmem:[%s15945_s5 + $0xba8] sm:$0xff] }
 0x424   :  { %9308 = vmatprep.mubr.bf16.mxu0 %v12892_v4  ;;  %9449 = vmatpush1.bf16.msra.mxu1 %v10627_v18  ;;  %v10723_v18 = vcombine.low %v2674_v2, %v2682_v5  ;;  %v10740_v22 = vcombine.high %v2690_v14, %v2698_v7  ;;  %v2770_v2 = vld [vmem:[%s15945_s5 + $0xe28] sm:$0xff] }
 0x425   :  { %9480 = vmatprep.mubr.bf16.mxu1 %v12892_v4  ;;  %9278 = vmatprep.subr.bf16.mxu0 %v10642_v20  ;;  %v10738_v20 = vcombine.high %v2689_v12, %v2697_v13  ;;  %v2778_v5 = vld [vmem:[%s15945_s5 + $0xe68] sm:$0xff] }
 0x426   :  { %9450 = vmatprep.subr.bf16.mxu1 %v10644_v24  ;;  %v2713_v24 = vld [vmem:[%s15945_s5 + $0xc60] sm:$0xff] }
 0x427   :  { %9279 = vmatpush1.bf16.msra.mxu0 %v10641_v26  ;;  %v10737_v26 = vcombine.low %v2689_v12, %v2697_v13  ;;  %v2785_v12 = vld [vmem:[%s15945_s5 + $0xea0] sm:$0xff] }
 0x428   :  { %9451 = vmatpush1.bf16.msra.mxu1 %v10643_v52  ;;  %9280 = vmatprep.subr.bf16.mxu0 %v10658_v27  ;;  %v10739_v52 = vcombine.low %v2690_v14, %v2698_v7  ;;  %v10754_v27 = vcombine.high %v2705_v23, %v2713_v24  ;;  %v2793_v13 = vld [vmem:[%s15945_s5 + $0xee0] sm:$0xff]  ;;  %v2786_v14 = vld [vmem:[%s15945_s5 + $0xea8] sm:$0xff] }
 0x429   :  { %9452 = vmatprep.subr.bf16.mxu1 %v10660_v29  ;;  %v10756_v29 = vcombine.high %v2706_v25, %v2714_v43  ;;  %v2794_v7 = vld [vmem:[%s15945_s5 + $0xee8] sm:$0xff] }
 0x42b   :  { %9281 = vmatpush1.bf16.msra.mxu0 %v10657_v19  ;;  %v10753_v19 = vcombine.low %v2705_v23, %v2713_v24  ;;  %v2801_v23 = vld [vmem:[%s15945_s5 + $0xf20] sm:$0xff] }
 0x42c   :  { %9453 = vmatpush1.bf16.msra.mxu1 %v10659_v37  ;;  %9282 = vmatprep.subr.bf16.mxu0 %v10674_v38  ;;  %v10755_v37 = vcombine.low %v2706_v25, %v2714_v43  ;;  %v10770_v38 = vcombine.high %v2721_v30, %v2729_v31  ;;  %v2809_v24 = vld [vmem:[%s15945_s5 + $0xf60] sm:$0xff]  ;;  %v2802_v25 = vld [vmem:[%s15945_s5 + $0xf28] sm:$0xff] }
 0x42d   :  { %9454 = vmatprep.subr.bf16.mxu1 %v10676_v39  ;;  %v10772_v39 = vcombine.high %v2722_v32, %v2730_v33  ;;  %v2810_v43 = vld [vmem:[%s15945_s5 + $0xf68] sm:$0xff] }
 0x42f   :  { %9283 = vmatpush1.bf16.msra.mxu0 %v10673_v47  ;;  %v10769_v47 = vcombine.low %v2721_v30, %v2729_v31  ;;  %v2817_v30 = vld [vmem:[%s15945_s5 + $0xfa0] sm:$0xff] }
 0x430   :  { %9455 = vmatpush1.bf16.msra.mxu1 %v10675_v48  ;;  %9284 = vmatprep.subr.bf16.mxu0 %v10690_v49  ;;  %v10771_v48 = vcombine.low %v2722_v32, %v2730_v33  ;;  %v10786_v49 = vcombine.high %v2737_v40, %v2745_v41  ;;  %v2825_v31 = vld [vmem:[%s15945_s5 + $0xfe0] sm:$0xff]  ;;  %v2818_v32 = vld [vmem:[%s15945_s5 + $0xfa8] sm:$0xff] }
 0x431   :  { %9456 = vmatprep.subr.bf16.mxu1 %v10692_v50  ;;  %v10788_v50 = vcombine.high %v2738_v42, %v2746_v45  ;;  %v2826_v33 = vld [vmem:[%s15945_s5 + $0xfe8] sm:$0xff] }
 0x433   :  { %9285 = vmatpush1.bf16.msra.mxu0 %v10689_v57  ;;  %v10785_v57 = vcombine.low %v2737_v40, %v2745_v41  ;;  %v2833_v40 = vld [vmem:[%s15945_s5 + $0x1020] sm:$0xff] }
 0x434   :  { %9457 = vmatpush1.bf16.msra.mxu1 %v10691_v58  ;;  %9286 = vmatprep.subr.bf16.mxu0 %v10706_v59  ;;  %v10787_v58 = vcombine.low %v2738_v42, %v2746_v45  ;;  %v10802_v59 = vcombine.high %v2753_v51, %v2761_v53  ;;  %v2841_v41 = vld [vmem:[%s15945_s5 + $0x1060] sm:$0xff]  ;;  %v2834_v42 = vld [vmem:[%s15945_s5 + $0x1028] sm:$0xff] }
 0x435   :  { %9458 = vmatprep.subr.bf16.mxu1 %v10708_v61  ;;  %v10804_v61 = vcombine.high %v2754_v54, %v2762_v56  ;;  %v2842_v45 = vld [vmem:[%s15945_s5 + $0x1068] sm:$0xff] }
 0x437   :  { %9287 = vmatpush1.bf16.msra.mxu0 %v10705_v6  ;;  %v10801_v6 = vcombine.low %v2753_v51, %v2761_v53  ;;  %v2849_v51 = vld [vmem:[%s15945_s5 + $0x10a0] sm:$0xff] }
 0x438   :  { %9459 = vmatpush1.bf16.msra.mxu1 %v10707_v8  ;;  %9288 = vmatprep.subr.bf16.mxu0 %v10722_v10  ;;  %v10803_v8 = vcombine.low %v2754_v54, %v2762_v56  ;;  %v10818_v10 = vcombine.high %v2769_v9, %v2777_v1  ;;  %v2857_v53 = vld [vmem:[%s15945_s5 + $0x10e0] sm:$0xff]  ;;  %v10881_v54 = vcombine.low %v2833_v40, %v2841_v41  ;;  %v2850_v56 = vld [vmem:[%s15945_s5 + $0x10a8] sm:$0xff] }
 0x439   :  { %9460 = vmatprep.subr.bf16.mxu1 %v10724_v11  ;;  %v10820_v11 = vcombine.high %v2770_v2, %v2778_v5 }
 0x43b   :  { %9289 = vmatpush1.bf16.msra.mxu0 %v10721_v17  ;;  %v10817_v17 = vcombine.low %v2769_v9, %v2777_v1  ;;  %v2873_v9 = vld [vmem:[%s15945_s5 + $0x1160] sm:$0xff] }
 0x43c   :  { %9461 = vmatpush1.bf16.msra.mxu1 %v10723_v18  ;;  %9290 = vmatprep.subr.bf16.mxu0 %v10738_v20  ;;  %v10819_v18 = vcombine.low %v2770_v2, %v2778_v5  ;;  %v10834_v20 = vcombine.high %v2785_v12, %v2793_v13  ;;  %v2866_v2 = vld [vmem:[%s15945_s5 + $0x1128] sm:$0xff] }
 0x43d   :  { %9462 = vmatprep.subr.bf16.mxu1 %v10740_v22  ;;  %v10836_v22 = vcombine.high %v2786_v14, %v2794_v7  ;;  %v2874_v5 = vld [vmem:[%s15945_s5 + $0x1168] sm:$0xff] }
 0x43f   :  { %9291 = vmatpush1.bf16.msra.mxu0 %v10737_v26  ;;  %v10833_v26 = vcombine.low %v2785_v12, %v2793_v13  ;;  %v2881_v12 = vld [vmem:[%s15945_s5 + $0x11a0] sm:$0xff] }
 0x440   :  { %9463 = vmatpush1.bf16.msra.mxu1 %v10739_v52  ;;  %9292 = vmatprep.subr.bf16.mxu0 %v10754_v27  ;;  %v10835_v52 = vcombine.low %v2786_v14, %v2794_v7  ;;  %v10850_v27 = vcombine.high %v2801_v23, %v2809_v24  ;;  %v2889_v13 = vld [vmem:[%s15945_s5 + $0x11e0] sm:$0xff]  ;;  %v2882_v14 = vld [vmem:[%s15945_s5 + $0x11a8] sm:$0xff] }
 0x441   :  { %9464 = vmatprep.subr.bf16.mxu1 %v10756_v29  ;;  %v10852_v29 = vcombine.high %v2802_v25, %v2810_v43  ;;  %v2890_v7 = vld [vmem:[%s15945_s5 + $0x11e8] sm:$0xff] }
 0x443   :  { %9293 = vmatpush1.bf16.msra.mxu0 %v10753_v19  ;;  %v10849_v19 = vcombine.low %v2801_v23, %v2809_v24  ;;  %v2897_v23 = vld [vmem:[%s15945_s5 + $0x1220] sm:$0xff] }
 0x444   :  { %9465 = vmatpush1.bf16.msra.mxu1 %v10755_v37  ;;  %9294 = vmatprep.subr.bf16.mxu0 %v10770_v38  ;;  %v10851_v37 = vcombine.low %v2802_v25, %v2810_v43  ;;  %v10866_v38 = vcombine.high %v2817_v30, %v2825_v31  ;;  %v2905_v24 = vld [vmem:[%s15945_s5 + $0x1260] sm:$0xff]  ;;  %v2898_v25 = vld [vmem:[%s15945_s5 + $0x1228] sm:$0xff] }
 0x445   :  { %9466 = vmatprep.subr.bf16.mxu1 %v10772_v39  ;;  %v10868_v39 = vcombine.high %v2818_v32, %v2826_v33  ;;  %v2906_v43 = vld [vmem:[%s15945_s5 + $0x1268] sm:$0xff] }
 0x447   :  { %9295 = vmatpush1.bf16.msra.mxu0 %v10769_v47  ;;  %v10865_v47 = vcombine.low %v2817_v30, %v2825_v31  ;;  %v2913_v30 = vld [vmem:[%s15945_s5 + $0x12a0] sm:$0xff] }
 0x448   :  { %9467 = vmatpush1.bf16.msra.mxu1 %v10771_v48  ;;  %9296 = vmatprep.subr.bf16.mxu0 %v10786_v49  ;;  %v10867_v48 = vcombine.low %v2818_v32, %v2826_v33  ;;  %v10882_v49 = vcombine.high %v2833_v40, %v2841_v41  ;;  %v2921_v31 = vld [vmem:[%s15945_s5 + $0x12e0] sm:$0xff]  ;;  %v2914_v32 = vld [vmem:[%s15945_s5 + $0x12a8] sm:$0xff] }
 0x449   :  { %9468 = vmatprep.subr.bf16.mxu1 %v10788_v50  ;;  %v10884_v50 = vcombine.high %v2834_v42, %v2842_v45  ;;  %v2922_v33 = vld [vmem:[%s15945_s5 + $0x12e8] sm:$0xff]  ;;  %v2929_v40 = vld [vmem:[%s15945_s5 + $0x1320] sm:$0xff] }
 0x44a   :  { %v2937_v41 = vld [vmem:[%s15945_s5 + $0x1360] sm:$0xff] }
 0x44b   :  { %9297 = vmatpush1.bf16.msra.mxu0 %v10785_v57  ;;  %v2858_v57 = vld [vmem:[%s15945_s5 + $0x10e8] sm:$0xff] }
 0x44c   :  { %9469 = vmatpush1.bf16.msra.mxu1 %v10787_v58  ;;  %9298 = vmatprep.subr.bf16.mxu0 %v10802_v59  ;;  %v10883_v58 = vcombine.low %v2834_v42, %v2842_v45  ;;  %v10898_v59 = vcombine.high %v2849_v51, %v2857_v53  ;;  %v10900_v1 = vcombine.high %v2850_v56, %v2858_v57  ;;  %v2930_v42 = vld [vmem:[%s15945_s5 + $0x1328] sm:$0xff] }
 0x44d   :  { %9470 = vmatprep.subr.bf16.mxu1 %v10804_v61  ;;  %v2865_v61 = vld [vmem:[%s15945_s5 + $0x1120] sm:$0xff]  ;;  %v2938_v45 = vld [vmem:[%s15945_s5 + $0x1368] sm:$0xff] }
 0x44f   :  { %9299 = vmatpush1.bf16.msra.mxu0 %v10801_v6  ;;  %v10897_v6 = vcombine.low %v2849_v51, %v2857_v53  ;;  %v2945_v51 = vld [vmem:[%s15945_s5 + $0x13a0] sm:$0xff] }
 0x450   :  { %9471 = vmatpush1.bf16.msra.mxu1 %v10803_v8  ;;  %9300 = vmatprep.subr.bf16.mxu0 %v10818_v10  ;;  %v10899_v8 = vcombine.low %v2850_v56, %v2858_v57  ;;  %v10914_v10 = vcombine.high %v2865_v61, %v2873_v9  ;;  %v2953_v53 = vld [vmem:[%s15945_s5 + $0x13e0] sm:$0xff]  ;;  %v2954_v56 = vld [vmem:[%s15945_s5 + $0x13e8] sm:$0xff]  ;;  %v10977_v57 = vcombine.low %v2929_v40, %v2937_v41 }
 0x451   :  { %9472 = vmatprep.subr.bf16.mxu1 %v10820_v11  ;;  %v10916_v11 = vcombine.high %v2866_v2, %v2874_v5 }
 0x453   :  { %9301 = vmatpush1.bf16.msra.mxu0 %v10817_v17  ;;  %v10913_v17 = vcombine.low %v2865_v61, %v2873_v9  ;;  %v2961_v9 = vld [vmem:[%s15945_s5 + $0x1420] sm:$0xff] }
 0x454   :  { %9473 = vmatpush1.bf16.msra.mxu1 %v10819_v18  ;;  %9302 = vmatprep.subr.bf16.mxu0 %v10834_v20  ;;  %v10915_v18 = vcombine.low %v2866_v2, %v2874_v5  ;;  %v10930_v20 = vcombine.high %v2881_v12, %v2889_v13  ;;  %v2962_v2 = vld [vmem:[%s15945_s5 + $0x1428] sm:$0xff] }
 0x455   :  { %9474 = vmatprep.subr.bf16.mxu1 %v10836_v22  ;;  %v10932_v22 = vcombine.high %v2882_v14, %v2890_v7  ;;  %v2970_v5 = vld [vmem:[%s15945_s5 + $0x1468] sm:$0xff] }
 0x457   :  { %9303 = vmatpush1.bf16.msra.mxu0 %v10833_v26  ;;  %v10929_v26 = vcombine.low %v2881_v12, %v2889_v13  ;;  %v2977_v12 = vld [vmem:[%s15945_s5 + $0x14a0] sm:$0xff] }
 0x458   :  { %9475 = vmatpush1.bf16.msra.mxu1 %v10835_v52  ;;  %9304 = vmatprep.subr.bf16.mxu0 %v10850_v27  ;;  %v10931_v52 = vcombine.low %v2882_v14, %v2890_v7  ;;  %v10946_v27 = vcombine.high %v2897_v23, %v2905_v24  ;;  %v2985_v13 = vld [vmem:[%s15945_s5 + $0x14e0] sm:$0xff]  ;;  %v2978_v14 = vld [vmem:[%s15945_s5 + $0x14a8] sm:$0xff] }
 0x459   :  { %9476 = vmatprep.subr.bf16.mxu1 %v10852_v29  ;;  %v10948_v29 = vcombine.high %v2898_v25, %v2906_v43  ;;  %v2986_v7 = vld [vmem:[%s15945_s5 + $0x14e8] sm:$0xff] }
 0x45b   :  { %9305 = vmatpush1.bf16.msra.mxu0 %v10849_v19  ;;  %v10945_v19 = vcombine.low %v2897_v23, %v2905_v24  ;;  %v2993_v23 = vld [vmem:[%s15945_s5 + $0x1520] sm:$0xff] }
 0x45c   :  { %9477 = vmatpush1.bf16.msra.mxu1 %v10851_v37  ;;  %9306 = vmatprep.subr.bf16.mxu0 %v10866_v38  ;;  %v10947_v37 = vcombine.low %v2898_v25, %v2906_v43  ;;  %v10962_v38 = vcombine.high %v2913_v30, %v2921_v31  ;;  %v3001_v24 = vld [vmem:[%s15945_s5 + $0x1560] sm:$0xff]  ;;  %v2994_v25 = vld [vmem:[%s15945_s5 + $0x1528] sm:$0xff] }
 0x45d   :  { %9478 = vmatprep.subr.bf16.mxu1 %v10868_v39  ;;  %v10964_v39 = vcombine.high %v2914_v32, %v2922_v33  ;;  %v3002_v43 = vld [vmem:[%s15945_s5 + $0x1568] sm:$0xff] }
 0x45f   :  { %9307 = vmatpush1.bf16.msra.mxu0 %v10865_v47  ;;  %v10961_v47 = vcombine.low %v2913_v30, %v2921_v31  ;;  %v3009_v30 = vld [vmem:[%s15945_s5 + $0x15a0] sm:$0xff] }
 0x460   :  { %9479 = vmatpush1.bf16.msra.mxu1 %v10867_v48  ;;  %9319 = vmatprep.subr.bf16.mxu0 %v10882_v49  ;;  %v10963_v48 = vcombine.low %v2914_v32, %v2922_v33  ;;  %v10978_v49 = vcombine.high %v2929_v40, %v2937_v41  ;;  %v3017_v31 = vld [vmem:[%s15945_s5 + $0x15e0] sm:$0xff]  ;;  %v3010_v32 = vld [vmem:[%s15945_s5 + $0x15a8] sm:$0xff] }
 0x461   :  { %9491 = vmatprep.subr.bf16.mxu1 %v10884_v50  ;;  %v10980_v50 = vcombine.high %v2930_v42, %v2938_v45  ;;  %v3018_v33 = vld [vmem:[%s15945_s5 + $0x15e8] sm:$0xff]  ;;  %v3025_v40 = vld [vmem:[%s15945_s5 + $0x1620] sm:$0xff] }
 0x462   :  { %9309 = vmatmul.mubr.bf16.vlgmr.msra.gmra.mrb[20].mxu0 %v12879_v0  ;;  %v3033_v41 = vld [vmem:[%s15945_s5 + $0x1660] sm:$0xff] }
 0x463   :  { %9481 = vmatmul.mubr.bf16.vlgmr.msra.gmra.mrb[20].mxu1 %v12879_v0  ;;  %9320 = vmatpush1.bf16.msra.mxu0 %v10881_v54  ;;  %v2946_v54 = vld [vmem:[%s15945_s5 + $0x13a8] sm:$0xff] }
 0x464   :  { %9351 = vmatprep.mubr.bf16.mxu0 %v13326_v35  ;;  %9492 = vmatpush1.bf16.msra.mxu1 %v10883_v58  ;;  %v10979_v58 = vcombine.low %v2930_v42, %v2938_v45  ;;  %v10996_v61 = vcombine.high %v2946_v54, %v2954_v56  ;;  %v3026_v42 = vld [vmem:[%s15945_s5 + $0x1628] sm:$0xff] }
 0x465   :  { %9523 = vmatprep.mubr.bf16.mxu1 %v13326_v35  ;;  %9321 = vmatprep.subr.bf16.mxu0 %v10898_v59  ;;  %v10994_v59 = vcombine.high %v2945_v51, %v2953_v53  ;;  %v3034_v45 = vld [vmem:[%s15945_s5 + $0x1668] sm:$0xff] }
 0x466   :  { %9493 = vmatprep.subr.bf16.mxu1 %v10900_v1  ;;  %v2969_v1 = vld [vmem:[%s15945_s5 + $0x1460] sm:$0xff] }
 0x467   :  { %9322 = vmatpush1.bf16.msra.mxu0 %v10897_v6  ;;  %v10993_v6 = vcombine.low %v2945_v51, %v2953_v53  ;;  %v3041_v51 = vld [vmem:[%s15945_s5 + $0x16a0] sm:$0xff] }
 0x468   :  { %9494 = vmatpush1.bf16.msra.mxu1 %v10899_v8  ;;  %9323 = vmatprep.subr.bf16.mxu0 %v10914_v10  ;;  %v10995_v8 = vcombine.low %v2946_v54, %v2954_v56  ;;  %v11010_v10 = vcombine.high %v2961_v9, %v2969_v1  ;;  %v3049_v53 = vld [vmem:[%s15945_s5 + $0x16e0] sm:$0xff]  ;;  %v3042_v54 = vld [vmem:[%s15945_s5 + $0x16a8] sm:$0xff] }
 0x469   :  { %9495 = vmatprep.subr.bf16.mxu1 %v10916_v11  ;;  %v11012_v11 = vcombine.high %v2962_v2, %v2970_v5  ;;  %v3050_v56 = vld [vmem:[%s15945_s5 + $0x16e8] sm:$0xff] }
 0x46b   :  { %9324 = vmatpush1.bf16.msra.mxu0 %v10913_v17  ;;  %v11009_v17 = vcombine.low %v2961_v9, %v2969_v1  ;;  %v3057_v9 = vld [vmem:[%s15945_s5 + $0x1720] sm:$0xff] }
 0x46c   :  { %9496 = vmatpush1.bf16.msra.mxu1 %v10915_v18  ;;  %9325 = vmatprep.subr.bf16.mxu0 %v10930_v20  ;;  %v11011_v18 = vcombine.low %v2962_v2, %v2970_v5  ;;  %v11026_v20 = vcombine.high %v2977_v12, %v2985_v13  ;;  %v3065_v1 = vld [vmem:[%s15945_s5 + $0x1760] sm:$0xff]  ;;  %v3058_v2 = vld [vmem:[%s15945_s5 + $0x1728] sm:$0xff] }
 0x46d   :  { %9497 = vmatprep.subr.bf16.mxu1 %v10932_v22  ;;  %v11028_v22 = vcombine.high %v2978_v14, %v2986_v7  ;;  %v3066_v5 = vld [vmem:[%s15945_s5 + $0x1768] sm:$0xff] }
 0x46f   :  { %9326 = vmatpush1.bf16.msra.mxu0 %v10929_v26  ;;  %v11025_v26 = vcombine.low %v2977_v12, %v2985_v13  ;;  %v3073_v12 = vld [vmem:[%s15945_s5 + $0x17a0] sm:$0xff] }
 0x470   :  { %9498 = vmatpush1.bf16.msra.mxu1 %v10931_v52  ;;  %9327 = vmatprep.subr.bf16.mxu0 %v10946_v27  ;;  %v11027_v52 = vcombine.low %v2978_v14, %v2986_v7  ;;  %v11042_v27 = vcombine.high %v2993_v23, %v3001_v24  ;;  %v3081_v13 = vld [vmem:[%s15945_s5 + $0x17e0] sm:$0xff]  ;;  %v3074_v14 = vld [vmem:[%s15945_s5 + $0x17a8] sm:$0xff] }
 0x471   :  { %9499 = vmatprep.subr.bf16.mxu1 %v10948_v29  ;;  %v11044_v29 = vcombine.high %v2994_v25, %v3002_v43  ;;  %v3082_v7 = vld [vmem:[%s15945_s5 + $0x17e8] sm:$0xff] }
 0x473   :  { %9328 = vmatpush1.bf16.msra.mxu0 %v10945_v19  ;;  %v11041_v19 = vcombine.low %v2993_v23, %v3001_v24  ;;  %v3089_v23 = vld [vmem:[%s15945_s5 + $0x1820] sm:$0xff] }
 0x474   :  { %9500 = vmatpush1.bf16.msra.mxu1 %v10947_v37  ;;  %9329 = vmatprep.subr.bf16.mxu0 %v10962_v38  ;;  %v11043_v37 = vcombine.low %v2994_v25, %v3002_v43  ;;  %v11058_v38 = vcombine.high %v3009_v30, %v3017_v31  ;;  %v3097_v24 = vld [vmem:[%s15945_s5 + $0x1860] sm:$0xff]  ;;  %v3090_v25 = vld [vmem:[%s15945_s5 + $0x1828] sm:$0xff] }
 0x475   :  { %9501 = vmatprep.subr.bf16.mxu1 %v10964_v39  ;;  %v11060_v39 = vcombine.high %v3010_v32, %v3018_v33  ;;  %v3098_v43 = vld [vmem:[%s15945_s5 + $0x1868] sm:$0xff] }
 0x477   :  { %9330 = vmatpush1.bf16.msra.mxu0 %v10961_v47  ;;  %v11057_v47 = vcombine.low %v3009_v30, %v3017_v31  ;;  %v3105_v30 = vld [vmem:[%s15945_s5 + $0x18a0] sm:$0xff] }
 0x478   :  { %9502 = vmatpush1.bf16.msra.mxu1 %v10963_v48  ;;  %9331 = vmatprep.subr.bf16.mxu0 %v10978_v49  ;;  %v11059_v48 = vcombine.low %v3010_v32, %v3018_v33  ;;  %v11074_v49 = vcombine.high %v3025_v40, %v3033_v41  ;;  %v3113_v31 = vld [vmem:[%s15945_s5 + $0x18e0] sm:$0xff]  ;;  %v11137_v32 = vcombine.low %v3089_v23, %v3097_v24  ;;  %v3106_v33 = vld [vmem:[%s15945_s5 + $0x18a8] sm:$0xff] }
 0x479   :  { %9503 = vmatprep.subr.bf16.mxu1 %v10980_v50  ;;  %v11076_v50 = vcombine.high %v3026_v42, %v3034_v45 }
 0x47b   :  { %9332 = vmatpush1.bf16.msra.mxu0 %v10977_v57  ;;  %v11073_v57 = vcombine.low %v3025_v40, %v3033_v41  ;;  %v3129_v40 = vld [vmem:[%s15945_s5 + $0x1960] sm:$0xff] }
 0x47c   :  { %9504 = vmatpush1.bf16.msra.mxu1 %v10979_v58  ;;  %9333 = vmatprep.subr.bf16.mxu0 %v10994_v59  ;;  %v11075_v58 = vcombine.low %v3026_v42, %v3034_v45  ;;  %v11090_v59 = vcombine.high %v3041_v51, %v3049_v53  ;;  %v3122_v42 = vld [vmem:[%s15945_s5 + $0x1928] sm:$0xff] }
 0x47d   :  { %9505 = vmatprep.subr.bf16.mxu1 %v10996_v61  ;;  %v11092_v61 = vcombine.high %v3042_v54, %v3050_v56  ;;  %v3130_v45 = vld [vmem:[%s15945_s5 + $0x1968] sm:$0xff] }
 0x47f   :  { %9334 = vmatpush1.bf16.msra.mxu0 %v10993_v6  ;;  %v11089_v6 = vcombine.low %v3041_v51, %v3049_v53  ;;  %v3137_v51 = vld [vmem:[%s15945_s5 + $0x19a0] sm:$0xff] }
 0x480   :  { %9506 = vmatpush1.bf16.msra.mxu1 %v10995_v8  ;;  %9335 = vmatprep.subr.bf16.mxu0 %v11010_v10  ;;  %v11091_v8 = vcombine.low %v3042_v54, %v3050_v56  ;;  %v11106_v10 = vcombine.high %v3057_v9, %v3065_v1  ;;  %v3145_v53 = vld [vmem:[%s15945_s5 + $0x19e0] sm:$0xff]  ;;  %v3138_v54 = vld [vmem:[%s15945_s5 + $0x19a8] sm:$0xff] }
 0x481   :  { %9507 = vmatprep.subr.bf16.mxu1 %v11012_v11  ;;  %v11108_v11 = vcombine.high %v3058_v2, %v3066_v5  ;;  %v3146_v56 = vld [vmem:[%s15945_s5 + $0x19e8] sm:$0xff] }
 0x483   :  { %9336 = vmatpush1.bf16.msra.mxu0 %v11009_v17  ;;  %v11105_v17 = vcombine.low %v3057_v9, %v3065_v1  ;;  %v3153_v9 = vld [vmem:[%s15945_s5 + $0x1a20] sm:$0xff] }
 0x484   :  { %9508 = vmatpush1.bf16.msra.mxu1 %v11011_v18  ;;  %9337 = vmatprep.subr.bf16.mxu0 %v11026_v20  ;;  %v11107_v18 = vcombine.low %v3058_v2, %v3066_v5  ;;  %v11122_v20 = vcombine.high %v3073_v12, %v3081_v13  ;;  %v3161_v1 = vld [vmem:[%s15945_s5 + $0x1a60] sm:$0xff]  ;;  %v3154_v2 = vld [vmem:[%s15945_s5 + $0x1a28] sm:$0xff] }
 0x485   :  { %9509 = vmatprep.subr.bf16.mxu1 %v11028_v22  ;;  %v11124_v22 = vcombine.high %v3074_v14, %v3082_v7  ;;  %v3162_v5 = vld [vmem:[%s15945_s5 + $0x1a68] sm:$0xff] }
 0x487   :  { %9338 = vmatpush1.bf16.msra.mxu0 %v11025_v26  ;;  %v11121_v26 = vcombine.low %v3073_v12, %v3081_v13  ;;  %v3169_v12 = vld [vmem:[%s15945_s5 + $0x1aa0] sm:$0xff] }
 0x488   :  { %9510 = vmatpush1.bf16.msra.mxu1 %v11027_v52  ;;  %9339 = vmatprep.subr.bf16.mxu0 %v11042_v27  ;;  %v11123_v52 = vcombine.low %v3074_v14, %v3082_v7  ;;  %v11138_v27 = vcombine.high %v3089_v23, %v3097_v24  ;;  %v3177_v13 = vld [vmem:[%s15945_s5 + $0x1ae0] sm:$0xff]  ;;  %v3170_v14 = vld [vmem:[%s15945_s5 + $0x1aa8] sm:$0xff] }
 0x489   :  { %9511 = vmatprep.subr.bf16.mxu1 %v11044_v29  ;;  %v11140_v29 = vcombine.high %v3090_v25, %v3098_v43  ;;  %v3178_v7 = vld [vmem:[%s15945_s5 + $0x1ae8] sm:$0xff]  ;;  %v3185_v23 = vld [vmem:[%s15945_s5 + $0x1b20] sm:$0xff] }
 0x48a   :  { %v3193_v24 = vld [vmem:[%s15945_s5 + $0x1b60] sm:$0xff] }
 0x48b   :  { %9340 = vmatpush1.bf16.msra.mxu0 %v11041_v19  ;;  %v3114_v19 = vld [vmem:[%s15945_s5 + $0x18e8] sm:$0xff] }
 0x48c   :  { %9512 = vmatpush1.bf16.msra.mxu1 %v11043_v37  ;;  %9341 = vmatprep.subr.bf16.mxu0 %v11058_v38  ;;  %v11139_v37 = vcombine.low %v3090_v25, %v3098_v43  ;;  %v11154_v38 = vcombine.high %v3105_v30, %v3113_v31  ;;  %v11156_v41 = vcombine.high %v3106_v33, %v3114_v19  ;;  %v11691_v25 = vld [vmem:[%s15947_s6] sm:$0xff] }
 0x48d   :  { %9513 = vmatprep.subr.bf16.mxu1 %v11060_v39  ;;  %v3121_v39 = vld [vmem:[%s15945_s5 + $0x1920] sm:$0xff]  ;;  %v3364_v43 = vrot.slane %v11691_v25, %v13243_v15 }
 0x48f   :  { %9342 = vmatpush1.bf16.msra.mxu0 %v11057_v47  ;;  %v11153_v47 = vcombine.low %v3105_v30, %v3113_v31  ;;  %v11217_v30 = vcombine.low %v3169_v12, %v3177_v13  ;;  %v3376_v31 = vrot.slane %v11691_v25, %v13252_v21 }
 0x490   :  { %9514 = vmatpush1.bf16.msra.mxu1 %v11059_v48  ;;  %9343 = vmatprep.subr.bf16.mxu0 %v11074_v49  ;;  %v11155_v48 = vcombine.low %v3106_v33, %v3114_v19  ;;  %v11170_v49 = vcombine.high %v3121_v39, %v3129_v40  ;;  %v11234_v33 = vcombine.high %v3185_v23, %v3193_v24 }
 0x491   :  { %9515 = vmatprep.subr.bf16.mxu1 %v11076_v50  ;;  %v11172_v50 = vcombine.high %v3122_v42, %v3130_v45 }
 0x493   :  { %9344 = vmatpush1.bf16.msra.mxu0 %v11073_v57  ;;  %v11169_v57 = vcombine.low %v3121_v39, %v3129_v40  ;;  %v3209_v39 = vld [vmem:[%s15945_s5 + $0x1be0] sm:$0xff] }
 0x494   :  { %9516 = vmatpush1.bf16.msra.mxu1 %v11075_v58  ;;  %9345 = vmatprep.subr.bf16.mxu0 %v11090_v59  ;;  %v11171_v58 = vcombine.low %v3122_v42, %v3130_v45  ;;  %v11186_v59 = vcombine.high %v3137_v51, %v3145_v53  ;;  %v3202_v45 = vld [vmem:[%s15945_s5 + $0x1ba8] sm:$0xff] }
 0x495   :  { %9517 = vmatprep.subr.bf16.mxu1 %v11092_v61  ;;  %v11188_v61 = vcombine.high %v3138_v54, %v3146_v56 }
 0x497   :  { %9346 = vmatpush1.bf16.msra.mxu0 %v11089_v6  ;;  %v11185_v6 = vcombine.low %v3137_v51, %v3145_v53  ;;  %v11233_v53 = vcombine.low %v3185_v23, %v3193_v24  ;;  %v3242_v23 = vld [vmem:[%s15945_s5 + $0x1ce8] sm:$0xff] }
 0x498   :  { %9518 = vmatpush1.bf16.msra.mxu1 %v11091_v8  ;;  %9347 = vmatprep.subr.bf16.mxu0 %v11106_v10  ;;  %v11187_v8 = vcombine.low %v3138_v54, %v3146_v56  ;;  %v11202_v10 = vcombine.high %v3153_v9, %v3161_v1 }
 0x499   :  { %9519 = vmatprep.subr.bf16.mxu1 %v11108_v11  ;;  %v11204_v11 = vcombine.high %v3154_v2, %v3162_v5 }
 0x49b   :  { %9348 = vmatpush1.bf16.msra.mxu0 %v11105_v17  ;;  %v11201_v17 = vcombine.low %v3153_v9, %v3161_v1 }
 0x49c   :  { %9520 = vmatpush1.bf16.msra.mxu1 %v11107_v18  ;;  %9349 = vmatprep.subr.bf16.mxu0 %v11122_v20  ;;  %v11203_v18 = vcombine.low %v3154_v2, %v3162_v5  ;;  %v11218_v20 = vcombine.high %v3169_v12, %v3177_v13  ;;  %v3217_v5 = vld [vmem:[%s15945_s5 + $0x1c20] sm:$0xff] }
 0x49d   :  { %9521 = vmatprep.subr.bf16.mxu1 %v11124_v22  ;;  %v11220_v22 = vcombine.high %v3170_v14, %v3178_v7 }
 0x49f   :  { %9350 = vmatpush1.bf16.msra.mxu0 %v11121_v26  ;;  %v3186_v26 = vld [vmem:[%s15945_s5 + $0x1b28] sm:$0xff] }
 0x4a0   :  { %9522 = vmatpush1.bf16.msra.mxu1 %v11123_v52  ;;  %9362 = vmatprep.subr.bf16.mxu0 %v11138_v27  ;;  %v3194_v52 = vld [vmem:[%s15945_s5 + $0x1b68] sm:$0xff]  ;;  %v3372_v27 = vrot.slane %v11691_v25, %v13246_v16 }
 0x4a1   :  { %9534 = vmatprep.subr.bf16.mxu1 %v11140_v29  ;;  %v3368_v29 = vrot.slane %v11691_v25, %v13249_v55  ;;  %v11235_v54 = vcombine.low %v3186_v26, %v3194_v52 }
 0x4a2   :  { %9352 = vmatmul.mubr.bf16.vlgmr.msra.gmra.mrb[20].mxu0 %v13312_v28 }
 0x4a3   :  { %9524 = vmatmul.mubr.bf16.vlgmr.msra.gmra.mrb[20].mxu1 %v13312_v28  ;;  %9363 = vmatpush1.bf16.msra.mxu0 %v11137_v32  ;;  %v11219_v32 = vcombine.low %v3170_v14, %v3178_v7 }
 0x4a4   :  { %9394 = vmatprep.mubr.bf16.mxu0 %v13328_v36  ;;  %9535 = vmatpush1.bf16.msra.mxu1 %v11139_v37  ;;  %v11236_v37 = vcombine.high %v3186_v26, %v3194_v52  ;;  %v3249_v52 = vld [vmem:[%s15945_s5 + $0x1d20] sm:$0xff] }
 0x4a5   :  { %9566 = vmatprep.mubr.bf16.mxu1 %v13328_v36  ;;  %9364 = vmatprep.subr.bf16.mxu0 %v11154_v38  ;;  %v3201_v38 = vld [vmem:[%s15945_s5 + $0x1ba0] sm:$0xff] }
 0x4a6   :  { %9536 = vmatprep.subr.bf16.mxu1 %v11156_v41  ;;  %v11249_v13 = vcombine.low %v3201_v38, %v3209_v39 }
 0x4a7   :  { %9365 = vmatpush1.bf16.msra.mxu0 %v11153_v47  ;;  %v3210_v47 = vld [vmem:[%s15945_s5 + $0x1be8] sm:$0xff] }
 0x4a8   :  { %9537 = vmatpush1.bf16.msra.mxu1 %v11155_v48  ;;  %9366 = vmatprep.subr.bf16.mxu0 %v11170_v49  ;;  %v11252_v2 = vcombine.high %v3202_v45, %v3210_v47  ;;  %v11251_v14 = vcombine.low %v3202_v45, %v3210_v47  ;;  %v3273_v45 = vld [vmem:[%s15945_s5 + $0x1de0] sm:$0xff] }
 0x4a9   :  { %9538 = vmatprep.subr.bf16.mxu1 %v11172_v50 }
 0x4ab   :  { %9367 = vmatpush1.bf16.msra.mxu0 %v11169_v57 }
 0x4ac   :  { %9539 = vmatpush1.bf16.msra.mxu1 %v11171_v58  ;;  %9368 = vmatprep.subr.bf16.mxu0 %v11186_v59 }
 0x4ad   :  { %9540 = vmatprep.subr.bf16.mxu1 %v11188_v61  ;;  %v11250_v61 = vcombine.high %v3201_v38, %v3209_v39 }
 0x4af   :  { %9369 = vmatpush1.bf16.msra.mxu0 %v11185_v6  ;;  %v3225_v6 = vld [vmem:[%s15945_s5 + $0x1c60] sm:$0xff] }
 0x4b0   :  { %9541 = vmatpush1.bf16.msra.mxu1 %v11187_v8  ;;  %9370 = vmatprep.subr.bf16.mxu0 %v11202_v10  ;;  %v3218_v10 = vld [vmem:[%s15945_s5 + $0x1c28] sm:$0xff]  ;;  %v11266_v7 = vcombine.high %v3217_v5, %v3225_v6  ;;  %v11265_v24 = vcombine.low %v3217_v5, %v3225_v6 }
 0x4b1   :  { %9542 = vmatprep.subr.bf16.mxu1 %v11204_v11  ;;  %v3226_v11 = vld [vmem:[%s15945_s5 + $0x1c68] sm:$0xff] }
 0x4b2   :  { %v11267_v25 = vcombine.low %v3218_v10, %v3226_v11  ;;  %v3282_v5 = vld [vmem:[%s15945_s5 + $0x1e28] sm:$0xff] }
 0x4b3   :  { %9371 = vmatpush1.bf16.msra.mxu0 %v11201_v17  ;;  %v11268_v17 = vcombine.high %v3218_v10, %v3226_v11  ;;  %v3290_v6 = vld [vmem:[%s15945_s5 + $0x1e68] sm:$0xff] }
 0x4b4   :  { %9543 = vmatpush1.bf16.msra.mxu1 %v11203_v18  ;;  %9372 = vmatprep.subr.bf16.mxu0 %v11218_v20  ;;  %v3233_v18 = vld [vmem:[%s15945_s5 + $0x1ca0] sm:$0xff] }
 0x4b5   :  { %v9052_v19 = vpop.f32.mrb[16].mxu0  ;;  %9544 = vmatprep.subr.bf16.mxu1 %v11220_v22  ;;  %v3241_v20 = vld [vmem:[%s15945_s5 + $0x1ce0] sm:$0xff]  ;;  %v3234_v22 = vld [vmem:[%s15945_s5 + $0x1ca8] sm:$0xff] }
 0x4b6   :  { %v11441_v40 = vadd.f32 %v9052_v19, %v3364_v43  ;;  %v9224_v41 = vpop.f32.mrb[16].mxu1  ;;  %v9054_v42 = vpop.f32.mrb[17].mxu0  ;;  %v11284_v26 = vcombine.high %v3234_v22, %v3242_v23 }
 0x4b7   :  { %v11445_v48 = vadd.f32 %v9224_v41, %v3372_v27  ;;  %v11442_v49 = vadd.f32 %v9054_v42, %v3368_v29  ;;  %v9226_v50 = vpop.f32.mrb[17].mxu1  ;;  %v9056_v51 = vpop.f32.mrb[18].mxu0  ;;  %9373 = vmatpush1.bf16.msra.mxu0 %v11217_v30  ;;  %v3250_v30 = vld [vmem:[%s15945_s5 + $0x1d28] sm:$0xff]  ;;  %v3265_v42 = vld [vmem:[%s15945_s5 + $0x1da0] sm:$0xff] }
 0x4b8   :  { %11643 = vtanh.f32 %v11441_v40  ;;  %v11446_v56 = vadd.f32 %v9226_v50, %v3376_v31  ;;  %v11443_v57 = vadd.f32 %v9056_v51, %v3364_v43  ;;  %v9228_v58 = vpop.f32.mrb[18].mxu1  ;;  %9545 = vmatpush1.bf16.msra.mxu1 %v11219_v32  ;;  %v9058_v59 = vpop.f32.mrb[19].mxu0  ;;  %9374 = vmatprep.subr.bf16.mxu0 %v11234_v33  ;;  %v11282_v43 = vcombine.high %v3233_v18, %v3241_v20  ;;  %v3274_v50 = vld [vmem:[%s15945_s5 + $0x1de8] sm:$0xff] }
 0x4b9   :  { %11645 = vtanh.f32 %v11445_v48  ;;  %v11447_v9 = vadd.f32 %v9228_v58, %v3372_v27  ;;  %v9230_v1 = vpop.f32.mrb[19].mxu1  ;;  %9546 = vmatprep.subr.bf16.mxu1 %v11236_v37  ;;  %v11444_v8 = vadd.f32 %v9058_v59, %v3368_v29  ;;  %v3257_v27 = vld [vmem:[%s15945_s5 + $0x1d60] sm:$0xff]  ;;  %v11281_v33 = vcombine.low %v3233_v18, %v3241_v20 }
 0x4ba   :  { %11647 = vtanh.f32 %v11442_v49  ;;  %v11448_v12 = vadd.f32 %v9230_v1, %v3376_v31  ;;  %v3258_v31 = vld [vmem:[%s15945_s5 + $0x1d68] sm:$0xff]  ;;  %v11283_v37 = vcombine.low %v3234_v22, %v3242_v23  ;;  %v11298_v38 = vcombine.high %v3249_v52, %v3257_v27  ;;  %v3289_v1 = vld [vmem:[%s15945_s5 + $0x1e60] sm:$0xff] }
 0x4bb   :  { %11649 = vtanh.f32 %v11446_v56  ;;  %9375 = vmatpush1.bf16.msra.mxu0 %v11233_v53  ;;  %v11300_v41 = vcombine.high %v3250_v30, %v3258_v31  ;;  %v3266_v49 = vld [vmem:[%s15945_s5 + $0x1da8] sm:$0xff]  ;;  %v11297_v53 = vcombine.low %v3249_v52, %v3257_v27  ;;  %v11299_v56 = vcombine.low %v3250_v30, %v3258_v31  ;;  %v3329_v31 = vld [vmem:[%s15945_s5 + $0x1fa0] sm:$0xff] }
 0x4bc   :  { %11651 = vtanh.f32 %v11443_v57  ;;  %9547 = vmatpush1.bf16.msra.mxu1 %v11235_v54  ;;  %9376 = vmatprep.subr.bf16.mxu0 %v11250_v61  ;;  %v11314_v57 = vcombine.high %v3265_v42, %v3273_v45  ;;  %v11316_v61 = vcombine.high %v3266_v49, %v3274_v50  ;;  %v11315_v10 = vcombine.low %v3266_v49, %v3274_v50 }
 0x4bd   :  { %11653 = vtanh.f32 %v11447_v9  ;;  %9548 = vmatprep.subr.bf16.mxu1 %v11252_v2  ;;  %v3281_v9 = vld [vmem:[%s15945_s5 + $0x1e20] sm:$0xff]  ;;  %v11331_v20 = vcombine.low %v3282_v5, %v3290_v6 }
 0x4be   :  { %11655 = vtanh.f32 %v11444_v8  ;;  %v11313_v8 = vcombine.low %v3265_v42, %v3273_v45  ;;  %v11330_v11 = vcombine.high %v3281_v9, %v3289_v1  ;;  %v11329_v18 = vcombine.low %v3281_v9, %v3289_v1  ;;  %v2331_v42 = vld [vmem:[%s15945_s5 + $0x70] sm:$0xff]  ;;  %v2324_v45 = vld [vmem:[%s15945_s5 + $0x38] sm:$0xff] }
 0x4bf   :  { %11657 = vtanh.f32 %v11448_v12  ;;  %9377 = vmatpush1.bf16.msra.mxu0 %v11249_v13  ;;  %v11332_v12 = vcombine.high %v3282_v5, %v3290_v6  ;;  %v3297_v13 = vld [vmem:[%s15945_s5 + $0x1ea0] sm:$0xff]  ;;  %v2355_v9 = vld [vmem:[%s15945_s5 + $0x130] sm:$0xff]  ;;  %v2356_v5 = vld [vmem:[%s15945_s5 + $0x138] sm:$0xff] }
 0x4c0   :  { %9549 = vmatpush1.bf16.msra.mxu1 %v11251_v14  ;;  %9378 = vmatprep.subr.bf16.mxu0 %v11266_v7  ;;  %v3305_v14 = vld [vmem:[%s15945_s5 + $0x1ee0] sm:$0xff]  ;;  %v3298_v7 = vld [vmem:[%s15945_s5 + $0x1ea8] sm:$0xff]  ;;  %v2363_v1 = vld [vmem:[%s15945_s5 + $0x170] sm:$0xff] }
 0x4c1   :  { %9550 = vmatprep.subr.bf16.mxu1 %v11268_v17  ;;  %v3306_v17 = vld [vmem:[%s15945_s5 + $0x1ee8] sm:$0xff]  ;;  %v11346_v22 = vcombine.high %v3297_v13, %v3305_v14  ;;  %v11345_v52 = vcombine.low %v3297_v13, %v3305_v14  ;;  %v2364_v6 = vld [vmem:[%s15945_s5 + $0x178] sm:$0xff]  ;;  %v2371_v13 = vld [vmem:[%s15945_s5 + $0x1b0] sm:$0xff] }
 0x4c2   :  { %v11644_v29 = vpop.eup %11643  ;;  %v11348_v23 = vcombine.high %v3298_v7, %v3306_v17  ;;  %v11347_v27 = vcombine.low %v3298_v7, %v3306_v17  ;;  %v2379_v14 = vld [vmem:[%s15945_s5 + $0x1f0] sm:$0xff]  ;;  %v2372_v7 = vld [vmem:[%s15945_s5 + $0x1b8] sm:$0xff] }
 0x4c3   :  { %v11646_v32 = vpop.eup %11645  ;;  %9379 = vmatpush1.bf16.msra.mxu0 %v11265_v24  ;;  %v3313_v24 = vld [vmem:[%s15945_s5 + $0x1f20] sm:$0xff]  ;;  %v2380_v17 = vld [vmem:[%s15945_s5 + $0x1f8] sm:$0xff] }
 0x4c4   :  { %v11648_v19 = vpop.eup %11647  ;;  %9551 = vmatpush1.bf16.msra.mxu1 %v11267_v25  ;;  %9380 = vmatprep.subr.bf16.mxu0 %v11282_v43  ;;  %v3321_v25 = vld [vmem:[%s15945_s5 + $0x1f60] sm:$0xff]  ;;  %v3314_v43 = vld [vmem:[%s15945_s5 + $0x1f28] sm:$0xff] }
 0x4c5   :  { %v11650_v39 = vpop.eup %11649  ;;  %v11403_v40 = vpack.c.bf16 %v11648_v19, %v11644_v29  ;;  %9552 = vmatprep.subr.bf16.mxu1 %v11284_v26  ;;  %v3322_v26 = vld [vmem:[%s15945_s5 + $0x1f68] sm:$0xff]  ;;  %v11362_v29 = vcombine.high %v3313_v24, %v3321_v25 }
 0x4c6   :  { %v11652_v47 = vpop.eup %11651  ;;  %v11404_v48 = vpack.c.bf16 %v11650_v39, %v11646_v32  ;;  %v11364_v30 = vcombine.high %v3314_v43, %v3322_v26  ;;  %v3337_v32 = vld [vmem:[%s15945_s5 + $0x1fe0] sm:$0xff]  ;;  %v3338_v19 = vld [vmem:[%s15945_s5 + $0x1fe8] sm:$0xff] }
 0x4c7   :  { %v11654_v51 = vpop.eup %11653  ;;  %10051 = vst [vmem:[%s15948_s7 + $0x10] sm:$0xff] %v11403_v40  ;;  %9381 = vmatpush1.bf16.msra.mxu0 %v11281_v33  ;;  %v3330_v33 = vld [vmem:[%s15945_s5 + $0x1fa8] sm:$0xff]  ;;  %v11378_v39 = vcombine.high %v3329_v31, %v3337_v32 }
 0x4c8   :  { %v11656_v54 = vpop.eup %11655  ;;  %10052 = vst [vmem:[%s15948_s7 + $0x18] sm:$0xff] %v11404_v48  ;;  %9553 = vmatpush1.bf16.msra.mxu1 %v11283_v37  ;;  %9382 = vmatprep.subr.bf16.mxu0 %v11298_v38  ;;  %v11361_v37 = vcombine.low %v3313_v24, %v3321_v25  ;;  %v11363_v38 = vcombine.low %v3314_v43, %v3322_v26  ;;  %v2395_v24 = vld [vmem:[%s15945_s5 + $0x270] sm:$0xff]  ;;  %v2388_v25 = vld [vmem:[%s15945_s5 + $0x238] sm:$0xff] }
 0x4c9   :  { %v11658_v58 = vpop.eup %11657  ;;  %v11411_v59 = vpack.c.bf16 %v11656_v54, %v11652_v47  ;;  %9554 = vmatprep.subr.bf16.mxu1 %v11300_v41  ;;  %v11380_v40 = vcombine.high %v3330_v33, %v3338_v19  ;;  %v2323_v41 = vld [vmem:[%s15945_s5 + $0x30] sm:$0xff]  ;;  %v2332_v47 = vld [vmem:[%s15945_s5 + $0x78] sm:$0xff]  ;;  %v11377_v48 = vcombine.low %v3329_v31, %v3337_v32  ;;  %v11379_v49 = vcombine.low %v3330_v33, %v3338_v19 }
 0x4ca   :  { %v11412_v2 = vpack.c.bf16 %v11658_v58, %v11654_v51  ;;  %v10374_v50 = vcombine.high %v2323_v41, %v2331_v42  ;;  %v10376_v51 = vcombine.high %v2324_v45, %v2332_v47  ;;  %v2347_v54 = vld [vmem:[%s15945_s5 + $0xf0] sm:$0xff]  ;;  %v2348_v58 = vld [vmem:[%s15945_s5 + $0xf8] sm:$0xff]  ;;  %v10421_v26 = vcombine.low %v2371_v13, %v2379_v14 }
 0x4cb   :  { %10062 = vst [vmem:[%s15948_s7 + $0x50] sm:$0xff] %v11411_v59  ;;  %9383 = vmatpush1.bf16.msra.mxu0 %v11297_v53  ;;  %v2339_v53 = vld [vmem:[%s15945_s5 + $0xb0] sm:$0xff]  ;;  %v10375_v59 = vcombine.low %v2324_v45, %v2332_v47  ;;  %v2396_v43 = vld [vmem:[%s15945_s5 + $0x278] sm:$0xff] }
 0x4cc   :  { %10063 = vst [vmem:[%s15948_s7 + $0x58] sm:$0xff] %v11412_v2  ;;  %9555 = vmatpush1.bf16.msra.mxu1 %v11299_v56  ;;  %9384 = vmatprep.subr.bf16.mxu0 %v11314_v57  ;;  %v10373_v56 = vcombine.low %v2323_v41, %v2331_v42  ;;  %v2340_v57 = vld [vmem:[%s15945_s5 + $0xb8] sm:$0xff]  ;;  %v2411_v31 = vld [vmem:[%s15945_s5 + $0x2f0] sm:$0xff] }
 0x4cd   :  { %9556 = vmatprep.subr.bf16.mxu1 %v11316_v61  ;;  %v10390_v61 = vcombine.high %v2339_v53, %v2347_v54  ;;  %v10392_v2 = vcombine.high %v2340_v57, %v2348_v58  ;;  %v2404_v32 = vld [vmem:[%s15945_s5 + $0x2b8] sm:$0xff]  ;;  %v2427_v41 = vld [vmem:[%s15945_s5 + $0x370] sm:$0xff] }
 0x4ce   :  { %v2412_v33 = vld [vmem:[%s15945_s5 + $0x2f8] sm:$0xff] }
 0x4cf   :  { %9385 = vmatpush1.bf16.msra.mxu0 %v11313_v8  ;;  %v10389_v8 = vcombine.low %v2339_v53, %v2347_v54  ;;  %v2420_v42 = vld [vmem:[%s15945_s5 + $0x338] sm:$0xff]  ;;  %v2443_v53 = vld [vmem:[%s15945_s5 + $0x3f0] sm:$0xff] }
 0x4d0   :  { %9557 = vmatpush1.bf16.msra.mxu1 %v11315_v10  ;;  %9386 = vmatprep.subr.bf16.mxu0 %v11330_v11  ;;  %v10391_v10 = vcombine.low %v2340_v57, %v2348_v58  ;;  %v10406_v11 = vcombine.high %v2355_v9, %v2363_v1  ;;  %v2428_v45 = vld [vmem:[%s15945_s5 + $0x378] sm:$0xff] }
 0x4d1   :  { %9558 = vmatprep.subr.bf16.mxu1 %v11332_v12  ;;  %v10408_v12 = vcombine.high %v2356_v5, %v2364_v6  ;;  %v2436_v54 = vld [vmem:[%s15945_s5 + $0x3b8] sm:$0xff]  ;;  %v10471_v58 = vcombine.low %v2420_v42, %v2428_v45 }
 0x4d3   :  { %9387 = vmatpush1.bf16.msra.mxu0 %v11329_v18  ;;  %v10407_v18 = vcombine.low %v2356_v5, %v2364_v6  ;;  %v2460_v5 = vld [vmem:[%s15945_s5 + $0x478] sm:$0xff] }
 0x4d4   :  { %9559 = vmatpush1.bf16.msra.mxu1 %v11331_v20  ;;  %9388 = vmatprep.subr.bf16.mxu0 %v11346_v22  ;;  %v10422_v20 = vcombine.high %v2371_v13, %v2379_v14  ;;  %v10424_v22 = vcombine.high %v2372_v7, %v2380_v17  ;;  %v2475_v13 = vld [vmem:[%s15945_s5 + $0x4f0] sm:$0xff]  ;;  %v2468_v14 = vld [vmem:[%s15945_s5 + $0x4b8] sm:$0xff] }
 0x4d5   :  { %9560 = vmatprep.subr.bf16.mxu1 %v11348_v23  ;;  %v2387_v23 = vld [vmem:[%s15945_s5 + $0x230] sm:$0xff] }
 0x4d6   :  { %v10437_v19 = vcombine.low %v2387_v23, %v2395_v24 }
 0x4d7   :  { %9389 = vmatpush1.bf16.msra.mxu0 %v11345_v52  ;;  %v10423_v52 = vcombine.low %v2372_v7, %v2380_v17  ;;  %v2476_v7 = vld [vmem:[%s15945_s5 + $0x4f8] sm:$0xff] }
 0x4d8   :  { %9561 = vmatpush1.bf16.msra.mxu1 %v11347_v27  ;;  %9390 = vmatprep.subr.bf16.mxu0 %v11362_v29  ;;  %v10438_v27 = vcombine.high %v2387_v23, %v2395_v24  ;;  %v10440_v29 = vcombine.high %v2388_v25, %v2396_v43  ;;  %v2491_v23 = vld [vmem:[%s15945_s5 + $0x570] sm:$0xff]  ;;  %v2484_v24 = vld [vmem:[%s15945_s5 + $0x538] sm:$0xff] }
 0x4d9   :  { %9562 = vmatprep.subr.bf16.mxu1 %v11364_v30  ;;  %v2403_v30 = vld [vmem:[%s15945_s5 + $0x2b0] sm:$0xff] }
 0x4da   :  { %v10453_v47 = vcombine.low %v2403_v30, %v2411_v31 }
 0x4db   :  { %9391 = vmatpush1.bf16.msra.mxu0 %v11361_v37  ;;  %v10439_v37 = vcombine.low %v2388_v25, %v2396_v43  ;;  %v2492_v25 = vld [vmem:[%s15945_s5 + $0x578] sm:$0xff] }
 0x4dc   :  { %9563 = vmatpush1.bf16.msra.mxu1 %v11363_v38  ;;  %9392 = vmatprep.subr.bf16.mxu0 %v11378_v39  ;;  %v10454_v38 = vcombine.high %v2403_v30, %v2411_v31  ;;  %v10456_v39 = vcombine.high %v2404_v32, %v2412_v33  ;;  %v2507_v30 = vld [vmem:[%s15945_s5 + $0x5f0] sm:$0xff]  ;;  %v2500_v31 = vld [vmem:[%s15945_s5 + $0x5b8] sm:$0xff] }
 0x4dd   :  { %9564 = vmatprep.subr.bf16.mxu1 %v11380_v40  ;;  %v2419_v40 = vld [vmem:[%s15945_s5 + $0x330] sm:$0xff] }
 0x4de   :  { %v10469_v57 = vcombine.low %v2419_v40, %v2427_v41 }
 0x4df   :  { %9393 = vmatpush1.bf16.msra.mxu0 %v11377_v48  ;;  %v10455_v48 = vcombine.low %v2404_v32, %v2412_v33  ;;  %v2508_v32 = vld [vmem:[%s15945_s5 + $0x5f8] sm:$0xff] }
 0x4e0   :  { %9565 = vmatpush1.bf16.msra.mxu1 %v11379_v49  ;;  %9577 = vmatprep.subr.bf16.mxu0 %v10374_v50  ;;  %v10470_v49 = vcombine.high %v2419_v40, %v2427_v41  ;;  %v10472_v50 = vcombine.high %v2420_v42, %v2428_v45  ;;  %v2523_v40 = vld [vmem:[%s15945_s5 + $0x670] sm:$0xff]  ;;  %v2516_v41 = vld [vmem:[%s15945_s5 + $0x638] sm:$0xff] }
 0x4e1   :  { %9749 = vmatprep.subr.bf16.mxu1 %v10376_v51  ;;  %v2435_v51 = vld [vmem:[%s15945_s5 + $0x3b0] sm:$0xff]  ;;  %v2524_v42 = vld [vmem:[%s15945_s5 + $0x678] sm:$0xff] }
 0x4e2   :  { %9395 = vmatmul.mubr.bf16.vlgmr.msra.gmra.mrb[20].mxu0 %v13324_v34  ;;  %v10485_v6 = vcombine.low %v2435_v51, %v2443_v53 }
 0x4e3   :  { %9567 = vmatmul.mubr.bf16.vlgmr.msra.gmra.mrb[20].mxu1 %v13324_v34  ;;  %9578 = vmatpush1.bf16.msra.mxu0 %v10373_v56  ;;  %v2444_v56 = vld [vmem:[%s15945_s5 + $0x3f8] sm:$0xff] }
 0x4e4   :  { %9609 = vmatprep.mubr.bf16.mxu0 %v12890_v3  ;;  %9750 = vmatpush1.bf16.msra.mxu1 %v10375_v59  ;;  %v10486_v59 = vcombine.high %v2435_v51, %v2443_v53  ;;  %v2539_v51 = vld [vmem:[%s15945_s5 + $0x6f0] sm:$0xff]  ;;  %v2532_v53 = vld [vmem:[%s15945_s5 + $0x6b8] sm:$0xff] }
 0x4e5   :  { %9781 = vmatprep.mubr.bf16.mxu1 %v12890_v3  ;;  %9579 = vmatprep.subr.bf16.mxu0 %v10390_v61  ;;  %v10405_v3 = vcombine.low %v2355_v9, %v2363_v1  ;;  %v10488_v61 = vcombine.high %v2436_v54, %v2444_v56  ;;  %v2451_v9 = vld [vmem:[%s15945_s5 + $0x430] sm:$0xff] }
 0x4e6   :  { %9751 = vmatprep.subr.bf16.mxu1 %v10392_v2  ;;  %v2459_v1 = vld [vmem:[%s15945_s5 + $0x470] sm:$0xff]  ;;  %v2452_v2 = vld [vmem:[%s15945_s5 + $0x438] sm:$0xff] }
 0x4e7   :  { %9580 = vmatpush1.bf16.msra.mxu0 %v10389_v8  ;;  %v10487_v8 = vcombine.low %v2436_v54, %v2444_v56  ;;  %v10501_v17 = vcombine.low %v2451_v9, %v2459_v1  ;;  %v2540_v54 = vld [vmem:[%s15945_s5 + $0x6f8] sm:$0xff] }
 0x4e8   :  { %9752 = vmatpush1.bf16.msra.mxu1 %v10391_v10  ;;  %9581 = vmatprep.subr.bf16.mxu0 %v10406_v11  ;;  %v10502_v10 = vcombine.high %v2451_v9, %v2459_v1  ;;  %v10504_v11 = vcombine.high %v2452_v2, %v2460_v5  ;;  %v2555_v9 = vld [vmem:[%s15945_s5 + $0x770] sm:$0xff]  ;;  %v2548_v1 = vld [vmem:[%s15945_s5 + $0x738] sm:$0xff] }
 0x4e9   :  { %9753 = vmatprep.subr.bf16.mxu1 %v10408_v12  ;;  %v2467_v12 = vld [vmem:[%s15945_s5 + $0x4b0] sm:$0xff] }
 0x4ea   :  { %v10517_v43 = vcombine.low %v2467_v12, %v2475_v13 }
 0x4eb   :  { %9582 = vmatpush1.bf16.msra.mxu0 %v10405_v3  ;;  %v10503_v3 = vcombine.low %v2452_v2, %v2460_v5  ;;  %v2556_v2 = vld [vmem:[%s15945_s5 + $0x778] sm:$0xff] }
 0x4ec   :  { %9754 = vmatpush1.bf16.msra.mxu1 %v10407_v18  ;;  %9583 = vmatprep.subr.bf16.mxu0 %v10422_v20  ;;  %v10518_v18 = vcombine.high %v2467_v12, %v2475_v13  ;;  %v10520_v20 = vcombine.high %v2468_v14, %v2476_v7  ;;  %v2571_v12 = vld [vmem:[%s15945_s5 + $0x7f0] sm:$0xff]  ;;  %v2564_v13 = vld [vmem:[%s15945_s5 + $0x7b8] sm:$0xff] }
 0x4ed   :  { %9755 = vmatprep.subr.bf16.mxu1 %v10424_v22  ;;  %v2483_v22 = vld [vmem:[%s15945_s5 + $0x530] sm:$0xff] }
 0x4ee   :  { %v10533_v33 = vcombine.low %v2483_v22, %v2491_v23 }
 0x4ef   :  { %9584 = vmatpush1.bf16.msra.mxu0 %v10421_v26  ;;  %v10519_v26 = vcombine.low %v2468_v14, %v2476_v7  ;;  %v2572_v14 = vld [vmem:[%s15945_s5 + $0x7f8] sm:$0xff] }
 0x4f0   :  { %9756 = vmatpush1.bf16.msra.mxu1 %v10423_v52  ;;  %9585 = vmatprep.subr.bf16.mxu0 %v10438_v27  ;;  %v10534_v52 = vcombine.high %v2483_v22, %v2491_v23  ;;  %v10536_v27 = vcombine.high %v2484_v24, %v2492_v25  ;;  %v2587_v22 = vld [vmem:[%s15945_s5 + $0x870] sm:$0xff]  ;;  %v2580_v23 = vld [vmem:[%s15945_s5 + $0x838] sm:$0xff] }
 0x4f1   :  { %9757 = vmatprep.subr.bf16.mxu1 %v10440_v29  ;;  %v2499_v29 = vld [vmem:[%s15945_s5 + $0x5b0] sm:$0xff] }
 0x4f2   :  { %v10549_v45 = vcombine.low %v2499_v29, %v2507_v30 }
 0x4f3   :  { %9586 = vmatpush1.bf16.msra.mxu0 %v10437_v19  ;;  %v10535_v19 = vcombine.low %v2484_v24, %v2492_v25  ;;  %v2588_v24 = vld [vmem:[%s15945_s5 + $0x878] sm:$0xff] }
 0x4f4   :  { %9758 = vmatpush1.bf16.msra.mxu1 %v10439_v37  ;;  %9587 = vmatprep.subr.bf16.mxu0 %v10454_v38  ;;  %v10550_v37 = vcombine.high %v2499_v29, %v2507_v30  ;;  %v10552_v38 = vcombine.high %v2500_v31, %v2508_v32  ;;  %v2603_v29 = vld [vmem:[%s15945_s5 + $0x8f0] sm:$0xff] }
 0x4f5   :  { %9759 = vmatprep.subr.bf16.mxu1 %v10456_v39  ;;  %v2515_v39 = vld [vmem:[%s15945_s5 + $0x630] sm:$0xff] }
 0x4f6   :  { %v10565_v56 = vcombine.low %v2515_v39, %v2523_v40 }
 0x4f7   :  { %9588 = vmatpush1.bf16.msra.mxu0 %v10453_v47  ;;  %v10551_v47 = vcombine.low %v2500_v31, %v2508_v32  ;;  %v2596_v31 = vld [vmem:[%s15945_s5 + $0x8b8] sm:$0xff] }
 0x4f8   :  { %9760 = vmatpush1.bf16.msra.mxu1 %v10455_v48  ;;  %9589 = vmatprep.subr.bf16.mxu0 %v10470_v49  ;;  %v10566_v48 = vcombine.high %v2515_v39, %v2523_v40  ;;  %v10568_v49 = vcombine.high %v2516_v41, %v2524_v42  ;;  %v2604_v32 = vld [vmem:[%s15945_s5 + $0x8f8] sm:$0xff] }
 0x4f9   :  { %9761 = vmatprep.subr.bf16.mxu1 %v10472_v50  ;;  %v2531_v50 = vld [vmem:[%s15945_s5 + $0x6b0] sm:$0xff]  ;;  %v10648_v39 = vcombine.high %v2596_v31, %v2604_v32  ;;  %v2612_v40 = vld [vmem:[%s15945_s5 + $0x938] sm:$0xff] }
 0x4fa   :  { %v10581_v5 = vcombine.low %v2531_v50, %v2539_v51 }
 0x4fb   :  { %9590 = vmatpush1.bf16.msra.mxu0 %v10469_v57  ;;  %v10567_v57 = vcombine.low %v2516_v41, %v2524_v42  ;;  %v2620_v41 = vld [vmem:[%s15945_s5 + $0x978] sm:$0xff] }
 0x4fc   :  { %9762 = vmatpush1.bf16.msra.mxu1 %v10471_v58  ;;  %9591 = vmatprep.subr.bf16.mxu0 %v10486_v59  ;;  %v10582_v58 = vcombine.high %v2531_v50, %v2539_v51  ;;  %v10584_v59 = vcombine.high %v2532_v53, %v2540_v54  ;;  %v2635_v50 = vld [vmem:[%s15945_s5 + $0x9f0] sm:$0xff]  ;;  %v2636_v51 = vld [vmem:[%s15945_s5 + $0x9f8] sm:$0xff] }
 0x4fd   :  { %9763 = vmatprep.subr.bf16.mxu1 %v10488_v61  ;;  %v2547_v61 = vld [vmem:[%s15945_s5 + $0x730] sm:$0xff] }
 0x4fe   :  { %v10597_v7 = vcombine.low %v2547_v61, %v2555_v9 }
 0x4ff   :  { %9592 = vmatpush1.bf16.msra.mxu0 %v10485_v6  ;;  %v10583_v6 = vcombine.low %v2532_v53, %v2540_v54  ;;  %v10663_v53 = vcombine.low %v2612_v40, %v2620_v41 }
 0x500   :  { %9764 = vmatpush1.bf16.msra.mxu1 %v10487_v8  ;;  %9593 = vmatprep.subr.bf16.mxu0 %v10502_v10  ;;  %v10598_v8 = vcombine.high %v2547_v61, %v2555_v9  ;;  %v10600_v10 = vcombine.high %v2548_v1, %v2556_v2  ;;  %v2652_v61 = vld [vmem:[%s15945_s5 + $0xa78] sm:$0xff] }
 0x501   :  { %9765 = vmatprep.subr.bf16.mxu1 %v10504_v11  ;;  %v2563_v11 = vld [vmem:[%s15945_s5 + $0x7b0] sm:$0xff] }
 0x502   :  { %v10613_v25 = vcombine.low %v2563_v11, %v2571_v12 }
 0x503   :  { %9594 = vmatpush1.bf16.msra.mxu0 %v10501_v17  ;;  %v10599_v17 = vcombine.low %v2548_v1, %v2556_v2 }
 0x504   :  { %9766 = vmatpush1.bf16.msra.mxu1 %v10503_v3  ;;  %9595 = vmatprep.subr.bf16.mxu0 %v10518_v18  ;;  %v10614_v3 = vcombine.high %v2563_v11, %v2571_v12  ;;  %v10616_v18 = vcombine.high %v2564_v13, %v2572_v14  ;;  %v2668_v11 = vld [vmem:[%s15945_s5 + $0xaf8] sm:$0xff] }
 0x505   :  { %9767 = vmatprep.subr.bf16.mxu1 %v10520_v20  ;;  %v2579_v20 = vld [vmem:[%s15945_s5 + $0x830] sm:$0xff] }
 0x506   :  { %v10629_v30 = vcombine.low %v2579_v20, %v2587_v22 }
 0x507   :  { %9596 = vmatpush1.bf16.msra.mxu0 %v10517_v43  ;;  %v10615_v43 = vcombine.low %v2564_v13, %v2572_v14 }
 0x508   :  { %9768 = vmatpush1.bf16.msra.mxu1 %v10519_v26  ;;  %9597 = vmatprep.subr.bf16.mxu0 %v10534_v52  ;;  %v10630_v26 = vcombine.high %v2579_v20, %v2587_v22  ;;  %v10632_v52 = vcombine.high %v2580_v23, %v2588_v24  ;;  %v2684_v20 = vld [vmem:[%s15945_s5 + $0xb78] sm:$0xff] }
 0x509   :  { %9769 = vmatprep.subr.bf16.mxu1 %v10536_v27  ;;  %v2595_v27 = vld [vmem:[%s15945_s5 + $0x8b0] sm:$0xff] }
 0x50a   :  { %v10645_v42 = vcombine.low %v2595_v27, %v2603_v29 }
 0x50b   :  { %9598 = vmatpush1.bf16.msra.mxu0 %v10533_v33  ;;  %v10631_v33 = vcombine.low %v2580_v23, %v2588_v24 }
 0x50c   :  { %9770 = vmatpush1.bf16.msra.mxu1 %v10535_v19  ;;  %9599 = vmatprep.subr.bf16.mxu0 %v10550_v37  ;;  %v10646_v19 = vcombine.high %v2595_v27, %v2603_v29  ;;  %v2611_v37 = vld [vmem:[%s15945_s5 + $0x930] sm:$0xff]  ;;  %v2700_v27 = vld [vmem:[%s15945_s5 + $0xbf8] sm:$0xff] }
 0x50d   :  { %9771 = vmatprep.subr.bf16.mxu1 %v10552_v38  ;;  %v2619_v38 = vld [vmem:[%s15945_s5 + $0x970] sm:$0xff] }
 0x50f   :  { %9600 = vmatpush1.bf16.msra.mxu0 %v10549_v45  ;;  %v10647_v45 = vcombine.low %v2596_v31, %v2604_v32 }
 0x510   :  { %9772 = vmatpush1.bf16.msra.mxu1 %v10551_v47  ;;  %9601 = vmatprep.subr.bf16.mxu0 %v10566_v48  ;;  %v10662_v47 = vcombine.high %v2611_v37, %v2619_v38  ;;  %v10664_v48 = vcombine.high %v2612_v40, %v2620_v41 }
 0x511   :  { %9773 = vmatprep.subr.bf16.mxu1 %v10568_v49  ;;  %v2627_v49 = vld [vmem:[%s15945_s5 + $0x9b0] sm:$0xff] }
 0x512   :  { %v10678_v54 = vcombine.high %v2627_v49, %v2635_v50  ;;  %v10677_v9 = vcombine.low %v2627_v49, %v2635_v50  ;;  %v2732_v49 = vld [vmem:[%s15945_s5 + $0xcf8] sm:$0xff] }
 0x513   :  { %9602 = vmatpush1.bf16.msra.mxu0 %v10565_v56 }
 0x514   :  { %9774 = vmatpush1.bf16.msra.mxu1 %v10567_v57  ;;  %9603 = vmatprep.subr.bf16.mxu0 %v10582_v58  ;;  %v2643_v57 = vld [vmem:[%s15945_s5 + $0xa30] sm:$0xff] }
 0x515   :  { %9775 = vmatprep.subr.bf16.mxu1 %v10584_v59  ;;  %v2651_v58 = vld [vmem:[%s15945_s5 + $0xa70] sm:$0xff]  ;;  %v2644_v59 = vld [vmem:[%s15945_s5 + $0xa38] sm:$0xff] }
 0x516   :  { %v10694_v2 = vcombine.high %v2643_v57, %v2651_v58  ;;  %v10693_v12 = vcombine.low %v2643_v57, %v2651_v58  ;;  %v10695_v13 = vcombine.low %v2644_v59, %v2652_v61  ;;  %v2748_v57 = vld [vmem:[%s15945_s5 + $0xd78] sm:$0xff] }
 0x517   :  { %9604 = vmatpush1.bf16.msra.mxu0 %v10581_v5  ;;  %v10696_v5 = vcombine.high %v2644_v59, %v2652_v61 }
 0x518   :  { %9776 = vmatpush1.bf16.msra.mxu1 %v10583_v6  ;;  %9605 = vmatprep.subr.bf16.mxu0 %v10598_v8  ;;  %v2659_v6 = vld [vmem:[%s15945_s5 + $0xab0] sm:$0xff] }
 0x519   :  { %9777 = vmatprep.subr.bf16.mxu1 %v10600_v10  ;;  %v2667_v8 = vld [vmem:[%s15945_s5 + $0xaf0] sm:$0xff]  ;;  %v2660_v10 = vld [vmem:[%s15945_s5 + $0xab8] sm:$0xff] }
 0x51a   :  { %v10710_v14 = vcombine.high %v2659_v6, %v2667_v8  ;;  %v10709_v22 = vcombine.low %v2659_v6, %v2667_v8  ;;  %v10711_v23 = vcombine.low %v2660_v10, %v2668_v11  ;;  %v2764_v6 = vld [vmem:[%s15945_s5 + $0xdf8] sm:$0xff] }
 0x51b   :  { %9606 = vmatpush1.bf16.msra.mxu0 %v10597_v7  ;;  %v10712_v7 = vcombine.high %v2660_v10, %v2668_v11 }
 0x51c   :  { %9778 = vmatpush1.bf16.msra.mxu1 %v10599_v17  ;;  %9607 = vmatprep.subr.bf16.mxu0 %v10614_v3  ;;  %v2675_v17 = vld [vmem:[%s15945_s5 + $0xb30] sm:$0xff] }
 0x51d   :  { %9779 = vmatprep.subr.bf16.mxu1 %v10616_v18  ;;  %v2683_v3 = vld [vmem:[%s15945_s5 + $0xb70] sm:$0xff]  ;;  %v2676_v18 = vld [vmem:[%s15945_s5 + $0xb38] sm:$0xff] }
 0x51e   :  { %v10726_v24 = vcombine.high %v2675_v17, %v2683_v3  ;;  %v10725_v29 = vcombine.low %v2675_v17, %v2683_v3  ;;  %v2780_v17 = vld [vmem:[%s15945_s5 + $0xe78] sm:$0xff] }
 0x51f   :  { %9608 = vmatpush1.bf16.msra.mxu0 %v10613_v25  ;;  %v10728_v25 = vcombine.high %v2676_v18, %v2684_v20 }
 0x520   :  { %9780 = vmatpush1.bf16.msra.mxu1 %v10615_v43  ;;  %9620 = vmatprep.subr.bf16.mxu0 %v10630_v26  ;;  %v2691_v43 = vld [vmem:[%s15945_s5 + $0xbb0] sm:$0xff] }
 0x521   :  { %9792 = vmatprep.subr.bf16.mxu1 %v10632_v52  ;;  %v2699_v26 = vld [vmem:[%s15945_s5 + $0xbf0] sm:$0xff]  ;;  %v2692_v52 = vld [vmem:[%s15945_s5 + $0xbb8] sm:$0xff] }
 0x522   :  { %9610 = vmatmul.mubr.bf16.vlgmr.msra.gmra.mrb[24].mxu0 %v12877_v63  ;;  %v10742_v31 = vcombine.high %v2691_v43, %v2699_v26  ;;  %v10744_v32 = vcombine.high %v2692_v52, %v2700_v27  ;;  %v10743_v40 = vcombine.low %v2692_v52, %v2700_v27 }
 0x523   :  { %9782 = vmatmul.mubr.bf16.vlgmr.msra.gmra.mrb[24].mxu1 %v12877_v63  ;;  %9621 = vmatpush1.bf16.msra.mxu0 %v10629_v30  ;;  %v2628_v63 = vld [vmem:[%s15945_s5 + $0x9b8] sm:$0xff]  ;;  %v10727_v30 = vcombine.low %v2676_v18, %v2684_v20 }
 0x524   :  { %9652 = vmatprep.mubr.bf16.mxu0 %v12892_v4  ;;  %9793 = vmatpush1.bf16.msra.mxu1 %v10631_v33  ;;  %v10680_v56 = vcombine.high %v2628_v63, %v2636_v51  ;;  %v10679_v1 = vcombine.low %v2628_v63, %v2636_v51  ;;  %v2707_v33 = vld [vmem:[%s15945_s5 + $0xc30] sm:$0xff] }
 0x525   :  { %9824 = vmatprep.mubr.bf16.mxu1 %v12892_v4  ;;  %9622 = vmatprep.subr.bf16.mxu0 %v10646_v19  ;;  %v10661_v4 = vcombine.low %v2611_v37, %v2619_v38  ;;  %v2715_v19 = vld [vmem:[%s15945_s5 + $0xc70] sm:$0xff]  ;;  %v2708_v37 = vld [vmem:[%s15945_s5 + $0xc38] sm:$0xff] }
 0x526   :  { %9794 = vmatprep.subr.bf16.mxu1 %v10648_v39  ;;  %v2716_v38 = vld [vmem:[%s15945_s5 + $0xc78] sm:$0xff]  ;;  %v10741_v39 = vcombine.low %v2691_v43, %v2699_v26  ;;  %v10758_v41 = vcombine.high %v2707_v33, %v2715_v19  ;;  %v10757_v50 = vcombine.low %v2707_v33, %v2715_v19 }
 0x527   :  { %9623 = vmatpush1.bf16.msra.mxu0 %v10645_v42  ;;  %v10760_v42 = vcombine.high %v2708_v37, %v2716_v38  ;;  %v10759_v63 = vcombine.low %v2708_v37, %v2716_v38  ;;  %v2796_v43 = vld [vmem:[%s15945_s5 + $0xef8] sm:$0xff] }
 0x528   :  { %9795 = vmatpush1.bf16.msra.mxu1 %v10647_v45  ;;  %9624 = vmatprep.subr.bf16.mxu0 %v10662_v47  ;;  %v2723_v45 = vld [vmem:[%s15945_s5 + $0xcb0] sm:$0xff]  ;;  %v2812_v33 = vld [vmem:[%s15945_s5 + $0xf78] sm:$0xff] }
 0x529   :  { %9796 = vmatprep.subr.bf16.mxu1 %v10664_v48  ;;  %v2731_v47 = vld [vmem:[%s15945_s5 + $0xcf0] sm:$0xff]  ;;  %v2724_v48 = vld [vmem:[%s15945_s5 + $0xcb8] sm:$0xff] }
 0x52a   :  { %v10774_v51 = vcombine.high %v2723_v45, %v2731_v47  ;;  %v10773_v58 = vcombine.low %v2723_v45, %v2731_v47  ;;  %v10775_v59 = vcombine.low %v2724_v48, %v2732_v49  ;;  %v2828_v45 = vld [vmem:[%s15945_s5 + $0xff8] sm:$0xff] }
 0x52b   :  { %9625 = vmatpush1.bf16.msra.mxu0 %v10661_v4  ;;  %v10776_v4 = vcombine.high %v2724_v48, %v2732_v49 }
 0x52c   :  { %9797 = vmatpush1.bf16.msra.mxu1 %v10663_v53  ;;  %9626 = vmatprep.subr.bf16.mxu0 %v10678_v54  ;;  %v2739_v53 = vld [vmem:[%s15945_s5 + $0xd30] sm:$0xff] }
 0x52d   :  { %9798 = vmatprep.subr.bf16.mxu1 %v10680_v56  ;;  %v2747_v54 = vld [vmem:[%s15945_s5 + $0xd70] sm:$0xff]  ;;  %v2740_v56 = vld [vmem:[%s15945_s5 + $0xd38] sm:$0xff] }
 0x52e   :  { %v10790_v61 = vcombine.high %v2739_v53, %v2747_v54  ;;  %v10789_v8 = vcombine.low %v2739_v53, %v2747_v54  ;;  %v10791_v10 = vcombine.low %v2740_v56, %v2748_v57  ;;  %v2844_v53 = vld [vmem:[%s15945_s5 + $0x1078] sm:$0xff] }
 0x52f   :  { %9627 = vmatpush1.bf16.msra.mxu0 %v10677_v9  ;;  %v10792_v9 = vcombine.high %v2740_v56, %v2748_v57 }
 0x530   :  { %9799 = vmatpush1.bf16.msra.mxu1 %v10679_v1  ;;  %9628 = vmatprep.subr.bf16.mxu0 %v10694_v2  ;;  %v2755_v1 = vld [vmem:[%s15945_s5 + $0xdb0] sm:$0xff] }
 0x531   :  { %9800 = vmatprep.subr.bf16.mxu1 %v10696_v5  ;;  %v2763_v2 = vld [vmem:[%s15945_s5 + $0xdf0] sm:$0xff]  ;;  %v2756_v5 = vld [vmem:[%s15945_s5 + $0xdb8] sm:$0xff] }
 0x532   :  { %v10806_v11 = vcombine.high %v2755_v1, %v2763_v2  ;;  %v10805_v3 = vcombine.low %v2755_v1, %v2763_v2  ;;  %v10807_v18 = vcombine.low %v2756_v5, %v2764_v6  ;;  %v2852_v1 = vld [vmem:[%s15945_s5 + $0x10b8] sm:$0xff] }
 0x533   :  { %9629 = vmatpush1.bf16.msra.mxu0 %v10693_v12  ;;  %v10808_v12 = vcombine.high %v2756_v5, %v2764_v6  ;;  %v2860_v2 = vld [vmem:[%s15945_s5 + $0x10f8] sm:$0xff] }
 0x534   :  { %9801 = vmatpush1.bf16.msra.mxu1 %v10695_v13  ;;  %9630 = vmatprep.subr.bf16.mxu0 %v10710_v14  ;;  %v2771_v13 = vld [vmem:[%s15945_s5 + $0xe30] sm:$0xff] }
 0x535   :  { %9802 = vmatprep.subr.bf16.mxu1 %v10712_v7  ;;  %v2779_v14 = vld [vmem:[%s15945_s5 + $0xe70] sm:$0xff]  ;;  %v2772_v7 = vld [vmem:[%s15945_s5 + $0xe38] sm:$0xff] }
 0x536   :  { %v10822_v20 = vcombine.high %v2771_v13, %v2779_v14  ;;  %v10821_v26 = vcombine.low %v2771_v13, %v2779_v14  ;;  %v10823_v52 = vcombine.low %v2772_v7, %v2780_v17  ;;  %v2876_v13 = vld [vmem:[%s15945_s5 + $0x1178] sm:$0xff] }
 0x537   :  { %9631 = vmatpush1.bf16.msra.mxu0 %v10709_v22  ;;  %v10824_v22 = vcombine.high %v2772_v7, %v2780_v17  ;;  %v10903_v7 = vcombine.low %v2852_v1, %v2860_v2 }
 0x538   :  { %9803 = vmatpush1.bf16.msra.mxu1 %v10711_v23  ;;  %9632 = vmatprep.subr.bf16.mxu0 %v10726_v24  ;;  %v2787_v23 = vld [vmem:[%s15945_s5 + $0xeb0] sm:$0xff] }
 0x539   :  { %9804 = vmatprep.subr.bf16.mxu1 %v10728_v25  ;;  %v2795_v24 = vld [vmem:[%s15945_s5 + $0xef0] sm:$0xff]  ;;  %v2788_v25 = vld [vmem:[%s15945_s5 + $0xeb8] sm:$0xff] }
 0x53a   :  { %v10838_v27 = vcombine.high %v2787_v23, %v2795_v24  ;;  %v10837_v19 = vcombine.low %v2787_v23, %v2795_v24  ;;  %v10839_v37 = vcombine.low %v2788_v25, %v2796_v43 }
 0x53b   :  { %9633 = vmatpush1.bf16.msra.mxu0 %v10725_v29  ;;  %v10840_v29 = vcombine.high %v2788_v25, %v2796_v43  ;;  %v2899_v43 = vld [vmem:[%s15945_s5 + $0x1230] sm:$0xff] }
 0x53c   :  { %9805 = vmatpush1.bf16.msra.mxu1 %v10727_v30  ;;  %9634 = vmatprep.subr.bf16.mxu0 %v10742_v31  ;;  %v2803_v30 = vld [vmem:[%s15945_s5 + $0xf30] sm:$0xff] }
 0x53d   :  { %9806 = vmatprep.subr.bf16.mxu1 %v10744_v32  ;;  %v2811_v31 = vld [vmem:[%s15945_s5 + $0xf70] sm:$0xff]  ;;  %v2804_v32 = vld [vmem:[%s15945_s5 + $0xf38] sm:$0xff] }
 0x53e   :  { %v10854_v38 = vcombine.high %v2803_v30, %v2811_v31  ;;  %v10853_v47 = vcombine.low %v2803_v30, %v2811_v31  ;;  %v10855_v48 = vcombine.low %v2804_v32, %v2812_v33 }
 0x53f   :  { %9635 = vmatpush1.bf16.msra.mxu0 %v10741_v39  ;;  %v10856_v39 = vcombine.high %v2804_v32, %v2812_v33  ;;  %v2915_v33 = vld [vmem:[%s15945_s5 + $0x12b0] sm:$0xff] }
 0x540   :  { %9807 = vmatpush1.bf16.msra.mxu1 %v10743_v40  ;;  %9636 = vmatprep.subr.bf16.mxu0 %v10758_v41  ;;  %v2819_v40 = vld [vmem:[%s15945_s5 + $0xfb0] sm:$0xff] }
 0x541   :  { %9808 = vmatprep.subr.bf16.mxu1 %v10760_v42  ;;  %v2827_v41 = vld [vmem:[%s15945_s5 + $0xff0] sm:$0xff]  ;;  %v2820_v42 = vld [vmem:[%s15945_s5 + $0xfb8] sm:$0xff] }
 0x542   :  { %v10870_v49 = vcombine.high %v2819_v40, %v2827_v41  ;;  %v10869_v54 = vcombine.low %v2819_v40, %v2827_v41  ;;  %v10871_v56 = vcombine.low %v2820_v42, %v2828_v45 }
 0x543   :  { %9637 = vmatpush1.bf16.msra.mxu0 %v10757_v50  ;;  %v10872_v50 = vcombine.high %v2820_v42, %v2828_v45  ;;  %v2931_v45 = vld [vmem:[%s15945_s5 + $0x1330] sm:$0xff] }
 0x544   :  { %9809 = vmatpush1.bf16.msra.mxu1 %v10759_v63  ;;  %9638 = vmatprep.subr.bf16.mxu0 %v10774_v51  ;;  %v2835_v63 = vld [vmem:[%s15945_s5 + $0x1030] sm:$0xff] }
 0x545   :  { %9810 = vmatprep.subr.bf16.mxu1 %v10776_v4  ;;  %v2843_v51 = vld [vmem:[%s15945_s5 + $0x1070] sm:$0xff]  ;;  %v2836_v4 = vld [vmem:[%s15945_s5 + $0x1038] sm:$0xff] }
 0x546   :  { %v10886_v57 = vcombine.high %v2835_v63, %v2843_v51  ;;  %v10887_v5 = vcombine.low %v2836_v4, %v2844_v53 }
 0x547   :  { %9639 = vmatpush1.bf16.msra.mxu0 %v10773_v58  ;;  %v10888_v58 = vcombine.high %v2836_v4, %v2844_v53  ;;  %v2947_v53 = vld [vmem:[%s15945_s5 + $0x13b0] sm:$0xff] }
 0x548   :  { %9811 = vmatpush1.bf16.msra.mxu1 %v10775_v59  ;;  %9640 = vmatprep.subr.bf16.mxu0 %v10790_v61  ;;  %v2851_v59 = vld [vmem:[%s15945_s5 + $0x10b0] sm:$0xff] }
 0x549   :  { %9812 = vmatprep.subr.bf16.mxu1 %v10792_v9  ;;  %v2859_v61 = vld [vmem:[%s15945_s5 + $0x10f0] sm:$0xff]  ;;  %v10885_v9 = vcombine.low %v2835_v63, %v2843_v51 }
 0x54a   :  { %v10902_v6 = vcombine.high %v2851_v59, %v2859_v61  ;;  %v10901_v14 = vcombine.low %v2851_v59, %v2859_v61 }
 0x54b   :  { %9641 = vmatpush1.bf16.msra.mxu0 %v10789_v8  ;;  %v2867_v8 = vld [vmem:[%s15945_s5 + $0x1130] sm:$0xff] }
 0x54c   :  { %9813 = vmatpush1.bf16.msra.mxu1 %v10791_v10  ;;  %9642 = vmatprep.subr.bf16.mxu0 %v10806_v11  ;;  %v2875_v10 = vld [vmem:[%s15945_s5 + $0x1170] sm:$0xff]  ;;  %v10904_v11 = vcombine.high %v2852_v1, %v2860_v2 }
 0x54d   :  { %9814 = vmatprep.subr.bf16.mxu1 %v10808_v12  ;;  %v2868_v12 = vld [vmem:[%s15945_s5 + $0x1138] sm:$0xff]  ;;  %v10918_v17 = vcombine.high %v2867_v8, %v2875_v10  ;;  %v2963_v1 = vld [vmem:[%s15945_s5 + $0x1430] sm:$0xff] }
 0x54e   :  { %v10919_v23 = vcombine.low %v2868_v12, %v2876_v13  ;;  %v2971_v2 = vld [vmem:[%s15945_s5 + $0x1470] sm:$0xff] }
 0x54f   :  { %9643 = vmatpush1.bf16.msra.mxu0 %v10805_v3  ;;  %v10920_v3 = vcombine.high %v2868_v12, %v2876_v13  ;;  %v2979_v13 = vld [vmem:[%s15945_s5 + $0x14b0] sm:$0xff] }
 0x550   :  { %9815 = vmatpush1.bf16.msra.mxu1 %v10807_v18  ;;  %9644 = vmatprep.subr.bf16.mxu0 %v10822_v20  ;;  %v2883_v18 = vld [vmem:[%s15945_s5 + $0x11b0] sm:$0xff] }
 0x551   :  { %9816 = vmatprep.subr.bf16.mxu1 %v10824_v22  ;;  %v2891_v20 = vld [vmem:[%s15945_s5 + $0x11f0] sm:$0xff]  ;;  %v2892_v22 = vld [vmem:[%s15945_s5 + $0x11f8] sm:$0xff] }
 0x552   :  { %v10934_v24 = vcombine.high %v2883_v18, %v2891_v20 }
 0x553   :  { %9645 = vmatpush1.bf16.msra.mxu0 %v10821_v26  ;;  %v2907_v26 = vld [vmem:[%s15945_s5 + $0x1270] sm:$0xff] }
 0x554   :  { %9817 = vmatpush1.bf16.msra.mxu1 %v10823_v52  ;;  %9646 = vmatprep.subr.bf16.mxu0 %v10838_v27  ;;  %v2900_v52 = vld [vmem:[%s15945_s5 + $0x1238] sm:$0xff]  ;;  %v10950_v31 = vcombine.high %v2899_v43, %v2907_v26 }
 0x555   :  { %9818 = vmatprep.subr.bf16.mxu1 %v10840_v29  ;;  %v2908_v27 = vld [vmem:[%s15945_s5 + $0x1278] sm:$0xff]  ;;  %v10933_v29 = vcombine.low %v2883_v18, %v2891_v20 }
 0x556   :  { %v10952_v32 = vcombine.high %v2900_v52, %v2908_v27  ;;  %v10951_v40 = vcombine.low %v2900_v52, %v2908_v27  ;;  %v3011_v27 = vld [vmem:[%s15945_s5 + $0x15b0] sm:$0xff] }
 0x557   :  { %9647 = vmatpush1.bf16.msra.mxu0 %v10837_v19  ;;  %v2923_v19 = vld [vmem:[%s15945_s5 + $0x12f0] sm:$0xff] }
 0x558   :  { %9819 = vmatpush1.bf16.msra.mxu1 %v10839_v37  ;;  %9648 = vmatprep.subr.bf16.mxu0 %v10854_v38  ;;  %v2916_v37 = vld [vmem:[%s15945_s5 + $0x12b8] sm:$0xff]  ;;  %v10966_v41 = vcombine.high %v2915_v33, %v2923_v19 }
 0x559   :  { %9820 = vmatprep.subr.bf16.mxu1 %v10856_v39  ;;  %v2924_v38 = vld [vmem:[%s15945_s5 + $0x12f8] sm:$0xff]  ;;  %v10949_v39 = vcombine.low %v2899_v43, %v2907_v26 }
 0x55a   :  { %v10968_v42 = vcombine.high %v2916_v37, %v2924_v38  ;;  %v10967_v63 = vcombine.low %v2916_v37, %v2924_v38  ;;  %v3027_v38 = vld [vmem:[%s15945_s5 + $0x1630] sm:$0xff] }
 0x55b   :  { %9649 = vmatpush1.bf16.msra.mxu0 %v10853_v47  ;;  %v2939_v47 = vld [vmem:[%s15945_s5 + $0x1370] sm:$0xff] }
 0x55c   :  { %9821 = vmatpush1.bf16.msra.mxu1 %v10855_v48  ;;  %9650 = vmatprep.subr.bf16.mxu0 %v10870_v49  ;;  %v2932_v48 = vld [vmem:[%s15945_s5 + $0x1338] sm:$0xff]  ;;  %v10982_v51 = vcombine.high %v2931_v45, %v2939_v47 }
 0x55d   :  { %9822 = vmatprep.subr.bf16.mxu1 %v10872_v50  ;;  %v2940_v49 = vld [vmem:[%s15945_s5 + $0x1378] sm:$0xff]  ;;  %v10965_v50 = vcombine.low %v2915_v33, %v2923_v19 }
 0x55e   :  { %v10984_v4 = vcombine.high %v2932_v48, %v2940_v49  ;;  %v10983_v59 = vcombine.low %v2932_v48, %v2940_v49  ;;  %v3043_v49 = vld [vmem:[%s15945_s5 + $0x16b0] sm:$0xff] }
 0x55f   :  { %9651 = vmatpush1.bf16.msra.mxu0 %v10869_v54  ;;  %v2955_v54 = vld [vmem:[%s15945_s5 + $0x13f0] sm:$0xff] }
 0x560   :  { %9823 = vmatpush1.bf16.msra.mxu1 %v10871_v56  ;;  %9663 = vmatprep.subr.bf16.mxu0 %v10886_v57  ;;  %v2948_v56 = vld [vmem:[%s15945_s5 + $0x13b8] sm:$0xff]  ;;  %v10998_v61 = vcombine.high %v2947_v53, %v2955_v54 }
 0x561   :  { %9835 = vmatprep.subr.bf16.mxu1 %v10888_v58  ;;  %v2956_v57 = vld [vmem:[%s15945_s5 + $0x13f8] sm:$0xff]  ;;  %v10981_v58 = vcombine.low %v2931_v45, %v2939_v47 }
 0x562   :  { %9653 = vmatmul.mubr.bf16.vlgmr.msra.gmra.mrb[24].mxu0 %v12879_v0 }
 0x563   :  { %9825 = vmatmul.mubr.bf16.vlgmr.msra.gmra.mrb[24].mxu1 %v12879_v0  ;;  %9664 = vmatpush1.bf16.msra.mxu0 %v10885_v9  ;;  %v2884_v0 = vld [vmem:[%s15945_s5 + $0x11b8] sm:$0xff]  ;;  %v11000_v9 = vcombine.high %v2948_v56, %v2956_v57 }
 0x564   :  { %9695 = vmatprep.mubr.bf16.mxu0 %v13326_v35  ;;  %9836 = vmatpush1.bf16.msra.mxu1 %v10887_v5  ;;  %v10936_v25 = vcombine.high %v2884_v0, %v2892_v22  ;;  %v10935_v30 = vcombine.low %v2884_v0, %v2892_v22  ;;  %v2964_v5 = vld [vmem:[%s15945_s5 + $0x1438] sm:$0xff]  ;;  %v2995_v22 = vld [vmem:[%s15945_s5 + $0x1530] sm:$0xff] }
 0x565   :  { %9867 = vmatprep.mubr.bf16.mxu1 %v13326_v35  ;;  %9665 = vmatprep.subr.bf16.mxu0 %v10902_v6  ;;  %v10917_v35 = vcombine.low %v2867_v8, %v2875_v10  ;;  %v2972_v6 = vld [vmem:[%s15945_s5 + $0x1478] sm:$0xff]  ;;  %v10997_v8 = vcombine.low %v2947_v53, %v2955_v54  ;;  %v10999_v10 = vcombine.low %v2948_v56, %v2956_v57  ;;  %v3059_v57 = vld [vmem:[%s15945_s5 + $0x1730] sm:$0xff] }
 0x566   :  { %9837 = vmatprep.subr.bf16.mxu1 %v10904_v11  ;;  %v11014_v11 = vcombine.high %v2963_v1, %v2971_v2  ;;  %v11016_v12 = vcombine.high %v2964_v5, %v2972_v6  ;;  %v11015_v18 = vcombine.low %v2964_v5, %v2972_v6  ;;  %v3075_v6 = vld [vmem:[%s15945_s5 + $0x17b0] sm:$0xff] }
 0x567   :  { %9666 = vmatpush1.bf16.msra.mxu0 %v10901_v14  ;;  %v2987_v14 = vld [vmem:[%s15945_s5 + $0x14f0] sm:$0xff] }
 0x568   :  { %9838 = vmatpush1.bf16.msra.mxu1 %v10903_v7  ;;  %9667 = vmatprep.subr.bf16.mxu0 %v10918_v17  ;;  %v2980_v7 = vld [vmem:[%s15945_s5 + $0x14b8] sm:$0xff]  ;;  %v11030_v20 = vcombine.high %v2979_v13, %v2987_v14 }
 0x569   :  { %9839 = vmatprep.subr.bf16.mxu1 %v10920_v3  ;;  %v2988_v17 = vld [vmem:[%s15945_s5 + $0x14f8] sm:$0xff]  ;;  %v11013_v3 = vcombine.low %v2963_v1, %v2971_v2 }
 0x56a   :  { %v11032_v0 = vcombine.high %v2980_v7, %v2988_v17  ;;  %v11031_v43 = vcombine.low %v2980_v7, %v2988_v17  ;;  %v3091_v17 = vld [vmem:[%s15945_s5 + $0x1830] sm:$0xff] }
 0x56b   :  { %9668 = vmatpush1.bf16.msra.mxu0 %v10917_v35  ;;  %v3003_v35 = vld [vmem:[%s15945_s5 + $0x1570] sm:$0xff] }
 0x56c   :  { %9840 = vmatpush1.bf16.msra.mxu1 %v10919_v23  ;;  %9669 = vmatprep.subr.bf16.mxu0 %v10934_v24  ;;  %v2996_v23 = vld [vmem:[%s15945_s5 + $0x1538] sm:$0xff]  ;;  %v11046_v26 = vcombine.high %v2995_v22, %v3003_v35 }
 0x56d   :  { %9841 = vmatprep.subr.bf16.mxu1 %v10936_v25  ;;  %v3004_v24 = vld [vmem:[%s15945_s5 + $0x1578] sm:$0xff]  ;;  %v11029_v25 = vcombine.low %v2979_v13, %v2987_v14 }
 0x56e   :  { %v11048_v52 = vcombine.high %v2996_v23, %v3004_v24  ;;  %v11047_v33 = vcombine.low %v2996_v23, %v3004_v24  ;;  %v3107_v24 = vld [vmem:[%s15945_s5 + $0x18b0] sm:$0xff] }
 0x56f   :  { %9670 = vmatpush1.bf16.msra.mxu0 %v10933_v29  ;;  %v3019_v29 = vld [vmem:[%s15945_s5 + $0x15f0] sm:$0xff] }
 0x570   :  { %9842 = vmatpush1.bf16.msra.mxu1 %v10935_v30  ;;  %9671 = vmatprep.subr.bf16.mxu0 %v10950_v31  ;;  %v3012_v30 = vld [vmem:[%s15945_s5 + $0x15b8] sm:$0xff]  ;;  %v11062_v19 = vcombine.high %v3011_v27, %v3019_v29 }
 0x571   :  { %9843 = vmatprep.subr.bf16.mxu1 %v10952_v32  ;;  %v3020_v31 = vld [vmem:[%s15945_s5 + $0x15f8] sm:$0xff]  ;;  %v11045_v32 = vcombine.low %v2995_v22, %v3003_v35 }
 0x572   :  { %v11064_v37 = vcombine.high %v3012_v30, %v3020_v31  ;;  %v11063_v45 = vcombine.low %v3012_v30, %v3020_v31  ;;  %v3123_v30 = vld [vmem:[%s15945_s5 + $0x1930] sm:$0xff] }
 0x573   :  { %9672 = vmatpush1.bf16.msra.mxu0 %v10949_v39  ;;  %v3035_v39 = vld [vmem:[%s15945_s5 + $0x1670] sm:$0xff] }
 0x574   :  { %9844 = vmatpush1.bf16.msra.mxu1 %v10951_v40  ;;  %9673 = vmatprep.subr.bf16.mxu0 %v10966_v41  ;;  %v3028_v40 = vld [vmem:[%s15945_s5 + $0x1638] sm:$0xff]  ;;  %v11078_v47 = vcombine.high %v3027_v38, %v3035_v39  ;;  %v3131_v31 = vld [vmem:[%s15945_s5 + $0x1970] sm:$0xff] }
 0x575   :  { %9845 = vmatprep.subr.bf16.mxu1 %v10968_v42  ;;  %v3036_v41 = vld [vmem:[%s15945_s5 + $0x1678] sm:$0xff]  ;;  %v11061_v42 = vcombine.low %v3011_v27, %v3019_v29 }
 0x576   :  { %v11080_v48 = vcombine.high %v3028_v40, %v3036_v41  ;;  %v11079_v53 = vcombine.low %v3028_v40, %v3036_v41  ;;  %v3139_v41 = vld [vmem:[%s15945_s5 + $0x19b0] sm:$0xff] }
 0x577   :  { %9674 = vmatpush1.bf16.msra.mxu0 %v10965_v50  ;;  %v3051_v50 = vld [vmem:[%s15945_s5 + $0x16f0] sm:$0xff] }
 0x578   :  { %9846 = vmatpush1.bf16.msra.mxu1 %v10967_v63  ;;  %9675 = vmatprep.subr.bf16.mxu0 %v10982_v51  ;;  %v3044_v63 = vld [vmem:[%s15945_s5 + $0x16b8] sm:$0xff]  ;;  %v11094_v54 = vcombine.high %v3043_v49, %v3051_v50 }
 0x579   :  { %9847 = vmatprep.subr.bf16.mxu1 %v10984_v4  ;;  %v3052_v51 = vld [vmem:[%s15945_s5 + $0x16f8] sm:$0xff]  ;;  %v11077_v4 = vcombine.low %v3027_v38, %v3035_v39  ;;  %v11174_v39 = vcombine.high %v3123_v30, %v3131_v31 }
 0x57a   :  { %v11096_v56 = vcombine.high %v3044_v63, %v3052_v51  ;;  %v11095_v1 = vcombine.low %v3044_v63, %v3052_v51  ;;  %v3163_v63 = vld [vmem:[%s15945_s5 + $0x1a70] sm:$0xff]  ;;  %v3156_v51 = vld [vmem:[%s15945_s5 + $0x1a38] sm:$0xff] }
 0x57b   :  { %9676 = vmatpush1.bf16.msra.mxu0 %v10981_v58  ;;  %v3067_v58 = vld [vmem:[%s15945_s5 + $0x1770] sm:$0xff] }
 0x57c   :  { %9848 = vmatpush1.bf16.msra.mxu1 %v10983_v59  ;;  %9677 = vmatprep.subr.bf16.mxu0 %v10998_v61  ;;  %v3060_v59 = vld [vmem:[%s15945_s5 + $0x1738] sm:$0xff]  ;;  %v11110_v2 = vcombine.high %v3059_v57, %v3067_v58 }
 0x57d   :  { %9849 = vmatprep.subr.bf16.mxu1 %v11000_v9  ;;  %v3068_v61 = vld [vmem:[%s15945_s5 + $0x1778] sm:$0xff]  ;;  %v11093_v9 = vcombine.low %v3043_v49, %v3051_v50  ;;  %v3155_v50 = vld [vmem:[%s15945_s5 + $0x1a30] sm:$0xff] }
 0x57e   :  { %v11112_v5 = vcombine.high %v3060_v59, %v3068_v61  ;;  %v11111_v13 = vcombine.low %v3060_v59, %v3068_v61  ;;  %v3179_v59 = vld [vmem:[%s15945_s5 + $0x1af0] sm:$0xff]  ;;  %v3172_v61 = vld [vmem:[%s15945_s5 + $0x1ab8] sm:$0xff] }
 0x57f   :  { %9678 = vmatpush1.bf16.msra.mxu0 %v10997_v8  ;;  %v3083_v8 = vld [vmem:[%s15945_s5 + $0x17f0] sm:$0xff] }
 0x580   :  { %9850 = vmatpush1.bf16.msra.mxu1 %v10999_v10  ;;  %9679 = vmatprep.subr.bf16.mxu0 %v11014_v11  ;;  %v3076_v10 = vld [vmem:[%s15945_s5 + $0x17b8] sm:$0xff]  ;;  %v11126_v14 = vcombine.high %v3075_v6, %v3083_v8 }
 0x581   :  { %9851 = vmatprep.subr.bf16.mxu1 %v11016_v12  ;;  %v3084_v11 = vld [vmem:[%s15945_s5 + $0x17f8] sm:$0xff]  ;;  %v11109_v12 = vcombine.low %v3059_v57, %v3067_v58  ;;  %v3171_v58 = vld [vmem:[%s15945_s5 + $0x1ab0] sm:$0xff] }
 0x582   :  { %v11128_v7 = vcombine.high %v3076_v10, %v3084_v11  ;;  %v11127_v22 = vcombine.low %v3076_v10, %v3084_v11  ;;  %v3187_v10 = vld [vmem:[%s15945_s5 + $0x1b30] sm:$0xff] }
 0x583   :  { %9680 = vmatpush1.bf16.msra.mxu0 %v11013_v3  ;;  %v3099_v3 = vld [vmem:[%s15945_s5 + $0x1870] sm:$0xff] }
 0x584   :  { %9852 = vmatpush1.bf16.msra.mxu1 %v11015_v18  ;;  %9681 = vmatprep.subr.bf16.mxu0 %v11030_v20  ;;  %v3092_v18 = vld [vmem:[%s15945_s5 + $0x1838] sm:$0xff]  ;;  %v11142_v35 = vcombine.high %v3091_v17, %v3099_v3  ;;  %v3195_v11 = vld [vmem:[%s15945_s5 + $0x1b70] sm:$0xff] }
 0x585   :  { %9853 = vmatprep.subr.bf16.mxu1 %v11032_v0  ;;  %v3100_v20 = vld [vmem:[%s15945_s5 + $0x1878] sm:$0xff]  ;;  %v11125_v0 = vcombine.low %v3075_v6, %v3083_v8  ;;  %v11222_v6 = vcombine.high %v3171_v58, %v3179_v59 }
 0x586   :  { %v11144_v23 = vcombine.high %v3092_v18, %v3100_v20  ;;  %v11143_v27 = vcombine.low %v3092_v18, %v3100_v20  ;;  %v11238_v20 = vcombine.high %v3187_v10, %v3195_v11 }
 0x587   :  { %9682 = vmatpush1.bf16.msra.mxu0 %v11029_v25  ;;  %v3115_v25 = vld [vmem:[%s15945_s5 + $0x18f0] sm:$0xff] }
 0x588   :  { %9854 = vmatpush1.bf16.msra.mxu1 %v11031_v43  ;;  %9683 = vmatprep.subr.bf16.mxu0 %v11046_v26  ;;  %v11141_v43 = vcombine.low %v3091_v17, %v3099_v3  ;;  %v3108_v26 = vld [vmem:[%s15945_s5 + $0x18b8] sm:$0xff]  ;;  %v11158_v29 = vcombine.high %v3107_v24, %v3115_v25  ;;  %v11221_v3 = vcombine.low %v3171_v58, %v3179_v59 }
 0x589   :  { %9855 = vmatprep.subr.bf16.mxu1 %v11048_v52  ;;  %v3116_v52 = vld [vmem:[%s15945_s5 + $0x18f8] sm:$0xff] }
 0x58a   :  { %v11159_v38 = vcombine.low %v3108_v26, %v3116_v52 }
 0x58b   :  { %9684 = vmatpush1.bf16.msra.mxu0 %v11045_v32  ;;  %v11160_v32 = vcombine.high %v3108_v26, %v3116_v52 }
 0x58c   :  { %9856 = vmatpush1.bf16.msra.mxu1 %v11047_v33  ;;  %9685 = vmatprep.subr.bf16.mxu0 %v11062_v19  ;;  %v3124_v33 = vld [vmem:[%s15945_s5 + $0x1938] sm:$0xff] }
 0x58d   :  { %9857 = vmatprep.subr.bf16.mxu1 %v11064_v37  ;;  %v3132_v19 = vld [vmem:[%s15945_s5 + $0x1978] sm:$0xff]  ;;  %v11157_v37 = vcombine.low %v3107_v24, %v3115_v25 }
 0x58e   :  { %v11176_v40 = vcombine.high %v3124_v33, %v3132_v19  ;;  %v3212_v25 = vld [vmem:[%s15945_s5 + $0x1bf8] sm:$0xff] }
 0x58f   :  { %9686 = vmatpush1.bf16.msra.mxu0 %v11061_v42  ;;  %v3147_v42 = vld [vmem:[%s15945_s5 + $0x19f0] sm:$0xff] }
 0x590   :  { %9858 = vmatpush1.bf16.msra.mxu1 %v11063_v45  ;;  %9687 = vmatprep.subr.bf16.mxu0 %v11078_v47  ;;  %v3148_v45 = vld [vmem:[%s15945_s5 + $0x19f8] sm:$0xff]  ;;  %v11175_v47 = vcombine.low %v3124_v33, %v3132_v19 }
 0x591   :  { %9859 = vmatprep.subr.bf16.mxu1 %v11080_v48  ;;  %v11190_v48 = vcombine.high %v3139_v41, %v3147_v42 }
 0x593   :  { %9688 = vmatpush1.bf16.msra.mxu0 %v11077_v4  ;;  %v3164_v4 = vld [vmem:[%s15945_s5 + $0x1a78] sm:$0xff] }
 0x594   :  { %9860 = vmatpush1.bf16.msra.mxu1 %v11079_v53  ;;  %9689 = vmatprep.subr.bf16.mxu0 %v11094_v54  ;;  %v11189_v53 = vcombine.low %v3139_v41, %v3147_v42  ;;  %v11208_v57 = vcombine.high %v3156_v51, %v3164_v4  ;;  %v3219_v41 = vld [vmem:[%s15945_s5 + $0x1c30] sm:$0xff] }
 0x595   :  { %9861 = vmatprep.subr.bf16.mxu1 %v11096_v56  ;;  %v11206_v56 = vcombine.high %v3155_v50, %v3163_v63  ;;  %v3227_v42 = vld [vmem:[%s15945_s5 + $0x1c70] sm:$0xff] }
 0x597   :  { %9690 = vmatpush1.bf16.msra.mxu0 %v11093_v9  ;;  %v3180_v9 = vld [vmem:[%s15945_s5 + $0x1af8] sm:$0xff] }
 0x598   :  { %9862 = vmatpush1.bf16.msra.mxu1 %v11095_v1  ;;  %9691 = vmatprep.subr.bf16.mxu0 %v11110_v2  ;;  %v11205_v1 = vcombine.low %v3155_v50, %v3163_v63  ;;  %v15777_v2 = vld [vmem:[%s15947_s6 + $0x8] sm:$0xff]  ;;  %v11224_v8 = vcombine.high %v3172_v61, %v3180_v9  ;;  %v11223_v18 = vcombine.low %v3172_v61, %v3180_v9  ;;  %v3251_v61 = vld [vmem:[%s15945_s5 + $0x1d30] sm:$0xff] }
 0x599   :  { %9863 = vmatprep.subr.bf16.mxu1 %v11112_v5  ;;  %v11207_v5 = vcombine.low %v3156_v51, %v3164_v4  ;;  %v3384_v17 = vrot.slane %v15777_v2, %v12045_v46  ;;  %v11270_v50 = vcombine.high %v3219_v41, %v3227_v42  ;;  %v3235_v51 = vld [vmem:[%s15945_s5 + $0x1cb0] sm:$0xff] }
 0x59a   :  { %v3243_v4 = vld [vmem:[%s15945_s5 + $0x1cf0] sm:$0xff] }
 0x59b   :  { %9692 = vmatpush1.bf16.msra.mxu0 %v11109_v12  ;;  %v3380_v12 = vrot.slane %v15777_v2, %v12039_v44  ;;  %v3392_v44 = vrot.slane %v15777_v2, %v12053_v62  ;;  %v3204_v62 = vld [vmem:[%s15945_s5 + $0x1bb8] sm:$0xff]  ;;  %v11286_v58 = vcombine.high %v3235_v51, %v3243_v4  ;;  %v3259_v9 = vld [vmem:[%s15945_s5 + $0x1d70] sm:$0xff] }
 0x59c   :  { %9864 = vmatpush1.bf16.msra.mxu1 %v11111_v13  ;;  %9693 = vmatprep.subr.bf16.mxu0 %v11126_v14  ;;  %v3188_v13 = vld [vmem:[%s15945_s5 + $0x1b38] sm:$0xff] }
 0x59d   :  { %9865 = vmatprep.subr.bf16.mxu1 %v11128_v7  ;;  %v3196_v14 = vld [vmem:[%s15945_s5 + $0x1b78] sm:$0xff]  ;;  %v3388_v7 = vrot.slane %v15777_v2, %v12050_v60  ;;  %v3211_v60 = vld [vmem:[%s15945_s5 + $0x1bf0] sm:$0xff] }
 0x59f   :  { %9694 = vmatpush1.bf16.msra.mxu0 %v11125_v0 }
 0x5a0   :  { %9866 = vmatpush1.bf16.msra.mxu1 %v11127_v22  ;;  %9706 = vmatprep.subr.bf16.mxu0 %v11142_v35  ;;  %v11240_v22 = vcombine.high %v3188_v13, %v3196_v14  ;;  %v3203_v35 = vld [vmem:[%s15945_s5 + $0x1bb0] sm:$0xff] }
 0x5a1   :  { %9878 = vmatprep.subr.bf16.mxu1 %v11144_v23 }
 0x5a2   :  { %9696 = vmatmul.mubr.bf16.vlgmr.msra.gmra.mrb[24].mxu0 %v13312_v28 }
 0x5a3   :  { %9868 = vmatmul.mubr.bf16.vlgmr.msra.gmra.mrb[24].mxu1 %v13312_v28  ;;  %9707 = vmatpush1.bf16.msra.mxu0 %v11141_v43  ;;  %v3140_v28 = vld [vmem:[%s15945_s5 + $0x19b8] sm:$0xff] }
 0x5a4   :  { %9738 = vmatprep.mubr.bf16.mxu0 %v13328_v36  ;;  %9879 = vmatpush1.bf16.msra.mxu1 %v11143_v27  ;;  %v11192_v49 = vcombine.high %v3140_v28, %v3148_v45  ;;  %v11191_v54 = vcombine.low %v3140_v28, %v3148_v45  ;;  %v3220_v45 = vld [vmem:[%s15945_s5 + $0x1c38] sm:$0xff] }
 0x5a5   :  { %9910 = vmatprep.mubr.bf16.mxu1 %v13328_v36  ;;  %9708 = vmatprep.subr.bf16.mxu0 %v11158_v29  ;;  %v11173_v36 = vcombine.low %v3123_v30, %v3131_v31  ;;  %v11237_v29 = vcombine.low %v3187_v10, %v3195_v11  ;;  %v11239_v30 = vcombine.low %v3188_v13, %v3196_v14 }
 0x5a6   :  { %9880 = vmatprep.subr.bf16.mxu1 %v11160_v32  ;;  %v11285_v10 = vcombine.low %v3235_v51, %v3243_v4  ;;  %v11302_v13 = vcombine.high %v3251_v61, %v3259_v9 }
 0x5a7   :  { %9709 = vmatpush1.bf16.msra.mxu0 %v11157_v37  ;;  %v11254_v37 = vcombine.high %v3203_v35, %v3211_v60 }
 0x5a8   :  { %9881 = vmatpush1.bf16.msra.mxu1 %v11159_v38  ;;  %9710 = vmatprep.subr.bf16.mxu0 %v11174_v39 }
 0x5a9   :  { %9882 = vmatprep.subr.bf16.mxu1 %v11176_v40  ;;  %v11256_v40 = vcombine.high %v3204_v62, %v3212_v25 }
 0x5ab   :  { %9711 = vmatpush1.bf16.msra.mxu0 %v11173_v36  ;;  %v3228_v36 = vld [vmem:[%s15945_s5 + $0x1c78] sm:$0xff] }
 0x5ac   :  { %9883 = vmatpush1.bf16.msra.mxu1 %v11175_v47  ;;  %9712 = vmatprep.subr.bf16.mxu0 %v11190_v48  ;;  %v11253_v48 = vcombine.low %v3203_v35, %v3211_v60  ;;  %v11272_v63 = vcombine.high %v3220_v45, %v3228_v36  ;;  %v11301_v60 = vcombine.low %v3251_v61, %v3259_v9 }
 0x5ad   :  { %9884 = vmatprep.subr.bf16.mxu1 %v11192_v49  ;;  %v11255_v49 = vcombine.low %v3204_v62, %v3212_v25 }
 0x5af   :  { %9713 = vmatpush1.bf16.msra.mxu0 %v11189_v53  ;;  %v3236_v53 = vld [vmem:[%s15945_s5 + $0x1cb8] sm:$0xff] }
 0x5b0   :  { %9885 = vmatpush1.bf16.msra.mxu1 %v11191_v54  ;;  %9714 = vmatprep.subr.bf16.mxu0 %v11206_v56  ;;  %v3244_v54 = vld [vmem:[%s15945_s5 + $0x1cf8] sm:$0xff]  ;;  %v11269_v56 = vcombine.low %v3219_v41, %v3227_v42 }
 0x5b1   :  { %9886 = vmatprep.subr.bf16.mxu1 %v11208_v57  ;;  %v11271_v57 = vcombine.low %v3220_v45, %v3228_v36  ;;  %v11288_v59 = vcombine.high %v3236_v53, %v3244_v54  ;;  %v3315_v36 = vld [vmem:[%s15945_s5 + $0x1f30] sm:$0xff] }
 0x5b3   :  { %9715 = vmatpush1.bf16.msra.mxu0 %v11205_v1 }
 0x5b4   :  { %9887 = vmatpush1.bf16.msra.mxu1 %v11207_v5  ;;  %9716 = vmatprep.subr.bf16.mxu0 %v11222_v6  ;;  %v3252_v5 = vld [vmem:[%s15945_s5 + $0x1d38] sm:$0xff] }
 0x5b5   :  { %v9396_v0 = vpop.f32.mrb[20].mxu0  ;;  %9888 = vmatprep.subr.bf16.mxu1 %v11224_v8  ;;  %v3260_v6 = vld [vmem:[%s15945_s5 + $0x1d78] sm:$0xff] }
 0x5b6   :  { %v11449_v46 = vadd.f32 %v9396_v0, %v3380_v12  ;;  %v9568_v23 = vpop.f32.mrb[20].mxu1  ;;  %v9398_v24 = vpop.f32.mrb[21].mxu0  ;;  %v3268_v0 = vld [vmem:[%s15945_s5 + $0x1db8] sm:$0xff] }
 0x5b7   :  { %v11453_v43 = vadd.f32 %v9568_v23, %v3388_v7  ;;  %v11450_v26 = vadd.f32 %v9398_v24, %v3384_v17  ;;  %v9570_v52 = vpop.f32.mrb[21].mxu1  ;;  %v9400_v27 = vpop.f32.mrb[22].mxu0  ;;  %9717 = vmatpush1.bf16.msra.mxu0 %v11221_v3  ;;  %v3267_v3 = vld [vmem:[%s15945_s5 + $0x1db0] sm:$0xff]  ;;  %v11303_v23 = vcombine.low %v3252_v5, %v3260_v6 }
 0x5b8   :  { %11659 = vtanh.f32 %v11449_v46  ;;  %v11454_v31 = vadd.f32 %v9570_v52, %v3392_v44  ;;  %v11451_v32 = vadd.f32 %v9400_v27, %v3380_v12  ;;  %v9572_v33 = vpop.f32.mrb[22].mxu1  ;;  %9889 = vmatpush1.bf16.msra.mxu1 %v11223_v18  ;;  %v9402_v19 = vpop.f32.mrb[23].mxu0  ;;  %9718 = vmatprep.subr.bf16.mxu0 %v11238_v20  ;;  %v11287_v12 = vcombine.low %v3236_v53, %v3244_v54  ;;  %v3291_v52 = vld [vmem:[%s15945_s5 + $0x1e70] sm:$0xff] }
 0x5b9   :  { %11661 = vtanh.f32 %v11453_v43  ;;  %v11455_v38 = vadd.f32 %v9572_v33, %v3388_v7  ;;  %v9574_v39 = vpop.f32.mrb[23].mxu1  ;;  %9890 = vmatprep.subr.bf16.mxu1 %v11240_v22  ;;  %v11452_v28 = vadd.f32 %v9402_v19, %v3384_v17  ;;  %v11304_v17 = vcombine.high %v3252_v5, %v3260_v6  ;;  %v3276_v22 = vld [vmem:[%s15945_s5 + $0x1df8] sm:$0xff]  ;;  %v3331_v53 = vld [vmem:[%s15945_s5 + $0x1fb0] sm:$0xff] }
 0x5ba   :  { %11663 = vtanh.f32 %v11450_v26  ;;  %v11456_v47 = vadd.f32 %v9574_v39, %v3392_v44  ;;  %v3275_v44 = vld [vmem:[%s15945_s5 + $0x1df0] sm:$0xff]  ;;  %v11320_v43 = vcombine.high %v3268_v0, %v3276_v22  ;;  %v3300_v39 = vld [vmem:[%s15945_s5 + $0x1eb8] sm:$0xff]  ;;  %v3396_v6 = vrot.slane %v15777_v2, %v13243_v15 }
 0x5bb   :  { %11665 = vtanh.f32 %v11454_v31  ;;  %9719 = vmatpush1.bf16.msra.mxu0 %v11237_v29  ;;  %v11318_v24 = vcombine.high %v3267_v3, %v3275_v44  ;;  %v3283_v26 = vld [vmem:[%s15945_s5 + $0x1e30] sm:$0xff]  ;;  %v3284_v29 = vld [vmem:[%s15945_s5 + $0x1e38] sm:$0xff]  ;;  %v11317_v31 = vcombine.low %v3267_v3, %v3275_v44 }
 0x5bc   :  { %11667 = vtanh.f32 %v11451_v32  ;;  %9891 = vmatpush1.bf16.msra.mxu1 %v11239_v30  ;;  %9720 = vmatprep.subr.bf16.mxu0 %v11254_v37  ;;  %v3292_v30 = vld [vmem:[%s15945_s5 + $0x1e78] sm:$0xff]  ;;  %v11319_v32 = vcombine.low %v3268_v0, %v3276_v22  ;;  %v11334_v33 = vcombine.high %v3283_v26, %v3291_v52  ;;  %v3299_v37 = vld [vmem:[%s15945_s5 + $0x1eb0] sm:$0xff]  ;;  %v11333_v41 = vcombine.low %v3283_v26, %v3291_v52 }
 0x5bd   :  { %11669 = vtanh.f32 %v11455_v38  ;;  %9892 = vmatprep.subr.bf16.mxu1 %v11256_v40  ;;  %v11336_v19 = vcombine.high %v3284_v29, %v3292_v30  ;;  %v3307_v38 = vld [vmem:[%s15945_s5 + $0x1ef0] sm:$0xff]  ;;  %v3308_v40 = vld [vmem:[%s15945_s5 + $0x1ef8] sm:$0xff]  ;;  %v11335_v42 = vcombine.low %v3284_v29, %v3292_v30 }
 0x5be   :  { %11671 = vtanh.f32 %v11452_v28  ;;  %v11350_v28 = vcombine.high %v3299_v37, %v3307_v38  ;;  %v11352_v45 = vcombine.high %v3300_v39, %v3308_v40  ;;  %v3339_v54 = vld [vmem:[%s15945_s5 + $0x1ff0] sm:$0xff] }
 0x5bf   :  { %11673 = vtanh.f32 %v11456_v47  ;;  %9721 = vmatpush1.bf16.msra.mxu0 %v11253_v48  ;;  %v3323_v47 = vld [vmem:[%s15945_s5 + $0x1f70] sm:$0xff]  ;;  %v3316_v48 = vld [vmem:[%s15945_s5 + $0x1f38] sm:$0xff]  ;;  %v11382_v61 = vcombine.high %v3331_v53, %v3339_v54 }
 0x5c0   :  { %9893 = vmatpush1.bf16.msra.mxu1 %v11255_v49  ;;  %9722 = vmatprep.subr.bf16.mxu0 %v11270_v50  ;;  %v3324_v49 = vld [vmem:[%s15945_s5 + $0x1f78] sm:$0xff]  ;;  %v11349_v50 = vcombine.low %v3299_v37, %v3307_v38  ;;  %v11366_v51 = vcombine.high %v3315_v36, %v3323_v47 }
 0x5c1   :  { %9894 = vmatprep.subr.bf16.mxu1 %v11272_v63  ;;  %v11351_v63 = vcombine.low %v3300_v39, %v3308_v40  ;;  %v11368_v4 = vcombine.high %v3316_v48, %v3324_v49 }
 0x5c2   :  { %v11660_v1 = vpop.eup %11659 }
 0x5c3   :  { %v11662_v8 = vpop.eup %11661  ;;  %9723 = vmatpush1.bf16.msra.mxu0 %v11269_v56  ;;  %v3332_v56 = vld [vmem:[%s15945_s5 + $0x1fb8] sm:$0xff] }
 0x5c4   :  { %v11664_v11 = vpop.eup %11663  ;;  %9895 = vmatpush1.bf16.msra.mxu1 %v11271_v57  ;;  %9724 = vmatprep.subr.bf16.mxu0 %v11286_v58  ;;  %v3340_v57 = vld [vmem:[%s15945_s5 + $0x1ff8] sm:$0xff]  ;;  %v11365_v58 = vcombine.low %v3315_v36, %v3323_v47 }
 0x5c5   :  { %v11666_v14 = vpop.eup %11665  ;;  %v11405_v7 = vpack.c.bf16 %v11664_v11, %v11660_v1  ;;  %9896 = vmatprep.subr.bf16.mxu1 %v11288_v59  ;;  %v11367_v59 = vcombine.low %v3316_v48, %v3324_v49  ;;  %v11384_v9 = vcombine.high %v3332_v56, %v3340_v57  ;;  %v11381_v1 = vcombine.low %v3331_v53, %v3339_v54 }
 0x5c6   :  { %v11668_v18 = vpop.eup %11667  ;;  %v11406_v20 = vpack.c.bf16 %v11666_v14, %v11662_v8  ;;  %v11383_v5 = vcombine.low %v3332_v56, %v3340_v57  ;;  %v3404_v8 = vrot.slane %v15777_v2, %v13246_v16  ;;  %v3408_v11 = vrot.slane %v15777_v2, %v13252_v21 }
 0x5c7   :  { %v11670_v35 = vpop.eup %11669  ;;  %10053 = vst [vmem:[%s15948_s7 + $0x20] sm:$0xff] %v11405_v7  ;;  %9725 = vmatpush1.bf16.msra.mxu0 %v11285_v10  ;;  %v3400_v10 = vrot.slane %v15777_v2, %v13249_v55 }
 0x5c8   :  { %v11672_v46 = vpop.eup %11671  ;;  %10054 = vst [vmem:[%s15948_s7 + $0x28] sm:$0xff] %v11406_v20  ;;  %9897 = vmatpush1.bf16.msra.mxu1 %v11287_v12  ;;  %9726 = vmatprep.subr.bf16.mxu0 %v11302_v13 }
 0x5c9   :  { %v11674_v62 = vpop.eup %11673  ;;  %v11413_v25 = vpack.c.bf16 %v11672_v46, %v11668_v18  ;;  %9898 = vmatprep.subr.bf16.mxu1 %v11304_v17 }
 0x5ca   :  { %v11414_v27 = vpack.c.bf16 %v11674_v62, %v11670_v35 }
 0x5cb   :  { %10064 = vst [vmem:[%s15948_s7 + $0x60] sm:$0xff] %v11413_v25  ;;  %9727 = vmatpush1.bf16.msra.mxu0 %v11301_v60 }
 0x5cc   :  { %10065 = vst [vmem:[%s15948_s7 + $0x68] sm:$0xff] %v11414_v27  ;;  %9899 = vmatpush1.bf16.msra.mxu1 %v11303_v23  ;;  %9728 = vmatprep.subr.bf16.mxu0 %v11318_v24 }
 0x5cd   :  { %9900 = vmatprep.subr.bf16.mxu1 %v11320_v43 }
 0x5cf   :  { %9729 = vmatpush1.bf16.msra.mxu0 %v11317_v31 }
 0x5d0   :  { %9901 = vmatpush1.bf16.msra.mxu1 %v11319_v32  ;;  %9730 = vmatprep.subr.bf16.mxu0 %v11334_v33 }
 0x5d1   :  { %9902 = vmatprep.subr.bf16.mxu1 %v11336_v19 }
 0x5d3   :  { %9731 = vmatpush1.bf16.msra.mxu0 %v11333_v41 }
 0x5d4   :  { %9903 = vmatpush1.bf16.msra.mxu1 %v11335_v42  ;;  %9732 = vmatprep.subr.bf16.mxu0 %v11350_v28 }
 0x5d5   :  { %9904 = vmatprep.subr.bf16.mxu1 %v11352_v45 }
 0x5d7   :  { %9733 = vmatpush1.bf16.msra.mxu0 %v11349_v50 }
 0x5d8   :  { %9905 = vmatpush1.bf16.msra.mxu1 %v11351_v63  ;;  %9734 = vmatprep.subr.bf16.mxu0 %v11366_v51 }
 0x5d9   :  { %9906 = vmatprep.subr.bf16.mxu1 %v11368_v4 }
 0x5db   :  { %9735 = vmatpush1.bf16.msra.mxu0 %v11365_v58 }
 0x5dc   :  { %9907 = vmatpush1.bf16.msra.mxu1 %v11367_v59  ;;  %9736 = vmatprep.subr.bf16.mxu0 %v11382_v61 }
 0x5dd   :  { %9908 = vmatprep.subr.bf16.mxu1 %v11384_v9 }
 0x5df   :  { %9737 = vmatpush1.bf16.msra.mxu0 %v11381_v1 }
 0x5e0   :  { %9909 = vmatpush1.bf16.msra.mxu1 %v11383_v5 }
 0x5e2   :  { %9739 = vmatmul.mubr.bf16.vlgmr.msra.gmra.mrb[24].mxu0 %v13324_v34 }
 0x5e3   :  { %9911 = vmatmul.mubr.bf16.vlgmr.msra.gmra.mrb[24].mxu1 %v13324_v34 }
 0x6b5   :  { %v9740_v12 = vpop.f32.mrb[24].mxu0 }
 0x6b6   :  { %v11457_v13 = vadd.f32 %v9740_v12, %v3396_v6  ;;  %v9912_v14 = vpop.f32.mrb[24].mxu1  ;;  %v9742_v7 = vpop.f32.mrb[25].mxu0 }
 0x6b7   :  { %v11461_v17 = vadd.f32 %v9912_v14, %v3404_v8  ;;  %v11458_v3 = vadd.f32 %v9742_v7, %v3400_v10  ;;  %v9914_v44 = vpop.f32.mrb[25].mxu1  ;;  %v9744_v34 = vpop.f32.mrb[26].mxu0 }
 0x6b8   :  { %11675 = vtanh.f32 %v11457_v13  ;;  %v11462_v18 = vadd.f32 %v9914_v44, %v3408_v11  ;;  %v11459_v15 = vadd.f32 %v9744_v34, %v3396_v6  ;;  %v9916_v20 = vpop.f32.mrb[26].mxu1  ;;  %v9746_v0 = vpop.f32.mrb[27].mxu0 }
 0x6b9   :  { %11677 = vtanh.f32 %v11461_v17  ;;  %v11463_v16 = vadd.f32 %v9916_v20, %v3404_v8  ;;  %v9918_v22 = vpop.f32.mrb[27].mxu1  ;;  %v11460_v55 = vadd.f32 %v9746_v0, %v3400_v10 }
 0x6ba   :  { %11679 = vtanh.f32 %v11458_v3  ;;  %v11464_v21 = vadd.f32 %v9918_v22, %v3408_v11 }
 0x6bb   :  { %11681 = vtanh.f32 %v11462_v18 }
 0x6bc   :  { %11683 = vtanh.f32 %v11459_v15 }
 0x6bd   :  { %11685 = vtanh.f32 %v11463_v16 }
 0x6be   :  { %11687 = vtanh.f32 %v11460_v55 }
 0x6bf   :  { %11689 = vtanh.f32 %v11464_v21 }
 0x6c2   :  { %v11676_v2 = vpop.eup %11675 }
 0x6c3   :  { %v11678_v35 = vpop.eup %11677 }
 0x6c4   :  { %v11680_v60 = vpop.eup %11679 }
 0x6c5   :  { %v11682_v46 = vpop.eup %11681  ;;  %v11407_v23 = vpack.c.bf16 %v11680_v60, %v11676_v2 }
 0x6c6   :  { %v11684_v24 = vpop.eup %11683  ;;  %v11408_v62 = vpack.c.bf16 %v11682_v46, %v11678_v35 }
 0x6c7   :  { %v11686_v25 = vpop.eup %11685  ;;  %10055 = vst [vmem:[%s15948_s7 + $0x30] sm:$0xff] %v11407_v23 }
 0x6c8   :  { %v11688_v43 = vpop.eup %11687  ;;  %10059 = vst.msk [vmem:[%s15948_s7 + $0x38] sm:$0xff] %vm10058_vm2, %v11408_v62 }
 0x6c9   :  { %v11690_v26 = vpop.eup %11689  ;;  %v11415_v52 = vpack.c.bf16 %v11688_v43, %v11684_v24 }
 0x6ca   :  { %v11416_v27 = vpack.c.bf16 %v11690_v26, %v11686_v25 }
 0x6cb   :  { %10066 = vst [vmem:[%s15948_s7 + $0x70] sm:$0xff] %v11415_v52 }
 0x6cc   :  { %10067 = vst.msk [vmem:[%s15948_s7 + $0x78] sm:$0xff] %vm10058_vm2, %v11416_v27 }

</bundles_post_ra>
